<compile_context>
chip_gen: v5e
topology: v5e:2x2
jax: 0.10.0
libtpu: 0.0.40
codegen_flags: <defaults>
</compile_context>

<pallas_src>
import functools

import jax
import jax.numpy as jnp
from jax.experimental import pallas as pl
from jax.experimental.pallas import tpu as pltpu

ETA = 1e-6                          # Constants.eta in the reference repo
_VMEM_LIMIT = 32 * 1024 * 1024      # safe scoped VMEM limit on v5e/v6e/v7x


def _pick_nb(batch):
    """Images per grid step (must divide batch; multiples of 8 when tiled)."""
    if batch <= 8:
        return batch
    if batch % 8 == 0:
        return 8
    # Odd large batches fall back to a single tile (~2.5 MiB VMEM per image);
    # pad the batch to a multiple of 8 upstream if this ever matters.
    return batch


# ----------------------------------------------------------------------------
# conv0: Conv2d(1, 32, 4, 2, 1) + ReLU as ONE matmul per batch tile over a
# full K=16 im2col (Cin == 1, so the patch expansion is only 4x the image).
# ----------------------------------------------------------------------------
def _conv0_kernel(p_ref, w_ref, b_ref, o_ref):
    acc = jnp.dot(p_ref[...], w_ref[...], preferred_element_type=jnp.float32)
    o_ref[...] = jnp.maximum(acc + b_ref[...], 0.0).astype(o_ref.dtype)


def _im2col_conv0(x_nchw):
    """(B, 1, 64, 64) f32 -> (B*1024, 16) bf16 patch matrix, K index = kh*4+kw."""
    B = x_nchw.shape[0]
    img = x_nchw[:, 0]                                    # (B, 64, 64)
    xp = jnp.pad(img, ((0, 0), (1, 1), (1, 1)))           # (B, 66, 66)
    cols = [xp[:, kh:kh + 64:2, kw:kw + 64:2]             # (B, 32, 32) each
            for kh in range(4) for kw in range(4)]
    p = jnp.stack(cols, axis=-1)                          # (B, 32, 32, 16)
    return p.reshape(B * 1024, 16).astype(jnp.bfloat16)


def conv0(x_nchw, w, b, nb):
    B = x_nchw.shape[0]
    MO, Cout = 1024, w.shape[-1]
    p = _im2col_conv0(x_nchw)
    y = pl.pallas_call(
        _conv0_kernel,
        out_shape=jax.ShapeDtypeStruct((B * MO, Cout), jnp.bfloat16),
        grid=(B // nb,),
        in_specs=[
            pl.BlockSpec((nb * MO, 16), lambda n: (n, 0)),
            pl.BlockSpec((16, Cout), lambda n: (0, 0)),
            pl.BlockSpec((1, Cout), lambda n: (0, 0)),
        ],
        out_specs=pl.BlockSpec((nb * MO, Cout), lambda n: (n, 0)),
        compiler_params=pltpu.CompilerParams(
            dimension_semantics=("parallel",), vmem_limit_bytes=_VMEM_LIMIT),
        cost_estimate=pl.CostEstimate(
            flops=2 * B * MO * 16 * Cout, transcendentals=0,
            bytes_accessed=B * MO * 16 * 2 + 16 * Cout * 2 + Cout * 4
                           + B * MO * Cout * 2),
    )(p, w, b)
    return y.reshape(B, 32, 32, Cout)


# ----------------------------------------------------------------------------
# conv1 / conv2: Conv2d(k=4, s=2, p=1) + ReLU as TWO height-tap MXU matmuls
# over a space-to-depth + width-concat slab; NB images per grid step share one
# big matmul per tap, per-image bias/ReLU/store epilogue unrolled in-kernel.
# ----------------------------------------------------------------------------
def _conv2tap_kernel(t_ref, w_ref, b_ref, o_ref, *, nb, rows, wo, mo):
    # t_ref : (nb*rows, 8*Cin) bf16, rows = (Ho+1)*Wo per image
    # w_ref : (2, 8*Cin, Cout) bf16 (height tap a = 0, 1);  b_ref: (1, Cout) f32
    t = t_ref[...]
    y0 = jnp.dot(t, w_ref[0], preferred_element_type=jnp.float32)
    y1 = jnp.dot(t, w_ref[1], preferred_element_type=jnp.float32)
    bias = b_ref[...]
    for i in range(nb):                      # static unroll; all offsets 8-aligned
        base = i * rows
        z = y0[base:base + mo] + y1[base + wo:base + wo + mo] + bias
        o_ref[pl.ds(i * mo, mo), :] = jnp.maximum(z, 0.0).astype(o_ref.dtype)


def _s2d_width_concat(x_nhwc):
    """(B, H, W, C) -> (B, P*Wo, 8C) bf16, P = H/2 + 1, Wo = W/2.

    Row I*Wo + wo holds the two horizontally adjacent 2x2xC space-to-depth
    cells needed by output pixels in s2d-row I (channel = wq*4C + p*2C + q*C + c)."""
    B, H, W, C = x_nhwc.shape
    P, Q, Wo = (H + 2) // 2, (W + 2) // 2, W // 2
    xp = jnp.pad(x_nhwc, ((0, 0), (1, 1), (1, 1), (0, 0)))
    s = jnp.transpose(xp.reshape(B, P, 2, Q, 2, C), (0, 1, 3, 2, 4, 5))
    s = s.reshape(B, P, Q, 4 * C)
    t = jnp.concatenate([s[:, :, :Wo, :], s[:, :, 1:Wo + 1, :]], axis=-1)
    return t.reshape(B, P * Wo, 8 * C).astype(jnp.bfloat16)


def conv4x4_s2_p1(x_nhwc, w2, b2, nb):
    B, H, W, Cin = x_nhwc.shape
    Ho, Wo = H // 2, W // 2
    MO, rows, K = Ho * Wo, (Ho + 1) * Wo, 8 * Cin
    Cout = w2.shape[-1]
    t = _s2d_width_concat(x_nhwc).reshape(B * rows, K)
    kernel = functools.partial(_conv2tap_kernel, nb=nb, rows=rows, wo=Wo, mo=MO)
    y = pl.pallas_call(
        kernel,
        out_shape=jax.ShapeDtypeStruct((B * MO, Cout), jnp.bfloat16),
        grid=(B // nb,),
        in_specs=[
            pl.BlockSpec((nb * rows, K), lambda n: (n, 0)),
            pl.BlockSpec((2, K, Cout), lambda n: (0, 0, 0)),
            pl.BlockSpec((1, Cout), lambda n: (0, 0)),
        ],
        out_specs=pl.BlockSpec((nb * MO, Cout), lambda n: (n, 0)),
        compiler_params=pltpu.CompilerParams(
            dimension_semantics=("parallel",), vmem_limit_bytes=_VMEM_LIMIT),
        cost_estimate=pl.CostEstimate(
            flops=4 * B * rows * K * Cout, transcendentals=0,
            bytes_accessed=B * rows * K * 2 + 2 * K * Cout * 2 + Cout * 4
                           + B * MO * Cout * 2),
    )(t, w2, b2)
    return y.reshape(B, Ho, Wo, Cout)


# ----------------------------------------------------------------------------
# Fused tail: conv3 + lin + c1/c2 heads in ONE kernel per batch tile.
# conv3 activations live only in VMEM; exp is applied to the logvar half only.
# ----------------------------------------------------------------------------
def _tail_kernel(t0_ref, t1_ref, w3_ref, b3_ref, wl_ref, bl_ref,
                 wc1_ref, bc1_ref, wc2_ref, bc2_ref,
                 mu_ref, sig_ref, h_scr, *, nb):
    # conv3 as two big height-tap matmuls; rows are (output-pixel r, image)-major.
    h = jnp.dot(t0_ref[...], w3_ref[0], preferred_element_type=jnp.float32)
    h = h + jnp.dot(t1_ref[...], w3_ref[1], preferred_element_type=jnp.float32)
    h_scr[...] = jnp.maximum(h + b3_ref[...], 0.0)        # (16*nb, 64) f32

    # lin: contract the 16 spatial positions against the matching weight rows.
    e = jnp.zeros((nb, 128), jnp.float32)
    for r in range(16):
        hr = h_scr[pl.ds(r * nb, nb), :].astype(jnp.bfloat16)
        e = e + jnp.dot(hr, wl_ref[pl.ds(r * 64, 64), :],
                        preferred_element_type=jnp.float32)
    e = e + bl_ref[...]                                   # no activation (as in PyTorch)

    # heads (f32, tiny): mu = c1(e); sigma = exp(0.5 * c2(e)) + eta.
    mu = jnp.dot(e, wc1_ref[...], preferred_element_type=jnp.float32) + bc1_ref[...]
    lv = jnp.dot(e, wc2_ref[...], preferred_element_type=jnp.float32) + bc2_ref[...]
    mu_ref[...] = mu
    sig_ref[...] = jnp.exp(0.5 * lv) + ETA


def _tail_inputs(x_nhwc, nb):
    """conv2 output (B,8,8,64) -> two (B/nb, 16*nb, 512) bf16 slabs (taps a=0,1);
    rows within a tile ordered (conv3 output pixel r, image)-major."""
    B = x_nhwc.shape[0]
    t = _s2d_width_concat(x_nhwc).reshape(B, 5, 4, 512)

    def build(a):
        ta = t[:, a:a + 4]                                # (B, 4, 4, 512)
        ta = ta.reshape(B // nb, nb, 16, 512)
        ta = jnp.transpose(ta, (0, 2, 1, 3))              # (tile, r, image, K)
        return ta.reshape(B // nb, 16 * nb, 512)

    return build(0), build(1)


def enc_tail(x_nhwc, kp, nb):
    """conv2 output (B,8,8,64) NHWC -> (mu, sigma), each (B, L) f32."""
    B = x_nhwc.shape[0]
    L = kp["c1_w"].shape[1]
    t0, t1 = _tail_inputs(x_nhwc, nb)
    kernel = functools.partial(_tail_kernel, nb=nb)
    mu, sig = pl.pallas_call(
        kernel,
        out_shape=(jax.ShapeDtypeStruct((B, L), jnp.float32),
                   jax.ShapeDtypeStruct((B, L), jnp.float32)),
        grid=(B // nb,),
        in_specs=[
            pl.BlockSpec((None, 16 * nb, 512), lambda n: (n, 0, 0)),
            pl.BlockSpec((None, 16 * nb, 512), lambda n: (n, 0, 0)),
            pl.BlockSpec((2, 512, 64), lambda n: (0, 0, 0)),
            pl.BlockSpec((1, 64), lambda n: (0, 0)),
            pl.BlockSpec((1024, 128), lambda n: (0, 0)),
            pl.BlockSpec((1, 128), lambda n: (0, 0)),
            pl.BlockSpec((128, L), lambda n: (0, 0)),
            pl.BlockSpec((1, L), lambda n: (0, 0)),
            pl.BlockSpec((128, L), lambda n: (0, 0)),
            pl.BlockSpec((1, L), lambda n: (0, 0)),
        ],
        out_specs=(pl.BlockSpec((nb, L), lambda n: (n, 0)),
                   pl.BlockSpec((nb, L), lambda n: (n, 0))),
        scratch_shapes=[pltpu.VMEM((16 * nb, 64), jnp.float32)],
        compiler_params=pltpu.CompilerParams(
            dimension_semantics=("parallel",), vmem_limit_bytes=_VMEM_LIMIT),
        cost_estimate=pl.CostEstimate(
            flops=B * (4 * 16 * 512 * 64 + 2 * 1024 * 128 + 4 * 128 * L),
            transcendentals=B * L,
            bytes_accessed=2 * B * 16 * 512 * 2
                           + (2 * 512 * 64 + 1024 * 128) * 2 + 2 * B * L * 4),
    )(t0, t1, kp["conv3_w"], kp["conv3_b"], kp["lin_w"], kp["lin_b"],
      kp["c1_w"], kp["c1_b"], kp["c2_w"], kp["c2_b"])
    return mu, sig


# ----------------------------------------------------------------------------
# One-time parameter preparation (host side / at init)
# ----------------------------------------------------------------------------
def prepare_params(params):
    """Convert PyTorch-layout params to kernel layout (done once, not per call)."""
    kp = {}

    # conv0: full-im2col weight (16, 32) bf16, K index = kh*4 + kw (Cin == 1).
    w0 = params["conv0_w"]                                # (32, 1, 4, 4)
    kp["conv0_w"] = w0.reshape(w0.shape[0], 16).T.astype(jnp.bfloat16)
    kp["conv0_b"] = params["conv0_b"].reshape(1, -1).astype(jnp.float32)

    # conv1..3: (Cout,Cin,4,4) -> (2, 8*Cin, Cout) bf16 matching the s2d +
    # width-concat input (leading axis = height tap a; kh = 2a+p, kw = 2wq+q).
    for i in (1, 2, 3):
        w = params[f"conv{i}_w"]
        b = params[f"conv{i}_b"]
        Cout, Cin = w.shape[0], w.shape[1]
        wr = w.reshape(Cout, Cin, 2, 2, 2, 2)             # (co, cin, a, p, wq, q)
        wr = jnp.transpose(wr, (2, 4, 3, 5, 1, 0))        # (a, wq, p, q, cin, co)
        kp[f"conv{i}_w"] = wr.reshape(2, 8 * Cin, Cout).astype(jnp.bfloat16)
        kp[f"conv{i}_b"] = b.reshape(1, Cout).astype(jnp.float32)

    # lin: rows re-ordered from NCHW flatten (c,h,w) to (h,w,c) = (r, c) so the
    # fused tail can contract conv3's NHWC rows without any runtime transpose.
    lw = params["lin_w"]                                  # (128, 1024) = (out, in)
    Dout = lw.shape[0]
    lw = jnp.transpose(lw.reshape(Dout, 64, 4, 4), (2, 3, 1, 0))   # (h, w, c, out)
    kp["lin_w"] = lw.reshape(16 * 64, Dout).astype(jnp.bfloat16)
    kp["lin_b"] = params["lin_b"].reshape(1, Dout).astype(jnp.float32)

    # Heads stay f32 (tiny).
    kp["c1_w"] = params["c1_w"].T.astype(jnp.float32)     # (128, L)
    kp["c1_b"] = params["c1_b"].reshape(1, -1).astype(jnp.float32)
    kp["c2_w"] = params["c2_w"].T.astype(jnp.float32)
    kp["c2_b"] = params["c2_b"].reshape(1, -1).astype(jnp.float32)
    return kp


# ----------------------------------------------------------------------------
# Enc forward (Pallas path)
# ----------------------------------------------------------------------------
def enc_forward(kp, x):
    """x: (*pre_shape, 1, 64, 64) NCHW -> (mu, sigma), each (*pre_shape, L)."""
    L = kp["c1_w"].shape[1]
    pre_shape = x.shape[:-3]
    x = x.reshape((-1,) + x.shape[-3:])                   # (B, 1, 64, 64)
    B = x.shape[0]
    nb = _pick_nb(B)
    h = conv0(x, kp["conv0_w"], kp["conv0_b"], nb)            # (B, 32, 32, 32)
    h = conv4x4_s2_p1(h, kp["conv1_w"], kp["conv1_b"], nb)    # (B, 16, 16, 32)
    h = conv4x4_s2_p1(h, kp["conv2_w"], kp["conv2_b"], nb)    # (B, 8, 8, 64)
    mu, sigma = enc_tail(h, kp, nb)                           # conv3+lin+heads
    return mu.reshape(pre_shape + (L,)), sigma.reshape(pre_shape + (L,))


# ----------------------------------------------------------------------------
# Pure-JAX f32 reference (same math as the PyTorch module) — self-check only.
# ----------------------------------------------------------------------------
def enc_forward_ref(params, x):
    pre_shape = x.shape[:-3]
    x = x.reshape((-1,) + x.shape[-3:])
    h = jnp.transpose(x, (0, 2, 3, 1))

    def conv(h, w, b):
        N, H, W, C = h.shape
        k, s, p = 4, 2, 1
        Ho, Wo = (H + 2 * p - k) // s + 1, (W + 2 * p - k) // s + 1
        xp = jnp.pad(h, ((0, 0), (p, p), (p, p), (0, 0)))
        cols = [xp[:, kh:kh + s * Ho:s, kw:kw + s * Wo:s, :]
                for kh in range(k) for kw in range(k)]
        patches = jnp.stack(cols, axis=3).reshape(N * Ho * Wo, k * k * C)
        wm = jnp.transpose(w, (2, 3, 1, 0)).reshape(k * k * C, -1)
        y = jnp.maximum(patches @ wm + b, 0.0)
        return y.reshape(N, Ho, Wo, -1)

    for i in range(4):
        h = conv(h, params[f"conv{i}_w"], params[f"conv{i}_b"])
    h = jnp.transpose(h, (0, 3, 1, 2)).reshape(h.shape[0], -1)     # NCHW flatten
    e = h @ params["lin_w"].T + params["lin_b"]
    mu = e @ params["c1_w"].T + params["c1_b"]
    sigma = jnp.exp(0.5 * (e @ params["c2_w"].T + params["c2_b"])) + ETA
    return (mu.reshape(pre_shape + (mu.shape[-1],)),
            sigma.reshape(pre_shape + (mu.shape[-1],)))


def init_params(latent_dim, key):
    """Deterministic synthetic parameters with PyTorch nn-module shapes."""
    ks = jax.random.split(key, 14)
    s = 0.05

    def n(k, shape):
        return s * jax.random.normal(k, shape, dtype=jnp.float32)

    return {
        "conv0_w": n(ks[0], (32, 1, 4, 4)),   "conv0_b": n(ks[1], (32,)),
        "conv1_w": n(ks[2], (32, 32, 4, 4)),  "conv1_b": n(ks[3], (32,)),
        "conv2_w": n(ks[4], (64, 32, 4, 4)),  "conv2_b": n(ks[5], (64,)),
        "conv3_w": n(ks[6], (64, 64, 4, 4)),  "conv3_b": n(ks[7], (64,)),
        "lin_w":   n(ks[8], (128, 64 * 4 * 4)), "lin_b": n(ks[9], (128,)),
        "c1_w":    n(ks[10], (latent_dim, 128)), "c1_b": n(ks[11], (latent_dim,)),
        "c2_w":    n(ks[12], (latent_dim, 128)), "c2_b": n(ks[13], (latent_dim,)),
    }


if __name__ == "__main__":
    latent_dim = 10
    key = jax.random.PRNGKey(0)
    pkey, xkey = jax.random.split(key)

    params = init_params(latent_dim, pkey)        # PyTorch-layout params
    kparams = prepare_params(params)              # one-time kernel-layout prep
    # dSprites images are (1, 64, 64); batch = 2, NCHW like PyTorch.
    x = jax.random.uniform(xkey, (2, 1, 64, 64), dtype=jnp.float32)

    mu, sigma = jax.jit(enc_forward)(kparams, x)
    jax.block_until_ready((mu, sigma))

    assert mu.shape == (2, latent_dim)
    assert sigma.shape == (2, latent_dim)
    assert bool(jnp.all(sigma > 0.0))

    # Correctness self-check against the pure-JAX f32 reference (loose
    # tolerance: bf16 matmul operands, f32 accumulation).
    mu_ref, sigma_ref = jax.jit(enc_forward_ref)(params, x)
    jax.block_until_ready((mu_ref, sigma_ref))
    assert bool(jnp.allclose(mu, mu_ref, rtol=5e-2, atol=2e-2)), \
        float(jnp.max(jnp.abs(mu - mu_ref)))
    assert bool(jnp.allclose(sigma, sigma_ref, rtol=5e-2, atol=2e-2)), \
        float(jnp.max(jnp.abs(sigma - sigma_ref)))

    print("KERNEL_OK")
</pallas_src>

<mosaic_0001>
module attributes {stable_mosaic.version = 11 : i64} {
  func.func @_conv0_kernel(%arg0: i32, %arg1: memref<2048x16xbf16, #tpu.memory_space<vmem>>, %arg2: memref<16x32xbf16, #tpu.memory_space<vmem>>, %arg3: memref<1x32xf32, #tpu.memory_space<vmem>>, %arg4: memref<2048x32xbf16, #tpu.memory_space<vmem>>) attributes {dimension_semantics = [#tpu.dimension_semantics<parallel>], iteration_bounds = array<i64: 1>, scalar_prefetch = 0 : i64, scratch_operands = 0 : i64, tpu.core_type = #tpu.core_type<tc>, window_params = [{transform_indices = @transform_0, window_bounds = array<i64: 2048, 16>}, {pipeline_mode = #tpu.pipeline_mode<synchronous>, transform_indices = @transform_1, window_bounds = array<i64: 16, 32>}, {pipeline_mode = #tpu.pipeline_mode<synchronous>, transform_indices = @transform_2, window_bounds = array<i64: 1, 32>}, {transform_indices = @transform_3, window_bounds = array<i64: 2048, 32>}]} {
    %c0 = arith.constant 0 : index
    %c0_0 = arith.constant 0 : index
    %0 = vector.load %arg1[%c0, %c0_0] : memref<2048x16xbf16, #tpu.memory_space<vmem>>, vector<2048x16xbf16>
    %c0_1 = arith.constant 0 : index
    %c0_2 = arith.constant 0 : index
    %1 = vector.load %arg2[%c0_1, %c0_2] : memref<16x32xbf16, #tpu.memory_space<vmem>>, vector<16x32xbf16>
    %cst = arith.constant dense<0.000000e+00> : vector<2048x32xf32>
    %2 = tpu.matmul %0, %1, %cst {dimension_numbers = #tpu.dot_dimension_numbers<[1], [0], [0], [1], [0, 0, 1, 1], [], []>} : vector<2048x16xbf16>, vector<16x32xbf16>, vector<2048x32xf32> -> vector<2048x32xf32>
    %c0_3 = arith.constant 0 : index
    %c0_4 = arith.constant 0 : index
    %3 = vector.load %arg3[%c0_3, %c0_4] : memref<1x32xf32, #tpu.memory_space<vmem>>, vector<1x32xf32>
    %4 = vector.broadcast %3 : vector<1x32xf32> to vector<2048x32xf32>
    %5 = arith.addf %2, %4 : vector<2048x32xf32>
    %cst_5 = arith.constant 0.000000e+00 : f32
    %6 = vector.broadcast %cst_5 : f32 to vector<2048x32xf32>
    %7 = arith.maximumf %5, %6 : vector<2048x32xf32>
    %8 = arith.truncf %7 : vector<2048x32xf32> to vector<2048x32xbf16>
    %c0_6 = arith.constant 0 : index
    %c0_7 = arith.constant 0 : index
    %9 = vector.load %arg4[%c0_6, %c0_7] : memref<2048x32xbf16, #tpu.memory_space<vmem>>, vector<2048x32xbf16>
    tpu.vector_store %arg4[%c0_6, %c0_7], %8 {strides = array<i32>} : memref<2048x32xbf16, #tpu.memory_space<vmem>>, vector<2048x32xbf16>,
    return
  }
  func.func @transform_0(%arg0: i32) -> (i32, i32) {
    %c0_i32 = arith.constant 0 : i32
    %c0_i32_0 = arith.constant 0 : i32
    return %arg0, %c0_i32 : i32, i32
  }
  func.func @transform_1(%arg0: i32) -> (i32, i32) {
    %c0_i32 = arith.constant 0 : i32
    %c0_i32_0 = arith.constant 0 : i32
    %c0_i32_1 = arith.constant 0 : i32
    return %c0_i32, %c0_i32_0 : i32, i32
  }
  func.func @transform_2(%arg0: i32) -> (i32, i32) {
    %c0_i32 = arith.constant 0 : i32
    %c0_i32_0 = arith.constant 0 : i32
    %c0_i32_1 = arith.constant 0 : i32
    return %c0_i32, %c0_i32_0 : i32, i32
  }
  func.func @transform_3(%arg0: i32) -> (i32, i32) {
    %c0_i32 = arith.constant 0 : i32
    %c0_i32_0 = arith.constant 0 : i32
    return %arg0, %c0_i32 : i32, i32
  }
}

module attributes {stable_mosaic.version = 11 : i64} {
  func.func @_conv2tap_kernel(%arg0: i32, %arg1: memref<544x256xbf16, #tpu.memory_space<vmem>>, %arg2: memref<2x256x32xbf16, #tpu.memory_space<vmem>>, %arg3: memref<1x32xf32, #tpu.memory_space<vmem>>, %arg4: memref<512x32xbf16, #tpu.memory_space<vmem>>) attributes {dimension_semantics = [#tpu.dimension_semantics<parallel>], iteration_bounds = array<i64: 1>, scalar_prefetch = 0 : i64, scratch_operands = 0 : i64, tpu.core_type = #tpu.core_type<tc>, window_params = [{transform_indices = @transform_0, window_bounds = array<i64: 544, 256>}, {pipeline_mode = #tpu.pipeline_mode<synchronous>, transform_indices = @transform_1, window_bounds = array<i64: 2, 256, 32>}, {pipeline_mode = #tpu.pipeline_mode<synchronous>, transform_indices = @transform_2, window_bounds = array<i64: 1, 32>}, {transform_indices = @transform_3, window_bounds = array<i64: 512, 32>}]} {
    %c0 = arith.constant 0 : index
    %c0_0 = arith.constant 0 : index
    %0 = vector.load %arg1[%c0, %c0_0] : memref<544x256xbf16, #tpu.memory_space<vmem>>, vector<544x256xbf16>
    %c0_1 = arith.constant 0 : index
    %c0_2 = arith.constant 0 : index
    %c0_3 = arith.constant 0 : index
    %1 = vector.load %arg2[%c0_1, %c0_2, %c0_3] : memref<2x256x32xbf16, #tpu.memory_space<vmem>>, vector<1x256x32xbf16>
    %2 = vector.shape_cast %1 : vector<1x256x32xbf16> to vector<256x32xbf16>
    %cst = arith.constant dense<0.000000e+00> : vector<544x32xf32>
    %3 = tpu.matmul %0, %2, %cst {dimension_numbers = #tpu.dot_dimension_numbers<[1], [0], [0], [1], [0, 0, 1, 1], [], []>} : vector<544x256xbf16>, vector<256x32xbf16>, vector<544x32xf32> -> vector<544x32xf32>
    %c1 = arith.constant 1 : index
    %c0_4 = arith.constant 0 : index
    %c0_5 = arith.constant 0 : index
    %4 = vector.load %arg2[%c1, %c0_4, %c0_5] : memref<2x256x32xbf16, #tpu.memory_space<vmem>>, vector<1x256x32xbf16>
    %5 = vector.shape_cast %4 : vector<1x256x32xbf16> to vector<256x32xbf16>
    %cst_6 = arith.constant dense<0.000000e+00> : vector<544x32xf32>
    %6 = tpu.matmul %0, %5, %cst_6 {dimension_numbers = #tpu.dot_dimension_numbers<[1], [0], [0], [1], [0, 0, 1, 1], [], []>} : vector<544x256xbf16>, vector<256x32xbf16>, vector<544x32xf32> -> vector<544x32xf32>
    %c0_7 = arith.constant 0 : index
    %c0_8 = arith.constant 0 : index
    %7 = vector.load %arg3[%c0_7, %c0_8] : memref<1x32xf32, #tpu.memory_space<vmem>>, vector<1x32xf32>
    %8 = vector.extract_strided_slice %3 {offsets = [0, 0], sizes = [256, 32], strides = [1, 1]} : vector<544x32xf32> to vector<256x32xf32>
    %9 = vector.extract_strided_slice %6 {offsets = [16, 0], sizes = [256, 32], strides = [1, 1]} : vector<544x32xf32> to vector<256x32xf32>
    %10 = arith.addf %8, %9 : vector<256x32xf32>
    %11 = vector.broadcast %7 : vector<1x32xf32> to vector<256x32xf32>
    %12 = arith.addf %10, %11 : vector<256x32xf32>
    %cst_9 = arith.constant 0.000000e+00 : f32
    %13 = vector.broadcast %cst_9 : f32 to vector<256x32xf32>
    %14 = arith.maximumf %12, %13 : vector<256x32xf32>
    %15 = arith.truncf %14 : vector<256x32xf32> to vector<256x32xbf16>
    %c0_10 = arith.constant 0 : index
    %c0_11 = arith.constant 0 : index
    %16 = vector.load %arg4[%c0_10, %c0_11] : memref<512x32xbf16, #tpu.memory_space<vmem>>, vector<256x32xbf16>
    tpu.vector_store %arg4[%c0_10, %c0_11], %15 {strides = array<i32>} : memref<512x32xbf16, #tpu.memory_space<vmem>>, vector<256x32xbf16>,
    %17 = vector.extract_strided_slice %3 {offsets = [272, 0], sizes = [256, 32], strides = [1, 1]} : vector<544x32xf32> to vector<256x32xf32>
    %18 = vector.extract_strided_slice %6 {offsets = [288, 0], sizes = [256, 32], strides = [1, 1]} : vector<544x32xf32> to vector<256x32xf32>
    %19 = arith.addf %17, %18 : vector<256x32xf32>
    %20 = vector.broadcast %7 : vector<1x32xf32> to vector<256x32xf32>
    %21 = arith.addf %19, %20 : vector<256x32xf32>
    %cst_12 = arith.constant 0.000000e+00 : f32
    %22 = vector.broadcast %cst_12 : f32 to vector<256x32xf32>
    %23 = arith.maximumf %21, %22 : vector<256x32xf32>
    %24 = arith.truncf %23 : vector<256x32xf32> to vector<256x32xbf16>
    %c256 = arith.constant 256 : index
    %c0_13 = arith.constant 0 : index
    %25 = vector.load %arg4[%c256, %c0_13] : memref<512x32xbf16, #tpu.memory_space<vmem>>, vector<256x32xbf16>
    tpu.vector_store %arg4[%c256, %c0_13], %24 {strides = array<i32>} : memref<512x32xbf16, #tpu.memory_space<vmem>>, vector<256x32xbf16>,
    return
  }
  func.func @transform_0(%arg0: i32) -> (i32, i32) {
    %c0_i32 = arith.constant 0 : i32
    %c0_i32_0 = arith.constant 0 : i32
    return %arg0, %c0_i32 : i32, i32
  }
  func.func @transform_1(%arg0: i32) -> (i32, i32, i32) {
    %c0_i32 = arith.constant 0 : i32
    %c0_i32_0 = arith.constant 0 : i32
    %c0_i32_1 = arith.constant 0 : i32
    %c0_i32_2 = arith.constant 0 : i32
    return %c0_i32, %c0_i32_0, %c0_i32_1 : i32, i32, i32
  }
  func.func @transform_2(%arg0: i32) -> (i32, i32) {
    %c0_i32 = arith.constant 0 : i32
    %c0_i32_0 = arith.constant 0 : i32
    %c0_i32_1 = arith.constant 0 : i32
    return %c0_i32, %c0_i32_0 : i32, i32
  }
  func.func @transform_3(%arg0: i32) -> (i32, i32) {
    %c0_i32 = arith.constant 0 : i32
    %c0_i32_0 = arith.constant 0 : i32
    return %arg0, %c0_i32 : i32, i32
  }
}

module attributes {stable_mosaic.version = 11 : i64} {
  func.func @_conv2tap_kernel(%arg0: i32, %arg1: memref<144x256xbf16, #tpu.memory_space<vmem>>, %arg2: memref<2x256x64xbf16, #tpu.memory_space<vmem>>, %arg3: memref<1x64xf32, #tpu.memory_space<vmem>>, %arg4: memref<128x64xbf16, #tpu.memory_space<vmem>>) attributes {dimension_semantics = [#tpu.dimension_semantics<parallel>], iteration_bounds = array<i64: 1>, scalar_prefetch = 0 : i64, scratch_operands = 0 : i64, tpu.core_type = #tpu.core_type<tc>, window_params = [{transform_indices = @transform_0, window_bounds = array<i64: 144, 256>}, {pipeline_mode = #tpu.pipeline_mode<synchronous>, transform_indices = @transform_1, window_bounds = array<i64: 2, 256, 64>}, {pipeline_mode = #tpu.pipeline_mode<synchronous>, transform_indices = @transform_2, window_bounds = array<i64: 1, 64>}, {transform_indices = @transform_3, window_bounds = array<i64: 128, 64>}]} {
    %c0 = arith.constant 0 : index
    %c0_0 = arith.constant 0 : index
    %0 = vector.load %arg1[%c0, %c0_0] : memref<144x256xbf16, #tpu.memory_space<vmem>>, vector<144x256xbf16>
    %c0_1 = arith.constant 0 : index
    %c0_2 = arith.constant 0 : index
    %c0_3 = arith.constant 0 : index
    %1 = vector.load %arg2[%c0_1, %c0_2, %c0_3] : memref<2x256x64xbf16, #tpu.memory_space<vmem>>, vector<1x256x64xbf16>
    %2 = vector.shape_cast %1 : vector<1x256x64xbf16> to vector<256x64xbf16>
    %cst = arith.constant dense<0.000000e+00> : vector<144x64xf32>
    %3 = tpu.matmul %0, %2, %cst {dimension_numbers = #tpu.dot_dimension_numbers<[1], [0], [0], [1], [0, 0, 1, 1], [], []>} : vector<144x256xbf16>, vector<256x64xbf16>, vector<144x64xf32> -> vector<144x64xf32>
    %c1 = arith.constant 1 : index
    %c0_4 = arith.constant 0 : index
    %c0_5 = arith.constant 0 : index
    %4 = vector.load %arg2[%c1, %c0_4, %c0_5] : memref<2x256x64xbf16, #tpu.memory_space<vmem>>, vector<1x256x64xbf16>
    %5 = vector.shape_cast %4 : vector<1x256x64xbf16> to vector<256x64xbf16>
    %cst_6 = arith.constant dense<0.000000e+00> : vector<144x64xf32>
    %6 = tpu.matmul %0, %5, %cst_6 {dimension_numbers = #tpu.dot_dimension_numbers<[1], [0], [0], [1], [0, 0, 1, 1], [], []>} : vector<144x256xbf16>, vector<256x64xbf16>, vector<144x64xf32> -> vector<144x64xf32>
    %c0_7 = arith.constant 0 : index
    %c0_8 = arith.constant 0 : index
    %7 = vector.load %arg3[%c0_7, %c0_8] : memref<1x64xf32, #tpu.memory_space<vmem>>, vector<1x64xf32>
    %8 = vector.extract_strided_slice %3 {offsets = [0, 0], sizes = [64, 64], strides = [1, 1]} : vector<144x64xf32> to vector<64x64xf32>
    %9 = vector.extract_strided_slice %6 {offsets = [8, 0], sizes = [64, 64], strides = [1, 1]} : vector<144x64xf32> to vector<64x64xf32>
    %10 = arith.addf %8, %9 : vector<64x64xf32>
    %11 = vector.broadcast %7 : vector<1x64xf32> to vector<64x64xf32>
    %12 = arith.addf %10, %11 : vector<64x64xf32>
    %cst_9 = arith.constant 0.000000e+00 : f32
    %13 = vector.broadcast %cst_9 : f32 to vector<64x64xf32>
    %14 = arith.maximumf %12, %13 : vector<64x64xf32>
    %15 = arith.truncf %14 : vector<64x64xf32> to vector<64x64xbf16>
    %c0_10 = arith.constant 0 : index
    %c0_11 = arith.constant 0 : index
    %16 = vector.load %arg4[%c0_10, %c0_11] : memref<128x64xbf16, #tpu.memory_space<vmem>>, vector<64x64xbf16>
    tpu.vector_store %arg4[%c0_10, %c0_11], %15 {strides = array<i32>} : memref<128x64xbf16, #tpu.memory_space<vmem>>, vector<64x64xbf16>,
    %17 = vector.extract_strided_slice %3 {offsets = [72, 0], sizes = [64, 64], strides = [1, 1]} : vector<144x64xf32> to vector<64x64xf32>
    %18 = vector.extract_strided_slice %6 {offsets = [80, 0], sizes = [64, 64], strides = [1, 1]} : vector<144x64xf32> to vector<64x64xf32>
    %19 = arith.addf %17, %18 : vector<64x64xf32>
    %20 = vector.broadcast %7 : vector<1x64xf32> to vector<64x64xf32>
    %21 = arith.addf %19, %20 : vector<64x64xf32>
    %cst_12 = arith.constant 0.000000e+00 : f32
    %22 = vector.broadcast %cst_12 : f32 to vector<64x64xf32>
    %23 = arith.maximumf %21, %22 : vector<64x64xf32>
    %24 = arith.truncf %23 : vector<64x64xf32> to vector<64x64xbf16>
    %c64 = arith.constant 64 : index
    %c0_13 = arith.constant 0 : index
    %25 = vector.load %arg4[%c64, %c0_13] : memref<128x64xbf16, #tpu.memory_space<vmem>>, vector<64x64xbf16>
    tpu.vector_store %arg4[%c64, %c0_13], %24 {strides = array<i32>} : memref<128x64xbf16, #tpu.memory_space<vmem>>, vector<64x64xbf16>,
    return
  }
  func.func @transform_0(%arg0: i32) -> (i32, i32) {
    %c0_i32 = arith.constant 0 : i32
    %c0_i32_0 = arith.constant 0 : i32
    return %arg0, %c0_i32 : i32, i32
  }
  func.func @transform_1(%arg0: i32) -> (i32, i32, i32) {
    %c0_i32 = arith.constant 0 : i32
    %c0_i32_0 = arith.constant 0 : i32
    %c0_i32_1 = arith.constant 0 : i32
    %c0_i32_2 = arith.constant 0 : i32
    return %c0_i32, %c0_i32_0, %c0_i32_1 : i32, i32, i32
  }
  func.func @transform_2(%arg0: i32) -> (i32, i32) {
    %c0_i32 = arith.constant 0 : i32
    %c0_i32_0 = arith.constant 0 : i32
    %c0_i32_1 = arith.constant 0 : i32
    return %c0_i32, %c0_i32_0 : i32, i32
  }
  func.func @transform_3(%arg0: i32) -> (i32, i32) {
    %c0_i32 = arith.constant 0 : i32
    %c0_i32_0 = arith.constant 0 : i32
    return %arg0, %c0_i32 : i32, i32
  }
}

module attributes {stable_mosaic.version = 11 : i64} {
  func.func @_tail_kernel(%arg0: i32, %arg1: memref<1x32x512xbf16, #tpu.memory_space<vmem>>, %arg2: memref<1x32x512xbf16, #tpu.memory_space<vmem>>, %arg3: memref<2x512x64xbf16, #tpu.memory_space<vmem>>, %arg4: memref<1x64xf32, #tpu.memory_space<vmem>>, %arg5: memref<1024x128xbf16, #tpu.memory_space<vmem>>, %arg6: memref<1x128xf32, #tpu.memory_space<vmem>>, %arg7: memref<128x10xf32, #tpu.memory_space<vmem>>, %arg8: memref<1x10xf32, #tpu.memory_space<vmem>>, %arg9: memref<128x10xf32, #tpu.memory_space<vmem>>, %arg10: memref<1x10xf32, #tpu.memory_space<vmem>>, %arg11: memref<2x10xf32, #tpu.memory_space<vmem>>, %arg12: memref<2x10xf32, #tpu.memory_space<vmem>>, %arg13: memref<32x64xf32, #tpu.memory_space<vmem>>) attributes {dimension_semantics = [#tpu.dimension_semantics<parallel>], iteration_bounds = array<i64: 1>, scalar_prefetch = 0 : i64, scratch_operands = 1 : i64, tpu.core_type = #tpu.core_type<tc>, window_params = [{transform_indices = @transform_0, window_bounds = array<i64: 1, 32, 512>}, {transform_indices = @transform_1, window_bounds = array<i64: 1, 32, 512>}, {pipeline_mode = #tpu.pipeline_mode<synchronous>, transform_indices = @transform_2, window_bounds = array<i64: 2, 512, 64>}, {pipeline_mode = #tpu.pipeline_mode<synchronous>, transform_indices = @transform_3, window_bounds = array<i64: 1, 64>}, {pipeline_mode = #tpu.pipeline_mode<synchronous>, transform_indices = @transform_4, window_bounds = array<i64: 1024, 128>}, {pipeline_mode = #tpu.pipeline_mode<synchronous>, transform_indices = @transform_5, window_bounds = array<i64: 1, 128>}, {pipeline_mode = #tpu.pipeline_mode<synchronous>, transform_indices = @transform_6, window_bounds = array<i64: 128, 10>}, {pipeline_mode = #tpu.pipeline_mode<synchronous>, transform_indices = @transform_7, window_bounds = array<i64: 1, 10>}, {pipeline_mode = #tpu.pipeline_mode<synchronous>, transform_indices = @transform_8, window_bounds = array<i64: 128, 10>}, {pipeline_mode = #tpu.pipeline_mode<synchronous>, transform_indices = @transform_9, window_bounds = array<i64: 1, 10>}, {transform_indices = @transform_10, window_bounds = array<i64: 2, 10>}, {transform_indices = @transform_11, window_bounds = array<i64: 2, 10>}]} {
    %c0 = arith.constant 0 : index
    %c0_0 = arith.constant 0 : index
    %c0_1 = arith.constant 0 : index
    %0 = vector.load %arg1[%c0, %c0_0, %c0_1] : memref<1x32x512xbf16, #tpu.memory_space<vmem>>, vector<1x32x512xbf16>
    %1 = vector.shape_cast %0 : vector<1x32x512xbf16> to vector<32x512xbf16>
    %c0_2 = arith.constant 0 : index
    %c0_3 = arith.constant 0 : index
    %c0_4 = arith.constant 0 : index
    %2 = vector.load %arg3[%c0_2, %c0_3, %c0_4] : memref<2x512x64xbf16, #tpu.memory_space<vmem>>, vector<1x512x64xbf16>
    %3 = vector.shape_cast %2 : vector<1x512x64xbf16> to vector<512x64xbf16>
    %cst = arith.constant dense<0.000000e+00> : vector<32x64xf32>
    %4 = tpu.matmul %1, %3, %cst {dimension_numbers = #tpu.dot_dimension_numbers<[1], [0], [0], [1], [0, 0, 1, 1], [], []>} : vector<32x512xbf16>, vector<512x64xbf16>, vector<32x64xf32> -> vector<32x64xf32>
    %c0_5 = arith.constant 0 : index
    %c0_6 = arith.constant 0 : index
    %c0_7 = arith.constant 0 : index
    %5 = vector.load %arg2[%c0_5, %c0_6, %c0_7] : memref<1x32x512xbf16, #tpu.memory_space<vmem>>, vector<1x32x512xbf16>
    %6 = vector.shape_cast %5 : vector<1x32x512xbf16> to vector<32x512xbf16>
    %c1 = arith.constant 1 : index
    %c0_8 = arith.constant 0 : index
    %c0_9 = arith.constant 0 : index
    %7 = vector.load %arg3[%c1, %c0_8, %c0_9] : memref<2x512x64xbf16, #tpu.memory_space<vmem>>, vector<1x512x64xbf16>
    %8 = vector.shape_cast %7 : vector<1x512x64xbf16> to vector<512x64xbf16>
    %cst_10 = arith.constant dense<0.000000e+00> : vector<32x64xf32>
    %9 = tpu.matmul %6, %8, %cst_10 {dimension_numbers = #tpu.dot_dimension_numbers<[1], [0], [0], [1], [0, 0, 1, 1], [], []>} : vector<32x512xbf16>, vector<512x64xbf16>, vector<32x64xf32> -> vector<32x64xf32>
    %10 = arith.addf %4, %9 : vector<32x64xf32>
    %c0_11 = arith.constant 0 : index
    %c0_12 = arith.constant 0 : index
    %11 = vector.load %arg4[%c0_11, %c0_12] : memref<1x64xf32, #tpu.memory_space<vmem>>, vector<1x64xf32>
    %12 = vector.broadcast %11 : vector<1x64xf32> to vector<32x64xf32>
    %13 = arith.addf %10, %12 : vector<32x64xf32>
    %cst_13 = arith.constant 0.000000e+00 : f32
    %14 = vector.broadcast %cst_13 : f32 to vector<32x64xf32>
    %15 = arith.maximumf %13, %14 : vector<32x64xf32>
    %c0_14 = arith.constant 0 : index
    %c0_15 = arith.constant 0 : index
    %16 = vector.load %arg13[%c0_14, %c0_15] : memref<32x64xf32, #tpu.memory_space<vmem>>, vector<32x64xf32>
    tpu.vector_store %arg13[%c0_14, %c0_15], %15 {strides = array<i32>} : memref<32x64xf32, #tpu.memory_space<vmem>>, vector<32x64xf32>,
    %cst_16 = arith.constant 0.000000e+00 : f32
    %17 = vector.broadcast %cst_16 : f32 to vector<2x128xf32>
    %c0_17 = arith.constant 0 : index
    %c0_18 = arith.constant 0 : index
    %18 = vector.load %arg13[%c0_17, %c0_18] : memref<32x64xf32, #tpu.memory_space<vmem>>, vector<2x64xf32>
    %19 = arith.truncf %18 : vector<2x64xf32> to vector<2x64xbf16>
    %c0_19 = arith.constant 0 : index
    %c0_20 = arith.constant 0 : index
    %20 = vector.load %arg5[%c0_19, %c0_20] : memref<1024x128xbf16, #tpu.memory_space<vmem>>, vector<64x128xbf16>
    %cst_21 = arith.constant dense<0.000000e+00> : vector<2x128xf32>
    %21 = tpu.matmul %19, %20, %cst_21 {dimension_numbers = #tpu.dot_dimension_numbers<[1], [0], [0], [1], [0, 0, 1, 1], [], []>} : vector<2x64xbf16>, vector<64x128xbf16>, vector<2x128xf32> -> vector<2x128xf32>
    %22 = arith.addf %17, %21 : vector<2x128xf32>
    %c2 = arith.constant 2 : index
    %c0_22 = arith.constant 0 : index
    %23 = vector.load %arg13[%c2, %c0_22] : memref<32x64xf32, #tpu.memory_space<vmem>>, vector<2x64xf32>
    %24 = arith.truncf %23 : vector<2x64xf32> to vector<2x64xbf16>
    %c64 = arith.constant 64 : index
    %c0_23 = arith.constant 0 : index
    %25 = vector.load %arg5[%c64, %c0_23] : memref<1024x128xbf16, #tpu.memory_space<vmem>>, vector<64x128xbf16>
    %cst_24 = arith.constant dense<0.000000e+00> : vector<2x128xf32>
    %26 = tpu.matmul %24, %25, %cst_24 {dimension_numbers = #tpu.dot_dimension_numbers<[1], [0], [0], [1], [0, 0, 1, 1], [], []>} : vector<2x64xbf16>, vector<64x128xbf16>, vector<2x128xf32> -> vector<2x128xf32>
    %27 = arith.addf %22, %26 : vector<2x128xf32>
    %c4 = arith.constant 4 : index
    %c0_25 = arith.constant 0 : index
    %28 = vector.load %arg13[%c4, %c0_25] : memref<32x64xf32, #tpu.memory_space<vmem>>, vector<2x64xf32>
    %29 = arith.truncf %28 : vector<2x64xf32> to vector<2x64xbf16>
    %c128 = arith.constant 128 : index
    %c0_26 = arith.constant 0 : index
    %30 = vector.load %arg5[%c128, %c0_26] : memref<1024x128xbf16, #tpu.memory_space<vmem>>, vector<64x128xbf16>
    %cst_27 = arith.constant dense<0.000000e+00> : vector<2x128xf32>
    %31 = tpu.matmul %29, %30, %cst_27 {dimension_numbers = #tpu.dot_dimension_numbers<[1], [0], [0], [1], [0, 0, 1, 1], [], []>} : vector<2x64xbf16>, vector<64x128xbf16>, vector<2x128xf32> -> vector<2x128xf32>
    %32 = arith.addf %27, %31 : vector<2x128xf32>
    %c6 = arith.constant 6 : index
    %c0_28 = arith.constant 0 : index
    %33 = vector.load %arg13[%c6, %c0_28] : memref<32x64xf32, #tpu.memory_space<vmem>>, vector<2x64xf32>
    %34 = arith.truncf %33 : vector<2x64xf32> to vector<2x64xbf16>
    %c192 = arith.constant 192 : index
    %c0_29 = arith.constant 0 : index
    %35 = vector.load %arg5[%c192, %c0_29] : memref<1024x128xbf16, #tpu.memory_space<vmem>>, vector<64x128xbf16>
    %cst_30 = arith.constant dense<0.000000e+00> : vector<2x128xf32>
    %36 = tpu.matmul %34, %35, %cst_30 {dimension_numbers = #tpu.dot_dimension_numbers<[1], [0], [0], [1], [0, 0, 1, 1], [], []>} : vector<2x64xbf16>, vector<64x128xbf16>, vector<2x128xf32> -> vector<2x128xf32>
    %37 = arith.addf %32, %36 : vector<2x128xf32>
    %c8 = arith.constant 8 : index
    %c0_31 = arith.constant 0 : index
    %38 = vector.load %arg13[%c8, %c0_31] : memref<32x64xf32, #tpu.memory_space<vmem>>, vector<2x64xf32>
    %39 = arith.truncf %38 : vector<2x64xf32> to vector<2x64xbf16>
    %c256 = arith.constant 256 : index
    %c0_32 = arith.constant 0 : index
    %40 = vector.load %arg5[%c256, %c0_32] : memref<1024x128xbf16, #tpu.memory_space<vmem>>, vector<64x128xbf16>
    %cst_33 = arith.constant dense<0.000000e+00> : vector<2x128xf32>
    %41 = tpu.matmul %39, %40, %cst_33 {dimension_numbers = #tpu.dot_dimension_numbers<[1], [0], [0], [1], [0, 0, 1, 1], [], []>} : vector<2x64xbf16>, vector<64x128xbf16>, vector<2x128xf32> -> vector<2x128xf32>
    %42 = arith.addf %37, %41 : vector<2x128xf32>
    %c10 = arith.constant 10 : index
    %c0_34 = arith.constant 0 : index
    %43 = vector.load %arg13[%c10, %c0_34] : memref<32x64xf32, #tpu.memory_space<vmem>>, vector<2x64xf32>
    %44 = arith.truncf %43 : vector<2x64xf32> to vector<2x64xbf16>
    %c320 = arith.constant 320 : index
    %c0_35 = arith.constant 0 : index
    %45 = vector.load %arg5[%c320, %c0_35] : memref<1024x128xbf16, #tpu.memory_space<vmem>>, vector<64x128xbf16>
    %cst_36 = arith.constant dense<0.000000e+00> : vector<2x128xf32>
    %46 = tpu.matmul %44, %45, %cst_36 {dimension_numbers = #tpu.dot_dimension_numbers<[1], [0], [0], [1], [0, 0, 1, 1], [], []>} : vector<2x64xbf16>, vector<64x128xbf16>, vector<2x128xf32> -> vector<2x128xf32>
    %47 = arith.addf %42, %46 : vector<2x128xf32>
    %c12 = arith.constant 12 : index
    %c0_37 = arith.constant 0 : index
    %48 = vector.load %arg13[%c12, %c0_37] : memref<32x64xf32, #tpu.memory_space<vmem>>, vector<2x64xf32>
    %49 = arith.truncf %48 : vector<2x64xf32> to vector<2x64xbf16>
    %c384 = arith.constant 384 : index
    %c0_38 = arith.constant 0 : index
    %50 = vector.load %arg5[%c384, %c0_38] : memref<1024x128xbf16, #tpu.memory_space<vmem>>, vector<64x128xbf16>
    %cst_39 = arith.constant dense<0.000000e+00> : vector<2x128xf32>
    %51 = tpu.matmul %49, %50, %cst_39 {dimension_numbers = #tpu.dot_dimension_numbers<[1], [0], [0], [1], [0, 0, 1, 1], [], []>} : vector<2x64xbf16>, vector<64x128xbf16>, vector<2x128xf32> -> vector<2x128xf32>
    %52 = arith.addf %47, %51 : vector<2x128xf32>
    %c14 = arith.constant 14 : index
    %c0_40 = arith.constant 0 : index
    %53 = vector.load %arg13[%c14, %c0_40] : memref<32x64xf32, #tpu.memory_space<vmem>>, vector<2x64xf32>
    %54 = arith.truncf %53 : vector<2x64xf32> to vector<2x64xbf16>
    %c448 = arith.constant 448 : index
    %c0_41 = arith.constant 0 : index
    %55 = vector.load %arg5[%c448, %c0_41] : memref<1024x128xbf16, #tpu.memory_space<vmem>>, vector<64x128xbf16>
    %cst_42 = arith.constant dense<0.000000e+00> : vector<2x128xf32>
    %56 = tpu.matmul %54, %55, %cst_42 {dimension_numbers = #tpu.dot_dimension_numbers<[1], [0], [0], [1], [0, 0, 1, 1], [], []>} : vector<2x64xbf16>, vector<64x128xbf16>, vector<2x128xf32> -> vector<2x128xf32>
    %57 = arith.addf %52, %56 : vector<2x128xf32>
    %c16 = arith.constant 16 : index
    %c0_43 = arith.constant 0 : index
    %58 = vector.load %arg13[%c16, %c0_43] : memref<32x64xf32, #tpu.memory_space<vmem>>, vector<2x64xf32>
    %59 = arith.truncf %58 : vector<2x64xf32> to vector<2x64xbf16>
    %c512 = arith.constant 512 : index
    %c0_44 = arith.constant 0 : index
    %60 = vector.load %arg5[%c512, %c0_44] : memref<1024x128xbf16, #tpu.memory_space<vmem>>, vector<64x128xbf16>
    %cst_45 = arith.constant dense<0.000000e+00> : vector<2x128xf32>
    %61 = tpu.matmul %59, %60, %cst_45 {dimension_numbers = #tpu.dot_dimension_numbers<[1], [0], [0], [1], [0, 0, 1, 1], [], []>} : vector<2x64xbf16>, vector<64x128xbf16>, vector<2x128xf32> -> vector<2x128xf32>
    %62 = arith.addf %57, %61 : vector<2x128xf32>
    %c18 = arith.constant 18 : index
    %c0_46 = arith.constant 0 : index
    %63 = vector.load %arg13[%c18, %c0_46] : memref<32x64xf32, #tpu.memory_space<vmem>>, vector<2x64xf32>
    %64 = arith.truncf %63 : vector<2x64xf32> to vector<2x64xbf16>
    %c576 = arith.constant 576 : index
    %c0_47 = arith.constant 0 : index
    %65 = vector.load %arg5[%c576, %c0_47] : memref<1024x128xbf16, #tpu.memory_space<vmem>>, vector<64x128xbf16>
    %cst_48 = arith.constant dense<0.000000e+00> : vector<2x128xf32>
    %66 = tpu.matmul %64, %65, %cst_48 {dimension_numbers = #tpu.dot_dimension_numbers<[1], [0], [0], [1], [0, 0, 1, 1], [], []>} : vector<2x64xbf16>, vector<64x128xbf16>, vector<2x128xf32> -> vector<2x128xf32>
    %67 = arith.addf %62, %66 : vector<2x128xf32>
    %c20 = arith.constant 20 : index
    %c0_49 = arith.constant 0 : index
    %68 = vector.load %arg13[%c20, %c0_49] : memref<32x64xf32, #tpu.memory_space<vmem>>, vector<2x64xf32>
    %69 = arith.truncf %68 : vector<2x64xf32> to vector<2x64xbf16>
    %c640 = arith.constant 640 : index
    %c0_50 = arith.constant 0 : index
    %70 = vector.load %arg5[%c640, %c0_50] : memref<1024x128xbf16, #tpu.memory_space<vmem>>, vector<64x128xbf16>
    %cst_51 = arith.constant dense<0.000000e+00> : vector<2x128xf32>
    %71 = tpu.matmul %69, %70, %cst_51 {dimension_numbers = #tpu.dot_dimension_numbers<[1], [0], [0], [1], [0, 0, 1, 1], [], []>} : vector<2x64xbf16>, vector<64x128xbf16>, vector<2x128xf32> -> vector<2x128xf32>
    %72 = arith.addf %67, %71 : vector<2x128xf32>
    %c22 = arith.constant 22 : index
    %c0_52 = arith.constant 0 : index
    %73 = vector.load %arg13[%c22, %c0_52] : memref<32x64xf32, #tpu.memory_space<vmem>>, vector<2x64xf32>
    %74 = arith.truncf %73 : vector<2x64xf32> to vector<2x64xbf16>
    %c704 = arith.constant 704 : index
    %c0_53 = arith.constant 0 : index
    %75 = vector.load %arg5[%c704, %c0_53] : memref<1024x128xbf16, #tpu.memory_space<vmem>>, vector<64x128xbf16>
    %cst_54 = arith.constant dense<0.000000e+00> : vector<2x128xf32>
    %76 = tpu.matmul %74, %75, %cst_54 {dimension_numbers = #tpu.dot_dimension_numbers<[1], [0], [0], [1], [0, 0, 1, 1], [], []>} : vector<2x64xbf16>, vector<64x128xbf16>, vector<2x128xf32> -> vector<2x128xf32>
    %77 = arith.addf %72, %76 : vector<2x128xf32>
    %c24 = arith.constant 24 : index
    %c0_55 = arith.constant 0 : index
    %78 = vector.load %arg13[%c24, %c0_55] : memref<32x64xf32, #tpu.memory_space<vmem>>, vector<2x64xf32>
    %79 = arith.truncf %78 : vector<2x64xf32> to vector<2x64xbf16>
    %c768 = arith.constant 768 : index
    %c0_56 = arith.constant 0 : index
    %80 = vector.load %arg5[%c768, %c0_56] : memref<1024x128xbf16, #tpu.memory_space<vmem>>, vector<64x128xbf16>
    %cst_57 = arith.constant dense<0.000000e+00> : vector<2x128xf32>
    %81 = tpu.matmul %79, %80, %cst_57 {dimension_numbers = #tpu.dot_dimension_numbers<[1], [0], [0], [1], [0, 0, 1, 1], [], []>} : vector<2x64xbf16>, vector<64x128xbf16>, vector<2x128xf32> -> vector<2x128xf32>
    %82 = arith.addf %77, %81 : vector<2x128xf32>
    %c26 = arith.constant 26 : index
    %c0_58 = arith.constant 0 : index
    %83 = vector.load %arg13[%c26, %c0_58] : memref<32x64xf32, #tpu.memory_space<vmem>>, vector<2x64xf32>
    %84 = arith.truncf %83 : vector<2x64xf32> to vector<2x64xbf16>
    %c832 = arith.constant 832 : index
    %c0_59 = arith.constant 0 : index
    %85 = vector.load %arg5[%c832, %c0_59] : memref<1024x128xbf16, #tpu.memory_space<vmem>>, vector<64x128xbf16>
    %cst_60 = arith.constant dense<0.000000e+00> : vector<2x128xf32>
    %86 = tpu.matmul %84, %85, %cst_60 {dimension_numbers = #tpu.dot_dimension_numbers<[1], [0], [0], [1], [0, 0, 1, 1], [], []>} : vector<2x64xbf16>, vector<64x128xbf16>, vector<2x128xf32> -> vector<2x128xf32>
    %87 = arith.addf %82, %86 : vector<2x128xf32>
    %c28 = arith.constant 28 : index
    %c0_61 = arith.constant 0 : index
    %88 = vector.load %arg13[%c28, %c0_61] : memref<32x64xf32, #tpu.memory_space<vmem>>, vector<2x64xf32>
    %89 = arith.truncf %88 : vector<2x64xf32> to vector<2x64xbf16>
    %c896 = arith.constant 896 : index
    %c0_62 = arith.constant 0 : index
    %90 = vector.load %arg5[%c896, %c0_62] : memref<1024x128xbf16, #tpu.memory_space<vmem>>, vector<64x128xbf16>
    %cst_63 = arith.constant dense<0.000000e+00> : vector<2x128xf32>
    %91 = tpu.matmul %89, %90, %cst_63 {dimension_numbers = #tpu.dot_dimension_numbers<[1], [0], [0], [1], [0, 0, 1, 1], [], []>} : vector<2x64xbf16>, vector<64x128xbf16>, vector<2x128xf32> -> vector<2x128xf32>
    %92 = arith.addf %87, %91 : vector<2x128xf32>
    %c30 = arith.constant 30 : index
    %c0_64 = arith.constant 0 : index
    %93 = vector.load %arg13[%c30, %c0_64] : memref<32x64xf32, #tpu.memory_space<vmem>>, vector<2x64xf32>
    %94 = arith.truncf %93 : vector<2x64xf32> to vector<2x64xbf16>
    %c960 = arith.constant 960 : index
    %c0_65 = arith.constant 0 : index
    %95 = vector.load %arg5[%c960, %c0_65] : memref<1024x128xbf16, #tpu.memory_space<vmem>>, vector<64x128xbf16>
    %cst_66 = arith.constant dense<0.000000e+00> : vector<2x128xf32>
    %96 = tpu.matmul %94, %95, %cst_66 {dimension_numbers = #tpu.dot_dimension_numbers<[1], [0], [0], [1], [0, 0, 1, 1], [], []>} : vector<2x64xbf16>, vector<64x128xbf16>, vector<2x128xf32> -> vector<2x128xf32>
    %97 = arith.addf %92, %96 : vector<2x128xf32>
    %c0_67 = arith.constant 0 : index
    %c0_68 = arith.constant 0 : index
    %98 = vector.load %arg6[%c0_67, %c0_68] : memref<1x128xf32, #tpu.memory_space<vmem>>, vector<1x128xf32>
    %99 = vector.broadcast %98 : vector<1x128xf32> to vector<2x128xf32>
    %100 = arith.addf %97, %99 : vector<2x128xf32>
    %c0_69 = arith.constant 0 : index
    %c0_70 = arith.constant 0 : index
    %101 = vector.load %arg7[%c0_69, %c0_70] : memref<128x10xf32, #tpu.memory_space<vmem>>, vector<128x10xf32>
    %cst_71 = arith.constant dense<0.000000e+00> : vector<2x10xf32>
    %102 = tpu.matmul %100, %101, %cst_71 {dimension_numbers = #tpu.dot_dimension_numbers<[1], [0], [0], [1], [0, 0, 1, 1], [], []>} : vector<2x128xf32>, vector<128x10xf32>, vector<2x10xf32> -> vector<2x10xf32>
    %c0_72 = arith.constant 0 : index
    %c0_73 = arith.constant 0 : index
    %103 = vector.load %arg8[%c0_72, %c0_73] : memref<1x10xf32, #tpu.memory_space<vmem>>, vector<1x10xf32>
    %104 = vector.broadcast %103 : vector<1x10xf32> to vector<2x10xf32>
    %105 = arith.addf %102, %104 : vector<2x10xf32>
    %c0_74 = arith.constant 0 : index
    %c0_75 = arith.constant 0 : index
    %106 = vector.load %arg9[%c0_74, %c0_75] : memref<128x10xf32, #tpu.memory_space<vmem>>, vector<128x10xf32>
    %cst_76 = arith.constant dense<0.000000e+00> : vector<2x10xf32>
    %107 = tpu.matmul %100, %106, %cst_76 {dimension_numbers = #tpu.dot_dimension_numbers<[1], [0], [0], [1], [0, 0, 1, 1], [], []>} : vector<2x128xf32>, vector<128x10xf32>, vector<2x10xf32> -> vector<2x10xf32>
    %c0_77 = arith.constant 0 : index
    %c0_78 = arith.constant 0 : index
    %108 = vector.load %arg10[%c0_77, %c0_78] : memref<1x10xf32, #tpu.memory_space<vmem>>, vector<1x10xf32>
    %109 = vector.broadcast %108 : vector<1x10xf32> to vector<2x10xf32>
    %110 = arith.addf %107, %109 : vector<2x10xf32>
    %c0_79 = arith.constant 0 : index
    %c0_80 = arith.constant 0 : index
    %111 = vector.load %arg11[%c0_79, %c0_80] : memref<2x10xf32, #tpu.memory_space<vmem>>, vector<2x10xf32>
    tpu.vector_store %arg11[%c0_79, %c0_80], %105 {strides = array<i32>} : memref<2x10xf32, #tpu.memory_space<vmem>>, vector<2x10xf32>,
    %cst_81 = arith.constant 5.000000e-01 : f32
    %112 = vector.broadcast %cst_81 : f32 to vector<2x10xf32>
    %113 = arith.mulf %112, %110 : vector<2x10xf32>
    %114 = math.exp %113 : vector<2x10xf32>
    %cst_82 = arith.constant 9.99999997E-7 : f32
    %115 = vector.broadcast %cst_82 : f32 to vector<2x10xf32>
    %116 = arith.addf %114, %115 : vector<2x10xf32>
    %c0_83 = arith.constant 0 : index
    %c0_84 = arith.constant 0 : index
    %117 = vector.load %arg12[%c0_83, %c0_84] : memref<2x10xf32, #tpu.memory_space<vmem>>, vector<2x10xf32>
    tpu.vector_store %arg12[%c0_83, %c0_84], %116 {strides = array<i32>} : memref<2x10xf32, #tpu.memory_space<vmem>>, vector<2x10xf32>,
    return
  }
  func.func @transform_0(%arg0: i32) -> (i32, i32, i32) {
    %c0_i32 = arith.constant 0 : i32
    %c0_i32_0 = arith.constant 0 : i32
    %c0_i32_1 = arith.constant 0 : i32
    return %arg0, %c0_i32, %c0_i32_0 : i32, i32, i32
  }
  func.func @transform_1(%arg0: i32) -> (i32, i32, i32) {
    %c0_i32 = arith.constant 0 : i32
    %c0_i32_0 = arith.constant 0 : i32
    %c0_i32_1 = arith.constant 0 : i32
    return %arg0, %c0_i32, %c0_i32_0 : i32, i32, i32
  }
  func.func @transform_2(%arg0: i32) -> (i32, i32, i32) {
    %c0_i32 = arith.constant 0 : i32
    %c0_i32_0 = arith.constant 0 : i32
    %c0_i32_1 = arith.constant 0 : i32
    %c0_i32_2 = arith.constant 0 : i32
    return %c0_i32, %c0_i32_0, %c0_i32_1 : i32, i32, i32
  }
  func.func @transform_3(%arg0: i32) -> (i32, i32) {
    %c0_i32 = arith.constant 0 : i32
    %c0_i32_0 = arith.constant 0 : i32
    %c0_i32_1 = arith.constant 0 : i32
    return %c0_i32, %c0_i32_0 : i32, i32
  }
  func.func @transform_4(%arg0: i32) -> (i32, i32) {
    %c0_i32 = arith.constant 0 : i32
    %c0_i32_0 = arith.constant 0 : i32
    %c0_i32_1 = arith.constant 0 : i32
    return %c0_i32, %c0_i32_0 : i32, i32
  }
  func.func @transform_5(%arg0: i32) -> (i32, i32) {
    %c0_i32 = arith.constant 0 : i32
    %c0_i32_0 = arith.constant 0 : i32
    %c0_i32_1 = arith.constant 0 : i32
    return %c0_i32, %c0_i32_0 : i32, i32
  }
  func.func @transform_6(%arg0: i32) -> (i32, i32) {
    %c0_i32 = arith.constant 0 : i32
    %c0_i32_0 = arith.constant 0 : i32
    %c0_i32_1 = arith.constant 0 : i32
    return %c0_i32, %c0_i32_0 : i32, i32
  }
  func.func @transform_7(%arg0: i32) -> (i32, i32) {
    %c0_i32 = arith.constant 0 : i32
    %c0_i32_0 = arith.constant 0 : i32
    %c0_i32_1 = arith.constant 0 : i32
    return %c0_i32, %c0_i32_0 : i32, i32
  }
  func.func @transform_8(%arg0: i32) -> (i32, i32) {
    %c0_i32 = arith.constant 0 : i32
    %c0_i32_0 = arith.constant 0 : i32
    %c0_i32_1 = arith.constant 0 : i32
    return %c0_i32, %c0_i32_0 : i32, i32
  }
  func.func @transform_9(%arg0: i32) -> (i32, i32) {
    %c0_i32 = arith.constant 0 : i32
    %c0_i32_0 = arith.constant 0 : i32
    %c0_i32_1 = arith.constant 0 : i32
    return %c0_i32, %c0_i32_0 : i32, i32
  }
  func.func @transform_10(%arg0: i32) -> (i32, i32) {
    %c0_i32 = arith.constant 0 : i32
    %c0_i32_0 = arith.constant 0 : i32
    return %arg0, %c0_i32 : i32, i32
  }
  func.func @transform_11(%arg0: i32) -> (i32, i32) {
    %c0_i32 = arith.constant 0 : i32
    %c0_i32_0 = arith.constant 0 : i32
    return %arg0, %c0_i32 : i32, i32
  }
}

</mosaic_0001>

<bundles_post_ra>
// kernel: enc_forward.4
= control target key start
LH: loop header
LB: loop body
LE: loop exit
PB: predicated region body
PF: predicated region fallthrough
CT: control target
= control target key end

     0   :  { %vm923_vm0 = vcmask 130048   ;;  %vm2469_vm1 = vcmask 257024   ;;  %s5339_s1 = inlined_call_operand.vmem [shape: bf16[16,32], index: 1, kind: input, shape index: {}]   ;;  %s5340_s0 = inlined_call_operand.vmem [shape: bf16[2048,16], index: 0, kind: input, shape index: {}]   ;;  %s5341_s2 = inlined_call_operand.vmem [shape: f32[1,32], index: 2, kind: input, shape index: {}]   ;;  %s5342_s3 = inlined_call_operand.vmem [shape: bf16[2048,32], index: 3, kind: output, shape index: {}]  }
   0x1   :  { %v3502_v0 = vld [vmem:[%s5339_s1] sm:$0xff]  ;;  %v3375_v5 = vld [vmem:[%s5340_s0 + $0x8] sm:$0xff]  ;;  %v3376_v9 = vld [vmem:[%s5340_s0 + $0x10] sm:$0xff] }
   0x2   :  { %v3374_v1 = vld [vmem:[%s5340_s0] sm:$0xff]  ;;  %1315 = vmatpush.bf16.msra.mxu0 %v3502_v0  ;;  %3503 = vmatpush.bf16.msra.mxu1 %v3502_v0  ;;  %v3407_v6 = vld [vmem:[%s5340_s0 + $0x108] sm:$0xff]  ;;  %v3408_v10 = vld [vmem:[%s5340_s0 + $0x110] sm:$0xff] }
   0x3   :  { %v3406_v2 = vld [vmem:[%s5340_s0 + $0x100] sm:$0xff]  ;;  %3504 = vmatpush.bf16.msra.mxu2 %v3502_v0  ;;  %3505 = vmatpush.bf16.msra.mxu3 %v3502_v0  ;;  %v3439_v7 = vld [vmem:[%s5340_s0 + $0x208] sm:$0xff]  ;;  %v3440_v11 = vld [vmem:[%s5340_s0 + $0x210] sm:$0xff] }
   0x4   :  { %v3438_v3 = vld [vmem:[%s5340_s0 + $0x200] sm:$0xff]  ;;  %v3471_v8 = vld [vmem:[%s5340_s0 + $0x308] sm:$0xff]  ;;  %v3472_v12 = vld [vmem:[%s5340_s0 + $0x310] sm:$0xff] }
   0x5   :  { %v3470_v4 = vld [vmem:[%s5340_s0 + $0x300] sm:$0xff]  ;;  %3246 = vmatmul.msk.bf16.vlgmr.msra.gmra.mxu0 %vm923_vm0, %v3374_v1  ;;  %3278 = vmatmul.msk.bf16.vlgmr.msra.gmra.mxu1 %vm923_vm0, %v3406_v2  ;;  %v3377_v13 = vld [vmem:[%s5340_s0 + $0x18] sm:$0xff]  ;;  %v3379_v21 = vld [vmem:[%s5340_s0 + $0x28] sm:$0xff] }
   0x6   :  { %3310 = vmatmul.msk.bf16.vlgmr.msra.gmra.mxu2 %vm923_vm0, %v3438_v3  ;;  %3342 = vmatmul.msk.bf16.vlgmr.msra.gmra.mxu3 %vm923_vm0, %v3470_v4  ;;  %v3409_v14 = vld [vmem:[%s5340_s0 + $0x118] sm:$0xff]  ;;  %v3378_v17 = vld [vmem:[%s5340_s0 + $0x20] sm:$0xff]  ;;  %v3411_v22 = vld [vmem:[%s5340_s0 + $0x128] sm:$0xff] }
   0x7   :  { %v3441_v15 = vld [vmem:[%s5340_s0 + $0x218] sm:$0xff]  ;;  %v3410_v18 = vld [vmem:[%s5340_s0 + $0x120] sm:$0xff]  ;;  %v3443_v23 = vld [vmem:[%s5340_s0 + $0x228] sm:$0xff] }
   0x8   :  { %v3473_v16 = vld [vmem:[%s5340_s0 + $0x318] sm:$0xff]  ;;  %v3442_v19 = vld [vmem:[%s5340_s0 + $0x220] sm:$0xff]  ;;  %v3475_v24 = vld [vmem:[%s5340_s0 + $0x328] sm:$0xff] }
   0x9   :  { %v3474_v20 = vld [vmem:[%s5340_s0 + $0x320] sm:$0xff]  ;;  %v3380_v25 = vld [vmem:[%s5340_s0 + $0x30] sm:$0xff]  ;;  %v3381_v29 = vld [vmem:[%s5340_s0 + $0x38] sm:$0xff] }
   0xa   :  { %v3412_v26 = vld [vmem:[%s5340_s0 + $0x130] sm:$0xff]  ;;  %v3413_v30 = vld [vmem:[%s5340_s0 + $0x138] sm:$0xff]  ;;  %v3663_v33 = vld [vmem:[%s5341_s2] ss:$0 sm:$0xff] }
   0xb   :  { %v3444_v27 = vld [vmem:[%s5340_s0 + $0x230] sm:$0xff]  ;;  %v3445_v31 = vld [vmem:[%s5340_s0 + $0x238] sm:$0xff]  ;;  %v3382_v34 = vld [vmem:[%s5340_s0 + $0x40] sm:$0xff] }
   0xc   :  { %v3476_v28 = vld [vmem:[%s5340_s0 + $0x330] sm:$0xff]  ;;  %v3477_v32 = vld [vmem:[%s5340_s0 + $0x338] sm:$0xff]  ;;  %v3414_v35 = vld [vmem:[%s5340_s0 + $0x140] sm:$0xff] }
   0xd   :  { %v3446_v38 = vld [vmem:[%s5340_s0 + $0x240] sm:$0xff]  ;;  %v3383_v0 = vld [vmem:[%s5340_s0 + $0x48] sm:$0xff] }
   0xe   :  { %v3478_v39 = vld [vmem:[%s5340_s0 + $0x340] sm:$0xff]  ;;  %v3415_v1 = vld [vmem:[%s5340_s0 + $0x148] sm:$0xff] }
  0x15   :  { %3247 = vmatmul.msk.bf16.gmra.mxu0 %vm923_vm0, %v3375_v5  ;;  %3279 = vmatmul.msk.bf16.gmra.mxu1 %vm923_vm0, %v3407_v6  ;;  %v3447_v6 = vld [vmem:[%s5340_s0 + $0x248] sm:$0xff] }
  0x16   :  { %3311 = vmatmul.msk.bf16.gmra.mxu2 %vm923_vm0, %v3439_v7  ;;  %3343 = vmatmul.msk.bf16.gmra.mxu3 %vm923_vm0, %v3471_v8  ;;  %v3479_v7 = vld [vmem:[%s5340_s0 + $0x348] sm:$0xff] }
  0x25   :  { %3248 = vmatmul.msk.bf16.gmra.mxu0 %vm923_vm0, %v3376_v9  ;;  %3280 = vmatmul.msk.bf16.gmra.mxu1 %vm923_vm0, %v3408_v10 }
  0x26   :  { %3312 = vmatmul.msk.bf16.gmra.mxu2 %vm923_vm0, %v3440_v11  ;;  %3344 = vmatmul.msk.bf16.gmra.mxu3 %vm923_vm0, %v3472_v12 }
  0x35   :  { %3249 = vmatmul.msk.bf16.gmra.mxu0 %vm923_vm0, %v3377_v13  ;;  %3281 = vmatmul.msk.bf16.gmra.mxu1 %vm923_vm0, %v3409_v14 }
  0x36   :  { %3313 = vmatmul.msk.bf16.gmra.mxu2 %vm923_vm0, %v3441_v15  ;;  %3345 = vmatmul.msk.bf16.gmra.mxu3 %vm923_vm0, %v3473_v16 }
  0x45   :  { %3250 = vmatmul.msk.bf16.gmra.mxu0 %vm923_vm0, %v3378_v17  ;;  %3282 = vmatmul.msk.bf16.gmra.mxu1 %vm923_vm0, %v3410_v18 }
  0x46   :  { %3314 = vmatmul.msk.bf16.gmra.mxu2 %vm923_vm0, %v3442_v19  ;;  %3346 = vmatmul.msk.bf16.gmra.mxu3 %vm923_vm0, %v3474_v20 }
  0x55   :  { %3251 = vmatmul.msk.bf16.gmra.mxu0 %vm923_vm0, %v3379_v21  ;;  %3283 = vmatmul.msk.bf16.gmra.mxu1 %vm923_vm0, %v3411_v22 }
  0x56   :  { %3315 = vmatmul.msk.bf16.gmra.mxu2 %vm923_vm0, %v3443_v23  ;;  %3347 = vmatmul.msk.bf16.gmra.mxu3 %vm923_vm0, %v3475_v24 }
  0x65   :  { %3252 = vmatmul.msk.bf16.gmra.mxu0 %vm923_vm0, %v3380_v25  ;;  %3284 = vmatmul.msk.bf16.gmra.mxu1 %vm923_vm0, %v3412_v26 }
  0x66   :  { %3316 = vmatmul.msk.bf16.gmra.mxu2 %vm923_vm0, %v3444_v27  ;;  %3348 = vmatmul.msk.bf16.gmra.mxu3 %vm923_vm0, %v3476_v28 }
  0x75   :  { %3253 = vmatmul.msk.bf16.gmra.mxu0 %vm923_vm0, %v3381_v29  ;;  %3285 = vmatmul.msk.bf16.gmra.mxu1 %vm923_vm0, %v3413_v30 }
  0x76   :  { %3317 = vmatmul.msk.bf16.gmra.mxu2 %vm923_vm0, %v3445_v31  ;;  %3349 = vmatmul.msk.bf16.gmra.mxu3 %vm923_vm0, %v3477_v32 }
  0x82   :  { %v1317_v36 = vpop.f32.mrf.mxu0  ;;  %v1477_v37 = vpop.f32.mrf.mxu1 }
  0x83   :  { %v1318_v40 = vadd.f32 %v3663_v33, %v1317_v36  ;;  %v1478_v41 = vadd.f32 %v3663_v33, %v1477_v37  ;;  %v3384_v37 = vld [vmem:[%s5340_s0 + $0x50] sm:$0xff] }
  0x85   :  { %v1957_v42 = vmax.f32 %v1318_v40, 0.0  ;;  %v2021_v43 = vmax.f32 %v1478_v41, 0.0  ;;  %3254 = vmatmul.msk.bf16.gmra.mxu0 %vm923_vm0, %v3382_v34  ;;  %3286 = vmatmul.msk.bf16.gmra.mxu1 %vm923_vm0, %v3414_v35 }
  0x86   :  { %3318 = vmatmul.msk.bf16.gmra.mxu2 %vm923_vm0, %v3446_v38  ;;  %3350 = vmatmul.msk.bf16.gmra.mxu3 %vm923_vm0, %v3478_v39  ;;  %v3416_v38 = vld [vmem:[%s5340_s0 + $0x150] sm:$0xff] }
  0x87   :  { %v2213_v44 = vpack.c.bf16 %v1957_v42, %v1957_v42  ;;  %v2277_v45 = vpack.c.bf16 %v2021_v43, %v2021_v43  ;;  %v3448_v43 = vld [vmem:[%s5340_s0 + $0x250] sm:$0xff] }
  0x89   :  { %2470 = vst.msk [vmem:[%s5342_s3] sm:$0xf] %vm2469_vm1, %v2213_v44  ;;  %v1637_v46 = vpop.f32.mrf.mxu2  ;;  %v1797_v47 = vpop.f32.mrf.mxu3  ;;  %v3480_v44 = vld [vmem:[%s5340_s0 + $0x350] sm:$0xff] }
  0x8a   :  { %2534 = vst.msk [vmem:[%s5342_s3 + $0x100] sm:$0xf] %vm2469_vm1, %v2277_v45  ;;  %v1638_v48 = vadd.f32 %v3663_v33, %v1637_v46  ;;  %v1798_v49 = vadd.f32 %v3663_v33, %v1797_v47  ;;  %v1319_v50 = vpop.f32.mrf.mxu0  ;;  %v1479_v51 = vpop.f32.mrf.mxu1 }
  0x8b   :  { %v1320_v52 = vadd.f32 %v3663_v33, %v1319_v50  ;;  %v1480_v53 = vadd.f32 %v3663_v33, %v1479_v51 }
  0x8c   :  { %v2085_v54 = vmax.f32 %v1638_v48, 0.0  ;;  %v2149_v55 = vmax.f32 %v1798_v49, 0.0 }
  0x8d   :  { %v1958_v56 = vmax.f32 %v1320_v52, 0.0  ;;  %v2022_v57 = vmax.f32 %v1480_v53, 0.0 }
  0x8e   :  { %v2341_v58 = vpack.c.bf16 %v2085_v54, %v2085_v54  ;;  %v2405_v59 = vpack.c.bf16 %v2149_v55, %v2149_v55 }
  0x8f   :  { %v2214_v60 = vpack.c.bf16 %v1958_v56, %v1958_v56  ;;  %v2278_v61 = vpack.c.bf16 %v2022_v57, %v2022_v57 }
  0x90   :  { %2598 = vst.msk [vmem:[%s5342_s3 + $0x200] sm:$0xf] %vm2469_vm1, %v2341_v58 }
  0x91   :  { %2662 = vst.msk [vmem:[%s5342_s3 + $0x300] sm:$0xf] %vm2469_vm1, %v2405_v59  ;;  %v1639_v62 = vpop.f32.mrf.mxu2  ;;  %v1799_v63 = vpop.f32.mrf.mxu3 }
  0x92   :  { %2471 = vst.msk [vmem:[%s5342_s3 + $0x4] sm:$0xf] %vm2469_vm1, %v2214_v60  ;;  %v1640_v2 = vadd.f32 %v3663_v33, %v1639_v62  ;;  %v1800_v3 = vadd.f32 %v3663_v33, %v1799_v63  ;;  %v1322_v4 = vpop.f32.mrf.mxu0  ;;  %v1482_v5 = vpop.f32.mrf.mxu1 }
  0x93   :  { %2535 = vst.msk [vmem:[%s5342_s3 + $0x104] sm:$0xf] %vm2469_vm1, %v2278_v61  ;;  %v1323_v8 = vadd.f32 %v3663_v33, %v1322_v4  ;;  %v1483_v9 = vadd.f32 %v3663_v33, %v1482_v5 }
  0x94   :  { %v2086_v10 = vmax.f32 %v1640_v2, 0.0  ;;  %v2150_v11 = vmax.f32 %v1800_v3, 0.0 }
  0x95   :  { %v1959_v12 = vmax.f32 %v1323_v8, 0.0  ;;  %v2023_v13 = vmax.f32 %v1483_v9, 0.0  ;;  %3255 = vmatmul.msk.bf16.gmra.mxu0 %vm923_vm0, %v3383_v0  ;;  %3287 = vmatmul.msk.bf16.gmra.mxu1 %vm923_vm0, %v3415_v1  ;;  %v3385_v9 = vld [vmem:[%s5340_s0 + $0x58] sm:$0xff] }
  0x96   :  { %v2342_v14 = vpack.c.bf16 %v2086_v10, %v2086_v10  ;;  %v2406_v15 = vpack.c.bf16 %v2150_v11, %v2150_v11  ;;  %3319 = vmatmul.msk.bf16.gmra.mxu2 %vm923_vm0, %v3447_v6  ;;  %3351 = vmatmul.msk.bf16.gmra.mxu3 %vm923_vm0, %v3479_v7  ;;  %v3417_v10 = vld [vmem:[%s5340_s0 + $0x158] sm:$0xff] }
  0x97   :  { %v2215_v16 = vpack.c.bf16 %v1959_v12, %v1959_v12  ;;  %v2279_v17 = vpack.c.bf16 %v2023_v13, %v2023_v13 }
  0x98   :  { %2599 = vst.msk [vmem:[%s5342_s3 + $0x204] sm:$0xf] %vm2469_vm1, %v2342_v14 }
  0x99   :  { %2663 = vst.msk [vmem:[%s5342_s3 + $0x304] sm:$0xf] %vm2469_vm1, %v2406_v15  ;;  %v1642_v18 = vpop.f32.mrf.mxu2  ;;  %v1802_v19 = vpop.f32.mrf.mxu3  ;;  %v3449_v15 = vld [vmem:[%s5340_s0 + $0x258] sm:$0xff] }
  0x9a   :  { %2472 = vst.msk [vmem:[%s5342_s3 + $0x8] sm:$0xf] %vm2469_vm1, %v2215_v16  ;;  %v1643_v20 = vadd.f32 %v3663_v33, %v1642_v18  ;;  %v1803_v21 = vadd.f32 %v3663_v33, %v1802_v19  ;;  %v1324_v22 = vpop.f32.mrf.mxu0  ;;  %v1484_v23 = vpop.f32.mrf.mxu1  ;;  %v3481_v16 = vld [vmem:[%s5340_s0 + $0x358] sm:$0xff] }
  0x9b   :  { %2536 = vst.msk [vmem:[%s5342_s3 + $0x108] sm:$0xf] %vm2469_vm1, %v2279_v17  ;;  %v1325_v24 = vadd.f32 %v3663_v33, %v1324_v22  ;;  %v1485_v25 = vadd.f32 %v3663_v33, %v1484_v23 }
  0x9c   :  { %v2087_v26 = vmax.f32 %v1643_v20, 0.0  ;;  %v2151_v27 = vmax.f32 %v1803_v21, 0.0 }
  0x9d   :  { %v1960_v28 = vmax.f32 %v1325_v24, 0.0  ;;  %v2024_v29 = vmax.f32 %v1485_v25, 0.0 }
  0x9e   :  { %v2343_v30 = vpack.c.bf16 %v2087_v26, %v2087_v26  ;;  %v2407_v31 = vpack.c.bf16 %v2151_v27, %v2151_v27 }
  0x9f   :  { %v2216_v32 = vpack.c.bf16 %v1960_v28, %v1960_v28  ;;  %v2280_v34 = vpack.c.bf16 %v2024_v29, %v2024_v29 }
  0xa0   :  { %2600 = vst.msk [vmem:[%s5342_s3 + $0x208] sm:$0xf] %vm2469_vm1, %v2343_v30 }
  0xa1   :  { %2664 = vst.msk [vmem:[%s5342_s3 + $0x308] sm:$0xf] %vm2469_vm1, %v2407_v31  ;;  %v1644_v35 = vpop.f32.mrf.mxu2  ;;  %v1804_v36 = vpop.f32.mrf.mxu3 }
  0xa2   :  { %2473 = vst.msk [vmem:[%s5342_s3 + $0xc] sm:$0xf] %vm2469_vm1, %v2216_v32  ;;  %v1645_v39 = vadd.f32 %v3663_v33, %v1644_v35  ;;  %v1805_v40 = vadd.f32 %v3663_v33, %v1804_v36  ;;  %v1327_v41 = vpop.f32.mrf.mxu0  ;;  %v1487_v42 = vpop.f32.mrf.mxu1 }
  0xa3   :  { %2537 = vst.msk [vmem:[%s5342_s3 + $0x10c] sm:$0xf] %vm2469_vm1, %v2280_v34  ;;  %v1328_v45 = vadd.f32 %v3663_v33, %v1327_v41  ;;  %v1488_v46 = vadd.f32 %v3663_v33, %v1487_v42 }
  0xa4   :  { %v2088_v47 = vmax.f32 %v1645_v39, 0.0  ;;  %v2152_v48 = vmax.f32 %v1805_v40, 0.0 }
  0xa5   :  { %v1961_v49 = vmax.f32 %v1328_v45, 0.0  ;;  %v2025_v50 = vmax.f32 %v1488_v46, 0.0  ;;  %3256 = vmatmul.msk.bf16.gmra.mxu0 %vm923_vm0, %v3384_v37  ;;  %3288 = vmatmul.msk.bf16.gmra.mxu1 %vm923_vm0, %v3416_v38  ;;  %v3386_v46 = vld [vmem:[%s5340_s0 + $0x60] sm:$0xff] }
  0xa6   :  { %v2344_v51 = vpack.c.bf16 %v2088_v47, %v2088_v47  ;;  %v2408_v52 = vpack.c.bf16 %v2152_v48, %v2152_v48  ;;  %3320 = vmatmul.msk.bf16.gmra.mxu2 %vm923_vm0, %v3448_v43  ;;  %3352 = vmatmul.msk.bf16.gmra.mxu3 %vm923_vm0, %v3480_v44  ;;  %v3418_v47 = vld [vmem:[%s5340_s0 + $0x160] sm:$0xff] }
  0xa7   :  { %v2217_v53 = vpack.c.bf16 %v1961_v49, %v1961_v49  ;;  %v2281_v54 = vpack.c.bf16 %v2025_v50, %v2025_v50 }
  0xa8   :  { %2601 = vst.msk [vmem:[%s5342_s3 + $0x20c] sm:$0xf] %vm2469_vm1, %v2344_v51 }
  0xa9   :  { %2665 = vst.msk [vmem:[%s5342_s3 + $0x30c] sm:$0xf] %vm2469_vm1, %v2408_v52  ;;  %v1647_v55 = vpop.f32.mrf.mxu2  ;;  %v1807_v56 = vpop.f32.mrf.mxu3  ;;  %v3450_v52 = vld [vmem:[%s5340_s0 + $0x260] sm:$0xff] }
  0xaa   :  { %2474 = vst.msk [vmem:[%s5342_s3 + $0x10] sm:$0xf] %vm2469_vm1, %v2217_v53  ;;  %v1648_v57 = vadd.f32 %v3663_v33, %v1647_v55  ;;  %v1808_v58 = vadd.f32 %v3663_v33, %v1807_v56  ;;  %v1329_v59 = vpop.f32.mrf.mxu0  ;;  %v1489_v60 = vpop.f32.mrf.mxu1  ;;  %v3482_v53 = vld [vmem:[%s5340_s0 + $0x360] sm:$0xff] }
  0xab   :  { %2538 = vst.msk [vmem:[%s5342_s3 + $0x110] sm:$0xf] %vm2469_vm1, %v2281_v54  ;;  %v1330_v61 = vadd.f32 %v3663_v33, %v1329_v59  ;;  %v1490_v62 = vadd.f32 %v3663_v33, %v1489_v60 }
  0xac   :  { %v2089_v63 = vmax.f32 %v1648_v57, 0.0  ;;  %v2153_v0 = vmax.f32 %v1808_v58, 0.0 }
  0xad   :  { %v1962_v1 = vmax.f32 %v1330_v61, 0.0  ;;  %v2026_v2 = vmax.f32 %v1490_v62, 0.0 }
  0xae   :  { %v2345_v3 = vpack.c.bf16 %v2089_v63, %v2089_v63  ;;  %v2409_v4 = vpack.c.bf16 %v2153_v0, %v2153_v0 }
  0xaf   :  { %v2218_v5 = vpack.c.bf16 %v1962_v1, %v1962_v1  ;;  %v2282_v6 = vpack.c.bf16 %v2026_v2, %v2026_v2 }
  0xb0   :  { %2602 = vst.msk [vmem:[%s5342_s3 + $0x210] sm:$0xf] %vm2469_vm1, %v2345_v3 }
  0xb1   :  { %2666 = vst.msk [vmem:[%s5342_s3 + $0x310] sm:$0xf] %vm2469_vm1, %v2409_v4  ;;  %v1649_v7 = vpop.f32.mrf.mxu2  ;;  %v1809_v8 = vpop.f32.mrf.mxu3 }
  0xb2   :  { %2475 = vst.msk [vmem:[%s5342_s3 + $0x14] sm:$0xf] %vm2469_vm1, %v2218_v5  ;;  %v1650_v11 = vadd.f32 %v3663_v33, %v1649_v7  ;;  %v1810_v12 = vadd.f32 %v3663_v33, %v1809_v8  ;;  %v1332_v13 = vpop.f32.mrf.mxu0  ;;  %v1492_v14 = vpop.f32.mrf.mxu1 }
  0xb3   :  { %2539 = vst.msk [vmem:[%s5342_s3 + $0x114] sm:$0xf] %vm2469_vm1, %v2282_v6  ;;  %v1333_v17 = vadd.f32 %v3663_v33, %v1332_v13  ;;  %v1493_v18 = vadd.f32 %v3663_v33, %v1492_v14 }
  0xb4   :  { %v2090_v19 = vmax.f32 %v1650_v11, 0.0  ;;  %v2154_v20 = vmax.f32 %v1810_v12, 0.0 }
  0xb5   :  { %v1963_v21 = vmax.f32 %v1333_v17, 0.0  ;;  %v2027_v22 = vmax.f32 %v1493_v18, 0.0  ;;  %3257 = vmatmul.msk.bf16.gmra.mxu0 %vm923_vm0, %v3385_v9  ;;  %3289 = vmatmul.msk.bf16.gmra.mxu1 %vm923_vm0, %v3417_v10  ;;  %v3387_v18 = vld [vmem:[%s5340_s0 + $0x68] sm:$0xff] }
  0xb6   :  { %v2346_v23 = vpack.c.bf16 %v2090_v19, %v2090_v19  ;;  %v2410_v24 = vpack.c.bf16 %v2154_v20, %v2154_v20  ;;  %3321 = vmatmul.msk.bf16.gmra.mxu2 %vm923_vm0, %v3449_v15  ;;  %3353 = vmatmul.msk.bf16.gmra.mxu3 %vm923_vm0, %v3481_v16  ;;  %v3419_v19 = vld [vmem:[%s5340_s0 + $0x168] sm:$0xff] }
  0xb7   :  { %v2219_v25 = vpack.c.bf16 %v1963_v21, %v1963_v21  ;;  %v2283_v26 = vpack.c.bf16 %v2027_v22, %v2027_v22 }
  0xb8   :  { %2603 = vst.msk [vmem:[%s5342_s3 + $0x214] sm:$0xf] %vm2469_vm1, %v2346_v23 }
  0xb9   :  { %2667 = vst.msk [vmem:[%s5342_s3 + $0x314] sm:$0xf] %vm2469_vm1, %v2410_v24  ;;  %v1652_v27 = vpop.f32.mrf.mxu2  ;;  %v1812_v28 = vpop.f32.mrf.mxu3  ;;  %v3451_v24 = vld [vmem:[%s5340_s0 + $0x268] sm:$0xff] }
  0xba   :  { %2476 = vst.msk [vmem:[%s5342_s3 + $0x18] sm:$0xf] %vm2469_vm1, %v2219_v25  ;;  %v1653_v29 = vadd.f32 %v3663_v33, %v1652_v27  ;;  %v1813_v30 = vadd.f32 %v3663_v33, %v1812_v28  ;;  %v1334_v31 = vpop.f32.mrf.mxu0  ;;  %v1494_v32 = vpop.f32.mrf.mxu1  ;;  %v3483_v25 = vld [vmem:[%s5340_s0 + $0x368] sm:$0xff] }
  0xbb   :  { %2540 = vst.msk [vmem:[%s5342_s3 + $0x118] sm:$0xf] %vm2469_vm1, %v2283_v26  ;;  %v1335_v34 = vadd.f32 %v3663_v33, %v1334_v31  ;;  %v1495_v35 = vadd.f32 %v3663_v33, %v1494_v32 }
  0xbc   :  { %v2091_v36 = vmax.f32 %v1653_v29, 0.0  ;;  %v2155_v37 = vmax.f32 %v1813_v30, 0.0 }
  0xbd   :  { %v1964_v38 = vmax.f32 %v1335_v34, 0.0  ;;  %v2028_v39 = vmax.f32 %v1495_v35, 0.0 }
  0xbe   :  { %v2347_v40 = vpack.c.bf16 %v2091_v36, %v2091_v36  ;;  %v2411_v41 = vpack.c.bf16 %v2155_v37, %v2155_v37 }
  0xbf   :  { %v2220_v42 = vpack.c.bf16 %v1964_v38, %v1964_v38  ;;  %v2284_v43 = vpack.c.bf16 %v2028_v39, %v2028_v39 }
  0xc0   :  { %2604 = vst.msk [vmem:[%s5342_s3 + $0x218] sm:$0xf] %vm2469_vm1, %v2347_v40 }
  0xc1   :  { %2668 = vst.msk [vmem:[%s5342_s3 + $0x318] sm:$0xf] %vm2469_vm1, %v2411_v41  ;;  %v1654_v44 = vpop.f32.mrf.mxu2  ;;  %v1814_v45 = vpop.f32.mrf.mxu3 }
  0xc2   :  { %2477 = vst.msk [vmem:[%s5342_s3 + $0x1c] sm:$0xf] %vm2469_vm1, %v2220_v42  ;;  %v1655_v48 = vadd.f32 %v3663_v33, %v1654_v44  ;;  %v1815_v49 = vadd.f32 %v3663_v33, %v1814_v45  ;;  %v1337_v50 = vpop.f32.mrf.mxu0  ;;  %v1497_v51 = vpop.f32.mrf.mxu1 }
  0xc3   :  { %2541 = vst.msk [vmem:[%s5342_s3 + $0x11c] sm:$0xf] %vm2469_vm1, %v2284_v43  ;;  %v1338_v54 = vadd.f32 %v3663_v33, %v1337_v50  ;;  %v1498_v55 = vadd.f32 %v3663_v33, %v1497_v51 }
  0xc4   :  { %v2092_v56 = vmax.f32 %v1655_v48, 0.0  ;;  %v2156_v57 = vmax.f32 %v1815_v49, 0.0 }
  0xc5   :  { %v1965_v58 = vmax.f32 %v1338_v54, 0.0  ;;  %v2029_v59 = vmax.f32 %v1498_v55, 0.0  ;;  %3258 = vmatmul.msk.bf16.gmra.mxu0 %vm923_vm0, %v3386_v46  ;;  %3290 = vmatmul.msk.bf16.gmra.mxu1 %vm923_vm0, %v3418_v47  ;;  %v3388_v55 = vld [vmem:[%s5340_s0 + $0x70] sm:$0xff] }
  0xc6   :  { %v2348_v60 = vpack.c.bf16 %v2092_v56, %v2092_v56  ;;  %v2412_v61 = vpack.c.bf16 %v2156_v57, %v2156_v57  ;;  %3322 = vmatmul.msk.bf16.gmra.mxu2 %vm923_vm0, %v3450_v52  ;;  %3354 = vmatmul.msk.bf16.gmra.mxu3 %vm923_vm0, %v3482_v53  ;;  %v3420_v56 = vld [vmem:[%s5340_s0 + $0x170] sm:$0xff] }
  0xc7   :  { %v2221_v62 = vpack.c.bf16 %v1965_v58, %v1965_v58  ;;  %v2285_v63 = vpack.c.bf16 %v2029_v59, %v2029_v59 }
  0xc8   :  { %2605 = vst.msk [vmem:[%s5342_s3 + $0x21c] sm:$0xf] %vm2469_vm1, %v2348_v60 }
  0xc9   :  { %2669 = vst.msk [vmem:[%s5342_s3 + $0x31c] sm:$0xf] %vm2469_vm1, %v2412_v61  ;;  %v1657_v0 = vpop.f32.mrf.mxu2  ;;  %v1817_v1 = vpop.f32.mrf.mxu3  ;;  %v3452_v61 = vld [vmem:[%s5340_s0 + $0x270] sm:$0xff] }
  0xca   :  { %2478 = vst.msk [vmem:[%s5342_s3 + $0x20] sm:$0xf] %vm2469_vm1, %v2221_v62  ;;  %v1658_v2 = vadd.f32 %v3663_v33, %v1657_v0  ;;  %v1818_v3 = vadd.f32 %v3663_v33, %v1817_v1  ;;  %v1339_v4 = vpop.f32.mrf.mxu0  ;;  %v1499_v5 = vpop.f32.mrf.mxu1  ;;  %v3484_v62 = vld [vmem:[%s5340_s0 + $0x370] sm:$0xff] }
  0xcb   :  { %2542 = vst.msk [vmem:[%s5342_s3 + $0x120] sm:$0xf] %vm2469_vm1, %v2285_v63  ;;  %v1340_v6 = vadd.f32 %v3663_v33, %v1339_v4  ;;  %v1500_v7 = vadd.f32 %v3663_v33, %v1499_v5 }
  0xcc   :  { %v2093_v8 = vmax.f32 %v1658_v2, 0.0  ;;  %v2157_v9 = vmax.f32 %v1818_v3, 0.0 }
  0xcd   :  { %v1966_v10 = vmax.f32 %v1340_v6, 0.0  ;;  %v2030_v11 = vmax.f32 %v1500_v7, 0.0 }
  0xce   :  { %v2349_v12 = vpack.c.bf16 %v2093_v8, %v2093_v8  ;;  %v2413_v13 = vpack.c.bf16 %v2157_v9, %v2157_v9 }
  0xcf   :  { %v2222_v14 = vpack.c.bf16 %v1966_v10, %v1966_v10  ;;  %v2286_v15 = vpack.c.bf16 %v2030_v11, %v2030_v11 }
  0xd0   :  { %2606 = vst.msk [vmem:[%s5342_s3 + $0x220] sm:$0xf] %vm2469_vm1, %v2349_v12 }
  0xd1   :  { %2670 = vst.msk [vmem:[%s5342_s3 + $0x320] sm:$0xf] %vm2469_vm1, %v2413_v13  ;;  %v1659_v16 = vpop.f32.mrf.mxu2  ;;  %v1819_v17 = vpop.f32.mrf.mxu3 }
  0xd2   :  { %2479 = vst.msk [vmem:[%s5342_s3 + $0x24] sm:$0xf] %vm2469_vm1, %v2222_v14  ;;  %v1660_v20 = vadd.f32 %v3663_v33, %v1659_v16  ;;  %v1820_v21 = vadd.f32 %v3663_v33, %v1819_v17  ;;  %v1342_v22 = vpop.f32.mrf.mxu0  ;;  %v1502_v23 = vpop.f32.mrf.mxu1 }
  0xd3   :  { %2543 = vst.msk [vmem:[%s5342_s3 + $0x124] sm:$0xf] %vm2469_vm1, %v2286_v15  ;;  %v1343_v26 = vadd.f32 %v3663_v33, %v1342_v22  ;;  %v1503_v27 = vadd.f32 %v3663_v33, %v1502_v23 }
  0xd4   :  { %v2094_v28 = vmax.f32 %v1660_v20, 0.0  ;;  %v2158_v29 = vmax.f32 %v1820_v21, 0.0 }
  0xd5   :  { %v1967_v30 = vmax.f32 %v1343_v26, 0.0  ;;  %v2031_v31 = vmax.f32 %v1503_v27, 0.0  ;;  %3259 = vmatmul.msk.bf16.gmra.mxu0 %vm923_vm0, %v3387_v18  ;;  %3291 = vmatmul.msk.bf16.gmra.mxu1 %vm923_vm0, %v3419_v19  ;;  %v3389_v27 = vld [vmem:[%s5340_s0 + $0x78] sm:$0xff] }
  0xd6   :  { %v2350_v32 = vpack.c.bf16 %v2094_v28, %v2094_v28  ;;  %v2414_v34 = vpack.c.bf16 %v2158_v29, %v2158_v29  ;;  %3323 = vmatmul.msk.bf16.gmra.mxu2 %vm923_vm0, %v3451_v24  ;;  %3355 = vmatmul.msk.bf16.gmra.mxu3 %vm923_vm0, %v3483_v25  ;;  %v3421_v28 = vld [vmem:[%s5340_s0 + $0x178] sm:$0xff] }
  0xd7   :  { %v2223_v35 = vpack.c.bf16 %v1967_v30, %v1967_v30  ;;  %v2287_v36 = vpack.c.bf16 %v2031_v31, %v2031_v31 }
  0xd8   :  { %2607 = vst.msk [vmem:[%s5342_s3 + $0x224] sm:$0xf] %vm2469_vm1, %v2350_v32 }
  0xd9   :  { %2671 = vst.msk [vmem:[%s5342_s3 + $0x324] sm:$0xf] %vm2469_vm1, %v2414_v34  ;;  %v1662_v37 = vpop.f32.mrf.mxu2  ;;  %v1822_v38 = vpop.f32.mrf.mxu3  ;;  %v3453_v34 = vld [vmem:[%s5340_s0 + $0x278] sm:$0xff] }
  0xda   :  { %2480 = vst.msk [vmem:[%s5342_s3 + $0x28] sm:$0xf] %vm2469_vm1, %v2223_v35  ;;  %v1663_v39 = vadd.f32 %v3663_v33, %v1662_v37  ;;  %v1823_v40 = vadd.f32 %v3663_v33, %v1822_v38  ;;  %v1344_v41 = vpop.f32.mrf.mxu0  ;;  %v1504_v42 = vpop.f32.mrf.mxu1  ;;  %v3485_v35 = vld [vmem:[%s5340_s0 + $0x378] sm:$0xff] }
  0xdb   :  { %2544 = vst.msk [vmem:[%s5342_s3 + $0x128] sm:$0xf] %vm2469_vm1, %v2287_v36  ;;  %v1345_v43 = vadd.f32 %v3663_v33, %v1344_v41  ;;  %v1505_v44 = vadd.f32 %v3663_v33, %v1504_v42 }
  0xdc   :  { %v2095_v45 = vmax.f32 %v1663_v39, 0.0  ;;  %v2159_v46 = vmax.f32 %v1823_v40, 0.0 }
  0xdd   :  { %v1968_v47 = vmax.f32 %v1345_v43, 0.0  ;;  %v2032_v48 = vmax.f32 %v1505_v44, 0.0 }
  0xde   :  { %v2351_v49 = vpack.c.bf16 %v2095_v45, %v2095_v45  ;;  %v2415_v50 = vpack.c.bf16 %v2159_v46, %v2159_v46 }
  0xdf   :  { %v2224_v51 = vpack.c.bf16 %v1968_v47, %v1968_v47  ;;  %v2288_v52 = vpack.c.bf16 %v2032_v48, %v2032_v48 }
  0xe0   :  { %2608 = vst.msk [vmem:[%s5342_s3 + $0x228] sm:$0xf] %vm2469_vm1, %v2351_v49 }
  0xe1   :  { %2672 = vst.msk [vmem:[%s5342_s3 + $0x328] sm:$0xf] %vm2469_vm1, %v2415_v50  ;;  %v1664_v53 = vpop.f32.mrf.mxu2  ;;  %v1824_v54 = vpop.f32.mrf.mxu3 }
  0xe2   :  { %2481 = vst.msk [vmem:[%s5342_s3 + $0x2c] sm:$0xf] %vm2469_vm1, %v2224_v51  ;;  %v1665_v57 = vadd.f32 %v3663_v33, %v1664_v53  ;;  %v1825_v58 = vadd.f32 %v3663_v33, %v1824_v54  ;;  %v1347_v59 = vpop.f32.mrf.mxu0  ;;  %v1507_v60 = vpop.f32.mrf.mxu1 }
  0xe3   :  { %2545 = vst.msk [vmem:[%s5342_s3 + $0x12c] sm:$0xf] %vm2469_vm1, %v2288_v52  ;;  %v1348_v63 = vadd.f32 %v3663_v33, %v1347_v59  ;;  %v1508_v0 = vadd.f32 %v3663_v33, %v1507_v60 }
  0xe4   :  { %v2096_v1 = vmax.f32 %v1665_v57, 0.0  ;;  %v2160_v2 = vmax.f32 %v1825_v58, 0.0 }
  0xe5   :  { %v1969_v3 = vmax.f32 %v1348_v63, 0.0  ;;  %v2033_v4 = vmax.f32 %v1508_v0, 0.0  ;;  %3260 = vmatmul.msk.bf16.gmra.mxu0 %vm923_vm0, %v3388_v55  ;;  %3292 = vmatmul.msk.bf16.gmra.mxu1 %vm923_vm0, %v3420_v56  ;;  %v3390_v0 = vld [vmem:[%s5340_s0 + $0x80] sm:$0xff] }
  0xe6   :  { %v2352_v5 = vpack.c.bf16 %v2096_v1, %v2096_v1  ;;  %v2416_v6 = vpack.c.bf16 %v2160_v2, %v2160_v2  ;;  %3324 = vmatmul.msk.bf16.gmra.mxu2 %vm923_vm0, %v3452_v61  ;;  %3356 = vmatmul.msk.bf16.gmra.mxu3 %vm923_vm0, %v3484_v62  ;;  %v3422_v1 = vld [vmem:[%s5340_s0 + $0x180] sm:$0xff] }
  0xe7   :  { %v2225_v7 = vpack.c.bf16 %v1969_v3, %v1969_v3  ;;  %v2289_v8 = vpack.c.bf16 %v2033_v4, %v2033_v4 }
  0xe8   :  { %2609 = vst.msk [vmem:[%s5342_s3 + $0x22c] sm:$0xf] %vm2469_vm1, %v2352_v5 }
  0xe9   :  { %2673 = vst.msk [vmem:[%s5342_s3 + $0x32c] sm:$0xf] %vm2469_vm1, %v2416_v6  ;;  %v1667_v9 = vpop.f32.mrf.mxu2  ;;  %v1827_v10 = vpop.f32.mrf.mxu3  ;;  %v3454_v6 = vld [vmem:[%s5340_s0 + $0x280] sm:$0xff] }
  0xea   :  { %2482 = vst.msk [vmem:[%s5342_s3 + $0x30] sm:$0xf] %vm2469_vm1, %v2225_v7  ;;  %v1668_v11 = vadd.f32 %v3663_v33, %v1667_v9  ;;  %v1828_v12 = vadd.f32 %v3663_v33, %v1827_v10  ;;  %v1349_v13 = vpop.f32.mrf.mxu0  ;;  %v1509_v14 = vpop.f32.mrf.mxu1  ;;  %v3486_v7 = vld [vmem:[%s5340_s0 + $0x380] sm:$0xff] }
  0xeb   :  { %2546 = vst.msk [vmem:[%s5342_s3 + $0x130] sm:$0xf] %vm2469_vm1, %v2289_v8  ;;  %v1350_v15 = vadd.f32 %v3663_v33, %v1349_v13  ;;  %v1510_v16 = vadd.f32 %v3663_v33, %v1509_v14 }
  0xec   :  { %v2097_v17 = vmax.f32 %v1668_v11, 0.0  ;;  %v2161_v18 = vmax.f32 %v1828_v12, 0.0 }
  0xed   :  { %v1970_v19 = vmax.f32 %v1350_v15, 0.0  ;;  %v2034_v20 = vmax.f32 %v1510_v16, 0.0 }
  0xee   :  { %v2353_v21 = vpack.c.bf16 %v2097_v17, %v2097_v17  ;;  %v2417_v22 = vpack.c.bf16 %v2161_v18, %v2161_v18 }
  0xef   :  { %v2226_v23 = vpack.c.bf16 %v1970_v19, %v1970_v19  ;;  %v2290_v24 = vpack.c.bf16 %v2034_v20, %v2034_v20 }
  0xf0   :  { %2610 = vst.msk [vmem:[%s5342_s3 + $0x230] sm:$0xf] %vm2469_vm1, %v2353_v21 }
  0xf1   :  { %2674 = vst.msk [vmem:[%s5342_s3 + $0x330] sm:$0xf] %vm2469_vm1, %v2417_v22  ;;  %v1669_v25 = vpop.f32.mrf.mxu2  ;;  %v1829_v26 = vpop.f32.mrf.mxu3 }
  0xf2   :  { %2483 = vst.msk [vmem:[%s5342_s3 + $0x34] sm:$0xf] %vm2469_vm1, %v2226_v23  ;;  %v1670_v29 = vadd.f32 %v3663_v33, %v1669_v25  ;;  %v1830_v30 = vadd.f32 %v3663_v33, %v1829_v26  ;;  %v1352_v31 = vpop.f32.mrf.mxu0  ;;  %v1512_v32 = vpop.f32.mrf.mxu1 }
  0xf3   :  { %2547 = vst.msk [vmem:[%s5342_s3 + $0x134] sm:$0xf] %vm2469_vm1, %v2290_v24  ;;  %v1353_v36 = vadd.f32 %v3663_v33, %v1352_v31  ;;  %v1513_v37 = vadd.f32 %v3663_v33, %v1512_v32 }
  0xf4   :  { %v2098_v38 = vmax.f32 %v1670_v29, 0.0  ;;  %v2162_v39 = vmax.f32 %v1830_v30, 0.0 }
  0xf5   :  { %v1971_v40 = vmax.f32 %v1353_v36, 0.0  ;;  %v2035_v41 = vmax.f32 %v1513_v37, 0.0  ;;  %3261 = vmatmul.msk.bf16.gmra.mxu0 %vm923_vm0, %v3389_v27  ;;  %3293 = vmatmul.msk.bf16.gmra.mxu1 %vm923_vm0, %v3421_v28  ;;  %v3391_v37 = vld [vmem:[%s5340_s0 + $0x88] sm:$0xff] }
  0xf6   :  { %v2354_v42 = vpack.c.bf16 %v2098_v38, %v2098_v38  ;;  %v2418_v43 = vpack.c.bf16 %v2162_v39, %v2162_v39  ;;  %3325 = vmatmul.msk.bf16.gmra.mxu2 %vm923_vm0, %v3453_v34  ;;  %3357 = vmatmul.msk.bf16.gmra.mxu3 %vm923_vm0, %v3485_v35  ;;  %v3423_v38 = vld [vmem:[%s5340_s0 + $0x188] sm:$0xff] }
  0xf7   :  { %v2227_v44 = vpack.c.bf16 %v1971_v40, %v1971_v40  ;;  %v2291_v45 = vpack.c.bf16 %v2035_v41, %v2035_v41 }
  0xf8   :  { %2611 = vst.msk [vmem:[%s5342_s3 + $0x234] sm:$0xf] %vm2469_vm1, %v2354_v42 }
  0xf9   :  { %2675 = vst.msk [vmem:[%s5342_s3 + $0x334] sm:$0xf] %vm2469_vm1, %v2418_v43  ;;  %v1672_v46 = vpop.f32.mrf.mxu2  ;;  %v1832_v47 = vpop.f32.mrf.mxu3  ;;  %v3455_v43 = vld [vmem:[%s5340_s0 + $0x288] sm:$0xff] }
  0xfa   :  { %2484 = vst.msk [vmem:[%s5342_s3 + $0x38] sm:$0xf] %vm2469_vm1, %v2227_v44  ;;  %v1673_v48 = vadd.f32 %v3663_v33, %v1672_v46  ;;  %v1833_v49 = vadd.f32 %v3663_v33, %v1832_v47  ;;  %v1354_v50 = vpop.f32.mrf.mxu0  ;;  %v1514_v51 = vpop.f32.mrf.mxu1  ;;  %v3487_v44 = vld [vmem:[%s5340_s0 + $0x388] sm:$0xff] }
  0xfb   :  { %2548 = vst.msk [vmem:[%s5342_s3 + $0x138] sm:$0xf] %vm2469_vm1, %v2291_v45  ;;  %v1355_v52 = vadd.f32 %v3663_v33, %v1354_v50  ;;  %v1515_v53 = vadd.f32 %v3663_v33, %v1514_v51 }
  0xfc   :  { %v2099_v54 = vmax.f32 %v1673_v48, 0.0  ;;  %v2163_v55 = vmax.f32 %v1833_v49, 0.0 }
  0xfd   :  { %v1972_v56 = vmax.f32 %v1355_v52, 0.0  ;;  %v2036_v57 = vmax.f32 %v1515_v53, 0.0 }
  0xfe   :  { %v2355_v58 = vpack.c.bf16 %v2099_v54, %v2099_v54  ;;  %v2419_v59 = vpack.c.bf16 %v2163_v55, %v2163_v55 }
  0xff   :  { %v2228_v60 = vpack.c.bf16 %v1972_v56, %v1972_v56  ;;  %v2292_v61 = vpack.c.bf16 %v2036_v57, %v2036_v57 }
 0x100   :  { %2612 = vst.msk [vmem:[%s5342_s3 + $0x238] sm:$0xf] %vm2469_vm1, %v2355_v58 }
 0x101   :  { %2676 = vst.msk [vmem:[%s5342_s3 + $0x338] sm:$0xf] %vm2469_vm1, %v2419_v59  ;;  %v1674_v62 = vpop.f32.mrf.mxu2  ;;  %v1834_v63 = vpop.f32.mrf.mxu3 }
 0x102   :  { %2485 = vst.msk [vmem:[%s5342_s3 + $0x3c] sm:$0xf] %vm2469_vm1, %v2228_v60  ;;  %v1675_v2 = vadd.f32 %v3663_v33, %v1674_v62  ;;  %v1835_v3 = vadd.f32 %v3663_v33, %v1834_v63  ;;  %v1357_v4 = vpop.f32.mrf.mxu0  ;;  %v1517_v5 = vpop.f32.mrf.mxu1 }
 0x103   :  { %2549 = vst.msk [vmem:[%s5342_s3 + $0x13c] sm:$0xf] %vm2469_vm1, %v2292_v61  ;;  %v1358_v8 = vadd.f32 %v3663_v33, %v1357_v4  ;;  %v1518_v9 = vadd.f32 %v3663_v33, %v1517_v5 }
 0x104   :  { %v2100_v10 = vmax.f32 %v1675_v2, 0.0  ;;  %v2164_v11 = vmax.f32 %v1835_v3, 0.0 }
 0x105   :  { %v1973_v12 = vmax.f32 %v1358_v8, 0.0  ;;  %v2037_v13 = vmax.f32 %v1518_v9, 0.0  ;;  %3262 = vmatmul.msk.bf16.gmra.mxu0 %vm923_vm0, %v3390_v0  ;;  %3294 = vmatmul.msk.bf16.gmra.mxu1 %vm923_vm0, %v3422_v1  ;;  %v3392_v9 = vld [vmem:[%s5340_s0 + $0x90] sm:$0xff] }
 0x106   :  { %v2356_v14 = vpack.c.bf16 %v2100_v10, %v2100_v10  ;;  %v2420_v15 = vpack.c.bf16 %v2164_v11, %v2164_v11  ;;  %3326 = vmatmul.msk.bf16.gmra.mxu2 %vm923_vm0, %v3454_v6  ;;  %3358 = vmatmul.msk.bf16.gmra.mxu3 %vm923_vm0, %v3486_v7  ;;  %v3424_v10 = vld [vmem:[%s5340_s0 + $0x190] sm:$0xff] }
 0x107   :  { %v2229_v16 = vpack.c.bf16 %v1973_v12, %v1973_v12  ;;  %v2293_v17 = vpack.c.bf16 %v2037_v13, %v2037_v13 }
 0x108   :  { %2613 = vst.msk [vmem:[%s5342_s3 + $0x23c] sm:$0xf] %vm2469_vm1, %v2356_v14 }
 0x109   :  { %2677 = vst.msk [vmem:[%s5342_s3 + $0x33c] sm:$0xf] %vm2469_vm1, %v2420_v15  ;;  %v1677_v18 = vpop.f32.mrf.mxu2  ;;  %v1837_v19 = vpop.f32.mrf.mxu3  ;;  %v3456_v15 = vld [vmem:[%s5340_s0 + $0x290] sm:$0xff] }
 0x10a   :  { %2486 = vst.msk [vmem:[%s5342_s3 + $0x40] sm:$0xf] %vm2469_vm1, %v2229_v16  ;;  %v1678_v20 = vadd.f32 %v3663_v33, %v1677_v18  ;;  %v1838_v21 = vadd.f32 %v3663_v33, %v1837_v19  ;;  %v1359_v22 = vpop.f32.mrf.mxu0  ;;  %v1519_v23 = vpop.f32.mrf.mxu1  ;;  %v3488_v16 = vld [vmem:[%s5340_s0 + $0x390] sm:$0xff] }
 0x10b   :  { %2550 = vst.msk [vmem:[%s5342_s3 + $0x140] sm:$0xf] %vm2469_vm1, %v2293_v17  ;;  %v1360_v24 = vadd.f32 %v3663_v33, %v1359_v22  ;;  %v1520_v25 = vadd.f32 %v3663_v33, %v1519_v23 }
 0x10c   :  { %v2101_v26 = vmax.f32 %v1678_v20, 0.0  ;;  %v2165_v27 = vmax.f32 %v1838_v21, 0.0 }
 0x10d   :  { %v1974_v28 = vmax.f32 %v1360_v24, 0.0  ;;  %v2038_v29 = vmax.f32 %v1520_v25, 0.0 }
 0x10e   :  { %v2357_v30 = vpack.c.bf16 %v2101_v26, %v2101_v26  ;;  %v2421_v31 = vpack.c.bf16 %v2165_v27, %v2165_v27 }
 0x10f   :  { %v2230_v32 = vpack.c.bf16 %v1974_v28, %v1974_v28  ;;  %v2294_v34 = vpack.c.bf16 %v2038_v29, %v2038_v29 }
 0x110   :  { %2614 = vst.msk [vmem:[%s5342_s3 + $0x240] sm:$0xf] %vm2469_vm1, %v2357_v30 }
 0x111   :  { %2678 = vst.msk [vmem:[%s5342_s3 + $0x340] sm:$0xf] %vm2469_vm1, %v2421_v31  ;;  %v1679_v35 = vpop.f32.mrf.mxu2  ;;  %v1839_v36 = vpop.f32.mrf.mxu3 }
 0x112   :  { %2487 = vst.msk [vmem:[%s5342_s3 + $0x44] sm:$0xf] %vm2469_vm1, %v2230_v32  ;;  %v1680_v39 = vadd.f32 %v3663_v33, %v1679_v35  ;;  %v1840_v40 = vadd.f32 %v3663_v33, %v1839_v36  ;;  %v1362_v41 = vpop.f32.mrf.mxu0  ;;  %v1522_v42 = vpop.f32.mrf.mxu1 }
 0x113   :  { %2551 = vst.msk [vmem:[%s5342_s3 + $0x144] sm:$0xf] %vm2469_vm1, %v2294_v34  ;;  %v1363_v45 = vadd.f32 %v3663_v33, %v1362_v41  ;;  %v1523_v46 = vadd.f32 %v3663_v33, %v1522_v42 }
 0x114   :  { %v2102_v47 = vmax.f32 %v1680_v39, 0.0  ;;  %v2166_v48 = vmax.f32 %v1840_v40, 0.0 }
 0x115   :  { %v1975_v49 = vmax.f32 %v1363_v45, 0.0  ;;  %v2039_v50 = vmax.f32 %v1523_v46, 0.0  ;;  %3263 = vmatmul.msk.bf16.gmra.mxu0 %vm923_vm0, %v3391_v37  ;;  %3295 = vmatmul.msk.bf16.gmra.mxu1 %vm923_vm0, %v3423_v38  ;;  %v3393_v45 = vld [vmem:[%s5340_s0 + $0x98] sm:$0xff] }
 0x116   :  { %v2358_v51 = vpack.c.bf16 %v2102_v47, %v2102_v47  ;;  %v2422_v52 = vpack.c.bf16 %v2166_v48, %v2166_v48  ;;  %3327 = vmatmul.msk.bf16.gmra.mxu2 %vm923_vm0, %v3455_v43  ;;  %3359 = vmatmul.msk.bf16.gmra.mxu3 %vm923_vm0, %v3487_v44  ;;  %v3425_v46 = vld [vmem:[%s5340_s0 + $0x198] sm:$0xff]  ;;  %v4276_v47 = vld [vmem:[%s5341_s2] ss:$0 sm:$0xff] }
 0x117   :  { %v2231_v53 = vpack.c.bf16 %v1975_v49, %v1975_v49  ;;  %v2295_v54 = vpack.c.bf16 %v2039_v50, %v2039_v50 }
 0x118   :  { %2615 = vst.msk [vmem:[%s5342_s3 + $0x244] sm:$0xf] %vm2469_vm1, %v2358_v51 }
 0x119   :  { %2679 = vst.msk [vmem:[%s5342_s3 + $0x344] sm:$0xf] %vm2469_vm1, %v2422_v52  ;;  %v1682_v55 = vpop.f32.mrf.mxu2  ;;  %v1842_v56 = vpop.f32.mrf.mxu3  ;;  %v3457_v52 = vld [vmem:[%s5340_s0 + $0x298] sm:$0xff] }
 0x11a   :  { %2488 = vst.msk [vmem:[%s5342_s3 + $0x48] sm:$0xf] %vm2469_vm1, %v2231_v53  ;;  %v1683_v57 = vadd.f32 %v3663_v33, %v1682_v55  ;;  %v1843_v58 = vadd.f32 %v3663_v33, %v1842_v56  ;;  %v1364_v59 = vpop.f32.mrf.mxu0  ;;  %v1524_v60 = vpop.f32.mrf.mxu1  ;;  %v3489_v53 = vld [vmem:[%s5340_s0 + $0x398] sm:$0xff] }
 0x11b   :  { %2552 = vst.msk [vmem:[%s5342_s3 + $0x148] sm:$0xf] %vm2469_vm1, %v2295_v54  ;;  %v1365_v61 = vadd.f32 %v3663_v33, %v1364_v59  ;;  %v1525_v62 = vadd.f32 %v3663_v33, %v1524_v60 }
 0x11c   :  { %v2103_v63 = vmax.f32 %v1683_v57, 0.0  ;;  %v2167_v0 = vmax.f32 %v1843_v58, 0.0 }
 0x11d   :  { %v1976_v1 = vmax.f32 %v1365_v61, 0.0  ;;  %v2040_v2 = vmax.f32 %v1525_v62, 0.0 }
 0x11e   :  { %v2359_v3 = vpack.c.bf16 %v2103_v63, %v2103_v63  ;;  %v2423_v4 = vpack.c.bf16 %v2167_v0, %v2167_v0 }
 0x11f   :  { %v2232_v5 = vpack.c.bf16 %v1976_v1, %v1976_v1  ;;  %v2296_v6 = vpack.c.bf16 %v2040_v2, %v2040_v2 }
 0x120   :  { %2616 = vst.msk [vmem:[%s5342_s3 + $0x248] sm:$0xf] %vm2469_vm1, %v2359_v3 }
 0x121   :  { %2680 = vst.msk [vmem:[%s5342_s3 + $0x348] sm:$0xf] %vm2469_vm1, %v2423_v4  ;;  %v1684_v7 = vpop.f32.mrf.mxu2  ;;  %v1844_v8 = vpop.f32.mrf.mxu3 }
 0x122   :  { %2489 = vst.msk [vmem:[%s5342_s3 + $0x4c] sm:$0xf] %vm2469_vm1, %v2232_v5  ;;  %v1685_v11 = vadd.f32 %v3663_v33, %v1684_v7  ;;  %v1845_v12 = vadd.f32 %v3663_v33, %v1844_v8  ;;  %v1367_v13 = vpop.f32.mrf.mxu0  ;;  %v1527_v14 = vpop.f32.mrf.mxu1 }
 0x123   :  { %2553 = vst.msk [vmem:[%s5342_s3 + $0x14c] sm:$0xf] %vm2469_vm1, %v2296_v6  ;;  %v1368_v17 = vadd.f32 %v3663_v33, %v1367_v13  ;;  %v1528_v18 = vadd.f32 %v3663_v33, %v1527_v14 }
 0x124   :  { %v2104_v19 = vmax.f32 %v1685_v11, 0.0  ;;  %v2168_v20 = vmax.f32 %v1845_v12, 0.0 }
 0x125   :  { %v1977_v21 = vmax.f32 %v1368_v17, 0.0  ;;  %v2041_v22 = vmax.f32 %v1528_v18, 0.0  ;;  %3264 = vmatmul.msk.bf16.gmra.mxu0 %vm923_vm0, %v3392_v9  ;;  %3296 = vmatmul.msk.bf16.gmra.mxu1 %vm923_vm0, %v3424_v10  ;;  %v3394_v18 = vld [vmem:[%s5340_s0 + $0xa0] sm:$0xff] }
 0x126   :  { %v2360_v23 = vpack.c.bf16 %v2104_v19, %v2104_v19  ;;  %v2424_v24 = vpack.c.bf16 %v2168_v20, %v2168_v20  ;;  %3328 = vmatmul.msk.bf16.gmra.mxu2 %vm923_vm0, %v3456_v15  ;;  %3360 = vmatmul.msk.bf16.gmra.mxu3 %vm923_vm0, %v3488_v16  ;;  %v3426_v19 = vld [vmem:[%s5340_s0 + $0x1a0] sm:$0xff] }
 0x127   :  { %v2233_v25 = vpack.c.bf16 %v1977_v21, %v1977_v21  ;;  %v2297_v26 = vpack.c.bf16 %v2041_v22, %v2041_v22 }
 0x128   :  { %2617 = vst.msk [vmem:[%s5342_s3 + $0x24c] sm:$0xf] %vm2469_vm1, %v2360_v23 }
 0x129   :  { %2681 = vst.msk [vmem:[%s5342_s3 + $0x34c] sm:$0xf] %vm2469_vm1, %v2424_v24  ;;  %v1687_v27 = vpop.f32.mrf.mxu2  ;;  %v1847_v28 = vpop.f32.mrf.mxu3  ;;  %v3458_v24 = vld [vmem:[%s5340_s0 + $0x2a0] sm:$0xff] }
 0x12a   :  { %2490 = vst.msk [vmem:[%s5342_s3 + $0x50] sm:$0xf] %vm2469_vm1, %v2233_v25  ;;  %v1688_v29 = vadd.f32 %v3663_v33, %v1687_v27  ;;  %v1848_v30 = vadd.f32 %v3663_v33, %v1847_v28  ;;  %v1369_v31 = vpop.f32.mrf.mxu0  ;;  %v1529_v32 = vpop.f32.mrf.mxu1  ;;  %v3490_v25 = vld [vmem:[%s5340_s0 + $0x3a0] sm:$0xff] }
 0x12b   :  { %2554 = vst.msk [vmem:[%s5342_s3 + $0x150] sm:$0xf] %vm2469_vm1, %v2297_v26  ;;  %v1370_v34 = vadd.f32 %v3663_v33, %v1369_v31  ;;  %v1530_v35 = vadd.f32 %v3663_v33, %v1529_v32 }
 0x12c   :  { %v2105_v36 = vmax.f32 %v1688_v29, 0.0  ;;  %v2169_v37 = vmax.f32 %v1848_v30, 0.0 }
 0x12d   :  { %v1978_v38 = vmax.f32 %v1370_v34, 0.0  ;;  %v2042_v39 = vmax.f32 %v1530_v35, 0.0 }
 0x12e   :  { %v2361_v40 = vpack.c.bf16 %v2105_v36, %v2105_v36  ;;  %v2425_v41 = vpack.c.bf16 %v2169_v37, %v2169_v37 }
 0x12f   :  { %v2234_v42 = vpack.c.bf16 %v1978_v38, %v1978_v38  ;;  %v2298_v43 = vpack.c.bf16 %v2042_v39, %v2042_v39 }
 0x130   :  { %2618 = vst.msk [vmem:[%s5342_s3 + $0x250] sm:$0xf] %vm2469_vm1, %v2361_v40 }
 0x131   :  { %2682 = vst.msk [vmem:[%s5342_s3 + $0x350] sm:$0xf] %vm2469_vm1, %v2425_v41  ;;  %v1689_v44 = vpop.f32.mrf.mxu2  ;;  %v1849_v33 = vpop.f32.mrf.mxu3 }
 0x132   :  { %2491 = vst.msk [vmem:[%s5342_s3 + $0x54] sm:$0xf] %vm2469_vm1, %v2234_v42  ;;  %v1690_v48 = vadd.f32 %v4276_v47, %v1689_v44  ;;  %v1850_v49 = vadd.f32 %v4276_v47, %v1849_v33  ;;  %v1372_v50 = vpop.f32.mrf.mxu0  ;;  %v1532_v51 = vpop.f32.mrf.mxu1 }
 0x133   :  { %2555 = vst.msk [vmem:[%s5342_s3 + $0x154] sm:$0xf] %vm2469_vm1, %v2298_v43  ;;  %v1373_v54 = vadd.f32 %v4276_v47, %v1372_v50  ;;  %v1533_v55 = vadd.f32 %v4276_v47, %v1532_v51 }
 0x134   :  { %v2106_v56 = vmax.f32 %v1690_v48, 0.0  ;;  %v2170_v57 = vmax.f32 %v1850_v49, 0.0 }
 0x135   :  { %v1979_v58 = vmax.f32 %v1373_v54, 0.0  ;;  %v2043_v59 = vmax.f32 %v1533_v55, 0.0  ;;  %3265 = vmatmul.msk.bf16.gmra.mxu0 %vm923_vm0, %v3393_v45  ;;  %3297 = vmatmul.msk.bf16.gmra.mxu1 %vm923_vm0, %v3425_v46  ;;  %v3395_v55 = vld [vmem:[%s5340_s0 + $0xa8] sm:$0xff] }
 0x136   :  { %v2362_v60 = vpack.c.bf16 %v2106_v56, %v2106_v56  ;;  %v2426_v61 = vpack.c.bf16 %v2170_v57, %v2170_v57  ;;  %3329 = vmatmul.msk.bf16.gmra.mxu2 %vm923_vm0, %v3457_v52  ;;  %3361 = vmatmul.msk.bf16.gmra.mxu3 %vm923_vm0, %v3489_v53  ;;  %v3427_v56 = vld [vmem:[%s5340_s0 + $0x1a8] sm:$0xff] }
 0x137   :  { %v2235_v62 = vpack.c.bf16 %v1979_v58, %v1979_v58  ;;  %v2299_v63 = vpack.c.bf16 %v2043_v59, %v2043_v59 }
 0x138   :  { %2619 = vst.msk [vmem:[%s5342_s3 + $0x254] sm:$0xf] %vm2469_vm1, %v2362_v60 }
 0x139   :  { %2683 = vst.msk [vmem:[%s5342_s3 + $0x354] sm:$0xf] %vm2469_vm1, %v2426_v61  ;;  %v1692_v0 = vpop.f32.mrf.mxu2  ;;  %v1852_v1 = vpop.f32.mrf.mxu3  ;;  %v3459_v61 = vld [vmem:[%s5340_s0 + $0x2a8] sm:$0xff] }
 0x13a   :  { %2492 = vst.msk [vmem:[%s5342_s3 + $0x58] sm:$0xf] %vm2469_vm1, %v2235_v62  ;;  %v1693_v2 = vadd.f32 %v4276_v47, %v1692_v0  ;;  %v1853_v3 = vadd.f32 %v4276_v47, %v1852_v1  ;;  %v1374_v4 = vpop.f32.mrf.mxu0  ;;  %v1534_v5 = vpop.f32.mrf.mxu1  ;;  %v3491_v62 = vld [vmem:[%s5340_s0 + $0x3a8] sm:$0xff] }
 0x13b   :  { %2556 = vst.msk [vmem:[%s5342_s3 + $0x158] sm:$0xf] %vm2469_vm1, %v2299_v63  ;;  %v1375_v6 = vadd.f32 %v4276_v47, %v1374_v4  ;;  %v1535_v7 = vadd.f32 %v4276_v47, %v1534_v5 }
 0x13c   :  { %v2107_v8 = vmax.f32 %v1693_v2, 0.0  ;;  %v2171_v9 = vmax.f32 %v1853_v3, 0.0 }
 0x13d   :  { %v1980_v10 = vmax.f32 %v1375_v6, 0.0  ;;  %v2044_v11 = vmax.f32 %v1535_v7, 0.0 }
 0x13e   :  { %v2363_v12 = vpack.c.bf16 %v2107_v8, %v2107_v8  ;;  %v2427_v13 = vpack.c.bf16 %v2171_v9, %v2171_v9 }
 0x13f   :  { %v2236_v14 = vpack.c.bf16 %v1980_v10, %v1980_v10  ;;  %v2300_v15 = vpack.c.bf16 %v2044_v11, %v2044_v11 }
 0x140   :  { %2620 = vst.msk [vmem:[%s5342_s3 + $0x258] sm:$0xf] %vm2469_vm1, %v2363_v12 }
 0x141   :  { %2684 = vst.msk [vmem:[%s5342_s3 + $0x358] sm:$0xf] %vm2469_vm1, %v2427_v13  ;;  %v1694_v16 = vpop.f32.mrf.mxu2  ;;  %v1854_v17 = vpop.f32.mrf.mxu3 }
 0x142   :  { %2493 = vst.msk [vmem:[%s5342_s3 + $0x5c] sm:$0xf] %vm2469_vm1, %v2236_v14  ;;  %v1695_v20 = vadd.f32 %v4276_v47, %v1694_v16  ;;  %v1855_v21 = vadd.f32 %v4276_v47, %v1854_v17  ;;  %v1377_v22 = vpop.f32.mrf.mxu0  ;;  %v1537_v23 = vpop.f32.mrf.mxu1 }
 0x143   :  { %2557 = vst.msk [vmem:[%s5342_s3 + $0x15c] sm:$0xf] %vm2469_vm1, %v2300_v15  ;;  %v1378_v26 = vadd.f32 %v4276_v47, %v1377_v22  ;;  %v1538_v27 = vadd.f32 %v4276_v47, %v1537_v23 }
 0x144   :  { %v2108_v28 = vmax.f32 %v1695_v20, 0.0  ;;  %v2172_v29 = vmax.f32 %v1855_v21, 0.0 }
 0x145   :  { %v1981_v30 = vmax.f32 %v1378_v26, 0.0  ;;  %v2045_v31 = vmax.f32 %v1538_v27, 0.0  ;;  %3266 = vmatmul.msk.bf16.gmra.mxu0 %vm923_vm0, %v3394_v18  ;;  %3298 = vmatmul.msk.bf16.gmra.mxu1 %vm923_vm0, %v3426_v19  ;;  %v3396_v27 = vld [vmem:[%s5340_s0 + $0xb0] sm:$0xff] }
 0x146   :  { %v2364_v32 = vpack.c.bf16 %v2108_v28, %v2108_v28  ;;  %v2428_v34 = vpack.c.bf16 %v2172_v29, %v2172_v29  ;;  %3330 = vmatmul.msk.bf16.gmra.mxu2 %vm923_vm0, %v3458_v24  ;;  %3362 = vmatmul.msk.bf16.gmra.mxu3 %vm923_vm0, %v3490_v25  ;;  %v3428_v28 = vld [vmem:[%s5340_s0 + $0x1b0] sm:$0xff] }
 0x147   :  { %v2237_v35 = vpack.c.bf16 %v1981_v30, %v1981_v30  ;;  %v2301_v36 = vpack.c.bf16 %v2045_v31, %v2045_v31 }
 0x148   :  { %2621 = vst.msk [vmem:[%s5342_s3 + $0x25c] sm:$0xf] %vm2469_vm1, %v2364_v32 }
 0x149   :  { %2685 = vst.msk [vmem:[%s5342_s3 + $0x35c] sm:$0xf] %vm2469_vm1, %v2428_v34  ;;  %v1697_v37 = vpop.f32.mrf.mxu2  ;;  %v1857_v38 = vpop.f32.mrf.mxu3  ;;  %v3460_v34 = vld [vmem:[%s5340_s0 + $0x2b0] sm:$0xff] }
 0x14a   :  { %2494 = vst.msk [vmem:[%s5342_s3 + $0x60] sm:$0xf] %vm2469_vm1, %v2237_v35  ;;  %v1698_v39 = vadd.f32 %v4276_v47, %v1697_v37  ;;  %v1858_v40 = vadd.f32 %v4276_v47, %v1857_v38  ;;  %v1379_v41 = vpop.f32.mrf.mxu0  ;;  %v1539_v42 = vpop.f32.mrf.mxu1  ;;  %v3492_v35 = vld [vmem:[%s5340_s0 + $0x3b0] sm:$0xff] }
 0x14b   :  { %2558 = vst.msk [vmem:[%s5342_s3 + $0x160] sm:$0xf] %vm2469_vm1, %v2301_v36  ;;  %v1380_v43 = vadd.f32 %v4276_v47, %v1379_v41  ;;  %v1540_v44 = vadd.f32 %v4276_v47, %v1539_v42 }
 0x14c   :  { %v2109_v33 = vmax.f32 %v1698_v39, 0.0  ;;  %v2173_v45 = vmax.f32 %v1858_v40, 0.0 }
 0x14d   :  { %v1982_v46 = vmax.f32 %v1380_v43, 0.0  ;;  %v2046_v48 = vmax.f32 %v1540_v44, 0.0 }
 0x14e   :  { %v2365_v49 = vpack.c.bf16 %v2109_v33, %v2109_v33  ;;  %v2429_v50 = vpack.c.bf16 %v2173_v45, %v2173_v45 }
 0x14f   :  { %v2238_v51 = vpack.c.bf16 %v1982_v46, %v1982_v46  ;;  %v2302_v52 = vpack.c.bf16 %v2046_v48, %v2046_v48 }
 0x150   :  { %2622 = vst.msk [vmem:[%s5342_s3 + $0x260] sm:$0xf] %vm2469_vm1, %v2365_v49 }
 0x151   :  { %2686 = vst.msk [vmem:[%s5342_s3 + $0x360] sm:$0xf] %vm2469_vm1, %v2429_v50  ;;  %v1699_v53 = vpop.f32.mrf.mxu2  ;;  %v1859_v54 = vpop.f32.mrf.mxu3 }
 0x152   :  { %2495 = vst.msk [vmem:[%s5342_s3 + $0x64] sm:$0xf] %vm2469_vm1, %v2238_v51  ;;  %v1700_v57 = vadd.f32 %v4276_v47, %v1699_v53  ;;  %v1860_v58 = vadd.f32 %v4276_v47, %v1859_v54  ;;  %v1382_v59 = vpop.f32.mrf.mxu0  ;;  %v1542_v60 = vpop.f32.mrf.mxu1 }
 0x153   :  { %2559 = vst.msk [vmem:[%s5342_s3 + $0x164] sm:$0xf] %vm2469_vm1, %v2302_v52  ;;  %v1383_v63 = vadd.f32 %v4276_v47, %v1382_v59  ;;  %v1543_v0 = vadd.f32 %v4276_v47, %v1542_v60 }
 0x154   :  { %v2110_v1 = vmax.f32 %v1700_v57, 0.0  ;;  %v2174_v2 = vmax.f32 %v1860_v58, 0.0 }
 0x155   :  { %v1983_v3 = vmax.f32 %v1383_v63, 0.0  ;;  %v2047_v4 = vmax.f32 %v1543_v0, 0.0  ;;  %3267 = vmatmul.msk.bf16.gmra.mxu0 %vm923_vm0, %v3395_v55  ;;  %3299 = vmatmul.msk.bf16.gmra.mxu1 %vm923_vm0, %v3427_v56  ;;  %v3397_v0 = vld [vmem:[%s5340_s0 + $0xb8] sm:$0xff] }
 0x156   :  { %v2366_v5 = vpack.c.bf16 %v2110_v1, %v2110_v1  ;;  %v2430_v6 = vpack.c.bf16 %v2174_v2, %v2174_v2  ;;  %3331 = vmatmul.msk.bf16.gmra.mxu2 %vm923_vm0, %v3459_v61  ;;  %3363 = vmatmul.msk.bf16.gmra.mxu3 %vm923_vm0, %v3491_v62  ;;  %v3429_v1 = vld [vmem:[%s5340_s0 + $0x1b8] sm:$0xff] }
 0x157   :  { %v2239_v7 = vpack.c.bf16 %v1983_v3, %v1983_v3  ;;  %v2303_v8 = vpack.c.bf16 %v2047_v4, %v2047_v4 }
 0x158   :  { %2623 = vst.msk [vmem:[%s5342_s3 + $0x264] sm:$0xf] %vm2469_vm1, %v2366_v5 }
 0x159   :  { %2687 = vst.msk [vmem:[%s5342_s3 + $0x364] sm:$0xf] %vm2469_vm1, %v2430_v6  ;;  %v1702_v9 = vpop.f32.mrf.mxu2  ;;  %v1862_v10 = vpop.f32.mrf.mxu3  ;;  %v3461_v6 = vld [vmem:[%s5340_s0 + $0x2b8] sm:$0xff] }
 0x15a   :  { %2496 = vst.msk [vmem:[%s5342_s3 + $0x68] sm:$0xf] %vm2469_vm1, %v2239_v7  ;;  %v1703_v11 = vadd.f32 %v4276_v47, %v1702_v9  ;;  %v1863_v12 = vadd.f32 %v4276_v47, %v1862_v10  ;;  %v1384_v13 = vpop.f32.mrf.mxu0  ;;  %v1544_v14 = vpop.f32.mrf.mxu1  ;;  %v3493_v7 = vld [vmem:[%s5340_s0 + $0x3b8] sm:$0xff] }
 0x15b   :  { %2560 = vst.msk [vmem:[%s5342_s3 + $0x168] sm:$0xf] %vm2469_vm1, %v2303_v8  ;;  %v1385_v15 = vadd.f32 %v4276_v47, %v1384_v13  ;;  %v1545_v16 = vadd.f32 %v4276_v47, %v1544_v14 }
 0x15c   :  { %v2111_v17 = vmax.f32 %v1703_v11, 0.0  ;;  %v2175_v18 = vmax.f32 %v1863_v12, 0.0 }
 0x15d   :  { %v1984_v19 = vmax.f32 %v1385_v15, 0.0  ;;  %v2048_v20 = vmax.f32 %v1545_v16, 0.0 }
 0x15e   :  { %v2367_v21 = vpack.c.bf16 %v2111_v17, %v2111_v17  ;;  %v2431_v22 = vpack.c.bf16 %v2175_v18, %v2175_v18 }
 0x15f   :  { %v2240_v23 = vpack.c.bf16 %v1984_v19, %v1984_v19  ;;  %v2304_v24 = vpack.c.bf16 %v2048_v20, %v2048_v20 }
 0x160   :  { %2624 = vst.msk [vmem:[%s5342_s3 + $0x268] sm:$0xf] %vm2469_vm1, %v2367_v21 }
 0x161   :  { %2688 = vst.msk [vmem:[%s5342_s3 + $0x368] sm:$0xf] %vm2469_vm1, %v2431_v22  ;;  %v1704_v25 = vpop.f32.mrf.mxu2  ;;  %v1864_v26 = vpop.f32.mrf.mxu3 }
 0x162   :  { %2497 = vst.msk [vmem:[%s5342_s3 + $0x6c] sm:$0xf] %vm2469_vm1, %v2240_v23  ;;  %v1705_v29 = vadd.f32 %v4276_v47, %v1704_v25  ;;  %v1865_v30 = vadd.f32 %v4276_v47, %v1864_v26  ;;  %v1387_v31 = vpop.f32.mrf.mxu0  ;;  %v1547_v32 = vpop.f32.mrf.mxu1 }
 0x163   :  { %2561 = vst.msk [vmem:[%s5342_s3 + $0x16c] sm:$0xf] %vm2469_vm1, %v2304_v24  ;;  %v1388_v36 = vadd.f32 %v4276_v47, %v1387_v31  ;;  %v1548_v37 = vadd.f32 %v4276_v47, %v1547_v32 }
 0x164   :  { %v2112_v38 = vmax.f32 %v1705_v29, 0.0  ;;  %v2176_v39 = vmax.f32 %v1865_v30, 0.0 }
 0x165   :  { %v1985_v40 = vmax.f32 %v1388_v36, 0.0  ;;  %v2049_v41 = vmax.f32 %v1548_v37, 0.0  ;;  %3268 = vmatmul.msk.bf16.gmra.mxu0 %vm923_vm0, %v3396_v27  ;;  %3300 = vmatmul.msk.bf16.gmra.mxu1 %vm923_vm0, %v3428_v28  ;;  %v3398_v37 = vld [vmem:[%s5340_s0 + $0xc0] sm:$0xff] }
 0x166   :  { %v2368_v42 = vpack.c.bf16 %v2112_v38, %v2112_v38  ;;  %v2432_v43 = vpack.c.bf16 %v2176_v39, %v2176_v39  ;;  %3332 = vmatmul.msk.bf16.gmra.mxu2 %vm923_vm0, %v3460_v34  ;;  %3364 = vmatmul.msk.bf16.gmra.mxu3 %vm923_vm0, %v3492_v35  ;;  %v3430_v38 = vld [vmem:[%s5340_s0 + $0x1c0] sm:$0xff] }
 0x167   :  { %v2241_v44 = vpack.c.bf16 %v1985_v40, %v1985_v40  ;;  %v2305_v33 = vpack.c.bf16 %v2049_v41, %v2049_v41 }
 0x168   :  { %2625 = vst.msk [vmem:[%s5342_s3 + $0x26c] sm:$0xf] %vm2469_vm1, %v2368_v42 }
 0x169   :  { %2689 = vst.msk [vmem:[%s5342_s3 + $0x36c] sm:$0xf] %vm2469_vm1, %v2432_v43  ;;  %v1707_v45 = vpop.f32.mrf.mxu2  ;;  %v1867_v46 = vpop.f32.mrf.mxu3  ;;  %v3462_v43 = vld [vmem:[%s5340_s0 + $0x2c0] sm:$0xff] }
 0x16a   :  { %2498 = vst.msk [vmem:[%s5342_s3 + $0x70] sm:$0xf] %vm2469_vm1, %v2241_v44  ;;  %v1708_v48 = vadd.f32 %v4276_v47, %v1707_v45  ;;  %v1868_v49 = vadd.f32 %v4276_v47, %v1867_v46  ;;  %v1389_v50 = vpop.f32.mrf.mxu0  ;;  %v1549_v51 = vpop.f32.mrf.mxu1  ;;  %v3494_v44 = vld [vmem:[%s5340_s0 + $0x3c0] sm:$0xff] }
 0x16b   :  { %2562 = vst.msk [vmem:[%s5342_s3 + $0x170] sm:$0xf] %vm2469_vm1, %v2305_v33  ;;  %v1390_v52 = vadd.f32 %v4276_v47, %v1389_v50  ;;  %v1550_v53 = vadd.f32 %v4276_v47, %v1549_v51 }
 0x16c   :  { %v2113_v54 = vmax.f32 %v1708_v48, 0.0  ;;  %v2177_v55 = vmax.f32 %v1868_v49, 0.0 }
 0x16d   :  { %v1986_v56 = vmax.f32 %v1390_v52, 0.0  ;;  %v2050_v57 = vmax.f32 %v1550_v53, 0.0 }
 0x16e   :  { %v2369_v58 = vpack.c.bf16 %v2113_v54, %v2113_v54  ;;  %v2433_v59 = vpack.c.bf16 %v2177_v55, %v2177_v55 }
 0x16f   :  { %v2242_v60 = vpack.c.bf16 %v1986_v56, %v1986_v56  ;;  %v2306_v61 = vpack.c.bf16 %v2050_v57, %v2050_v57 }
 0x170   :  { %2626 = vst.msk [vmem:[%s5342_s3 + $0x270] sm:$0xf] %vm2469_vm1, %v2369_v58 }
 0x171   :  { %2690 = vst.msk [vmem:[%s5342_s3 + $0x370] sm:$0xf] %vm2469_vm1, %v2433_v59  ;;  %v1709_v62 = vpop.f32.mrf.mxu2  ;;  %v1869_v63 = vpop.f32.mrf.mxu3 }
 0x172   :  { %2499 = vst.msk [vmem:[%s5342_s3 + $0x74] sm:$0xf] %vm2469_vm1, %v2242_v60  ;;  %v1710_v2 = vadd.f32 %v4276_v47, %v1709_v62  ;;  %v1870_v3 = vadd.f32 %v4276_v47, %v1869_v63  ;;  %v1392_v4 = vpop.f32.mrf.mxu0  ;;  %v1552_v5 = vpop.f32.mrf.mxu1 }
 0x173   :  { %2563 = vst.msk [vmem:[%s5342_s3 + $0x174] sm:$0xf] %vm2469_vm1, %v2306_v61  ;;  %v1393_v8 = vadd.f32 %v4276_v47, %v1392_v4  ;;  %v1553_v9 = vadd.f32 %v4276_v47, %v1552_v5 }
 0x174   :  { %v2114_v10 = vmax.f32 %v1710_v2, 0.0  ;;  %v2178_v11 = vmax.f32 %v1870_v3, 0.0 }
 0x175   :  { %v1987_v12 = vmax.f32 %v1393_v8, 0.0  ;;  %v2051_v13 = vmax.f32 %v1553_v9, 0.0  ;;  %3269 = vmatmul.msk.bf16.gmra.mxu0 %vm923_vm0, %v3397_v0  ;;  %3301 = vmatmul.msk.bf16.gmra.mxu1 %vm923_vm0, %v3429_v1  ;;  %v3399_v9 = vld [vmem:[%s5340_s0 + $0xc8] sm:$0xff] }
 0x176   :  { %v2370_v14 = vpack.c.bf16 %v2114_v10, %v2114_v10  ;;  %v2434_v15 = vpack.c.bf16 %v2178_v11, %v2178_v11  ;;  %3333 = vmatmul.msk.bf16.gmra.mxu2 %vm923_vm0, %v3461_v6  ;;  %3365 = vmatmul.msk.bf16.gmra.mxu3 %vm923_vm0, %v3493_v7  ;;  %v3431_v10 = vld [vmem:[%s5340_s0 + $0x1c8] sm:$0xff] }
 0x177   :  { %v2243_v16 = vpack.c.bf16 %v1987_v12, %v1987_v12  ;;  %v2307_v17 = vpack.c.bf16 %v2051_v13, %v2051_v13 }
 0x178   :  { %2627 = vst.msk [vmem:[%s5342_s3 + $0x274] sm:$0xf] %vm2469_vm1, %v2370_v14 }
 0x179   :  { %2691 = vst.msk [vmem:[%s5342_s3 + $0x374] sm:$0xf] %vm2469_vm1, %v2434_v15  ;;  %v1712_v18 = vpop.f32.mrf.mxu2  ;;  %v1872_v19 = vpop.f32.mrf.mxu3  ;;  %v3463_v15 = vld [vmem:[%s5340_s0 + $0x2c8] sm:$0xff] }
 0x17a   :  { %2500 = vst.msk [vmem:[%s5342_s3 + $0x78] sm:$0xf] %vm2469_vm1, %v2243_v16  ;;  %v1713_v20 = vadd.f32 %v4276_v47, %v1712_v18  ;;  %v1873_v21 = vadd.f32 %v4276_v47, %v1872_v19  ;;  %v1394_v22 = vpop.f32.mrf.mxu0  ;;  %v1554_v23 = vpop.f32.mrf.mxu1  ;;  %v3495_v16 = vld [vmem:[%s5340_s0 + $0x3c8] sm:$0xff] }
 0x17b   :  { %2564 = vst.msk [vmem:[%s5342_s3 + $0x178] sm:$0xf] %vm2469_vm1, %v2307_v17  ;;  %v1395_v24 = vadd.f32 %v4276_v47, %v1394_v22  ;;  %v1555_v25 = vadd.f32 %v4276_v47, %v1554_v23 }
 0x17c   :  { %v2115_v26 = vmax.f32 %v1713_v20, 0.0  ;;  %v2179_v27 = vmax.f32 %v1873_v21, 0.0 }
 0x17d   :  { %v1988_v28 = vmax.f32 %v1395_v24, 0.0  ;;  %v2052_v29 = vmax.f32 %v1555_v25, 0.0 }
 0x17e   :  { %v2371_v30 = vpack.c.bf16 %v2115_v26, %v2115_v26  ;;  %v2435_v31 = vpack.c.bf16 %v2179_v27, %v2179_v27 }
 0x17f   :  { %v2244_v32 = vpack.c.bf16 %v1988_v28, %v1988_v28  ;;  %v2308_v34 = vpack.c.bf16 %v2052_v29, %v2052_v29 }
 0x180   :  { %2628 = vst.msk [vmem:[%s5342_s3 + $0x278] sm:$0xf] %vm2469_vm1, %v2371_v30 }
 0x181   :  { %2692 = vst.msk [vmem:[%s5342_s3 + $0x378] sm:$0xf] %vm2469_vm1, %v2435_v31  ;;  %v1714_v35 = vpop.f32.mrf.mxu2  ;;  %v1874_v36 = vpop.f32.mrf.mxu3 }
 0x182   :  { %2501 = vst.msk [vmem:[%s5342_s3 + $0x7c] sm:$0xf] %vm2469_vm1, %v2244_v32  ;;  %v1715_v39 = vadd.f32 %v4276_v47, %v1714_v35  ;;  %v1875_v40 = vadd.f32 %v4276_v47, %v1874_v36  ;;  %v1397_v41 = vpop.f32.mrf.mxu0  ;;  %v1557_v42 = vpop.f32.mrf.mxu1 }
 0x183   :  { %2565 = vst.msk [vmem:[%s5342_s3 + $0x17c] sm:$0xf] %vm2469_vm1, %v2308_v34  ;;  %v1398_v33 = vadd.f32 %v4276_v47, %v1397_v41  ;;  %v1558_v45 = vadd.f32 %v4276_v47, %v1557_v42 }
 0x184   :  { %v2116_v46 = vmax.f32 %v1715_v39, 0.0  ;;  %v2180_v48 = vmax.f32 %v1875_v40, 0.0 }
 0x185   :  { %v1989_v49 = vmax.f32 %v1398_v33, 0.0  ;;  %v2053_v50 = vmax.f32 %v1558_v45, 0.0  ;;  %3270 = vmatmul.msk.bf16.gmra.mxu0 %vm923_vm0, %v3398_v37  ;;  %3302 = vmatmul.msk.bf16.gmra.mxu1 %vm923_vm0, %v3430_v38  ;;  %v3400_v45 = vld [vmem:[%s5340_s0 + $0xd0] sm:$0xff] }
 0x186   :  { %v2372_v51 = vpack.c.bf16 %v2116_v46, %v2116_v46  ;;  %v2436_v52 = vpack.c.bf16 %v2180_v48, %v2180_v48  ;;  %3334 = vmatmul.msk.bf16.gmra.mxu2 %vm923_vm0, %v3462_v43  ;;  %3366 = vmatmul.msk.bf16.gmra.mxu3 %vm923_vm0, %v3494_v44  ;;  %v3432_v46 = vld [vmem:[%s5340_s0 + $0x1d0] sm:$0xff] }
 0x187   :  { %v2245_v53 = vpack.c.bf16 %v1989_v49, %v1989_v49  ;;  %v2309_v54 = vpack.c.bf16 %v2053_v50, %v2053_v50 }
 0x188   :  { %2629 = vst.msk [vmem:[%s5342_s3 + $0x27c] sm:$0xf] %vm2469_vm1, %v2372_v51 }
 0x189   :  { %2693 = vst.msk [vmem:[%s5342_s3 + $0x37c] sm:$0xf] %vm2469_vm1, %v2436_v52  ;;  %v1717_v55 = vpop.f32.mrf.mxu2  ;;  %v1877_v56 = vpop.f32.mrf.mxu3  ;;  %v3464_v52 = vld [vmem:[%s5340_s0 + $0x2d0] sm:$0xff] }
 0x18a   :  { %2502 = vst.msk [vmem:[%s5342_s3 + $0x80] sm:$0xf] %vm2469_vm1, %v2245_v53  ;;  %v1718_v57 = vadd.f32 %v4276_v47, %v1717_v55  ;;  %v1878_v58 = vadd.f32 %v4276_v47, %v1877_v56  ;;  %v1399_v59 = vpop.f32.mrf.mxu0  ;;  %v1559_v60 = vpop.f32.mrf.mxu1  ;;  %v3496_v53 = vld [vmem:[%s5340_s0 + $0x3d0] sm:$0xff] }
 0x18b   :  { %2566 = vst.msk [vmem:[%s5342_s3 + $0x180] sm:$0xf] %vm2469_vm1, %v2309_v54  ;;  %v1400_v61 = vadd.f32 %v4276_v47, %v1399_v59  ;;  %v1560_v62 = vadd.f32 %v4276_v47, %v1559_v60 }
 0x18c   :  { %v2117_v63 = vmax.f32 %v1718_v57, 0.0  ;;  %v2181_v0 = vmax.f32 %v1878_v58, 0.0 }
 0x18d   :  { %v1990_v1 = vmax.f32 %v1400_v61, 0.0  ;;  %v2054_v2 = vmax.f32 %v1560_v62, 0.0 }
 0x18e   :  { %v2373_v3 = vpack.c.bf16 %v2117_v63, %v2117_v63  ;;  %v2437_v4 = vpack.c.bf16 %v2181_v0, %v2181_v0 }
 0x18f   :  { %v2246_v5 = vpack.c.bf16 %v1990_v1, %v1990_v1  ;;  %v2310_v6 = vpack.c.bf16 %v2054_v2, %v2054_v2 }
 0x190   :  { %2630 = vst.msk [vmem:[%s5342_s3 + $0x280] sm:$0xf] %vm2469_vm1, %v2373_v3 }
 0x191   :  { %2694 = vst.msk [vmem:[%s5342_s3 + $0x380] sm:$0xf] %vm2469_vm1, %v2437_v4  ;;  %v1719_v7 = vpop.f32.mrf.mxu2  ;;  %v1879_v8 = vpop.f32.mrf.mxu3 }
 0x192   :  { %2503 = vst.msk [vmem:[%s5342_s3 + $0x84] sm:$0xf] %vm2469_vm1, %v2246_v5  ;;  %v1720_v11 = vadd.f32 %v4276_v47, %v1719_v7  ;;  %v1880_v12 = vadd.f32 %v4276_v47, %v1879_v8  ;;  %v1402_v13 = vpop.f32.mrf.mxu0  ;;  %v1562_v14 = vpop.f32.mrf.mxu1 }
 0x193   :  { %2567 = vst.msk [vmem:[%s5342_s3 + $0x184] sm:$0xf] %vm2469_vm1, %v2310_v6  ;;  %v1403_v17 = vadd.f32 %v4276_v47, %v1402_v13  ;;  %v1563_v18 = vadd.f32 %v4276_v47, %v1562_v14 }
 0x194   :  { %v2118_v19 = vmax.f32 %v1720_v11, 0.0  ;;  %v2182_v20 = vmax.f32 %v1880_v12, 0.0 }
 0x195   :  { %v1991_v21 = vmax.f32 %v1403_v17, 0.0  ;;  %v2055_v22 = vmax.f32 %v1563_v18, 0.0  ;;  %3271 = vmatmul.msk.bf16.gmra.mxu0 %vm923_vm0, %v3399_v9  ;;  %3303 = vmatmul.msk.bf16.gmra.mxu1 %vm923_vm0, %v3431_v10  ;;  %v3401_v18 = vld [vmem:[%s5340_s0 + $0xd8] sm:$0xff] }
 0x196   :  { %v2374_v23 = vpack.c.bf16 %v2118_v19, %v2118_v19  ;;  %v2438_v24 = vpack.c.bf16 %v2182_v20, %v2182_v20  ;;  %3335 = vmatmul.msk.bf16.gmra.mxu2 %vm923_vm0, %v3463_v15  ;;  %3367 = vmatmul.msk.bf16.gmra.mxu3 %vm923_vm0, %v3495_v16  ;;  %v3433_v19 = vld [vmem:[%s5340_s0 + $0x1d8] sm:$0xff] }
 0x197   :  { %v2247_v25 = vpack.c.bf16 %v1991_v21, %v1991_v21  ;;  %v2311_v26 = vpack.c.bf16 %v2055_v22, %v2055_v22 }
 0x198   :  { %2631 = vst.msk [vmem:[%s5342_s3 + $0x284] sm:$0xf] %vm2469_vm1, %v2374_v23 }
 0x199   :  { %2695 = vst.msk [vmem:[%s5342_s3 + $0x384] sm:$0xf] %vm2469_vm1, %v2438_v24  ;;  %v1722_v27 = vpop.f32.mrf.mxu2  ;;  %v1882_v28 = vpop.f32.mrf.mxu3  ;;  %v3465_v24 = vld [vmem:[%s5340_s0 + $0x2d8] sm:$0xff] }
 0x19a   :  { %2504 = vst.msk [vmem:[%s5342_s3 + $0x88] sm:$0xf] %vm2469_vm1, %v2247_v25  ;;  %v1723_v29 = vadd.f32 %v4276_v47, %v1722_v27  ;;  %v1883_v30 = vadd.f32 %v4276_v47, %v1882_v28  ;;  %v1404_v31 = vpop.f32.mrf.mxu0  ;;  %v1564_v32 = vpop.f32.mrf.mxu1  ;;  %v3497_v25 = vld [vmem:[%s5340_s0 + $0x3d8] sm:$0xff] }
 0x19b   :  { %2568 = vst.msk [vmem:[%s5342_s3 + $0x188] sm:$0xf] %vm2469_vm1, %v2311_v26  ;;  %v1405_v34 = vadd.f32 %v4276_v47, %v1404_v31  ;;  %v1565_v35 = vadd.f32 %v4276_v47, %v1564_v32 }
 0x19c   :  { %v2119_v36 = vmax.f32 %v1723_v29, 0.0  ;;  %v2183_v37 = vmax.f32 %v1883_v30, 0.0 }
 0x19d   :  { %v1992_v38 = vmax.f32 %v1405_v34, 0.0  ;;  %v2056_v39 = vmax.f32 %v1565_v35, 0.0 }
 0x19e   :  { %v2375_v40 = vpack.c.bf16 %v2119_v36, %v2119_v36  ;;  %v2439_v41 = vpack.c.bf16 %v2183_v37, %v2183_v37 }
 0x19f   :  { %v2248_v42 = vpack.c.bf16 %v1992_v38, %v1992_v38  ;;  %v2312_v43 = vpack.c.bf16 %v2056_v39, %v2056_v39 }
 0x1a0   :  { %2632 = vst.msk [vmem:[%s5342_s3 + $0x288] sm:$0xf] %vm2469_vm1, %v2375_v40 }
 0x1a1   :  { %2696 = vst.msk [vmem:[%s5342_s3 + $0x388] sm:$0xf] %vm2469_vm1, %v2439_v41  ;;  %v1724_v44 = vpop.f32.mrf.mxu2  ;;  %v1884_v33 = vpop.f32.mrf.mxu3 }
 0x1a2   :  { %2505 = vst.msk [vmem:[%s5342_s3 + $0x8c] sm:$0xf] %vm2469_vm1, %v2248_v42  ;;  %v1725_v48 = vadd.f32 %v4276_v47, %v1724_v44  ;;  %v1885_v49 = vadd.f32 %v4276_v47, %v1884_v33  ;;  %v1407_v50 = vpop.f32.mrf.mxu0  ;;  %v1567_v51 = vpop.f32.mrf.mxu1 }
 0x1a3   :  { %2569 = vst.msk [vmem:[%s5342_s3 + $0x18c] sm:$0xf] %vm2469_vm1, %v2312_v43  ;;  %v1408_v54 = vadd.f32 %v4276_v47, %v1407_v50  ;;  %v1568_v55 = vadd.f32 %v4276_v47, %v1567_v51 }
 0x1a4   :  { %v2120_v56 = vmax.f32 %v1725_v48, 0.0  ;;  %v2184_v57 = vmax.f32 %v1885_v49, 0.0 }
 0x1a5   :  { %v1993_v58 = vmax.f32 %v1408_v54, 0.0  ;;  %v2057_v59 = vmax.f32 %v1568_v55, 0.0  ;;  %3272 = vmatmul.msk.bf16.gmra.mxu0 %vm923_vm0, %v3400_v45  ;;  %3304 = vmatmul.msk.bf16.gmra.mxu1 %vm923_vm0, %v3432_v46  ;;  %v3402_v55 = vld [vmem:[%s5340_s0 + $0xe0] sm:$0xff] }
 0x1a6   :  { %v2376_v60 = vpack.c.bf16 %v2120_v56, %v2120_v56  ;;  %v2440_v61 = vpack.c.bf16 %v2184_v57, %v2184_v57  ;;  %3336 = vmatmul.msk.bf16.gmra.mxu2 %vm923_vm0, %v3464_v52  ;;  %3368 = vmatmul.msk.bf16.gmra.mxu3 %vm923_vm0, %v3496_v53  ;;  %v3434_v56 = vld [vmem:[%s5340_s0 + $0x1e0] sm:$0xff] }
 0x1a7   :  { %v2249_v62 = vpack.c.bf16 %v1993_v58, %v1993_v58  ;;  %v2313_v63 = vpack.c.bf16 %v2057_v59, %v2057_v59 }
 0x1a8   :  { %2633 = vst.msk [vmem:[%s5342_s3 + $0x28c] sm:$0xf] %vm2469_vm1, %v2376_v60 }
 0x1a9   :  { %2697 = vst.msk [vmem:[%s5342_s3 + $0x38c] sm:$0xf] %vm2469_vm1, %v2440_v61  ;;  %v1727_v0 = vpop.f32.mrf.mxu2  ;;  %v1887_v1 = vpop.f32.mrf.mxu3  ;;  %v3466_v61 = vld [vmem:[%s5340_s0 + $0x2e0] sm:$0xff] }
 0x1aa   :  { %2506 = vst.msk [vmem:[%s5342_s3 + $0x90] sm:$0xf] %vm2469_vm1, %v2249_v62  ;;  %v1728_v2 = vadd.f32 %v4276_v47, %v1727_v0  ;;  %v1888_v3 = vadd.f32 %v4276_v47, %v1887_v1  ;;  %v1409_v4 = vpop.f32.mrf.mxu0  ;;  %v1569_v5 = vpop.f32.mrf.mxu1  ;;  %v3498_v62 = vld [vmem:[%s5340_s0 + $0x3e0] sm:$0xff] }
 0x1ab   :  { %2570 = vst.msk [vmem:[%s5342_s3 + $0x190] sm:$0xf] %vm2469_vm1, %v2313_v63  ;;  %v1410_v6 = vadd.f32 %v4276_v47, %v1409_v4  ;;  %v1570_v7 = vadd.f32 %v4276_v47, %v1569_v5 }
 0x1ac   :  { %v2121_v8 = vmax.f32 %v1728_v2, 0.0  ;;  %v2185_v9 = vmax.f32 %v1888_v3, 0.0 }
 0x1ad   :  { %v1994_v10 = vmax.f32 %v1410_v6, 0.0  ;;  %v2058_v11 = vmax.f32 %v1570_v7, 0.0 }
 0x1ae   :  { %v2377_v12 = vpack.c.bf16 %v2121_v8, %v2121_v8  ;;  %v2441_v13 = vpack.c.bf16 %v2185_v9, %v2185_v9 }
 0x1af   :  { %v2250_v14 = vpack.c.bf16 %v1994_v10, %v1994_v10  ;;  %v2314_v15 = vpack.c.bf16 %v2058_v11, %v2058_v11 }
 0x1b0   :  { %2634 = vst.msk [vmem:[%s5342_s3 + $0x290] sm:$0xf] %vm2469_vm1, %v2377_v12 }
 0x1b1   :  { %2698 = vst.msk [vmem:[%s5342_s3 + $0x390] sm:$0xf] %vm2469_vm1, %v2441_v13  ;;  %v1729_v16 = vpop.f32.mrf.mxu2  ;;  %v1889_v17 = vpop.f32.mrf.mxu3 }
 0x1b2   :  { %2507 = vst.msk [vmem:[%s5342_s3 + $0x94] sm:$0xf] %vm2469_vm1, %v2250_v14  ;;  %v1730_v20 = vadd.f32 %v4276_v47, %v1729_v16  ;;  %v1890_v21 = vadd.f32 %v4276_v47, %v1889_v17  ;;  %v1412_v22 = vpop.f32.mrf.mxu0  ;;  %v1572_v23 = vpop.f32.mrf.mxu1 }
 0x1b3   :  { %2571 = vst.msk [vmem:[%s5342_s3 + $0x194] sm:$0xf] %vm2469_vm1, %v2314_v15  ;;  %v1413_v26 = vadd.f32 %v4276_v47, %v1412_v22  ;;  %v1573_v27 = vadd.f32 %v4276_v47, %v1572_v23 }
 0x1b4   :  { %v2122_v28 = vmax.f32 %v1730_v20, 0.0  ;;  %v2186_v29 = vmax.f32 %v1890_v21, 0.0 }
 0x1b5   :  { %v1995_v30 = vmax.f32 %v1413_v26, 0.0  ;;  %v2059_v31 = vmax.f32 %v1573_v27, 0.0  ;;  %3273 = vmatmul.msk.bf16.gmra.mxu0 %vm923_vm0, %v3401_v18  ;;  %3305 = vmatmul.msk.bf16.gmra.mxu1 %vm923_vm0, %v3433_v19  ;;  %v3403_v27 = vld [vmem:[%s5340_s0 + $0xe8] sm:$0xff] }
 0x1b6   :  { %v2378_v32 = vpack.c.bf16 %v2122_v28, %v2122_v28  ;;  %v2442_v34 = vpack.c.bf16 %v2186_v29, %v2186_v29  ;;  %3337 = vmatmul.msk.bf16.gmra.mxu2 %vm923_vm0, %v3465_v24  ;;  %3369 = vmatmul.msk.bf16.gmra.mxu3 %vm923_vm0, %v3497_v25  ;;  %v3435_v28 = vld [vmem:[%s5340_s0 + $0x1e8] sm:$0xff] }
 0x1b7   :  { %v2251_v35 = vpack.c.bf16 %v1995_v30, %v1995_v30  ;;  %v2315_v36 = vpack.c.bf16 %v2059_v31, %v2059_v31 }
 0x1b8   :  { %2635 = vst.msk [vmem:[%s5342_s3 + $0x294] sm:$0xf] %vm2469_vm1, %v2378_v32 }
 0x1b9   :  { %2699 = vst.msk [vmem:[%s5342_s3 + $0x394] sm:$0xf] %vm2469_vm1, %v2442_v34  ;;  %v1732_v37 = vpop.f32.mrf.mxu2  ;;  %v1892_v38 = vpop.f32.mrf.mxu3  ;;  %v3467_v34 = vld [vmem:[%s5340_s0 + $0x2e8] sm:$0xff] }
 0x1ba   :  { %2508 = vst.msk [vmem:[%s5342_s3 + $0x98] sm:$0xf] %vm2469_vm1, %v2251_v35  ;;  %v1733_v39 = vadd.f32 %v4276_v47, %v1732_v37  ;;  %v1893_v40 = vadd.f32 %v4276_v47, %v1892_v38  ;;  %v1414_v41 = vpop.f32.mrf.mxu0  ;;  %v1574_v42 = vpop.f32.mrf.mxu1  ;;  %v3499_v35 = vld [vmem:[%s5340_s0 + $0x3e8] sm:$0xff] }
 0x1bb   :  { %2572 = vst.msk [vmem:[%s5342_s3 + $0x198] sm:$0xf] %vm2469_vm1, %v2315_v36  ;;  %v1415_v43 = vadd.f32 %v4276_v47, %v1414_v41  ;;  %v1575_v44 = vadd.f32 %v4276_v47, %v1574_v42 }
 0x1bc   :  { %v2123_v33 = vmax.f32 %v1733_v39, 0.0  ;;  %v2187_v45 = vmax.f32 %v1893_v40, 0.0 }
 0x1bd   :  { %v1996_v46 = vmax.f32 %v1415_v43, 0.0  ;;  %v2060_v48 = vmax.f32 %v1575_v44, 0.0 }
 0x1be   :  { %v2379_v49 = vpack.c.bf16 %v2123_v33, %v2123_v33  ;;  %v2443_v50 = vpack.c.bf16 %v2187_v45, %v2187_v45 }
 0x1bf   :  { %v2252_v51 = vpack.c.bf16 %v1996_v46, %v1996_v46  ;;  %v2316_v52 = vpack.c.bf16 %v2060_v48, %v2060_v48 }
 0x1c0   :  { %2636 = vst.msk [vmem:[%s5342_s3 + $0x298] sm:$0xf] %vm2469_vm1, %v2379_v49 }
 0x1c1   :  { %2700 = vst.msk [vmem:[%s5342_s3 + $0x398] sm:$0xf] %vm2469_vm1, %v2443_v50  ;;  %v1734_v53 = vpop.f32.mrf.mxu2  ;;  %v1894_v54 = vpop.f32.mrf.mxu3 }
 0x1c2   :  { %2509 = vst.msk [vmem:[%s5342_s3 + $0x9c] sm:$0xf] %vm2469_vm1, %v2252_v51  ;;  %v1735_v57 = vadd.f32 %v4276_v47, %v1734_v53  ;;  %v1895_v58 = vadd.f32 %v4276_v47, %v1894_v54  ;;  %v1417_v59 = vpop.f32.mrf.mxu0  ;;  %v1577_v60 = vpop.f32.mrf.mxu1  ;;  %v4878_v53 = vld [vmem:[%s5341_s2] ss:$0 sm:$0xff] }
 0x1c3   :  { %2573 = vst.msk [vmem:[%s5342_s3 + $0x19c] sm:$0xf] %vm2469_vm1, %v2316_v52  ;;  %v1418_v63 = vadd.f32 %v4276_v47, %v1417_v59  ;;  %v1578_v0 = vadd.f32 %v4276_v47, %v1577_v60 }
 0x1c4   :  { %v2124_v1 = vmax.f32 %v1735_v57, 0.0  ;;  %v2188_v2 = vmax.f32 %v1895_v58, 0.0 }
 0x1c5   :  { %v1997_v3 = vmax.f32 %v1418_v63, 0.0  ;;  %v2061_v4 = vmax.f32 %v1578_v0, 0.0  ;;  %3274 = vmatmul.msk.bf16.gmra.mxu0 %vm923_vm0, %v3402_v55  ;;  %3306 = vmatmul.msk.bf16.gmra.mxu1 %vm923_vm0, %v3434_v56  ;;  %v3404_v0 = vld [vmem:[%s5340_s0 + $0xf0] sm:$0xff] }
 0x1c6   :  { %v2380_v5 = vpack.c.bf16 %v2124_v1, %v2124_v1  ;;  %v2444_v6 = vpack.c.bf16 %v2188_v2, %v2188_v2  ;;  %3338 = vmatmul.msk.bf16.gmra.mxu2 %vm923_vm0, %v3466_v61  ;;  %3370 = vmatmul.msk.bf16.gmra.mxu3 %vm923_vm0, %v3498_v62  ;;  %v3436_v1 = vld [vmem:[%s5340_s0 + $0x1f0] sm:$0xff] }
 0x1c7   :  { %v2253_v7 = vpack.c.bf16 %v1997_v3, %v1997_v3  ;;  %v2317_v8 = vpack.c.bf16 %v2061_v4, %v2061_v4 }
 0x1c8   :  { %2637 = vst.msk [vmem:[%s5342_s3 + $0x29c] sm:$0xf] %vm2469_vm1, %v2380_v5 }
 0x1c9   :  { %2701 = vst.msk [vmem:[%s5342_s3 + $0x39c] sm:$0xf] %vm2469_vm1, %v2444_v6  ;;  %v1737_v9 = vpop.f32.mrf.mxu2  ;;  %v1897_v10 = vpop.f32.mrf.mxu3  ;;  %v3468_v6 = vld [vmem:[%s5340_s0 + $0x2f0] sm:$0xff] }
 0x1ca   :  { %2510 = vst.msk [vmem:[%s5342_s3 + $0xa0] sm:$0xf] %vm2469_vm1, %v2253_v7  ;;  %v1738_v11 = vadd.f32 %v4276_v47, %v1737_v9  ;;  %v1898_v12 = vadd.f32 %v4276_v47, %v1897_v10  ;;  %v1419_v13 = vpop.f32.mrf.mxu0  ;;  %v1579_v14 = vpop.f32.mrf.mxu1  ;;  %v3500_v7 = vld [vmem:[%s5340_s0 + $0x3f0] sm:$0xff] }
 0x1cb   :  { %2574 = vst.msk [vmem:[%s5342_s3 + $0x1a0] sm:$0xf] %vm2469_vm1, %v2317_v8  ;;  %v1420_v15 = vadd.f32 %v4276_v47, %v1419_v13  ;;  %v1580_v16 = vadd.f32 %v4276_v47, %v1579_v14 }
 0x1cc   :  { %v2125_v17 = vmax.f32 %v1738_v11, 0.0  ;;  %v2189_v18 = vmax.f32 %v1898_v12, 0.0 }
 0x1cd   :  { %v1998_v19 = vmax.f32 %v1420_v15, 0.0  ;;  %v2062_v20 = vmax.f32 %v1580_v16, 0.0 }
 0x1ce   :  { %v2381_v21 = vpack.c.bf16 %v2125_v17, %v2125_v17  ;;  %v2445_v22 = vpack.c.bf16 %v2189_v18, %v2189_v18 }
 0x1cf   :  { %v2254_v23 = vpack.c.bf16 %v1998_v19, %v1998_v19  ;;  %v2318_v24 = vpack.c.bf16 %v2062_v20, %v2062_v20 }
 0x1d0   :  { %2638 = vst.msk [vmem:[%s5342_s3 + $0x2a0] sm:$0xf] %vm2469_vm1, %v2381_v21 }
 0x1d1   :  { %2702 = vst.msk [vmem:[%s5342_s3 + $0x3a0] sm:$0xf] %vm2469_vm1, %v2445_v22  ;;  %v1739_v25 = vpop.f32.mrf.mxu2  ;;  %v1899_v26 = vpop.f32.mrf.mxu3 }
 0x1d2   :  { %2511 = vst.msk [vmem:[%s5342_s3 + $0xa4] sm:$0xf] %vm2469_vm1, %v2254_v23  ;;  %v1740_v29 = vadd.f32 %v4276_v47, %v1739_v25  ;;  %v1900_v30 = vadd.f32 %v4276_v47, %v1899_v26  ;;  %v1422_v31 = vpop.f32.mrf.mxu0  ;;  %v1582_v32 = vpop.f32.mrf.mxu1 }
 0x1d3   :  { %2575 = vst.msk [vmem:[%s5342_s3 + $0x1a4] sm:$0xf] %vm2469_vm1, %v2318_v24  ;;  %v1423_v36 = vadd.f32 %v4276_v47, %v1422_v31  ;;  %v1583_v37 = vadd.f32 %v4276_v47, %v1582_v32 }
 0x1d4   :  { %v2126_v38 = vmax.f32 %v1740_v29, 0.0  ;;  %v2190_v39 = vmax.f32 %v1900_v30, 0.0 }
 0x1d5   :  { %v1999_v40 = vmax.f32 %v1423_v36, 0.0  ;;  %v2063_v41 = vmax.f32 %v1583_v37, 0.0  ;;  %3275 = vmatmul.msk.bf16.gmra.mxu0 %vm923_vm0, %v3403_v27  ;;  %3307 = vmatmul.msk.bf16.gmra.mxu1 %vm923_vm0, %v3435_v28  ;;  %v3405_v37 = vld [vmem:[%s5340_s0 + $0xf8] sm:$0xff] }
 0x1d6   :  { %v2382_v42 = vpack.c.bf16 %v2126_v38, %v2126_v38  ;;  %v2446_v43 = vpack.c.bf16 %v2190_v39, %v2190_v39  ;;  %3339 = vmatmul.msk.bf16.gmra.mxu2 %vm923_vm0, %v3467_v34  ;;  %3371 = vmatmul.msk.bf16.gmra.mxu3 %vm923_vm0, %v3499_v35  ;;  %v3437_v38 = vld [vmem:[%s5340_s0 + $0x1f8] sm:$0xff] }
 0x1d7   :  { %v2255_v44 = vpack.c.bf16 %v1999_v40, %v1999_v40  ;;  %v2319_v33 = vpack.c.bf16 %v2063_v41, %v2063_v41 }
 0x1d8   :  { %2639 = vst.msk [vmem:[%s5342_s3 + $0x2a4] sm:$0xf] %vm2469_vm1, %v2382_v42 }
 0x1d9   :  { %2703 = vst.msk [vmem:[%s5342_s3 + $0x3a4] sm:$0xf] %vm2469_vm1, %v2446_v43  ;;  %v1742_v45 = vpop.f32.mrf.mxu2  ;;  %v1902_v46 = vpop.f32.mrf.mxu3  ;;  %v3469_v43 = vld [vmem:[%s5340_s0 + $0x2f8] sm:$0xff] }
 0x1da   :  { %2512 = vst.msk [vmem:[%s5342_s3 + $0xa8] sm:$0xf] %vm2469_vm1, %v2255_v44  ;;  %v1743_v48 = vadd.f32 %v4276_v47, %v1742_v45  ;;  %v1903_v49 = vadd.f32 %v4276_v47, %v1902_v46  ;;  %v1424_v50 = vpop.f32.mrf.mxu0  ;;  %v1584_v51 = vpop.f32.mrf.mxu1  ;;  %v3501_v44 = vld [vmem:[%s5340_s0 + $0x3f8] sm:$0xff] }
 0x1db   :  { %2576 = vst.msk [vmem:[%s5342_s3 + $0x1a8] sm:$0xf] %vm2469_vm1, %v2319_v33  ;;  %v1425_v52 = vadd.f32 %v4276_v47, %v1424_v50  ;;  %v1585_v54 = vadd.f32 %v4878_v53, %v1584_v51 }
 0x1dc   :  { %v2127_v55 = vmax.f32 %v1743_v48, 0.0  ;;  %v2191_v56 = vmax.f32 %v1903_v49, 0.0 }
 0x1dd   :  { %v2000_v57 = vmax.f32 %v1425_v52, 0.0  ;;  %v2064_v58 = vmax.f32 %v1585_v54, 0.0 }
 0x1de   :  { %v2383_v59 = vpack.c.bf16 %v2127_v55, %v2127_v55  ;;  %v2447_v60 = vpack.c.bf16 %v2191_v56, %v2191_v56 }
 0x1df   :  { %v2256_v61 = vpack.c.bf16 %v2000_v57, %v2000_v57  ;;  %v2320_v62 = vpack.c.bf16 %v2064_v58, %v2064_v58 }
 0x1e0   :  { %2640 = vst.msk [vmem:[%s5342_s3 + $0x2a8] sm:$0xf] %vm2469_vm1, %v2383_v59 }
 0x1e1   :  { %2704 = vst.msk [vmem:[%s5342_s3 + $0x3a8] sm:$0xf] %vm2469_vm1, %v2447_v60  ;;  %v1744_v47 = vpop.f32.mrf.mxu2  ;;  %v1904_v63 = vpop.f32.mrf.mxu3 }
 0x1e2   :  { %2513 = vst.msk [vmem:[%s5342_s3 + $0xac] sm:$0xf] %vm2469_vm1, %v2256_v61  ;;  %v1745_v2 = vadd.f32 %v4878_v53, %v1744_v47  ;;  %v1905_v3 = vadd.f32 %v4878_v53, %v1904_v63  ;;  %v1427_v4 = vpop.f32.mrf.mxu0  ;;  %v1587_v5 = vpop.f32.mrf.mxu1 }
 0x1e3   :  { %2577 = vst.msk [vmem:[%s5342_s3 + $0x1ac] sm:$0xf] %vm2469_vm1, %v2320_v62  ;;  %v1428_v8 = vadd.f32 %v4878_v53, %v1427_v4  ;;  %v1588_v9 = vadd.f32 %v4878_v53, %v1587_v5 }
 0x1e4   :  { %v2128_v10 = vmax.f32 %v1745_v2, 0.0  ;;  %v2192_v11 = vmax.f32 %v1905_v3, 0.0 }
 0x1e5   :  { %v2001_v12 = vmax.f32 %v1428_v8, 0.0  ;;  %v2065_v13 = vmax.f32 %v1588_v9, 0.0  ;;  %3276 = vmatmul.msk.bf16.gmra.mxu0 %vm923_vm0, %v3404_v0  ;;  %3308 = vmatmul.msk.bf16.gmra.mxu1 %vm923_vm0, %v3436_v1 }
 0x1e6   :  { %v2384_v14 = vpack.c.bf16 %v2128_v10, %v2128_v10  ;;  %v2448_v15 = vpack.c.bf16 %v2192_v11, %v2192_v11  ;;  %3340 = vmatmul.msk.bf16.gmra.mxu2 %vm923_vm0, %v3468_v6  ;;  %3372 = vmatmul.msk.bf16.gmra.mxu3 %vm923_vm0, %v3500_v7 }
 0x1e7   :  { %v2257_v16 = vpack.c.bf16 %v2001_v12, %v2001_v12  ;;  %v2321_v17 = vpack.c.bf16 %v2065_v13, %v2065_v13 }
 0x1e8   :  { %2641 = vst.msk [vmem:[%s5342_s3 + $0x2ac] sm:$0xf] %vm2469_vm1, %v2384_v14 }
 0x1e9   :  { %2705 = vst.msk [vmem:[%s5342_s3 + $0x3ac] sm:$0xf] %vm2469_vm1, %v2448_v15  ;;  %v1747_v18 = vpop.f32.mrf.mxu2  ;;  %v1907_v19 = vpop.f32.mrf.mxu3 }
 0x1ea   :  { %2514 = vst.msk [vmem:[%s5342_s3 + $0xb0] sm:$0xf] %vm2469_vm1, %v2257_v16  ;;  %v1748_v20 = vadd.f32 %v4878_v53, %v1747_v18  ;;  %v1908_v21 = vadd.f32 %v4878_v53, %v1907_v19  ;;  %v1429_v22 = vpop.f32.mrf.mxu0  ;;  %v1589_v23 = vpop.f32.mrf.mxu1 }
 0x1eb   :  { %2578 = vst.msk [vmem:[%s5342_s3 + $0x1b0] sm:$0xf] %vm2469_vm1, %v2321_v17  ;;  %v1430_v24 = vadd.f32 %v4878_v53, %v1429_v22  ;;  %v1590_v25 = vadd.f32 %v4878_v53, %v1589_v23 }
 0x1ec   :  { %v2129_v26 = vmax.f32 %v1748_v20, 0.0  ;;  %v2193_v27 = vmax.f32 %v1908_v21, 0.0 }
 0x1ed   :  { %v2002_v28 = vmax.f32 %v1430_v24, 0.0  ;;  %v2066_v29 = vmax.f32 %v1590_v25, 0.0 }
 0x1ee   :  { %v2385_v30 = vpack.c.bf16 %v2129_v26, %v2129_v26  ;;  %v2449_v31 = vpack.c.bf16 %v2193_v27, %v2193_v27 }
 0x1ef   :  { %v2258_v32 = vpack.c.bf16 %v2002_v28, %v2002_v28  ;;  %v2322_v34 = vpack.c.bf16 %v2066_v29, %v2066_v29 }
 0x1f0   :  { %2642 = vst.msk [vmem:[%s5342_s3 + $0x2b0] sm:$0xf] %vm2469_vm1, %v2385_v30 }
 0x1f1   :  { %2706 = vst.msk [vmem:[%s5342_s3 + $0x3b0] sm:$0xf] %vm2469_vm1, %v2449_v31  ;;  %v1749_v35 = vpop.f32.mrf.mxu2  ;;  %v1909_v36 = vpop.f32.mrf.mxu3 }
 0x1f2   :  { %2515 = vst.msk [vmem:[%s5342_s3 + $0xb4] sm:$0xf] %vm2469_vm1, %v2258_v32  ;;  %v1750_v39 = vadd.f32 %v4878_v53, %v1749_v35  ;;  %v1910_v40 = vadd.f32 %v4878_v53, %v1909_v36  ;;  %v1432_v41 = vpop.f32.mrf.mxu0  ;;  %v1592_v42 = vpop.f32.mrf.mxu1 }
 0x1f3   :  { %2579 = vst.msk [vmem:[%s5342_s3 + $0x1b4] sm:$0xf] %vm2469_vm1, %v2322_v34  ;;  %v1433_v33 = vadd.f32 %v4878_v53, %v1432_v41  ;;  %v1593_v45 = vadd.f32 %v4878_v53, %v1592_v42 }
 0x1f4   :  { %v2130_v46 = vmax.f32 %v1750_v39, 0.0  ;;  %v2194_v48 = vmax.f32 %v1910_v40, 0.0 }
 0x1f5   :  { %v2003_v49 = vmax.f32 %v1433_v33, 0.0  ;;  %v2067_v50 = vmax.f32 %v1593_v45, 0.0  ;;  %3277 = vmatmul.msk.bf16.gmra.mxu0 %vm923_vm0, %v3405_v37  ;;  %3309 = vmatmul.msk.bf16.gmra.mxu1 %vm923_vm0, %v3437_v38 }
 0x1f6   :  { %v2386_v51 = vpack.c.bf16 %v2130_v46, %v2130_v46  ;;  %v2450_v52 = vpack.c.bf16 %v2194_v48, %v2194_v48  ;;  %3341 = vmatmul.msk.bf16.gmra.mxu2 %vm923_vm0, %v3469_v43  ;;  %3373 = vmatmul.msk.bf16.gmra.mxu3 %vm923_vm0, %v3501_v44 }
 0x1f7   :  { %v2259_v54 = vpack.c.bf16 %v2003_v49, %v2003_v49  ;;  %v2323_v55 = vpack.c.bf16 %v2067_v50, %v2067_v50 }
 0x1f8   :  { %2643 = vst.msk [vmem:[%s5342_s3 + $0x2b4] sm:$0xf] %vm2469_vm1, %v2386_v51 }
 0x1f9   :  { %2707 = vst.msk [vmem:[%s5342_s3 + $0x3b4] sm:$0xf] %vm2469_vm1, %v2450_v52  ;;  %v1752_v56 = vpop.f32.mrf.mxu2  ;;  %v1912_v57 = vpop.f32.mrf.mxu3 }
 0x1fa   :  { %2516 = vst.msk [vmem:[%s5342_s3 + $0xb8] sm:$0xf] %vm2469_vm1, %v2259_v54  ;;  %v1753_v58 = vadd.f32 %v4878_v53, %v1752_v56  ;;  %v1913_v59 = vadd.f32 %v4878_v53, %v1912_v57  ;;  %v1434_v60 = vpop.f32.mrf.mxu0  ;;  %v1594_v61 = vpop.f32.mrf.mxu1 }
 0x1fb   :  { %2580 = vst.msk [vmem:[%s5342_s3 + $0x1b8] sm:$0xf] %vm2469_vm1, %v2323_v55  ;;  %v1435_v62 = vadd.f32 %v4878_v53, %v1434_v60  ;;  %v1595_v47 = vadd.f32 %v4878_v53, %v1594_v61 }
 0x1fc   :  { %v2131_v63 = vmax.f32 %v1753_v58, 0.0  ;;  %v2195_v0 = vmax.f32 %v1913_v59, 0.0 }
 0x1fd   :  { %v2004_v1 = vmax.f32 %v1435_v62, 0.0  ;;  %v2068_v2 = vmax.f32 %v1595_v47, 0.0 }
 0x1fe   :  { %v2387_v3 = vpack.c.bf16 %v2131_v63, %v2131_v63  ;;  %v2451_v4 = vpack.c.bf16 %v2195_v0, %v2195_v0 }
 0x1ff   :  { %v2260_v5 = vpack.c.bf16 %v2004_v1, %v2004_v1  ;;  %v2324_v6 = vpack.c.bf16 %v2068_v2, %v2068_v2 }
 0x200   :  { %2644 = vst.msk [vmem:[%s5342_s3 + $0x2b8] sm:$0xf] %vm2469_vm1, %v2387_v3 }
 0x201   :  { %2708 = vst.msk [vmem:[%s5342_s3 + $0x3b8] sm:$0xf] %vm2469_vm1, %v2451_v4  ;;  %v1754_v7 = vpop.f32.mrf.mxu2  ;;  %v1914_v8 = vpop.f32.mrf.mxu3 }
 0x202   :  { %2517 = vst.msk [vmem:[%s5342_s3 + $0xbc] sm:$0xf] %vm2469_vm1, %v2260_v5  ;;  %v1755_v9 = vadd.f32 %v4878_v53, %v1754_v7  ;;  %v1915_v10 = vadd.f32 %v4878_v53, %v1914_v8  ;;  %v1437_v11 = vpop.f32.mrf.mxu0  ;;  %v1597_v12 = vpop.f32.mrf.mxu1 }
 0x203   :  { %2581 = vst.msk [vmem:[%s5342_s3 + $0x1bc] sm:$0xf] %vm2469_vm1, %v2324_v6  ;;  %v1438_v13 = vadd.f32 %v4878_v53, %v1437_v11  ;;  %v1598_v14 = vadd.f32 %v4878_v53, %v1597_v12 }
 0x204   :  { %v2132_v15 = vmax.f32 %v1755_v9, 0.0  ;;  %v2196_v16 = vmax.f32 %v1915_v10, 0.0 }
 0x205   :  { %v2005_v17 = vmax.f32 %v1438_v13, 0.0  ;;  %v2069_v18 = vmax.f32 %v1598_v14, 0.0 }
 0x206   :  { %v2388_v19 = vpack.c.bf16 %v2132_v15, %v2132_v15  ;;  %v2452_v20 = vpack.c.bf16 %v2196_v16, %v2196_v16 }
 0x207   :  { %v2261_v21 = vpack.c.bf16 %v2005_v17, %v2005_v17  ;;  %v2325_v22 = vpack.c.bf16 %v2069_v18, %v2069_v18 }
 0x208   :  { %2645 = vst.msk [vmem:[%s5342_s3 + $0x2bc] sm:$0xf] %vm2469_vm1, %v2388_v19 }
 0x209   :  { %2709 = vst.msk [vmem:[%s5342_s3 + $0x3bc] sm:$0xf] %vm2469_vm1, %v2452_v20  ;;  %v1757_v23 = vpop.f32.mrf.mxu2  ;;  %v1917_v24 = vpop.f32.mrf.mxu3 }
 0x20a   :  { %2518 = vst.msk [vmem:[%s5342_s3 + $0xc0] sm:$0xf] %vm2469_vm1, %v2261_v21  ;;  %v1758_v25 = vadd.f32 %v4878_v53, %v1757_v23  ;;  %v1918_v26 = vadd.f32 %v4878_v53, %v1917_v24  ;;  %v1439_v27 = vpop.f32.mrf.mxu0  ;;  %v1599_v28 = vpop.f32.mrf.mxu1 }
 0x20b   :  { %2582 = vst.msk [vmem:[%s5342_s3 + $0x1c0] sm:$0xf] %vm2469_vm1, %v2325_v22  ;;  %v1440_v29 = vadd.f32 %v4878_v53, %v1439_v27  ;;  %v1600_v30 = vadd.f32 %v4878_v53, %v1599_v28 }
 0x20c   :  { %v2133_v31 = vmax.f32 %v1758_v25, 0.0  ;;  %v2197_v32 = vmax.f32 %v1918_v26, 0.0 }
 0x20d   :  { %v2006_v34 = vmax.f32 %v1440_v29, 0.0  ;;  %v2070_v35 = vmax.f32 %v1600_v30, 0.0 }
 0x20e   :  { %v2389_v36 = vpack.c.bf16 %v2133_v31, %v2133_v31  ;;  %v2453_v37 = vpack.c.bf16 %v2197_v32, %v2197_v32 }
 0x20f   :  { %v2262_v38 = vpack.c.bf16 %v2006_v34, %v2006_v34  ;;  %v2326_v39 = vpack.c.bf16 %v2070_v35, %v2070_v35 }
 0x210   :  { %2646 = vst.msk [vmem:[%s5342_s3 + $0x2c0] sm:$0xf] %vm2469_vm1, %v2389_v36 }
 0x211   :  { %2710 = vst.msk [vmem:[%s5342_s3 + $0x3c0] sm:$0xf] %vm2469_vm1, %v2453_v37  ;;  %v1759_v40 = vpop.f32.mrf.mxu2  ;;  %v1919_v41 = vpop.f32.mrf.mxu3 }
 0x212   :  { %2519 = vst.msk [vmem:[%s5342_s3 + $0xc4] sm:$0xf] %vm2469_vm1, %v2262_v38  ;;  %v1760_v42 = vadd.f32 %v4878_v53, %v1759_v40  ;;  %v1920_v43 = vadd.f32 %v4878_v53, %v1919_v41  ;;  %v1442_v44 = vpop.f32.mrf.mxu0  ;;  %v1602_v33 = vpop.f32.mrf.mxu1 }
 0x213   :  { %2583 = vst.msk [vmem:[%s5342_s3 + $0x1c4] sm:$0xf] %vm2469_vm1, %v2326_v39  ;;  %v1443_v45 = vadd.f32 %v4878_v53, %v1442_v44  ;;  %v1603_v46 = vadd.f32 %v4878_v53, %v1602_v33 }
 0x214   :  { %v2134_v48 = vmax.f32 %v1760_v42, 0.0  ;;  %v2198_v49 = vmax.f32 %v1920_v43, 0.0 }
 0x215   :  { %v2007_v50 = vmax.f32 %v1443_v45, 0.0  ;;  %v2071_v51 = vmax.f32 %v1603_v46, 0.0 }
 0x216   :  { %v2390_v52 = vpack.c.bf16 %v2134_v48, %v2134_v48  ;;  %v2454_v54 = vpack.c.bf16 %v2198_v49, %v2198_v49 }
 0x217   :  { %v2263_v55 = vpack.c.bf16 %v2007_v50, %v2007_v50  ;;  %v2327_v56 = vpack.c.bf16 %v2071_v51, %v2071_v51 }
 0x218   :  { %2647 = vst.msk [vmem:[%s5342_s3 + $0x2c4] sm:$0xf] %vm2469_vm1, %v2390_v52 }
 0x219   :  { %2711 = vst.msk [vmem:[%s5342_s3 + $0x3c4] sm:$0xf] %vm2469_vm1, %v2454_v54  ;;  %v1762_v57 = vpop.f32.mrf.mxu2  ;;  %v1922_v58 = vpop.f32.mrf.mxu3 }
 0x21a   :  { %2520 = vst.msk [vmem:[%s5342_s3 + $0xc8] sm:$0xf] %vm2469_vm1, %v2263_v55  ;;  %v1763_v59 = vadd.f32 %v4878_v53, %v1762_v57  ;;  %v1923_v60 = vadd.f32 %v4878_v53, %v1922_v58  ;;  %v1444_v61 = vpop.f32.mrf.mxu0  ;;  %v1604_v62 = vpop.f32.mrf.mxu1 }
 0x21b   :  { %2584 = vst.msk [vmem:[%s5342_s3 + $0x1c8] sm:$0xf] %vm2469_vm1, %v2327_v56  ;;  %v1445_v47 = vadd.f32 %v4878_v53, %v1444_v61  ;;  %v1605_v63 = vadd.f32 %v4878_v53, %v1604_v62 }
 0x21c   :  { %v2135_v0 = vmax.f32 %v1763_v59, 0.0  ;;  %v2199_v1 = vmax.f32 %v1923_v60, 0.0 }
 0x21d   :  { %v2008_v2 = vmax.f32 %v1445_v47, 0.0  ;;  %v2072_v3 = vmax.f32 %v1605_v63, 0.0 }
 0x21e   :  { %v2391_v4 = vpack.c.bf16 %v2135_v0, %v2135_v0  ;;  %v2455_v5 = vpack.c.bf16 %v2199_v1, %v2199_v1 }
 0x21f   :  { %v2264_v6 = vpack.c.bf16 %v2008_v2, %v2008_v2  ;;  %v2328_v7 = vpack.c.bf16 %v2072_v3, %v2072_v3 }
 0x220   :  { %2648 = vst.msk [vmem:[%s5342_s3 + $0x2c8] sm:$0xf] %vm2469_vm1, %v2391_v4 }
 0x221   :  { %2712 = vst.msk [vmem:[%s5342_s3 + $0x3c8] sm:$0xf] %vm2469_vm1, %v2455_v5  ;;  %v1764_v8 = vpop.f32.mrf.mxu2  ;;  %v1924_v9 = vpop.f32.mrf.mxu3 }
 0x222   :  { %2521 = vst.msk [vmem:[%s5342_s3 + $0xcc] sm:$0xf] %vm2469_vm1, %v2264_v6  ;;  %v1765_v10 = vadd.f32 %v4878_v53, %v1764_v8  ;;  %v1925_v11 = vadd.f32 %v4878_v53, %v1924_v9  ;;  %v1447_v12 = vpop.f32.mrf.mxu0  ;;  %v1607_v13 = vpop.f32.mrf.mxu1 }
 0x223   :  { %2585 = vst.msk [vmem:[%s5342_s3 + $0x1cc] sm:$0xf] %vm2469_vm1, %v2328_v7  ;;  %v1448_v14 = vadd.f32 %v4878_v53, %v1447_v12  ;;  %v1608_v15 = vadd.f32 %v4878_v53, %v1607_v13 }
 0x224   :  { %v2136_v16 = vmax.f32 %v1765_v10, 0.0  ;;  %v2200_v17 = vmax.f32 %v1925_v11, 0.0 }
 0x225   :  { %v2009_v18 = vmax.f32 %v1448_v14, 0.0  ;;  %v2073_v19 = vmax.f32 %v1608_v15, 0.0 }
 0x226   :  { %v2392_v20 = vpack.c.bf16 %v2136_v16, %v2136_v16  ;;  %v2456_v21 = vpack.c.bf16 %v2200_v17, %v2200_v17 }
 0x227   :  { %v2265_v22 = vpack.c.bf16 %v2009_v18, %v2009_v18  ;;  %v2329_v23 = vpack.c.bf16 %v2073_v19, %v2073_v19 }
 0x228   :  { %2649 = vst.msk [vmem:[%s5342_s3 + $0x2cc] sm:$0xf] %vm2469_vm1, %v2392_v20 }
 0x229   :  { %2713 = vst.msk [vmem:[%s5342_s3 + $0x3cc] sm:$0xf] %vm2469_vm1, %v2456_v21  ;;  %v1767_v24 = vpop.f32.mrf.mxu2  ;;  %v1927_v25 = vpop.f32.mrf.mxu3 }
 0x22a   :  { %2522 = vst.msk [vmem:[%s5342_s3 + $0xd0] sm:$0xf] %vm2469_vm1, %v2265_v22  ;;  %v1768_v26 = vadd.f32 %v4878_v53, %v1767_v24  ;;  %v1928_v27 = vadd.f32 %v4878_v53, %v1927_v25  ;;  %v1449_v28 = vpop.f32.mrf.mxu0  ;;  %v1609_v29 = vpop.f32.mrf.mxu1 }
 0x22b   :  { %2586 = vst.msk [vmem:[%s5342_s3 + $0x1d0] sm:$0xf] %vm2469_vm1, %v2329_v23  ;;  %v1450_v30 = vadd.f32 %v4878_v53, %v1449_v28  ;;  %v1610_v31 = vadd.f32 %v4878_v53, %v1609_v29 }
 0x22c   :  { %v2137_v32 = vmax.f32 %v1768_v26, 0.0  ;;  %v2201_v34 = vmax.f32 %v1928_v27, 0.0 }
 0x22d   :  { %v2010_v35 = vmax.f32 %v1450_v30, 0.0  ;;  %v2074_v36 = vmax.f32 %v1610_v31, 0.0 }
 0x22e   :  { %v2393_v37 = vpack.c.bf16 %v2137_v32, %v2137_v32  ;;  %v2457_v38 = vpack.c.bf16 %v2201_v34, %v2201_v34 }
 0x22f   :  { %v2266_v39 = vpack.c.bf16 %v2010_v35, %v2010_v35  ;;  %v2330_v40 = vpack.c.bf16 %v2074_v36, %v2074_v36 }
 0x230   :  { %2650 = vst.msk [vmem:[%s5342_s3 + $0x2d0] sm:$0xf] %vm2469_vm1, %v2393_v37 }
 0x231   :  { %2714 = vst.msk [vmem:[%s5342_s3 + $0x3d0] sm:$0xf] %vm2469_vm1, %v2457_v38  ;;  %v1769_v41 = vpop.f32.mrf.mxu2  ;;  %v1929_v42 = vpop.f32.mrf.mxu3 }
 0x232   :  { %2523 = vst.msk [vmem:[%s5342_s3 + $0xd4] sm:$0xf] %vm2469_vm1, %v2266_v39  ;;  %v1770_v43 = vadd.f32 %v4878_v53, %v1769_v41  ;;  %v1930_v44 = vadd.f32 %v4878_v53, %v1929_v42  ;;  %v1452_v33 = vpop.f32.mrf.mxu0  ;;  %v1612_v45 = vpop.f32.mrf.mxu1 }
 0x233   :  { %2587 = vst.msk [vmem:[%s5342_s3 + $0x1d4] sm:$0xf] %vm2469_vm1, %v2330_v40  ;;  %v1453_v46 = vadd.f32 %v4878_v53, %v1452_v33  ;;  %v1613_v48 = vadd.f32 %v4878_v53, %v1612_v45 }
 0x234   :  { %v2138_v49 = vmax.f32 %v1770_v43, 0.0  ;;  %v2202_v50 = vmax.f32 %v1930_v44, 0.0 }
 0x235   :  { %v2011_v51 = vmax.f32 %v1453_v46, 0.0  ;;  %v2075_v52 = vmax.f32 %v1613_v48, 0.0 }
 0x236   :  { %v2394_v54 = vpack.c.bf16 %v2138_v49, %v2138_v49  ;;  %v2458_v55 = vpack.c.bf16 %v2202_v50, %v2202_v50 }
 0x237   :  { %v2267_v56 = vpack.c.bf16 %v2011_v51, %v2011_v51  ;;  %v2331_v57 = vpack.c.bf16 %v2075_v52, %v2075_v52 }
 0x238   :  { %2651 = vst.msk [vmem:[%s5342_s3 + $0x2d4] sm:$0xf] %vm2469_vm1, %v2394_v54 }
 0x239   :  { %2715 = vst.msk [vmem:[%s5342_s3 + $0x3d4] sm:$0xf] %vm2469_vm1, %v2458_v55  ;;  %v1772_v58 = vpop.f32.mrf.mxu2  ;;  %v1932_v59 = vpop.f32.mrf.mxu3 }
 0x23a   :  { %2524 = vst.msk [vmem:[%s5342_s3 + $0xd8] sm:$0xf] %vm2469_vm1, %v2267_v56  ;;  %v1773_v60 = vadd.f32 %v4878_v53, %v1772_v58  ;;  %v1933_v61 = vadd.f32 %v4878_v53, %v1932_v59  ;;  %v1454_v62 = vpop.f32.mrf.mxu0  ;;  %v1614_v47 = vpop.f32.mrf.mxu1 }
 0x23b   :  { %2588 = vst.msk [vmem:[%s5342_s3 + $0x1d8] sm:$0xf] %vm2469_vm1, %v2331_v57  ;;  %v1455_v63 = vadd.f32 %v4878_v53, %v1454_v62  ;;  %v1615_v0 = vadd.f32 %v4878_v53, %v1614_v47 }
 0x23c   :  { %v2139_v1 = vmax.f32 %v1773_v60, 0.0  ;;  %v2203_v2 = vmax.f32 %v1933_v61, 0.0 }
 0x23d   :  { %v2012_v3 = vmax.f32 %v1455_v63, 0.0  ;;  %v2076_v4 = vmax.f32 %v1615_v0, 0.0 }
 0x23e   :  { %v2395_v5 = vpack.c.bf16 %v2139_v1, %v2139_v1  ;;  %v2459_v6 = vpack.c.bf16 %v2203_v2, %v2203_v2 }
 0x23f   :  { %v2268_v7 = vpack.c.bf16 %v2012_v3, %v2012_v3  ;;  %v2332_v8 = vpack.c.bf16 %v2076_v4, %v2076_v4 }
 0x240   :  { %2652 = vst.msk [vmem:[%s5342_s3 + $0x2d8] sm:$0xf] %vm2469_vm1, %v2395_v5 }
 0x241   :  { %2716 = vst.msk [vmem:[%s5342_s3 + $0x3d8] sm:$0xf] %vm2469_vm1, %v2459_v6  ;;  %v1774_v9 = vpop.f32.mrf.mxu2  ;;  %v1934_v10 = vpop.f32.mrf.mxu3 }
 0x242   :  { %2525 = vst.msk [vmem:[%s5342_s3 + $0xdc] sm:$0xf] %vm2469_vm1, %v2268_v7  ;;  %v1775_v11 = vadd.f32 %v4878_v53, %v1774_v9  ;;  %v1935_v12 = vadd.f32 %v4878_v53, %v1934_v10  ;;  %v1457_v13 = vpop.f32.mrf.mxu0  ;;  %v1617_v14 = vpop.f32.mrf.mxu1 }
 0x243   :  { %2589 = vst.msk [vmem:[%s5342_s3 + $0x1dc] sm:$0xf] %vm2469_vm1, %v2332_v8  ;;  %v1458_v15 = vadd.f32 %v4878_v53, %v1457_v13  ;;  %v1618_v16 = vadd.f32 %v4878_v53, %v1617_v14 }
 0x244   :  { %v2140_v17 = vmax.f32 %v1775_v11, 0.0  ;;  %v2204_v18 = vmax.f32 %v1935_v12, 0.0 }
 0x245   :  { %v2013_v19 = vmax.f32 %v1458_v15, 0.0  ;;  %v2077_v20 = vmax.f32 %v1618_v16, 0.0 }
 0x246   :  { %v2396_v21 = vpack.c.bf16 %v2140_v17, %v2140_v17  ;;  %v2460_v22 = vpack.c.bf16 %v2204_v18, %v2204_v18 }
 0x247   :  { %v2269_v23 = vpack.c.bf16 %v2013_v19, %v2013_v19  ;;  %v2333_v24 = vpack.c.bf16 %v2077_v20, %v2077_v20 }
 0x248   :  { %2653 = vst.msk [vmem:[%s5342_s3 + $0x2dc] sm:$0xf] %vm2469_vm1, %v2396_v21 }
 0x249   :  { %2717 = vst.msk [vmem:[%s5342_s3 + $0x3dc] sm:$0xf] %vm2469_vm1, %v2460_v22  ;;  %v1777_v25 = vpop.f32.mrf.mxu2  ;;  %v1937_v26 = vpop.f32.mrf.mxu3 }
 0x24a   :  { %2526 = vst.msk [vmem:[%s5342_s3 + $0xe0] sm:$0xf] %vm2469_vm1, %v2269_v23  ;;  %v1778_v27 = vadd.f32 %v4878_v53, %v1777_v25  ;;  %v1938_v28 = vadd.f32 %v4878_v53, %v1937_v26  ;;  %v1459_v29 = vpop.f32.mrf.mxu0  ;;  %v1619_v30 = vpop.f32.mrf.mxu1 }
 0x24b   :  { %2590 = vst.msk [vmem:[%s5342_s3 + $0x1e0] sm:$0xf] %vm2469_vm1, %v2333_v24  ;;  %v1460_v31 = vadd.f32 %v4878_v53, %v1459_v29  ;;  %v1620_v32 = vadd.f32 %v4878_v53, %v1619_v30 }
 0x24c   :  { %v2141_v34 = vmax.f32 %v1778_v27, 0.0  ;;  %v2205_v35 = vmax.f32 %v1938_v28, 0.0 }
 0x24d   :  { %v2014_v36 = vmax.f32 %v1460_v31, 0.0  ;;  %v2078_v37 = vmax.f32 %v1620_v32, 0.0 }
 0x24e   :  { %v2397_v38 = vpack.c.bf16 %v2141_v34, %v2141_v34  ;;  %v2461_v39 = vpack.c.bf16 %v2205_v35, %v2205_v35 }
 0x24f   :  { %v2270_v40 = vpack.c.bf16 %v2014_v36, %v2014_v36  ;;  %v2334_v41 = vpack.c.bf16 %v2078_v37, %v2078_v37 }
 0x250   :  { %2654 = vst.msk [vmem:[%s5342_s3 + $0x2e0] sm:$0xf] %vm2469_vm1, %v2397_v38 }
 0x251   :  { %2718 = vst.msk [vmem:[%s5342_s3 + $0x3e0] sm:$0xf] %vm2469_vm1, %v2461_v39  ;;  %v1779_v42 = vpop.f32.mrf.mxu2  ;;  %v1939_v43 = vpop.f32.mrf.mxu3 }
 0x252   :  { %2527 = vst.msk [vmem:[%s5342_s3 + $0xe4] sm:$0xf] %vm2469_vm1, %v2270_v40  ;;  %v1780_v44 = vadd.f32 %v4878_v53, %v1779_v42  ;;  %v1940_v33 = vadd.f32 %v4878_v53, %v1939_v43  ;;  %v1462_v45 = vpop.f32.mrf.mxu0  ;;  %v1622_v46 = vpop.f32.mrf.mxu1 }
 0x253   :  { %2591 = vst.msk [vmem:[%s5342_s3 + $0x1e4] sm:$0xf] %vm2469_vm1, %v2334_v41  ;;  %v1463_v48 = vadd.f32 %v4878_v53, %v1462_v45  ;;  %v1623_v49 = vadd.f32 %v4878_v53, %v1622_v46 }
 0x254   :  { %v2142_v50 = vmax.f32 %v1780_v44, 0.0  ;;  %v2206_v51 = vmax.f32 %v1940_v33, 0.0 }
 0x255   :  { %v2015_v52 = vmax.f32 %v1463_v48, 0.0  ;;  %v2079_v54 = vmax.f32 %v1623_v49, 0.0 }
 0x256   :  { %v2398_v55 = vpack.c.bf16 %v2142_v50, %v2142_v50  ;;  %v2462_v56 = vpack.c.bf16 %v2206_v51, %v2206_v51 }
 0x257   :  { %v2271_v57 = vpack.c.bf16 %v2015_v52, %v2015_v52  ;;  %v2335_v58 = vpack.c.bf16 %v2079_v54, %v2079_v54 }
 0x258   :  { %2655 = vst.msk [vmem:[%s5342_s3 + $0x2e4] sm:$0xf] %vm2469_vm1, %v2398_v55 }
 0x259   :  { %2719 = vst.msk [vmem:[%s5342_s3 + $0x3e4] sm:$0xf] %vm2469_vm1, %v2462_v56  ;;  %v1782_v59 = vpop.f32.mrf.mxu2  ;;  %v1942_v60 = vpop.f32.mrf.mxu3 }
 0x25a   :  { %2528 = vst.msk [vmem:[%s5342_s3 + $0xe8] sm:$0xf] %vm2469_vm1, %v2271_v57  ;;  %v1783_v61 = vadd.f32 %v4878_v53, %v1782_v59  ;;  %v1943_v62 = vadd.f32 %v4878_v53, %v1942_v60  ;;  %v1464_v47 = vpop.f32.mrf.mxu0  ;;  %v1624_v63 = vpop.f32.mrf.mxu1 }
 0x25b   :  { %2592 = vst.msk [vmem:[%s5342_s3 + $0x1e8] sm:$0xf] %vm2469_vm1, %v2335_v58  ;;  %v1465_v0 = vadd.f32 %v4878_v53, %v1464_v47  ;;  %v1625_v1 = vadd.f32 %v4878_v53, %v1624_v63 }
 0x25c   :  { %v2143_v2 = vmax.f32 %v1783_v61, 0.0  ;;  %v2207_v3 = vmax.f32 %v1943_v62, 0.0 }
 0x25d   :  { %v2016_v4 = vmax.f32 %v1465_v0, 0.0  ;;  %v2080_v5 = vmax.f32 %v1625_v1, 0.0 }
 0x25e   :  { %v2399_v6 = vpack.c.bf16 %v2143_v2, %v2143_v2  ;;  %v2463_v7 = vpack.c.bf16 %v2207_v3, %v2207_v3 }
 0x25f   :  { %v2272_v8 = vpack.c.bf16 %v2016_v4, %v2016_v4  ;;  %v2336_v9 = vpack.c.bf16 %v2080_v5, %v2080_v5 }
 0x260   :  { %2656 = vst.msk [vmem:[%s5342_s3 + $0x2e8] sm:$0xf] %vm2469_vm1, %v2399_v6 }
 0x261   :  { %2720 = vst.msk [vmem:[%s5342_s3 + $0x3e8] sm:$0xf] %vm2469_vm1, %v2463_v7  ;;  %v1784_v10 = vpop.f32.mrf.mxu2  ;;  %v1944_v11 = vpop.f32.mrf.mxu3 }
 0x262   :  { %2529 = vst.msk [vmem:[%s5342_s3 + $0xec] sm:$0xf] %vm2469_vm1, %v2272_v8  ;;  %v1785_v12 = vadd.f32 %v4878_v53, %v1784_v10  ;;  %v1945_v13 = vadd.f32 %v4878_v53, %v1944_v11  ;;  %v1467_v14 = vpop.f32.mrf.mxu0  ;;  %v1627_v15 = vpop.f32.mrf.mxu1 }
 0x263   :  { %2593 = vst.msk [vmem:[%s5342_s3 + $0x1ec] sm:$0xf] %vm2469_vm1, %v2336_v9  ;;  %v1468_v16 = vadd.f32 %v4878_v53, %v1467_v14  ;;  %v1628_v17 = vadd.f32 %v4878_v53, %v1627_v15 }
 0x264   :  { %v2144_v18 = vmax.f32 %v1785_v12, 0.0  ;;  %v2208_v19 = vmax.f32 %v1945_v13, 0.0 }
 0x265   :  { %v2017_v20 = vmax.f32 %v1468_v16, 0.0  ;;  %v2081_v21 = vmax.f32 %v1628_v17, 0.0 }
 0x266   :  { %v2400_v22 = vpack.c.bf16 %v2144_v18, %v2144_v18  ;;  %v2464_v23 = vpack.c.bf16 %v2208_v19, %v2208_v19 }
 0x267   :  { %v2273_v24 = vpack.c.bf16 %v2017_v20, %v2017_v20  ;;  %v2337_v25 = vpack.c.bf16 %v2081_v21, %v2081_v21 }
 0x268   :  { %2657 = vst.msk [vmem:[%s5342_s3 + $0x2ec] sm:$0xf] %vm2469_vm1, %v2400_v22 }
 0x269   :  { %2721 = vst.msk [vmem:[%s5342_s3 + $0x3ec] sm:$0xf] %vm2469_vm1, %v2464_v23  ;;  %v1787_v26 = vpop.f32.mrf.mxu2  ;;  %v1947_v27 = vpop.f32.mrf.mxu3 }
 0x26a   :  { %2530 = vst.msk [vmem:[%s5342_s3 + $0xf0] sm:$0xf] %vm2469_vm1, %v2273_v24  ;;  %v1788_v28 = vadd.f32 %v4878_v53, %v1787_v26  ;;  %v1948_v29 = vadd.f32 %v4878_v53, %v1947_v27  ;;  %v1469_v30 = vpop.f32.mrf.mxu0  ;;  %v1629_v31 = vpop.f32.mrf.mxu1 }
 0x26b   :  { %2594 = vst.msk [vmem:[%s5342_s3 + $0x1f0] sm:$0xf] %vm2469_vm1, %v2337_v25  ;;  %v1470_v32 = vadd.f32 %v4878_v53, %v1469_v30  ;;  %v1630_v34 = vadd.f32 %v4878_v53, %v1629_v31 }
 0x26c   :  { %v2145_v35 = vmax.f32 %v1788_v28, 0.0  ;;  %v2209_v36 = vmax.f32 %v1948_v29, 0.0 }
 0x26d   :  { %v2018_v37 = vmax.f32 %v1470_v32, 0.0  ;;  %v2082_v38 = vmax.f32 %v1630_v34, 0.0 }
 0x26e   :  { %v2401_v39 = vpack.c.bf16 %v2145_v35, %v2145_v35  ;;  %v2465_v40 = vpack.c.bf16 %v2209_v36, %v2209_v36 }
 0x26f   :  { %v2274_v41 = vpack.c.bf16 %v2018_v37, %v2018_v37  ;;  %v2338_v42 = vpack.c.bf16 %v2082_v38, %v2082_v38 }
 0x270   :  { %2658 = vst.msk [vmem:[%s5342_s3 + $0x2f0] sm:$0xf] %vm2469_vm1, %v2401_v39 }
 0x271   :  { %2722 = vst.msk [vmem:[%s5342_s3 + $0x3f0] sm:$0xf] %vm2469_vm1, %v2465_v40  ;;  %v1789_v43 = vpop.f32.mrf.mxu2  ;;  %v1949_v44 = vpop.f32.mrf.mxu3 }
 0x272   :  { %2531 = vst.msk [vmem:[%s5342_s3 + $0xf4] sm:$0xf] %vm2469_vm1, %v2274_v41  ;;  %v1790_v33 = vadd.f32 %v4878_v53, %v1789_v43  ;;  %v1950_v45 = vadd.f32 %v4878_v53, %v1949_v44  ;;  %v1472_v46 = vpop.f32.mrf.mxu0  ;;  %v1632_v48 = vpop.f32.mrf.mxu1 }
 0x273   :  { %2595 = vst.msk [vmem:[%s5342_s3 + $0x1f4] sm:$0xf] %vm2469_vm1, %v2338_v42  ;;  %v1473_v49 = vadd.f32 %v4878_v53, %v1472_v46  ;;  %v1633_v50 = vadd.f32 %v4878_v53, %v1632_v48 }
 0x274   :  { %v2146_v51 = vmax.f32 %v1790_v33, 0.0  ;;  %v2210_v52 = vmax.f32 %v1950_v45, 0.0 }
 0x275   :  { %v2019_v54 = vmax.f32 %v1473_v49, 0.0  ;;  %v2083_v55 = vmax.f32 %v1633_v50, 0.0 }
 0x276   :  { %v2402_v56 = vpack.c.bf16 %v2146_v51, %v2146_v51  ;;  %v2466_v57 = vpack.c.bf16 %v2210_v52, %v2210_v52 }
 0x277   :  { %v2275_v58 = vpack.c.bf16 %v2019_v54, %v2019_v54  ;;  %v2339_v59 = vpack.c.bf16 %v2083_v55, %v2083_v55 }
 0x278   :  { %2659 = vst.msk [vmem:[%s5342_s3 + $0x2f4] sm:$0xf] %vm2469_vm1, %v2402_v56 }
 0x279   :  { %2723 = vst.msk [vmem:[%s5342_s3 + $0x3f4] sm:$0xf] %vm2469_vm1, %v2466_v57  ;;  %v1792_v60 = vpop.f32.mrf.mxu2  ;;  %v1952_v61 = vpop.f32.mrf.mxu3 }
 0x27a   :  { %2532 = vst.msk [vmem:[%s5342_s3 + $0xf8] sm:$0xf] %vm2469_vm1, %v2275_v58  ;;  %v1793_v62 = vadd.f32 %v4878_v53, %v1792_v60  ;;  %v1953_v47 = vadd.f32 %v4878_v53, %v1952_v61  ;;  %v1474_v63 = vpop.f32.mrf.mxu0  ;;  %v1634_v0 = vpop.f32.mrf.mxu1 }
 0x27b   :  { %2596 = vst.msk [vmem:[%s5342_s3 + $0x1f8] sm:$0xf] %vm2469_vm1, %v2339_v59  ;;  %v1475_v1 = vadd.f32 %v4878_v53, %v1474_v63  ;;  %v1635_v2 = vadd.f32 %v4878_v53, %v1634_v0 }
 0x27c   :  { %v2147_v3 = vmax.f32 %v1793_v62, 0.0  ;;  %v2211_v4 = vmax.f32 %v1953_v47, 0.0 }
 0x27d   :  { %v2020_v5 = vmax.f32 %v1475_v1, 0.0  ;;  %v2084_v6 = vmax.f32 %v1635_v2, 0.0 }
 0x27e   :  { %v2403_v7 = vpack.c.bf16 %v2147_v3, %v2147_v3  ;;  %v2467_v8 = vpack.c.bf16 %v2211_v4, %v2211_v4 }
 0x27f   :  { %v2276_v9 = vpack.c.bf16 %v2020_v5, %v2020_v5  ;;  %v2340_v10 = vpack.c.bf16 %v2084_v6, %v2084_v6 }
 0x280   :  { %2660 = vst.msk [vmem:[%s5342_s3 + $0x2f8] sm:$0xf] %vm2469_vm1, %v2403_v7 }
 0x281   :  { %2724 = vst.msk [vmem:[%s5342_s3 + $0x3f8] sm:$0xf] %vm2469_vm1, %v2467_v8  ;;  %v1794_v11 = vpop.f32.mrf.mxu2  ;;  %v1954_v12 = vpop.f32.mrf.mxu3 }
 0x282   :  { %2533 = vst.msk [vmem:[%s5342_s3 + $0xfc] sm:$0xf] %vm2469_vm1, %v2276_v9  ;;  %v1795_v13 = vadd.f32 %v4878_v53, %v1794_v11  ;;  %v1955_v14 = vadd.f32 %v4878_v53, %v1954_v12 }
 0x283   :  { %2597 = vst.msk [vmem:[%s5342_s3 + $0x1fc] sm:$0xf] %vm2469_vm1, %v2340_v10 }
 0x284   :  { %v2148_v15 = vmax.f32 %v1795_v13, 0.0  ;;  %v2212_v16 = vmax.f32 %v1955_v14, 0.0 }
 0x286   :  { %v2404_v17 = vpack.c.bf16 %v2148_v15, %v2148_v15  ;;  %v2468_v18 = vpack.c.bf16 %v2212_v16, %v2212_v16 }
 0x288   :  { %2661 = vst.msk [vmem:[%s5342_s3 + $0x2fc] sm:$0xf] %vm2469_vm1, %v2404_v17 }
 0x289   :  { %2725 = vst.msk [vmem:[%s5342_s3 + $0x3fc] sm:$0xf] %vm2469_vm1, %v2468_v18 }

// kernel: enc_forward.5
= control target key start
LH: loop header
LB: loop body
LE: loop exit
PB: predicated region body
PF: predicated region fallthrough
CT: control target
= control target key end

     0   :  { %vm1511_vm0 = vcmask 257024   ;;  %s3096_s1 = inlined_call_operand.vmem [shape: bf16[2,256,32], index: 1, kind: input, shape index: {}]   ;;  %s3097_s0 = inlined_call_operand.vmem [shape: bf16[544,256], index: 0, kind: input, shape index: {}]   ;;  %s3098_s2 = inlined_call_operand.vmem [shape: f32[1,32], index: 2, kind: input, shape index: {}]   ;;  %s3099_s3 = inlined_call_operand.vmem [shape: bf16[512,32], index: 3, kind: output, shape index: {}]  }
   0x1   :  { %v2231_v0 = vld [vmem:[%s3096_s1 + $0xb8] sm:$0xff]  ;;  %v2230_v2 = vld [vmem:[%s3096_s1 + $0xb0] sm:$0xff]  ;;  %v2229_v8 = vld [vmem:[%s3096_s1 + $0xa8] sm:$0xff] }
   0x2   :  { %v2239_v1 = vld [vmem:[%s3096_s1 + $0xf8] sm:$0xff]  ;;  %1029 = vmatpush.bf16.msra.mxu2 %v2231_v0  ;;  %v2238_v3 = vld [vmem:[%s3096_s1 + $0xf0] sm:$0xff]  ;;  %v2237_v9 = vld [vmem:[%s3096_s1 + $0xe8] sm:$0xff] }
   0x3   :  { %1204 = vmatpush.bf16.msra.mxu3 %v2239_v1  ;;  %v2215_v4 = vld [vmem:[%s3096_s1 + $0x38] sm:$0xff]  ;;  %v2214_v6 = vld [vmem:[%s3096_s1 + $0x30] sm:$0xff]  ;;  %v2213_v10 = vld [vmem:[%s3096_s1 + $0x28] sm:$0xff] }
   0x4   :  { %v2223_v5 = vld [vmem:[%s3096_s1 + $0x78] sm:$0xff]  ;;  %550 = vmatpush.bf16.msra.mxu0 %v2215_v4  ;;  %v2222_v7 = vld [vmem:[%s3096_s1 + $0x70] sm:$0xff]  ;;  %v2221_v11 = vld [vmem:[%s3096_s1 + $0x68] sm:$0xff] }
   0x5   :  { %725 = vmatpush.bf16.msra.mxu1 %v2223_v5  ;;  %v2228_v12 = vld [vmem:[%s3096_s1 + $0xa0] sm:$0xff]  ;;  %v2227_v16 = vld [vmem:[%s3096_s1 + $0x98] sm:$0xff]  ;;  %v2226_v20 = vld [vmem:[%s3096_s1 + $0x90] sm:$0xff] }
   0x6   :  { %1030 = vmatpush.bf16.msra.mxu2 %v2230_v2  ;;  %v2236_v13 = vld [vmem:[%s3096_s1 + $0xe0] sm:$0xff]  ;;  %v2235_v17 = vld [vmem:[%s3096_s1 + $0xd8] sm:$0xff]  ;;  %v2234_v21 = vld [vmem:[%s3096_s1 + $0xd0] sm:$0xff] }
   0x7   :  { %1205 = vmatpush.bf16.msra.mxu3 %v2238_v3  ;;  %v2212_v14 = vld [vmem:[%s3096_s1 + $0x20] sm:$0xff]  ;;  %v2211_v18 = vld [vmem:[%s3096_s1 + $0x18] sm:$0xff]  ;;  %v2210_v22 = vld [vmem:[%s3096_s1 + $0x10] sm:$0xff] }
   0x8   :  { %551 = vmatpush.bf16.msra.mxu0 %v2214_v6  ;;  %v2220_v15 = vld [vmem:[%s3096_s1 + $0x60] sm:$0xff]  ;;  %v2219_v19 = vld [vmem:[%s3096_s1 + $0x58] sm:$0xff]  ;;  %v2218_v23 = vld [vmem:[%s3096_s1 + $0x50] sm:$0xff] }
   0x9   :  { %726 = vmatpush.bf16.msra.mxu1 %v2222_v7  ;;  %v2225_v24 = vld [vmem:[%s3096_s1 + $0x88] sm:$0xff]  ;;  %v2224_v28 = vld [vmem:[%s3096_s1 + $0x80] sm:$0xff]  ;;  %v1718_v38 = vld [vmem:[%s3097_s0 + $0x10] sm:$0xf] }
   0xa   :  { %1031 = vmatpush.bf16.msra.mxu2 %v2229_v8  ;;  %v2233_v25 = vld [vmem:[%s3096_s1 + $0xc8] sm:$0xff]  ;;  %v2232_v29 = vld [vmem:[%s3096_s1 + $0xc0] sm:$0xff]  ;;  %v2143_v39 = vld [vmem:[%s3097_s0 + $0x14] sm:$0xf0] }
   0xb   :  { %1206 = vmatpush.bf16.msra.mxu3 %v2237_v9  ;;  %v2209_v26 = vld [vmem:[%s3096_s1 + $0x8] sm:$0xff]  ;;  %v1710_v30 = vld [vmem:[%s3097_s0] sm:$0xf]  ;;  %v2140_v32 = vld [vmem:[%s3097_s0 + $0x4] sm:$0xf]  ;;  %v1719_v42 = vor.u32 %v2143_v39, %v1718_v38 }
   0xc   :  { %552 = vmatpush.bf16.msra.mxu0 %v2213_v10  ;;  %v2217_v27 = vld [vmem:[%s3096_s1 + $0x48] sm:$0xff]  ;;  %v2208_v34 = vld [vmem:[%s3096_s1] sm:$0xff]  ;;  %v2142_v40 = vld [vmem:[%s3097_s0 + $0x14] sm:$0xf] }
   0xd   :  { %727 = vmatpush.bf16.msra.mxu1 %v2221_v11  ;;  %v2141_v31 = vld [vmem:[%s3097_s0 + $0x4] sm:$0xf0]  ;;  %v1712_v33 = vld [vmem:[%s3097_s0 + $0x8] sm:$0xf0]  ;;  %v2216_v35 = vld [vmem:[%s3096_s1 + $0x40] sm:$0xff] }
   0xe   :  { %1032 = vmatpush.bf16.msra.mxu2 %v2228_v12  ;;  %v1711_v36 = vor.u32 %v2141_v31, %v1710_v30  ;;  %v1715_v37 = vor.u32 %v2140_v32, %v1712_v33  ;;  %v1720_v41 = vld [vmem:[%s3097_s0 + $0x18] sm:$0xf0]  ;;  %v1726_v44 = vld [vmem:[%s3097_s0 + $0x20] sm:$0xf]  ;;  %v2145_v45 = vld [vmem:[%s3097_s0 + $0x24] sm:$0xf0] }
   0xf   :  { %1207 = vmatpush.bf16.msra.mxu3 %v2236_v13  ;;  %v1723_v43 = vor.u32 %v2142_v40, %v1720_v41  ;;  %v2144_v46 = vld [vmem:[%s3097_s0 + $0x24] sm:$0xf]  ;;  %v1728_v47 = vld [vmem:[%s3097_s0 + $0x28] sm:$0xf0]  ;;  %v1727_v48 = vor.u32 %v2145_v45, %v1726_v44  ;;  %v1734_v50 = vld [vmem:[%s3097_s0 + $0x30] sm:$0xf] }
  0x10   :  { %553 = vmatpush.bf16.msra.mxu0 %v2212_v14  ;;  %v1731_v49 = vor.u32 %v2144_v46, %v1728_v47  ;;  %v2147_v51 = vld [vmem:[%s3097_s0 + $0x34] sm:$0xf0]  ;;  %v2146_v52 = vld [vmem:[%s3097_s0 + $0x34] sm:$0xf]  ;;  %v1736_v53 = vld [vmem:[%s3097_s0 + $0x38] sm:$0xf0] }
  0x11   :  { %728 = vmatpush.bf16.msra.mxu1 %v2220_v15  ;;  %v1735_v54 = vor.u32 %v2147_v51, %v1734_v50  ;;  %v1739_v55 = vor.u32 %v2146_v52, %v1736_v53  ;;  %v1742_v56 = vld [vmem:[%s3097_s0 + $0x40] sm:$0xf]  ;;  %v2149_v57 = vld [vmem:[%s3097_s0 + $0x44] sm:$0xf0]  ;;  %v2148_v58 = vld [vmem:[%s3097_s0 + $0x44] sm:$0xf] }
  0x12   :  { %1033 = vmatpush.bf16.msra.mxu2 %v2227_v16  ;;  %v1744_v59 = vld [vmem:[%s3097_s0 + $0x48] sm:$0xf0]  ;;  %v1743_v60 = vor.u32 %v2149_v57, %v1742_v56  ;;  %v1750_v62 = vld [vmem:[%s3097_s0 + $0x50] sm:$0xf]  ;;  %v2151_v63 = vld [vmem:[%s3097_s0 + $0x54] sm:$0xf0] }
  0x13   :  { %1208 = vmatpush.bf16.msra.mxu3 %v2235_v17  ;;  %v1747_v61 = vor.u32 %v2148_v58, %v1744_v59  ;;  %v2150_v0 = vld [vmem:[%s3097_s0 + $0x54] sm:$0xf]  ;;  %v1752_v1 = vld [vmem:[%s3097_s0 + $0x58] sm:$0xf0]  ;;  %v1751_v2 = vor.u32 %v2151_v63, %v1750_v62  ;;  %v1758_v4 = vld [vmem:[%s3097_s0 + $0x60] sm:$0xf] }
  0x14   :  { %554 = vmatpush.bf16.msra.mxu0 %v2211_v18  ;;  %v1755_v3 = vor.u32 %v2150_v0, %v1752_v1  ;;  %v2153_v5 = vld [vmem:[%s3097_s0 + $0x64] sm:$0xf0]  ;;  %v2152_v6 = vld [vmem:[%s3097_s0 + $0x64] sm:$0xf]  ;;  %v1760_v7 = vld [vmem:[%s3097_s0 + $0x68] sm:$0xf0] }
  0x15   :  { %729 = vmatpush.bf16.msra.mxu1 %v2219_v19  ;;  %v1759_v8 = vor.u32 %v2153_v5, %v1758_v4  ;;  %v1763_v9 = vor.u32 %v2152_v6, %v1760_v7  ;;  %v1766_v10 = vld [vmem:[%s3097_s0 + $0x70] sm:$0xf]  ;;  %v2155_v11 = vld [vmem:[%s3097_s0 + $0x74] sm:$0xf0]  ;;  %v2154_v12 = vld [vmem:[%s3097_s0 + $0x74] sm:$0xf] }
  0x16   :  { %1034 = vmatpush.bf16.msra.mxu2 %v2226_v20  ;;  %v1768_v13 = vld [vmem:[%s3097_s0 + $0x78] sm:$0xf0]  ;;  %v1767_v14 = vor.u32 %v2155_v11, %v1766_v10  ;;  %v1774_v16 = vld [vmem:[%s3097_s0 + $0x80] sm:$0xf]  ;;  %v2157_v17 = vld [vmem:[%s3097_s0 + $0x84] sm:$0xf0] }
  0x17   :  { %1209 = vmatpush.bf16.msra.mxu3 %v2234_v21  ;;  %v1771_v15 = vor.u32 %v2154_v12, %v1768_v13  ;;  %v2156_v18 = vld [vmem:[%s3097_s0 + $0x84] sm:$0xf]  ;;  %v1776_v19 = vld [vmem:[%s3097_s0 + $0x88] sm:$0xf0]  ;;  %v1775_v20 = vor.u32 %v2157_v17, %v1774_v16  ;;  %v2158_v30 = vld [vmem:[%s3097_s0 + $0x94] sm:$0xf] }
  0x18   :  { %555 = vmatpush.bf16.msra.mxu0 %v2210_v22  ;;  %v1779_v21 = vor.u32 %v2156_v18, %v1776_v19  ;;  %v1784_v31 = vld [vmem:[%s3097_s0 + $0x98] sm:$0xf0]  ;;  %v1790_v47 = vld [vmem:[%s3097_s0 + $0xa0] sm:$0xf]  ;;  %v1792_v50 = vld [vmem:[%s3097_s0 + $0xa8] sm:$0xf0] }
  0x19   :  { %730 = vmatpush.bf16.msra.mxu1 %v2218_v23  ;;  %v2163_v10 = vld [vmem:[%s3097_s0 + $0xb4] sm:$0xf0]  ;;  %v2162_v11 = vld [vmem:[%s3097_s0 + $0xb4] sm:$0xf]  ;;  %v1800_v12 = vld [vmem:[%s3097_s0 + $0xb8] sm:$0xf0] }
  0x1a   :  { %1035 = vmatpush.bf16.msra.mxu2 %v2225_v24 }
  0x1b   :  { %1210 = vmatpush.bf16.msra.mxu3 %v2233_v25 }
  0x1c   :  { %556 = vmatpush.bf16.msra.mxu0 %v2209_v26 }
  0x1d   :  { %731 = vmatpush.bf16.msra.mxu1 %v2217_v27 }
  0x1e   :  { %1036 = vmatpush.bf16.msra.mxu2 %v2224_v28  ;;  %v1782_v28 = vld [vmem:[%s3097_s0 + $0x90] sm:$0xf] }
  0x1f   :  { %1211 = vmatpush.bf16.msra.mxu3 %v2232_v29  ;;  %v2159_v29 = vld [vmem:[%s3097_s0 + $0x94] sm:$0xf0] }
  0x20   :  { %557 = vmatpush.bf16.msra.mxu0 %v2208_v34  ;;  %v1783_v34 = vor.u32 %v2159_v29, %v1782_v28 }
  0x21   :  { %732 = vmatpush.bf16.msra.mxu1 %v2216_v35  ;;  %1037 = vmatmul.bf16.vlgmr.msra.gmra.mxu2 %v1711_v36  ;;  %v1787_v35 = vor.u32 %v2158_v30, %v1784_v31 }
  0x22   :  { %1212 = vmatmul.bf16.vlgmr.msra.gmra.mxu3 %v1715_v37 }
  0x23   :  { %558 = vmatmul.bf16.vlgmr.msra.gmra.mxu0 %v1711_v36 }
  0x24   :  { %733 = vmatmul.bf16.vlgmr.msra.gmra.mxu1 %v1715_v37 }
  0x31   :  { %1040 = vmatmul.bf16.gmra.mxu2 %v1719_v42 }
  0x32   :  { %1215 = vmatmul.bf16.gmra.mxu3 %v1723_v43 }
  0x33   :  { %563 = vmatmul.bf16.gmra.mxu0 %v1719_v42  ;;  %v2481_v42 = vld [vmem:[%s3098_s2] ss:$0 sm:$0xff] }
  0x34   :  { %738 = vmatmul.bf16.gmra.mxu1 %v1723_v43 }
  0x41   :  { %1045 = vmatmul.bf16.gmra.mxu2 %v1727_v48 }
  0x42   :  { %1220 = vmatmul.bf16.gmra.mxu3 %v1731_v49 }
  0x43   :  { %568 = vmatmul.bf16.gmra.mxu0 %v1727_v48  ;;  %v2161_v48 = vld [vmem:[%s3097_s0 + $0xa4] sm:$0xf0] }
  0x44   :  { %743 = vmatmul.bf16.gmra.mxu1 %v1731_v49  ;;  %v2160_v49 = vld [vmem:[%s3097_s0 + $0xa4] sm:$0xf] }
  0x45   :  { %v1795_v58 = vor.u32 %v2160_v49, %v1792_v50 }
  0x51   :  { %1050 = vmatmul.bf16.gmra.mxu2 %v1735_v54 }
  0x52   :  { %1225 = vmatmul.bf16.gmra.mxu3 %v1739_v55 }
  0x53   :  { %573 = vmatmul.bf16.gmra.mxu0 %v1735_v54  ;;  %v1791_v54 = vor.u32 %v2161_v48, %v1790_v47 }
  0x54   :  { %748 = vmatmul.bf16.gmra.mxu1 %v1739_v55 }
  0x61   :  { %1055 = vmatmul.bf16.gmra.mxu2 %v1743_v60 }
  0x62   :  { %1230 = vmatmul.bf16.gmra.mxu3 %v1747_v61 }
  0x63   :  { %578 = vmatmul.bf16.gmra.mxu0 %v1743_v60 }
  0x64   :  { %753 = vmatmul.bf16.gmra.mxu1 %v1747_v61 }
  0x71   :  { %1060 = vmatmul.bf16.gmra.mxu2 %v1751_v2 }
  0x72   :  { %1235 = vmatmul.bf16.gmra.mxu3 %v1755_v3 }
  0x73   :  { %583 = vmatmul.bf16.gmra.mxu0 %v1751_v2 }
  0x74   :  { %758 = vmatmul.bf16.gmra.mxu1 %v1755_v3 }
  0x81   :  { %1065 = vmatmul.bf16.gmra.mxu2 %v1759_v8 }
  0x82   :  { %1240 = vmatmul.bf16.gmra.mxu3 %v1763_v9 }
  0x83   :  { %588 = vmatmul.bf16.gmra.mxu0 %v1759_v8 }
  0x84   :  { %763 = vmatmul.bf16.gmra.mxu1 %v1763_v9  ;;  %v1798_v9 = vld [vmem:[%s3097_s0 + $0xb0] sm:$0xf] }
  0x85   :  { %v1799_v16 = vor.u32 %v2163_v10, %v1798_v9 }
  0x91   :  { %1070 = vmatmul.bf16.gmra.mxu2 %v1767_v14 }
  0x92   :  { %1245 = vmatmul.bf16.gmra.mxu3 %v1771_v15 }
  0x93   :  { %593 = vmatmul.bf16.gmra.mxu0 %v1767_v14 }
  0x94   :  { %768 = vmatmul.bf16.gmra.mxu1 %v1771_v15 }
  0xa0   :  { %v559_v22 = vpop.f32.mrf.mxu0 }
  0xa1   :  { %v734_v23 = vpop.f32.mrf.mxu1  ;;  %1075 = vmatmul.bf16.gmra.mxu2 %v1775_v20 }
  0xa2   :  { %1250 = vmatmul.bf16.gmra.mxu3 %v1779_v21  ;;  %v735_v40 = vadd.f32 %v734_v23, %v559_v22 }
  0xa3   :  { %598 = vmatmul.bf16.gmra.mxu0 %v1775_v20  ;;  %v1803_v20 = vor.u32 %v2162_v11, %v1800_v12 }
  0xa4   :  { %773 = vmatmul.bf16.gmra.mxu1 %v1779_v21  ;;  %v1038_v24 = vpop.f32.mrf.mxu2 }
  0xa5   :  { %v1213_v25 = vpop.f32.mrf.mxu3 }
  0xa8   :  { %v561_v26 = vpop.f32.mrf.mxu0 }
  0xa9   :  { %v736_v27 = vpop.f32.mrf.mxu1 }
  0xaa   :  { %v737_v55 = vadd.f32 %v736_v27, %v561_v26 }
  0xac   :  { %v1039_v32 = vpop.f32.mrf.mxu2 }
  0xad   :  { %v1214_v33 = vpop.f32.mrf.mxu3 }
  0xb0   :  { %v564_v36 = vpop.f32.mrf.mxu0 }
  0xb1   :  { %v739_v37 = vpop.f32.mrf.mxu1  ;;  %1080 = vmatmul.bf16.gmra.mxu2 %v1783_v34 }
  0xb2   :  { %1255 = vmatmul.bf16.gmra.mxu3 %v1787_v35  ;;  %v740_v2 = vadd.f32 %v739_v37, %v564_v36  ;;  %v2165_v36 = vld [vmem:[%s3097_s0 + $0xc4] sm:$0xf0]  ;;  %v2164_v37 = vld [vmem:[%s3097_s0 + $0xc4] sm:$0xf] }
  0xb3   :  { %603 = vmatmul.bf16.gmra.mxu0 %v1783_v34 }
  0xb4   :  { %778 = vmatmul.bf16.gmra.mxu1 %v1787_v35  ;;  %v1041_v38 = vpop.f32.mrf.mxu2  ;;  %v1806_v35 = vld [vmem:[%s3097_s0 + $0xc0] sm:$0xf] }
  0xb5   :  { %v1216_v39 = vpop.f32.mrf.mxu3 }
  0xb6   :  { %v1217_v41 = vadd.f32 %v1216_v39, %v1041_v38  ;;  %v1808_v38 = vld [vmem:[%s3097_s0 + $0xc8] sm:$0xf0] }
  0xb7   :  { %v1811_v47 = vor.u32 %v2164_v37, %v1808_v38 }
  0xb8   :  { %v1380_v43 = vadd.f32 %v1217_v41, %v735_v40  ;;  %v566_v44 = vpop.f32.mrf.mxu0 }
  0xb9   :  { %v741_v45 = vpop.f32.mrf.mxu1 }
  0xba   :  { %v1415_v46 = vadd.f32 %v2481_v42, %v1380_v43  ;;  %v742_v17 = vadd.f32 %v741_v45, %v566_v44  ;;  %v1807_v43 = vor.u32 %v2165_v36, %v1806_v35 }
  0xbc   :  { %v1447_v51 = vmax.f32 %v1415_v46, 0.0  ;;  %v1043_v52 = vpop.f32.mrf.mxu2 }
  0xbd   :  { %v1218_v53 = vpop.f32.mrf.mxu3 }
  0xbe   :  { %v1479_v56 = vpack.c.bf16 %v1447_v51, %v1447_v51  ;;  %v1219_v57 = vadd.f32 %v1218_v53, %v1043_v52 }
  0xc0   :  { %1512 = vst.msk [vmem:[%s3099_s3] sm:$0xf] %vm1511_vm0, %v1479_v56  ;;  %v1381_v59 = vadd.f32 %v1219_v57, %v737_v55  ;;  %v569_v60 = vpop.f32.mrf.mxu0 }
  0xc1   :  { %v744_v61 = vpop.f32.mrf.mxu1  ;;  %1085 = vmatmul.bf16.gmra.mxu2 %v1791_v54 }
  0xc2   :  { %v1416_v62 = vadd.f32 %v2481_v42, %v1381_v59  ;;  %1260 = vmatmul.bf16.gmra.mxu3 %v1795_v58  ;;  %v745_v28 = vadd.f32 %v744_v61, %v569_v60 }
  0xc3   :  { %608 = vmatmul.bf16.gmra.mxu0 %v1791_v54 }
  0xc4   :  { %v1448_v63 = vmax.f32 %v1416_v62, 0.0  ;;  %783 = vmatmul.bf16.gmra.mxu1 %v1795_v58  ;;  %v1046_v0 = vpop.f32.mrf.mxu2  ;;  %v1814_v62 = vld [vmem:[%s3097_s0 + $0xd0] sm:$0xf] }
  0xc5   :  { %v1221_v1 = vpop.f32.mrf.mxu3 }
  0xc6   :  { %v1480_v3 = vpack.c.bf16 %v1448_v63, %v1448_v63  ;;  %v1222_v4 = vadd.f32 %v1221_v1, %v1046_v0  ;;  %v2167_v63 = vld [vmem:[%s3097_s0 + $0xd4] sm:$0xf0]  ;;  %v2166_v0 = vld [vmem:[%s3097_s0 + $0xd4] sm:$0xf]  ;;  %v1816_v1 = vld [vmem:[%s3097_s0 + $0xd8] sm:$0xf0] }
  0xc7   :  { %v1819_v9 = vor.u32 %v2166_v0, %v1816_v1 }
  0xc8   :  { %1513 = vst.msk [vmem:[%s3099_s3 + $0x4] sm:$0xf] %vm1511_vm0, %v1480_v3  ;;  %v1382_v5 = vadd.f32 %v1222_v4, %v740_v2  ;;  %v571_v6 = vpop.f32.mrf.mxu0 }
  0xc9   :  { %v746_v7 = vpop.f32.mrf.mxu1 }
  0xca   :  { %v1417_v8 = vadd.f32 %v2481_v42, %v1382_v5  ;;  %v747_v44 = vadd.f32 %v746_v7, %v571_v6  ;;  %v1815_v5 = vor.u32 %v2167_v63, %v1814_v62 }
  0xcc   :  { %v1449_v13 = vmax.f32 %v1417_v8, 0.0  ;;  %v1048_v14 = vpop.f32.mrf.mxu2 }
  0xcd   :  { %v1223_v15 = vpop.f32.mrf.mxu3 }
  0xce   :  { %v1481_v18 = vpack.c.bf16 %v1449_v13, %v1449_v13  ;;  %v1224_v19 = vadd.f32 %v1223_v15, %v1048_v14 }
  0xd0   :  { %1514 = vst.msk [vmem:[%s3099_s3 + $0x8] sm:$0xf] %vm1511_vm0, %v1481_v18  ;;  %v1383_v21 = vadd.f32 %v1224_v19, %v742_v17  ;;  %v574_v22 = vpop.f32.mrf.mxu0 }
  0xd1   :  { %v749_v23 = vpop.f32.mrf.mxu1  ;;  %1090 = vmatmul.bf16.gmra.mxu2 %v1799_v16 }
  0xd2   :  { %v1418_v24 = vadd.f32 %v2481_v42, %v1383_v21  ;;  %1265 = vmatmul.bf16.gmra.mxu3 %v1803_v20  ;;  %v750_v55 = vadd.f32 %v749_v23, %v574_v22 }
  0xd3   :  { %613 = vmatmul.bf16.gmra.mxu0 %v1799_v16 }
  0xd4   :  { %v1450_v25 = vmax.f32 %v1418_v24, 0.0  ;;  %788 = vmatmul.bf16.gmra.mxu1 %v1803_v20  ;;  %v1051_v26 = vpop.f32.mrf.mxu2  ;;  %v1822_v24 = vld [vmem:[%s3097_s0 + $0xe0] sm:$0xf] }
  0xd5   :  { %v1226_v27 = vpop.f32.mrf.mxu3 }
  0xd6   :  { %v1482_v29 = vpack.c.bf16 %v1450_v25, %v1450_v25  ;;  %v1227_v30 = vadd.f32 %v1226_v27, %v1051_v26  ;;  %v2169_v25 = vld [vmem:[%s3097_s0 + $0xe4] sm:$0xf0]  ;;  %v2168_v26 = vld [vmem:[%s3097_s0 + $0xe4] sm:$0xf]  ;;  %v1824_v27 = vld [vmem:[%s3097_s0 + $0xe8] sm:$0xf0] }
  0xd7   :  { %v1827_v35 = vor.u32 %v2168_v26, %v1824_v27 }
  0xd8   :  { %1515 = vst.msk [vmem:[%s3099_s3 + $0xc] sm:$0xf] %vm1511_vm0, %v1482_v29  ;;  %v1384_v31 = vadd.f32 %v1227_v30, %v745_v28  ;;  %v576_v32 = vpop.f32.mrf.mxu0 }
  0xd9   :  { %v751_v33 = vpop.f32.mrf.mxu1 }
  0xda   :  { %v1419_v34 = vadd.f32 %v2481_v42, %v1384_v31  ;;  %v752_v6 = vadd.f32 %v751_v33, %v576_v32  ;;  %v1823_v31 = vor.u32 %v2169_v25, %v1822_v24 }
  0xdc   :  { %v1451_v39 = vmax.f32 %v1419_v34, 0.0  ;;  %v1053_v40 = vpop.f32.mrf.mxu2 }
  0xdd   :  { %v1228_v41 = vpop.f32.mrf.mxu3 }
  0xde   :  { %v1483_v45 = vpack.c.bf16 %v1451_v39, %v1451_v39  ;;  %v1229_v46 = vadd.f32 %v1228_v41, %v1053_v40 }
  0xe0   :  { %1516 = vst.msk [vmem:[%s3099_s3 + $0x10] sm:$0xf] %vm1511_vm0, %v1483_v45  ;;  %v1385_v48 = vadd.f32 %v1229_v46, %v747_v44  ;;  %v579_v49 = vpop.f32.mrf.mxu0 }
  0xe1   :  { %v754_v50 = vpop.f32.mrf.mxu1  ;;  %1095 = vmatmul.bf16.gmra.mxu2 %v1807_v43 }
  0xe2   :  { %v1420_v51 = vadd.f32 %v2481_v42, %v1385_v48  ;;  %1270 = vmatmul.bf16.gmra.mxu3 %v1811_v47  ;;  %v755_v17 = vadd.f32 %v754_v50, %v579_v49 }
  0xe3   :  { %618 = vmatmul.bf16.gmra.mxu0 %v1807_v43 }
  0xe4   :  { %v1452_v52 = vmax.f32 %v1420_v51, 0.0  ;;  %793 = vmatmul.bf16.gmra.mxu1 %v1811_v47  ;;  %v1056_v53 = vpop.f32.mrf.mxu2  ;;  %v1830_v51 = vld [vmem:[%s3097_s0 + $0xf0] sm:$0xf] }
  0xe5   :  { %v1231_v54 = vpop.f32.mrf.mxu3 }
  0xe6   :  { %v1484_v56 = vpack.c.bf16 %v1452_v52, %v1452_v52  ;;  %v1232_v57 = vadd.f32 %v1231_v54, %v1056_v53  ;;  %v2171_v52 = vld [vmem:[%s3097_s0 + $0xf4] sm:$0xf0]  ;;  %v2170_v53 = vld [vmem:[%s3097_s0 + $0xf4] sm:$0xf]  ;;  %v1832_v54 = vld [vmem:[%s3097_s0 + $0xf8] sm:$0xf0] }
  0xe7   :  { %v1835_v62 = vor.u32 %v2170_v53, %v1832_v54 }
  0xe8   :  { %1517 = vst.msk [vmem:[%s3099_s3 + $0x14] sm:$0xf] %vm1511_vm0, %v1484_v56  ;;  %v1386_v58 = vadd.f32 %v1232_v57, %v750_v55  ;;  %v581_v59 = vpop.f32.mrf.mxu0 }
  0xe9   :  { %v756_v60 = vpop.f32.mrf.mxu1 }
  0xea   :  { %v1421_v61 = vadd.f32 %v2481_v42, %v1386_v58  ;;  %v757_v32 = vadd.f32 %v756_v60, %v581_v59  ;;  %v1831_v58 = vor.u32 %v2171_v52, %v1830_v51 }
  0xec   :  { %v1453_v2 = vmax.f32 %v1421_v61, 0.0  ;;  %v1058_v3 = vpop.f32.mrf.mxu2 }
  0xed   :  { %v1233_v4 = vpop.f32.mrf.mxu3 }
  0xee   :  { %v1485_v7 = vpack.c.bf16 %v1453_v2, %v1453_v2  ;;  %v1234_v8 = vadd.f32 %v1233_v4, %v1058_v3 }
  0xf0   :  { %1518 = vst.msk [vmem:[%s3099_s3 + $0x18] sm:$0xf] %vm1511_vm0, %v1485_v7  ;;  %v1387_v10 = vadd.f32 %v1234_v8, %v752_v6  ;;  %v584_v11 = vpop.f32.mrf.mxu0 }
  0xf1   :  { %v759_v12 = vpop.f32.mrf.mxu1  ;;  %1100 = vmatmul.bf16.gmra.mxu2 %v1815_v5 }
  0xf2   :  { %v1422_v13 = vadd.f32 %v2481_v42, %v1387_v10  ;;  %1275 = vmatmul.bf16.gmra.mxu3 %v1819_v9  ;;  %v760_v44 = vadd.f32 %v759_v12, %v584_v11 }
  0xf3   :  { %623 = vmatmul.bf16.gmra.mxu0 %v1815_v5 }
  0xf4   :  { %v1454_v14 = vmax.f32 %v1422_v13, 0.0  ;;  %798 = vmatmul.bf16.gmra.mxu1 %v1819_v9  ;;  %v1061_v15 = vpop.f32.mrf.mxu2  ;;  %v1838_v13 = vld [vmem:[%s3097_s0 + $0x100] sm:$0xf] }
  0xf5   :  { %v1236_v16 = vpop.f32.mrf.mxu3 }
  0xf6   :  { %v1486_v18 = vpack.c.bf16 %v1454_v14, %v1454_v14  ;;  %v1237_v19 = vadd.f32 %v1236_v16, %v1061_v15  ;;  %v2173_v14 = vld [vmem:[%s3097_s0 + $0x104] sm:$0xf0]  ;;  %v2172_v15 = vld [vmem:[%s3097_s0 + $0x104] sm:$0xf]  ;;  %v1840_v16 = vld [vmem:[%s3097_s0 + $0x108] sm:$0xf0] }
  0xf7   :  { %v1843_v24 = vor.u32 %v2172_v15, %v1840_v16 }
  0xf8   :  { %1519 = vst.msk [vmem:[%s3099_s3 + $0x1c] sm:$0xf] %vm1511_vm0, %v1486_v18  ;;  %v1388_v20 = vadd.f32 %v1237_v19, %v755_v17  ;;  %v586_v21 = vpop.f32.mrf.mxu0 }
  0xf9   :  { %v761_v22 = vpop.f32.mrf.mxu1 }
  0xfa   :  { %v1423_v23 = vadd.f32 %v2481_v42, %v1388_v20  ;;  %v762_v59 = vadd.f32 %v761_v22, %v586_v21  ;;  %v1839_v20 = vor.u32 %v2173_v14, %v1838_v13 }
  0xfc   :  { %v1455_v28 = vmax.f32 %v1423_v23, 0.0  ;;  %v1063_v29 = vpop.f32.mrf.mxu2 }
  0xfd   :  { %v1238_v30 = vpop.f32.mrf.mxu3 }
  0xfe   :  { %v1487_v33 = vpack.c.bf16 %v1455_v28, %v1455_v28  ;;  %v1239_v34 = vadd.f32 %v1238_v30, %v1063_v29 }
 0x100   :  { %1520 = vst.msk [vmem:[%s3099_s3 + $0x20] sm:$0xf] %vm1511_vm0, %v1487_v33  ;;  %v1389_v36 = vadd.f32 %v1239_v34, %v757_v32  ;;  %v589_v37 = vpop.f32.mrf.mxu0 }
 0x101   :  { %v764_v38 = vpop.f32.mrf.mxu1  ;;  %1105 = vmatmul.bf16.gmra.mxu2 %v1823_v31 }
 0x102   :  { %v1424_v39 = vadd.f32 %v2481_v42, %v1389_v36  ;;  %1280 = vmatmul.bf16.gmra.mxu3 %v1827_v35  ;;  %v765_v6 = vadd.f32 %v764_v38, %v589_v37 }
 0x103   :  { %628 = vmatmul.bf16.gmra.mxu0 %v1823_v31 }
 0x104   :  { %v1456_v40 = vmax.f32 %v1424_v39, 0.0  ;;  %803 = vmatmul.bf16.gmra.mxu1 %v1827_v35  ;;  %v1066_v41 = vpop.f32.mrf.mxu2  ;;  %v1846_v39 = vld [vmem:[%s3097_s0 + $0x110] sm:$0xf] }
 0x105   :  { %v1241_v43 = vpop.f32.mrf.mxu3 }
 0x106   :  { %v1488_v45 = vpack.c.bf16 %v1456_v40, %v1456_v40  ;;  %v1242_v46 = vadd.f32 %v1241_v43, %v1066_v41  ;;  %v2175_v40 = vld [vmem:[%s3097_s0 + $0x114] sm:$0xf0]  ;;  %v2174_v41 = vld [vmem:[%s3097_s0 + $0x114] sm:$0xf]  ;;  %v1848_v43 = vld [vmem:[%s3097_s0 + $0x118] sm:$0xf0] }
 0x107   :  { %v1851_v51 = vor.u32 %v2174_v41, %v1848_v43 }
 0x108   :  { %1521 = vst.msk [vmem:[%s3099_s3 + $0x24] sm:$0xf] %vm1511_vm0, %v1488_v45  ;;  %v1390_v47 = vadd.f32 %v1242_v46, %v760_v44  ;;  %v591_v48 = vpop.f32.mrf.mxu0 }
 0x109   :  { %v766_v49 = vpop.f32.mrf.mxu1 }
 0x10a   :  { %v1425_v50 = vadd.f32 %v2481_v42, %v1390_v47  ;;  %v767_v21 = vadd.f32 %v766_v49, %v591_v48  ;;  %v1847_v47 = vor.u32 %v2175_v40, %v1846_v39 }
 0x10c   :  { %v1457_v55 = vmax.f32 %v1425_v50, 0.0  ;;  %v1068_v56 = vpop.f32.mrf.mxu2 }
 0x10d   :  { %v1243_v57 = vpop.f32.mrf.mxu3 }
 0x10e   :  { %v1489_v60 = vpack.c.bf16 %v1457_v55, %v1457_v55  ;;  %v1244_v61 = vadd.f32 %v1243_v57, %v1068_v56 }
 0x110   :  { %1522 = vst.msk [vmem:[%s3099_s3 + $0x28] sm:$0xf] %vm1511_vm0, %v1489_v60  ;;  %v1391_v63 = vadd.f32 %v1244_v61, %v762_v59  ;;  %v594_v0 = vpop.f32.mrf.mxu0 }
 0x111   :  { %v769_v1 = vpop.f32.mrf.mxu1  ;;  %1110 = vmatmul.bf16.gmra.mxu2 %v1831_v58 }
 0x112   :  { %v1426_v2 = vadd.f32 %v2481_v42, %v1391_v63  ;;  %1285 = vmatmul.bf16.gmra.mxu3 %v1835_v62  ;;  %v770_v32 = vadd.f32 %v769_v1, %v594_v0 }
 0x113   :  { %633 = vmatmul.bf16.gmra.mxu0 %v1831_v58 }
 0x114   :  { %v1458_v3 = vmax.f32 %v1426_v2, 0.0  ;;  %808 = vmatmul.bf16.gmra.mxu1 %v1835_v62  ;;  %v1071_v4 = vpop.f32.mrf.mxu2  ;;  %v1854_v2 = vld [vmem:[%s3097_s0 + $0x120] sm:$0xf] }
 0x115   :  { %v1246_v5 = vpop.f32.mrf.mxu3 }
 0x116   :  { %v1490_v7 = vpack.c.bf16 %v1458_v3, %v1458_v3  ;;  %v1247_v8 = vadd.f32 %v1246_v5, %v1071_v4  ;;  %v2177_v3 = vld [vmem:[%s3097_s0 + $0x124] sm:$0xf0]  ;;  %v2176_v4 = vld [vmem:[%s3097_s0 + $0x124] sm:$0xf]  ;;  %v1856_v5 = vld [vmem:[%s3097_s0 + $0x128] sm:$0xf0] }
 0x117   :  { %v1859_v13 = vor.u32 %v2176_v4, %v1856_v5 }
 0x118   :  { %1523 = vst.msk [vmem:[%s3099_s3 + $0x2c] sm:$0xf] %vm1511_vm0, %v1490_v7  ;;  %v1392_v9 = vadd.f32 %v1247_v8, %v765_v6  ;;  %v596_v10 = vpop.f32.mrf.mxu0 }
 0x119   :  { %v771_v11 = vpop.f32.mrf.mxu1 }
 0x11a   :  { %v1427_v12 = vadd.f32 %v2481_v42, %v1392_v9  ;;  %v772_v48 = vadd.f32 %v771_v11, %v596_v10  ;;  %v1855_v9 = vor.u32 %v2177_v3, %v1854_v2 }
 0x11c   :  { %v1459_v17 = vmax.f32 %v1427_v12, 0.0  ;;  %v1073_v18 = vpop.f32.mrf.mxu2 }
 0x11d   :  { %v1248_v19 = vpop.f32.mrf.mxu3 }
 0x11e   :  { %v1491_v22 = vpack.c.bf16 %v1459_v17, %v1459_v17  ;;  %v1249_v23 = vadd.f32 %v1248_v19, %v1073_v18 }
 0x120   :  { %1524 = vst.msk [vmem:[%s3099_s3 + $0x30] sm:$0xf] %vm1511_vm0, %v1491_v22  ;;  %v1393_v25 = vadd.f32 %v1249_v23, %v767_v21  ;;  %v599_v26 = vpop.f32.mrf.mxu0 }
 0x121   :  { %v774_v27 = vpop.f32.mrf.mxu1  ;;  %1115 = vmatmul.bf16.gmra.mxu2 %v1839_v20 }
 0x122   :  { %v1428_v28 = vadd.f32 %v2481_v42, %v1393_v25  ;;  %1290 = vmatmul.bf16.gmra.mxu3 %v1843_v24  ;;  %v775_v59 = vadd.f32 %v774_v27, %v599_v26 }
 0x123   :  { %638 = vmatmul.bf16.gmra.mxu0 %v1839_v20 }
 0x124   :  { %v1460_v29 = vmax.f32 %v1428_v28, 0.0  ;;  %813 = vmatmul.bf16.gmra.mxu1 %v1843_v24  ;;  %v1076_v30 = vpop.f32.mrf.mxu2  ;;  %v1862_v28 = vld [vmem:[%s3097_s0 + $0x130] sm:$0xf] }
 0x125   :  { %v1251_v31 = vpop.f32.mrf.mxu3 }
 0x126   :  { %v1492_v33 = vpack.c.bf16 %v1460_v29, %v1460_v29  ;;  %v1252_v34 = vadd.f32 %v1251_v31, %v1076_v30  ;;  %v2179_v29 = vld [vmem:[%s3097_s0 + $0x134] sm:$0xf0]  ;;  %v2178_v30 = vld [vmem:[%s3097_s0 + $0x134] sm:$0xf]  ;;  %v1864_v31 = vld [vmem:[%s3097_s0 + $0x138] sm:$0xf0] }
 0x127   :  { %v1867_v39 = vor.u32 %v2178_v30, %v1864_v31 }
 0x128   :  { %1525 = vst.msk [vmem:[%s3099_s3 + $0x34] sm:$0xf] %vm1511_vm0, %v1492_v33  ;;  %v1394_v35 = vadd.f32 %v1252_v34, %v770_v32  ;;  %v601_v36 = vpop.f32.mrf.mxu0 }
 0x129   :  { %v776_v37 = vpop.f32.mrf.mxu1 }
 0x12a   :  { %v1429_v38 = vadd.f32 %v2481_v42, %v1394_v35  ;;  %v777_v10 = vadd.f32 %v776_v37, %v601_v36  ;;  %v1863_v35 = vor.u32 %v2179_v29, %v1862_v28 }
 0x12c   :  { %v1461_v44 = vmax.f32 %v1429_v38, 0.0  ;;  %v1078_v45 = vpop.f32.mrf.mxu2 }
 0x12d   :  { %v1253_v46 = vpop.f32.mrf.mxu3 }
 0x12e   :  { %v1493_v49 = vpack.c.bf16 %v1461_v44, %v1461_v44  ;;  %v1254_v50 = vadd.f32 %v1253_v46, %v1078_v45 }
 0x130   :  { %1526 = vst.msk [vmem:[%s3099_s3 + $0x38] sm:$0xf] %vm1511_vm0, %v1493_v49  ;;  %v1395_v52 = vadd.f32 %v1254_v50, %v772_v48  ;;  %v604_v53 = vpop.f32.mrf.mxu0 }
 0x131   :  { %v779_v54 = vpop.f32.mrf.mxu1  ;;  %1120 = vmatmul.bf16.gmra.mxu2 %v1847_v47 }
 0x132   :  { %v1430_v55 = vadd.f32 %v2481_v42, %v1395_v52  ;;  %1295 = vmatmul.bf16.gmra.mxu3 %v1851_v51  ;;  %v780_v21 = vadd.f32 %v779_v54, %v604_v53 }
 0x133   :  { %641 = vmatmul.bf16.gmra.mxu0 %v1847_v47 }
 0x134   :  { %v1462_v56 = vmax.f32 %v1430_v55, 0.0  ;;  %816 = vmatmul.bf16.gmra.mxu1 %v1851_v51  ;;  %v1081_v57 = vpop.f32.mrf.mxu2  ;;  %v1870_v55 = vld [vmem:[%s3097_s0 + $0x140] sm:$0xf] }
 0x135   :  { %v1256_v58 = vpop.f32.mrf.mxu3 }
 0x136   :  { %v1494_v60 = vpack.c.bf16 %v1462_v56, %v1462_v56  ;;  %v1257_v61 = vadd.f32 %v1256_v58, %v1081_v57  ;;  %v2181_v56 = vld [vmem:[%s3097_s0 + $0x144] sm:$0xf0]  ;;  %v2180_v57 = vld [vmem:[%s3097_s0 + $0x144] sm:$0xf]  ;;  %v1872_v58 = vld [vmem:[%s3097_s0 + $0x148] sm:$0xf0] }
 0x137   :  { %v1875_v2 = vor.u32 %v2180_v57, %v1872_v58 }
 0x138   :  { %1527 = vst.msk [vmem:[%s3099_s3 + $0x3c] sm:$0xf] %vm1511_vm0, %v1494_v60  ;;  %v1396_v62 = vadd.f32 %v1257_v61, %v775_v59  ;;  %v606_v63 = vpop.f32.mrf.mxu0 }
 0x139   :  { %v781_v0 = vpop.f32.mrf.mxu1 }
 0x13a   :  { %v1431_v1 = vadd.f32 %v2481_v42, %v1396_v62  ;;  %v782_v36 = vadd.f32 %v781_v0, %v606_v63  ;;  %v1871_v62 = vor.u32 %v2181_v56, %v1870_v55 }
 0x13c   :  { %v1463_v6 = vmax.f32 %v1431_v1, 0.0  ;;  %v1083_v7 = vpop.f32.mrf.mxu2 }
 0x13d   :  { %v1258_v8 = vpop.f32.mrf.mxu3 }
 0x13e   :  { %v1495_v11 = vpack.c.bf16 %v1463_v6, %v1463_v6  ;;  %v1259_v12 = vadd.f32 %v1258_v8, %v1083_v7 }
 0x140   :  { %1528 = vst.msk [vmem:[%s3099_s3 + $0x40] sm:$0xf] %vm1511_vm0, %v1495_v11  ;;  %v1397_v14 = vadd.f32 %v1259_v12, %v777_v10  ;;  %v609_v15 = vpop.f32.mrf.mxu0 }
 0x141   :  { %v784_v16 = vpop.f32.mrf.mxu1  ;;  %1123 = vmatmul.bf16.gmra.mxu2 %v1855_v9 }
 0x142   :  { %v1432_v17 = vadd.f32 %v2481_v42, %v1397_v14  ;;  %1298 = vmatmul.bf16.gmra.mxu3 %v1859_v13  ;;  %v785_v48 = vadd.f32 %v784_v16, %v609_v15 }
 0x143   :  { %646 = vmatmul.bf16.gmra.mxu0 %v1855_v9 }
 0x144   :  { %v1464_v18 = vmax.f32 %v1432_v17, 0.0  ;;  %821 = vmatmul.bf16.gmra.mxu1 %v1859_v13  ;;  %v1086_v19 = vpop.f32.mrf.mxu2  ;;  %v1878_v17 = vld [vmem:[%s3097_s0 + $0x150] sm:$0xf] }
 0x145   :  { %v1261_v20 = vpop.f32.mrf.mxu3 }
 0x146   :  { %v1496_v22 = vpack.c.bf16 %v1464_v18, %v1464_v18  ;;  %v1262_v23 = vadd.f32 %v1261_v20, %v1086_v19  ;;  %v2183_v18 = vld [vmem:[%s3097_s0 + $0x154] sm:$0xf0]  ;;  %v2182_v19 = vld [vmem:[%s3097_s0 + $0x154] sm:$0xf]  ;;  %v1880_v20 = vld [vmem:[%s3097_s0 + $0x158] sm:$0xf0] }
 0x147   :  { %v1883_v28 = vor.u32 %v2182_v19, %v1880_v20 }
 0x148   :  { %1529 = vst.msk [vmem:[%s3099_s3 + $0x44] sm:$0xf] %vm1511_vm0, %v1496_v22  ;;  %v1398_v24 = vadd.f32 %v1262_v23, %v780_v21  ;;  %v611_v25 = vpop.f32.mrf.mxu0 }
 0x149   :  { %v786_v26 = vpop.f32.mrf.mxu1 }
 0x14a   :  { %v1433_v27 = vadd.f32 %v2481_v42, %v1398_v24  ;;  %v787_v63 = vadd.f32 %v786_v26, %v611_v25  ;;  %v1879_v24 = vor.u32 %v2183_v18, %v1878_v17 }
 0x14c   :  { %v1465_v32 = vmax.f32 %v1433_v27, 0.0  ;;  %v1088_v33 = vpop.f32.mrf.mxu2 }
 0x14d   :  { %v1263_v34 = vpop.f32.mrf.mxu3 }
 0x14e   :  { %v1497_v37 = vpack.c.bf16 %v1465_v32, %v1465_v32  ;;  %v1264_v38 = vadd.f32 %v1263_v34, %v1088_v33 }
 0x150   :  { %1530 = vst.msk [vmem:[%s3099_s3 + $0x48] sm:$0xf] %vm1511_vm0, %v1497_v37  ;;  %v1399_v40 = vadd.f32 %v1264_v38, %v782_v36  ;;  %v614_v41 = vpop.f32.mrf.mxu0 }
 0x151   :  { %v789_v43 = vpop.f32.mrf.mxu1  ;;  %1128 = vmatmul.bf16.gmra.mxu2 %v1863_v35 }
 0x152   :  { %v1434_v44 = vadd.f32 %v2481_v42, %v1399_v40  ;;  %1303 = vmatmul.bf16.gmra.mxu3 %v1867_v39  ;;  %v790_v10 = vadd.f32 %v789_v43, %v614_v41 }
 0x153   :  { %651 = vmatmul.bf16.gmra.mxu0 %v1863_v35 }
 0x154   :  { %v1466_v45 = vmax.f32 %v1434_v44, 0.0  ;;  %826 = vmatmul.bf16.gmra.mxu1 %v1867_v39  ;;  %v1091_v46 = vpop.f32.mrf.mxu2  ;;  %v1886_v44 = vld [vmem:[%s3097_s0 + $0x160] sm:$0xf] }
 0x155   :  { %v1266_v47 = vpop.f32.mrf.mxu3 }
 0x156   :  { %v1498_v49 = vpack.c.bf16 %v1466_v45, %v1466_v45  ;;  %v1267_v50 = vadd.f32 %v1266_v47, %v1091_v46  ;;  %v2185_v45 = vld [vmem:[%s3097_s0 + $0x164] sm:$0xf0]  ;;  %v2184_v46 = vld [vmem:[%s3097_s0 + $0x164] sm:$0xf]  ;;  %v1888_v47 = vld [vmem:[%s3097_s0 + $0x168] sm:$0xf0] }
 0x157   :  { %v1891_v55 = vor.u32 %v2184_v46, %v1888_v47 }
 0x158   :  { %1531 = vst.msk [vmem:[%s3099_s3 + $0x4c] sm:$0xf] %vm1511_vm0, %v1498_v49  ;;  %v1400_v51 = vadd.f32 %v1267_v50, %v785_v48  ;;  %v616_v52 = vpop.f32.mrf.mxu0 }
 0x159   :  { %v791_v53 = vpop.f32.mrf.mxu1 }
 0x15a   :  { %v1435_v54 = vadd.f32 %v2481_v42, %v1400_v51  ;;  %v792_v25 = vadd.f32 %v791_v53, %v616_v52  ;;  %v1887_v51 = vor.u32 %v2185_v45, %v1886_v44 }
 0x15c   :  { %v1467_v59 = vmax.f32 %v1435_v54, 0.0  ;;  %v1093_v60 = vpop.f32.mrf.mxu2 }
 0x15d   :  { %v1268_v61 = vpop.f32.mrf.mxu3 }
 0x15e   :  { %v1499_v0 = vpack.c.bf16 %v1467_v59, %v1467_v59  ;;  %v1269_v1 = vadd.f32 %v1268_v61, %v1093_v60 }
 0x160   :  { %1532 = vst.msk [vmem:[%s3099_s3 + $0x50] sm:$0xf] %vm1511_vm0, %v1499_v0  ;;  %v1401_v3 = vadd.f32 %v1269_v1, %v787_v63  ;;  %v619_v4 = vpop.f32.mrf.mxu0 }
 0x161   :  { %v794_v5 = vpop.f32.mrf.mxu1  ;;  %1133 = vmatmul.bf16.gmra.mxu2 %v1871_v62 }
 0x162   :  { %v1436_v6 = vadd.f32 %v2481_v42, %v1401_v3  ;;  %1308 = vmatmul.bf16.gmra.mxu3 %v1875_v2  ;;  %v795_v36 = vadd.f32 %v794_v5, %v619_v4 }
 0x163   :  { %656 = vmatmul.bf16.gmra.mxu0 %v1871_v62 }
 0x164   :  { %v1468_v7 = vmax.f32 %v1436_v6, 0.0  ;;  %831 = vmatmul.bf16.gmra.mxu1 %v1875_v2  ;;  %v1096_v8 = vpop.f32.mrf.mxu2  ;;  %v1894_v6 = vld [vmem:[%s3097_s0 + $0x170] sm:$0xf] }
 0x165   :  { %v1271_v9 = vpop.f32.mrf.mxu3 }
 0x166   :  { %v1500_v11 = vpack.c.bf16 %v1468_v7, %v1468_v7  ;;  %v1272_v12 = vadd.f32 %v1271_v9, %v1096_v8  ;;  %v2187_v7 = vld [vmem:[%s3097_s0 + $0x174] sm:$0xf0]  ;;  %v2186_v8 = vld [vmem:[%s3097_s0 + $0x174] sm:$0xf]  ;;  %v1896_v9 = vld [vmem:[%s3097_s0 + $0x178] sm:$0xf0] }
 0x167   :  { %v1899_v17 = vor.u32 %v2186_v8, %v1896_v9 }
 0x168   :  { %1533 = vst.msk [vmem:[%s3099_s3 + $0x54] sm:$0xf] %vm1511_vm0, %v1500_v11  ;;  %v1402_v13 = vadd.f32 %v1272_v12, %v790_v10  ;;  %v621_v14 = vpop.f32.mrf.mxu0 }
 0x169   :  { %v796_v15 = vpop.f32.mrf.mxu1 }
 0x16a   :  { %v1437_v16 = vadd.f32 %v2481_v42, %v1402_v13  ;;  %v797_v52 = vadd.f32 %v796_v15, %v621_v14  ;;  %v1895_v13 = vor.u32 %v2187_v7, %v1894_v6 }
 0x16c   :  { %v1469_v21 = vmax.f32 %v1437_v16, 0.0  ;;  %v1098_v22 = vpop.f32.mrf.mxu2 }
 0x16d   :  { %v1273_v23 = vpop.f32.mrf.mxu3 }
 0x16e   :  { %v1501_v26 = vpack.c.bf16 %v1469_v21, %v1469_v21  ;;  %v1274_v27 = vadd.f32 %v1273_v23, %v1098_v22 }
 0x170   :  { %1534 = vst.msk [vmem:[%s3099_s3 + $0x58] sm:$0xf] %vm1511_vm0, %v1501_v26  ;;  %v1403_v29 = vadd.f32 %v1274_v27, %v792_v25  ;;  %v624_v30 = vpop.f32.mrf.mxu0 }
 0x171   :  { %v799_v31 = vpop.f32.mrf.mxu1  ;;  %1138 = vmatmul.bf16.gmra.mxu2 %v1879_v24 }
 0x172   :  { %v1438_v32 = vadd.f32 %v2481_v42, %v1403_v29  ;;  %1313 = vmatmul.bf16.gmra.mxu3 %v1883_v28  ;;  %v800_v63 = vadd.f32 %v799_v31, %v624_v30 }
 0x173   :  { %661 = vmatmul.bf16.gmra.mxu0 %v1879_v24 }
 0x174   :  { %v1470_v33 = vmax.f32 %v1438_v32, 0.0  ;;  %836 = vmatmul.bf16.gmra.mxu1 %v1883_v28  ;;  %v1101_v34 = vpop.f32.mrf.mxu2  ;;  %v1902_v32 = vld [vmem:[%s3097_s0 + $0x180] sm:$0xf] }
 0x175   :  { %v1276_v35 = vpop.f32.mrf.mxu3 }
 0x176   :  { %v1502_v37 = vpack.c.bf16 %v1470_v33, %v1470_v33  ;;  %v1277_v38 = vadd.f32 %v1276_v35, %v1101_v34  ;;  %v2189_v33 = vld [vmem:[%s3097_s0 + $0x184] sm:$0xf0]  ;;  %v2188_v34 = vld [vmem:[%s3097_s0 + $0x184] sm:$0xf]  ;;  %v1904_v35 = vld [vmem:[%s3097_s0 + $0x188] sm:$0xf0] }
 0x177   :  { %v1907_v44 = vor.u32 %v2188_v34, %v1904_v35  ;;  %v1926_v35 = vld [vmem:[%s3097_s0 + $0x1b0] sm:$0xf] }
 0x178   :  { %1535 = vst.msk [vmem:[%s3099_s3 + $0x5c] sm:$0xf] %vm1511_vm0, %v1502_v37  ;;  %v1404_v39 = vadd.f32 %v1277_v38, %v795_v36  ;;  %v626_v40 = vpop.f32.mrf.mxu0 }
 0x179   :  { %v801_v41 = vpop.f32.mrf.mxu1 }
 0x17a   :  { %v1439_v43 = vadd.f32 %v2481_v42, %v1404_v39  ;;  %v802_v14 = vadd.f32 %v801_v41, %v626_v40  ;;  %v1903_v39 = vor.u32 %v2189_v33, %v1902_v32  ;;  %v2850_v33 = vld [vmem:[%s3098_s2] ss:$0 sm:$0xff] }
 0x17c   :  { %v1471_v48 = vmax.f32 %v1439_v43, 0.0  ;;  %v1103_v49 = vpop.f32.mrf.mxu2 }
 0x17d   :  { %v1278_v50 = vpop.f32.mrf.mxu3 }
 0x17e   :  { %v1503_v53 = vpack.c.bf16 %v1471_v48, %v1471_v48  ;;  %v1279_v54 = vadd.f32 %v1278_v50, %v1103_v49 }
 0x180   :  { %1536 = vst.msk [vmem:[%s3099_s3 + $0x60] sm:$0xf] %vm1511_vm0, %v1503_v53  ;;  %v1405_v56 = vadd.f32 %v1279_v54, %v797_v52  ;;  %v629_v57 = vpop.f32.mrf.mxu0 }
 0x181   :  { %v804_v58 = vpop.f32.mrf.mxu1  ;;  %1143 = vmatmul.bf16.gmra.mxu2 %v1887_v51 }
 0x182   :  { %v1440_v59 = vadd.f32 %v2481_v42, %v1405_v56  ;;  %1318 = vmatmul.bf16.gmra.mxu3 %v1891_v55  ;;  %v805_v25 = vadd.f32 %v804_v58, %v629_v57 }
 0x183   :  { %666 = vmatmul.bf16.gmra.mxu0 %v1887_v51 }
 0x184   :  { %v1472_v60 = vmax.f32 %v1440_v59, 0.0  ;;  %841 = vmatmul.bf16.gmra.mxu1 %v1891_v55  ;;  %v1106_v61 = vpop.f32.mrf.mxu2  ;;  %v1910_v59 = vld [vmem:[%s3097_s0 + $0x190] sm:$0xf] }
 0x185   :  { %v1281_v62 = vpop.f32.mrf.mxu3 }
 0x186   :  { %v1504_v0 = vpack.c.bf16 %v1472_v60, %v1472_v60  ;;  %v1282_v1 = vadd.f32 %v1281_v62, %v1106_v61  ;;  %v2191_v60 = vld [vmem:[%s3097_s0 + $0x194] sm:$0xf0]  ;;  %v2190_v61 = vld [vmem:[%s3097_s0 + $0x194] sm:$0xf]  ;;  %v1912_v62 = vld [vmem:[%s3097_s0 + $0x198] sm:$0xf0] }
 0x187   :  { %v1915_v6 = vor.u32 %v2190_v61, %v1912_v62  ;;  %v1934_v62 = vld [vmem:[%s3097_s0 + $0x1c0] sm:$0xf] }
 0x188   :  { %1537 = vst.msk [vmem:[%s3099_s3 + $0x64] sm:$0xf] %vm1511_vm0, %v1504_v0  ;;  %v1406_v2 = vadd.f32 %v1282_v1, %v800_v63  ;;  %v631_v3 = vpop.f32.mrf.mxu0 }
 0x189   :  { %v806_v4 = vpop.f32.mrf.mxu1 }
 0x18a   :  { %v1441_v5 = vadd.f32 %v2481_v42, %v1406_v2  ;;  %v807_v40 = vadd.f32 %v806_v4, %v631_v3  ;;  %v1911_v2 = vor.u32 %v2191_v60, %v1910_v59 }
 0x18c   :  { %v1473_v10 = vmax.f32 %v1441_v5, 0.0  ;;  %v1108_v11 = vpop.f32.mrf.mxu2 }
 0x18d   :  { %v1283_v12 = vpop.f32.mrf.mxu3 }
 0x18e   :  { %v1505_v15 = vpack.c.bf16 %v1473_v10, %v1473_v10  ;;  %v1284_v16 = vadd.f32 %v1283_v12, %v1108_v11 }
 0x190   :  { %1538 = vst.msk [vmem:[%s3099_s3 + $0x68] sm:$0xf] %vm1511_vm0, %v1505_v15  ;;  %v1407_v18 = vadd.f32 %v1284_v16, %v802_v14  ;;  %v634_v19 = vpop.f32.mrf.mxu0 }
 0x191   :  { %v809_v20 = vpop.f32.mrf.mxu1  ;;  %1148 = vmatmul.bf16.gmra.mxu2 %v1895_v13 }
 0x192   :  { %v1442_v21 = vadd.f32 %v2481_v42, %v1407_v18  ;;  %1323 = vmatmul.bf16.gmra.mxu3 %v1899_v17  ;;  %v810_v52 = vadd.f32 %v809_v20, %v634_v19  ;;  %v2192_v18 = vld [vmem:[%s3097_s0 + $0x1a4] sm:$0xf]  ;;  %v1920_v19 = vld [vmem:[%s3097_s0 + $0x1a8] sm:$0xf0] }
 0x193   :  { %671 = vmatmul.bf16.gmra.mxu0 %v1895_v13 }
 0x194   :  { %v1474_v22 = vmax.f32 %v1442_v21, 0.0  ;;  %846 = vmatmul.bf16.gmra.mxu1 %v1899_v17  ;;  %v1111_v23 = vpop.f32.mrf.mxu2  ;;  %v1918_v17 = vld [vmem:[%s3097_s0 + $0x1a0] sm:$0xf] }
 0x195   :  { %v1286_v24 = vpop.f32.mrf.mxu3 }
 0x196   :  { %v1506_v26 = vpack.c.bf16 %v1474_v22, %v1474_v22  ;;  %v1287_v27 = vadd.f32 %v1286_v24, %v1111_v23  ;;  %v1923_v23 = vor.u32 %v2192_v18, %v1920_v19 }
 0x198   :  { %1539 = vst.msk [vmem:[%s3099_s3 + $0x6c] sm:$0xf] %vm1511_vm0, %v1506_v26  ;;  %v1408_v28 = vadd.f32 %v1287_v27, %v805_v25  ;;  %v636_v29 = vpop.f32.mrf.mxu0 }
 0x199   :  { %v811_v30 = vpop.f32.mrf.mxu1 }
 0x19a   :  { %v1443_v31 = vadd.f32 %v2481_v42, %v1408_v28  ;;  %v812_v3 = vadd.f32 %v811_v30, %v636_v29 }
 0x19c   :  { %v1475_v36 = vmax.f32 %v1443_v31, 0.0  ;;  %v1113_v37 = vpop.f32.mrf.mxu2 }
 0x19d   :  { %v1288_v38 = vpop.f32.mrf.mxu3 }
 0x19e   :  { %v1507_v41 = vpack.c.bf16 %v1475_v36, %v1475_v36  ;;  %v1289_v43 = vadd.f32 %v1288_v38, %v1113_v37  ;;  %v2195_v36 = vld [vmem:[%s3097_s0 + $0x1b4] sm:$0xf0]  ;;  %v2194_v37 = vld [vmem:[%s3097_s0 + $0x1b4] sm:$0xf]  ;;  %v1928_v38 = vld [vmem:[%s3097_s0 + $0x1b8] sm:$0xf0] }
 0x1a0   :  { %1540 = vst.msk [vmem:[%s3099_s3 + $0x70] sm:$0xf] %vm1511_vm0, %v1507_v41  ;;  %v1409_v45 = vadd.f32 %v1289_v43, %v807_v40  ;;  %v639_v46 = vpop.f32.mrf.mxu0  ;;  %v1927_v43 = vor.u32 %v2195_v36, %v1926_v35 }
 0x1a1   :  { %v814_v47 = vpop.f32.mrf.mxu1  ;;  %1153 = vmatmul.bf16.gmra.mxu2 %v1903_v39 }
 0x1a2   :  { %v1444_v48 = vadd.f32 %v2481_v42, %v1409_v45  ;;  %1328 = vmatmul.bf16.gmra.mxu3 %v1907_v44  ;;  %v1931_v47 = vor.u32 %v2194_v37, %v1928_v38 }
 0x1a3   :  { %676 = vmatmul.bf16.gmra.mxu0 %v1903_v39 }
 0x1a4   :  { %v1476_v49 = vmax.f32 %v1444_v48, 0.0  ;;  %851 = vmatmul.bf16.gmra.mxu1 %v1907_v44  ;;  %v1116_v50 = vpop.f32.mrf.mxu2 }
 0x1a5   :  { %v1291_v51 = vpop.f32.mrf.mxu3 }
 0x1a6   :  { %v1508_v53 = vpack.c.bf16 %v1476_v49, %v1476_v49  ;;  %v1292_v54 = vadd.f32 %v1291_v51, %v1116_v50 }
 0x1a8   :  { %1541 = vst.msk [vmem:[%s3099_s3 + $0x74] sm:$0xf] %vm1511_vm0, %v1508_v53  ;;  %v1410_v55 = vadd.f32 %v1292_v54, %v810_v52  ;;  %v640_v56 = vpop.f32.mrf.mxu0 }
 0x1a9   :  { %v815_v57 = vpop.f32.mrf.mxu1 }
 0x1aa   :  { %v1445_v58 = vadd.f32 %v2481_v42, %v1410_v55 }
 0x1ac   :  { %v1477_v63 = vmax.f32 %v1445_v58, 0.0  ;;  %v1118_v0 = vpop.f32.mrf.mxu2 }
 0x1ad   :  { %v1293_v1 = vpop.f32.mrf.mxu3 }
 0x1ae   :  { %v1509_v4 = vpack.c.bf16 %v1477_v63, %v1477_v63  ;;  %v1294_v5 = vadd.f32 %v1293_v1, %v1118_v0  ;;  %v2197_v63 = vld [vmem:[%s3097_s0 + $0x1c4] sm:$0xf0]  ;;  %v2196_v0 = vld [vmem:[%s3097_s0 + $0x1c4] sm:$0xf]  ;;  %v1936_v1 = vld [vmem:[%s3097_s0 + $0x1c8] sm:$0xf0] }
 0x1b0   :  { %1542 = vst.msk [vmem:[%s3099_s3 + $0x78] sm:$0xf] %vm1511_vm0, %v1509_v4  ;;  %v1411_v7 = vadd.f32 %v1294_v5, %v812_v3  ;;  %v642_v8 = vpop.f32.mrf.mxu0  ;;  %v1935_v5 = vor.u32 %v2197_v63, %v1934_v62 }
 0x1b1   :  { %v817_v9 = vpop.f32.mrf.mxu1  ;;  %1158 = vmatmul.bf16.gmra.mxu2 %v1911_v2 }
 0x1b2   :  { %v1446_v10 = vadd.f32 %v2481_v42, %v1411_v7  ;;  %1333 = vmatmul.bf16.gmra.mxu3 %v1915_v6  ;;  %v2193_v42 = vld [vmem:[%s3097_s0 + $0x1a4] sm:$0xf0]  ;;  %v818_v28 = vadd.f32 %v817_v9, %v642_v8  ;;  %v1939_v9 = vor.u32 %v2196_v0, %v1936_v1 }
 0x1b3   :  { %681 = vmatmul.bf16.gmra.mxu0 %v1911_v2  ;;  %v1919_v22 = vor.u32 %v2193_v42, %v1918_v17 }
 0x1b4   :  { %v1478_v11 = vmax.f32 %v1446_v10, 0.0  ;;  %856 = vmatmul.bf16.gmra.mxu1 %v1915_v6  ;;  %v1121_v12 = vpop.f32.mrf.mxu2 }
 0x1b5   :  { %v1296_v13 = vpop.f32.mrf.mxu3 }
 0x1b6   :  { %v1510_v14 = vpack.c.bf16 %v1478_v11, %v1478_v11 }
 0x1b8   :  { %1543 = vst.msk [vmem:[%s3099_s3 + $0x7c] sm:$0xf] %vm1511_vm0, %v1510_v14  ;;  %v644_v15 = vpop.f32.mrf.mxu0 }
 0x1b9   :  { %v819_v16 = vpop.f32.mrf.mxu1 }
 0x1ba   :  { %v820_v44 = vadd.f32 %v819_v16, %v644_v15 }
 0x1bc   :  { %v1122_v20 = vpop.f32.mrf.mxu2 }
 0x1bd   :  { %v1297_v21 = vpop.f32.mrf.mxu3 }
 0x1c0   :  { %v647_v24 = vpop.f32.mrf.mxu0 }
 0x1c1   :  { %v822_v25 = vpop.f32.mrf.mxu1  ;;  %1163 = vmatmul.bf16.gmra.mxu2 %v1919_v22 }
 0x1c2   :  { %1338 = vmatmul.bf16.gmra.mxu3 %v1923_v23  ;;  %v823_v55 = vadd.f32 %v822_v25, %v647_v24  ;;  %v2199_v24 = vld [vmem:[%s3097_s0 + $0x1d4] sm:$0xf0]  ;;  %v2198_v25 = vld [vmem:[%s3097_s0 + $0x1d4] sm:$0xf] }
 0x1c3   :  { %686 = vmatmul.bf16.gmra.mxu0 %v1919_v22 }
 0x1c4   :  { %861 = vmatmul.bf16.gmra.mxu1 %v1923_v23  ;;  %v1124_v26 = vpop.f32.mrf.mxu2  ;;  %v1942_v23 = vld [vmem:[%s3097_s0 + $0x1d0] sm:$0xf] }
 0x1c5   :  { %v1299_v27 = vpop.f32.mrf.mxu3 }
 0x1c6   :  { %v1300_v29 = vadd.f32 %v1299_v27, %v1124_v26  ;;  %v1944_v26 = vld [vmem:[%s3097_s0 + $0x1d8] sm:$0xf0] }
 0x1c7   :  { %v1947_v35 = vor.u32 %v2198_v25, %v1944_v26 }
 0x1c8   :  { %v1544_v30 = vadd.f32 %v1300_v29, %v818_v28  ;;  %v649_v31 = vpop.f32.mrf.mxu0 }
 0x1c9   :  { %v824_v32 = vpop.f32.mrf.mxu1 }
 0x1ca   :  { %v1576_v34 = vadd.f32 %v2850_v33, %v1544_v30  ;;  %v825_v6 = vadd.f32 %v824_v32, %v649_v31  ;;  %v1943_v30 = vor.u32 %v2199_v24, %v1942_v23 }
 0x1cc   :  { %v1608_v39 = vmax.f32 %v1576_v34, 0.0  ;;  %v1126_v40 = vpop.f32.mrf.mxu2 }
 0x1cd   :  { %v1301_v41 = vpop.f32.mrf.mxu3 }
 0x1ce   :  { %v1640_v45 = vpack.c.bf16 %v1608_v39, %v1608_v39  ;;  %v1302_v46 = vadd.f32 %v1301_v41, %v1126_v40 }
 0x1d0   :  { %1672 = vst.msk [vmem:[%s3099_s3 + $0x80] sm:$0xf] %vm1511_vm0, %v1640_v45  ;;  %v1545_v48 = vadd.f32 %v1302_v46, %v820_v44  ;;  %v652_v49 = vpop.f32.mrf.mxu0 }
 0x1d1   :  { %v827_v50 = vpop.f32.mrf.mxu1  ;;  %1168 = vmatmul.bf16.gmra.mxu2 %v1927_v43 }
 0x1d2   :  { %v1577_v51 = vadd.f32 %v2850_v33, %v1545_v48  ;;  %1343 = vmatmul.bf16.gmra.mxu3 %v1931_v47  ;;  %v828_v17 = vadd.f32 %v827_v50, %v652_v49 }
 0x1d3   :  { %691 = vmatmul.bf16.gmra.mxu0 %v1927_v43 }
 0x1d4   :  { %v1609_v52 = vmax.f32 %v1577_v51, 0.0  ;;  %866 = vmatmul.bf16.gmra.mxu1 %v1931_v47  ;;  %v1129_v53 = vpop.f32.mrf.mxu2  ;;  %v1950_v51 = vld [vmem:[%s3097_s0 + $0x1e0] sm:$0xf] }
 0x1d5   :  { %v1304_v54 = vpop.f32.mrf.mxu3 }
 0x1d6   :  { %v1641_v56 = vpack.c.bf16 %v1609_v52, %v1609_v52  ;;  %v1305_v57 = vadd.f32 %v1304_v54, %v1129_v53  ;;  %v2201_v52 = vld [vmem:[%s3097_s0 + $0x1e4] sm:$0xf0]  ;;  %v2200_v53 = vld [vmem:[%s3097_s0 + $0x1e4] sm:$0xf]  ;;  %v1952_v54 = vld [vmem:[%s3097_s0 + $0x1e8] sm:$0xf0] }
 0x1d7   :  { %v1955_v62 = vor.u32 %v2200_v53, %v1952_v54 }
 0x1d8   :  { %1673 = vst.msk [vmem:[%s3099_s3 + $0x84] sm:$0xf] %vm1511_vm0, %v1641_v56  ;;  %v1546_v58 = vadd.f32 %v1305_v57, %v823_v55  ;;  %v654_v59 = vpop.f32.mrf.mxu0 }
 0x1d9   :  { %v829_v60 = vpop.f32.mrf.mxu1 }
 0x1da   :  { %v1578_v61 = vadd.f32 %v2850_v33, %v1546_v58  ;;  %v830_v31 = vadd.f32 %v829_v60, %v654_v59  ;;  %v1951_v58 = vor.u32 %v2201_v52, %v1950_v51 }
 0x1dc   :  { %v1610_v2 = vmax.f32 %v1578_v61, 0.0  ;;  %v1131_v3 = vpop.f32.mrf.mxu2 }
 0x1dd   :  { %v1306_v4 = vpop.f32.mrf.mxu3 }
 0x1de   :  { %v1642_v7 = vpack.c.bf16 %v1610_v2, %v1610_v2  ;;  %v1307_v8 = vadd.f32 %v1306_v4, %v1131_v3 }
 0x1e0   :  { %1674 = vst.msk [vmem:[%s3099_s3 + $0x88] sm:$0xf] %vm1511_vm0, %v1642_v7  ;;  %v1547_v10 = vadd.f32 %v1307_v8, %v825_v6  ;;  %v657_v11 = vpop.f32.mrf.mxu0 }
 0x1e1   :  { %v832_v12 = vpop.f32.mrf.mxu1  ;;  %1173 = vmatmul.bf16.gmra.mxu2 %v1935_v5 }
 0x1e2   :  { %v1579_v13 = vadd.f32 %v2850_v33, %v1547_v10  ;;  %1348 = vmatmul.bf16.gmra.mxu3 %v1939_v9  ;;  %v833_v44 = vadd.f32 %v832_v12, %v657_v11 }
 0x1e3   :  { %696 = vmatmul.bf16.gmra.mxu0 %v1935_v5 }
 0x1e4   :  { %v1611_v14 = vmax.f32 %v1579_v13, 0.0  ;;  %871 = vmatmul.bf16.gmra.mxu1 %v1939_v9  ;;  %v1134_v15 = vpop.f32.mrf.mxu2  ;;  %v1958_v13 = vld [vmem:[%s3097_s0 + $0x1f0] sm:$0xf] }
 0x1e5   :  { %v1309_v16 = vpop.f32.mrf.mxu3 }
 0x1e6   :  { %v1643_v42 = vpack.c.bf16 %v1611_v14, %v1611_v14  ;;  %v1310_v18 = vadd.f32 %v1309_v16, %v1134_v15  ;;  %v2203_v14 = vld [vmem:[%s3097_s0 + $0x1f4] sm:$0xf0]  ;;  %v2202_v15 = vld [vmem:[%s3097_s0 + $0x1f4] sm:$0xf]  ;;  %v1960_v16 = vld [vmem:[%s3097_s0 + $0x1f8] sm:$0xf0] }
 0x1e7   :  { %v1963_v23 = vor.u32 %v2202_v15, %v1960_v16 }
 0x1e8   :  { %1675 = vst.msk [vmem:[%s3099_s3 + $0x8c] sm:$0xf] %vm1511_vm0, %v1643_v42  ;;  %v1548_v19 = vadd.f32 %v1310_v18, %v828_v17  ;;  %v659_v20 = vpop.f32.mrf.mxu0 }
 0x1e9   :  { %v834_v21 = vpop.f32.mrf.mxu1 }
 0x1ea   :  { %v1580_v22 = vadd.f32 %v2850_v33, %v1548_v19  ;;  %v835_v59 = vadd.f32 %v834_v21, %v659_v20  ;;  %v1959_v19 = vor.u32 %v2203_v14, %v1958_v13 }
 0x1ec   :  { %v1612_v27 = vmax.f32 %v1580_v22, 0.0  ;;  %v1136_v28 = vpop.f32.mrf.mxu2 }
 0x1ed   :  { %v1311_v29 = vpop.f32.mrf.mxu3 }
 0x1ee   :  { %v1644_v32 = vpack.c.bf16 %v1612_v27, %v1612_v27  ;;  %v1312_v34 = vadd.f32 %v1311_v29, %v1136_v28 }
 0x1f0   :  { %1676 = vst.msk [vmem:[%s3099_s3 + $0x90] sm:$0xf] %vm1511_vm0, %v1644_v32  ;;  %v1549_v36 = vadd.f32 %v1312_v34, %v830_v31  ;;  %v662_v37 = vpop.f32.mrf.mxu0 }
 0x1f1   :  { %v837_v38 = vpop.f32.mrf.mxu1  ;;  %1178 = vmatmul.bf16.gmra.mxu2 %v1943_v30 }
 0x1f2   :  { %v1581_v39 = vadd.f32 %v2850_v33, %v1549_v36  ;;  %1353 = vmatmul.bf16.gmra.mxu3 %v1947_v35  ;;  %v838_v6 = vadd.f32 %v837_v38, %v662_v37 }
 0x1f3   :  { %701 = vmatmul.bf16.gmra.mxu0 %v1943_v30 }
 0x1f4   :  { %v1613_v40 = vmax.f32 %v1581_v39, 0.0  ;;  %876 = vmatmul.bf16.gmra.mxu1 %v1947_v35  ;;  %v1139_v41 = vpop.f32.mrf.mxu2  ;;  %v1966_v39 = vld [vmem:[%s3097_s0 + $0x200] sm:$0xf] }
 0x1f5   :  { %v1314_v43 = vpop.f32.mrf.mxu3 }
 0x1f6   :  { %v1645_v45 = vpack.c.bf16 %v1613_v40, %v1613_v40  ;;  %v1315_v46 = vadd.f32 %v1314_v43, %v1139_v41  ;;  %v2205_v40 = vld [vmem:[%s3097_s0 + $0x204] sm:$0xf0]  ;;  %v2204_v41 = vld [vmem:[%s3097_s0 + $0x204] sm:$0xf]  ;;  %v1968_v43 = vld [vmem:[%s3097_s0 + $0x208] sm:$0xf0] }
 0x1f7   :  { %v1971_v51 = vor.u32 %v2204_v41, %v1968_v43 }
 0x1f8   :  { %1677 = vst.msk [vmem:[%s3099_s3 + $0x94] sm:$0xf] %vm1511_vm0, %v1645_v45  ;;  %v1550_v47 = vadd.f32 %v1315_v46, %v833_v44  ;;  %v664_v48 = vpop.f32.mrf.mxu0 }
 0x1f9   :  { %v839_v49 = vpop.f32.mrf.mxu1 }
 0x1fa   :  { %v1582_v50 = vadd.f32 %v2850_v33, %v1550_v47  ;;  %v840_v20 = vadd.f32 %v839_v49, %v664_v48  ;;  %v1967_v47 = vor.u32 %v2205_v40, %v1966_v39 }
 0x1fc   :  { %v1614_v55 = vmax.f32 %v1582_v50, 0.0  ;;  %v1141_v56 = vpop.f32.mrf.mxu2 }
 0x1fd   :  { %v1316_v57 = vpop.f32.mrf.mxu3 }
 0x1fe   :  { %v1646_v60 = vpack.c.bf16 %v1614_v55, %v1614_v55  ;;  %v1317_v61 = vadd.f32 %v1316_v57, %v1141_v56 }
 0x200   :  { %1678 = vst.msk [vmem:[%s3099_s3 + $0x98] sm:$0xf] %vm1511_vm0, %v1646_v60  ;;  %v1551_v63 = vadd.f32 %v1317_v61, %v835_v59  ;;  %v667_v0 = vpop.f32.mrf.mxu0 }
 0x201   :  { %v842_v1 = vpop.f32.mrf.mxu1  ;;  %1183 = vmatmul.bf16.gmra.mxu2 %v1951_v58 }
 0x202   :  { %v1583_v2 = vadd.f32 %v2850_v33, %v1551_v63  ;;  %1358 = vmatmul.bf16.gmra.mxu3 %v1955_v62  ;;  %v843_v31 = vadd.f32 %v842_v1, %v667_v0 }
 0x203   :  { %706 = vmatmul.bf16.gmra.mxu0 %v1951_v58 }
 0x204   :  { %v1615_v3 = vmax.f32 %v1583_v2, 0.0  ;;  %881 = vmatmul.bf16.gmra.mxu1 %v1955_v62  ;;  %v1144_v4 = vpop.f32.mrf.mxu2  ;;  %v1974_v2 = vld [vmem:[%s3097_s0 + $0x210] sm:$0xf] }
 0x205   :  { %v1319_v5 = vpop.f32.mrf.mxu3 }
 0x206   :  { %v1647_v7 = vpack.c.bf16 %v1615_v3, %v1615_v3  ;;  %v1320_v8 = vadd.f32 %v1319_v5, %v1144_v4  ;;  %v2207_v3 = vld [vmem:[%s3097_s0 + $0x214] sm:$0xf0]  ;;  %v2206_v4 = vld [vmem:[%s3097_s0 + $0x214] sm:$0xf]  ;;  %v1976_v5 = vld [vmem:[%s3097_s0 + $0x218] sm:$0xf0] }
 0x207   :  { %v1979_v13 = vor.u32 %v2206_v4, %v1976_v5 }
 0x208   :  { %1679 = vst.msk [vmem:[%s3099_s3 + $0x9c] sm:$0xf] %vm1511_vm0, %v1647_v7  ;;  %v1552_v9 = vadd.f32 %v1320_v8, %v838_v6  ;;  %v669_v10 = vpop.f32.mrf.mxu0 }
 0x209   :  { %v844_v11 = vpop.f32.mrf.mxu1 }
 0x20a   :  { %v1584_v12 = vadd.f32 %v2850_v33, %v1552_v9  ;;  %v845_v48 = vadd.f32 %v844_v11, %v669_v10  ;;  %v1975_v9 = vor.u32 %v2207_v3, %v1974_v2 }
 0x20c   :  { %v1616_v17 = vmax.f32 %v1584_v12, 0.0  ;;  %v1146_v42 = vpop.f32.mrf.mxu2 }
 0x20d   :  { %v1321_v18 = vpop.f32.mrf.mxu3 }
 0x20e   :  { %v1648_v21 = vpack.c.bf16 %v1616_v17, %v1616_v17  ;;  %v1322_v22 = vadd.f32 %v1321_v18, %v1146_v42 }
 0x210   :  { %1680 = vst.msk [vmem:[%s3099_s3 + $0xa0] sm:$0xf] %vm1511_vm0, %v1648_v21  ;;  %v1553_v24 = vadd.f32 %v1322_v22, %v840_v20  ;;  %v672_v25 = vpop.f32.mrf.mxu0 }
 0x211   :  { %v847_v26 = vpop.f32.mrf.mxu1  ;;  %1188 = vmatmul.bf16.gmra.mxu2 %v1959_v19 }
 0x212   :  { %v1585_v27 = vadd.f32 %v2850_v33, %v1553_v24  ;;  %1363 = vmatmul.bf16.gmra.mxu3 %v1963_v23  ;;  %v848_v59 = vadd.f32 %v847_v26, %v672_v25 }
 0x213   :  { %711 = vmatmul.bf16.gmra.mxu0 %v1959_v19 }
 0x214   :  { %v1617_v28 = vmax.f32 %v1585_v27, 0.0  ;;  %886 = vmatmul.bf16.gmra.mxu1 %v1963_v23  ;;  %v1149_v29 = vpop.f32.mrf.mxu2 }
 0x215   :  { %v1324_v30 = vpop.f32.mrf.mxu3 }
 0x216   :  { %v1649_v32 = vpack.c.bf16 %v1617_v28, %v1617_v28  ;;  %v1325_v34 = vadd.f32 %v1324_v30, %v1149_v29 }
 0x218   :  { %1681 = vst.msk [vmem:[%s3099_s3 + $0xa4] sm:$0xf] %vm1511_vm0, %v1649_v32  ;;  %v1554_v35 = vadd.f32 %v1325_v34, %v843_v31  ;;  %v674_v36 = vpop.f32.mrf.mxu0 }
 0x219   :  { %v849_v37 = vpop.f32.mrf.mxu1 }
 0x21a   :  { %v1586_v38 = vadd.f32 %v2850_v33, %v1554_v35  ;;  %v850_v10 = vadd.f32 %v849_v37, %v674_v36 }
 0x21c   :  { %v1618_v44 = vmax.f32 %v1586_v38, 0.0  ;;  %v1151_v45 = vpop.f32.mrf.mxu2 }
 0x21d   :  { %v1326_v46 = vpop.f32.mrf.mxu3 }
 0x21e   :  { %v1650_v49 = vpack.c.bf16 %v1618_v44, %v1618_v44  ;;  %v1327_v50 = vadd.f32 %v1326_v46, %v1151_v45 }
 0x220   :  { %1682 = vst.msk [vmem:[%s3099_s3 + $0xa8] sm:$0xf] %vm1511_vm0, %v1650_v49  ;;  %v1555_v52 = vadd.f32 %v1327_v50, %v845_v48  ;;  %v677_v53 = vpop.f32.mrf.mxu0 }
 0x221   :  { %v852_v54 = vpop.f32.mrf.mxu1  ;;  %1193 = vmatmul.bf16.gmra.mxu2 %v1967_v47 }
 0x222   :  { %v1587_v55 = vadd.f32 %v2850_v33, %v1555_v52  ;;  %1368 = vmatmul.bf16.gmra.mxu3 %v1971_v51  ;;  %v853_v20 = vadd.f32 %v852_v54, %v677_v53 }
 0x223   :  { %716 = vmatmul.bf16.gmra.mxu0 %v1967_v47 }
 0x224   :  { %v1619_v56 = vmax.f32 %v1587_v55, 0.0  ;;  %891 = vmatmul.bf16.gmra.mxu1 %v1971_v51  ;;  %v1154_v57 = vpop.f32.mrf.mxu2 }
 0x225   :  { %v1329_v58 = vpop.f32.mrf.mxu3 }
 0x226   :  { %v1651_v60 = vpack.c.bf16 %v1619_v56, %v1619_v56  ;;  %v1330_v61 = vadd.f32 %v1329_v58, %v1154_v57 }
 0x228   :  { %1683 = vst.msk [vmem:[%s3099_s3 + $0xac] sm:$0xf] %vm1511_vm0, %v1651_v60  ;;  %v1556_v62 = vadd.f32 %v1330_v61, %v848_v59  ;;  %v679_v63 = vpop.f32.mrf.mxu0 }
 0x229   :  { %v854_v0 = vpop.f32.mrf.mxu1 }
 0x22a   :  { %v1588_v1 = vadd.f32 %v2850_v33, %v1556_v62  ;;  %v855_v30 = vadd.f32 %v854_v0, %v679_v63 }
 0x22c   :  { %v1620_v6 = vmax.f32 %v1588_v1, 0.0  ;;  %v1156_v7 = vpop.f32.mrf.mxu2 }
 0x22d   :  { %v1331_v8 = vpop.f32.mrf.mxu3 }
 0x22e   :  { %v1652_v11 = vpack.c.bf16 %v1620_v6, %v1620_v6  ;;  %v1332_v12 = vadd.f32 %v1331_v8, %v1156_v7 }
 0x230   :  { %1684 = vst.msk [vmem:[%s3099_s3 + $0xb0] sm:$0xf] %vm1511_vm0, %v1652_v11  ;;  %v1557_v14 = vadd.f32 %v1332_v12, %v850_v10  ;;  %v682_v15 = vpop.f32.mrf.mxu0 }
 0x231   :  { %v857_v16 = vpop.f32.mrf.mxu1  ;;  %1198 = vmatmul.bf16.gmra.mxu2 %v1975_v9 }
 0x232   :  { %v1589_v17 = vadd.f32 %v2850_v33, %v1557_v14  ;;  %1373 = vmatmul.bf16.gmra.mxu3 %v1979_v13  ;;  %v858_v41 = vadd.f32 %v857_v16, %v682_v15 }
 0x233   :  { %721 = vmatmul.bf16.gmra.mxu0 %v1975_v9 }
 0x234   :  { %v1621_v42 = vmax.f32 %v1589_v17, 0.0  ;;  %896 = vmatmul.bf16.gmra.mxu1 %v1979_v13  ;;  %v1159_v18 = vpop.f32.mrf.mxu2 }
 0x235   :  { %v1334_v19 = vpop.f32.mrf.mxu3 }
 0x236   :  { %v1653_v21 = vpack.c.bf16 %v1621_v42, %v1621_v42  ;;  %v1335_v22 = vadd.f32 %v1334_v19, %v1159_v18 }
 0x238   :  { %1685 = vst.msk [vmem:[%s3099_s3 + $0xb4] sm:$0xf] %vm1511_vm0, %v1653_v21  ;;  %v1558_v23 = vadd.f32 %v1335_v22, %v853_v20  ;;  %v684_v24 = vpop.f32.mrf.mxu0 }
 0x239   :  { %v859_v25 = vpop.f32.mrf.mxu1 }
 0x23a   :  { %v1590_v26 = vadd.f32 %v2850_v33, %v1558_v23  ;;  %v860_v52 = vadd.f32 %v859_v25, %v684_v24 }
 0x23c   :  { %v1622_v27 = vmax.f32 %v1590_v26, 0.0  ;;  %v1161_v28 = vpop.f32.mrf.mxu2 }
 0x23d   :  { %v1336_v29 = vpop.f32.mrf.mxu3 }
 0x23e   :  { %v1654_v31 = vpack.c.bf16 %v1622_v27, %v1622_v27  ;;  %v1337_v32 = vadd.f32 %v1336_v29, %v1161_v28 }
 0x240   :  { %1686 = vst.msk [vmem:[%s3099_s3 + $0xb8] sm:$0xf] %vm1511_vm0, %v1654_v31  ;;  %v1559_v34 = vadd.f32 %v1337_v32, %v855_v30  ;;  %v687_v35 = vpop.f32.mrf.mxu0 }
 0x241   :  { %v862_v36 = vpop.f32.mrf.mxu1 }
 0x242   :  { %v1591_v37 = vadd.f32 %v2850_v33, %v1559_v34  ;;  %v863_v62 = vadd.f32 %v862_v36, %v687_v35 }
 0x244   :  { %v1623_v38 = vmax.f32 %v1591_v37, 0.0  ;;  %v1164_v39 = vpop.f32.mrf.mxu2 }
 0x245   :  { %v1339_v40 = vpop.f32.mrf.mxu3 }
 0x246   :  { %v1655_v43 = vpack.c.bf16 %v1623_v38, %v1623_v38  ;;  %v1340_v44 = vadd.f32 %v1339_v40, %v1164_v39 }
 0x248   :  { %1687 = vst.msk [vmem:[%s3099_s3 + $0xbc] sm:$0xf] %vm1511_vm0, %v1655_v43  ;;  %v1560_v45 = vadd.f32 %v1340_v44, %v858_v41  ;;  %v689_v46 = vpop.f32.mrf.mxu0 }
 0x249   :  { %v864_v47 = vpop.f32.mrf.mxu1 }
 0x24a   :  { %v1592_v48 = vadd.f32 %v2850_v33, %v1560_v45  ;;  %v865_v8 = vadd.f32 %v864_v47, %v689_v46 }
 0x24c   :  { %v1624_v49 = vmax.f32 %v1592_v48, 0.0  ;;  %v1166_v50 = vpop.f32.mrf.mxu2 }
 0x24d   :  { %v1341_v51 = vpop.f32.mrf.mxu3 }
 0x24e   :  { %v1656_v53 = vpack.c.bf16 %v1624_v49, %v1624_v49  ;;  %v1342_v54 = vadd.f32 %v1341_v51, %v1166_v50 }
 0x250   :  { %1688 = vst.msk [vmem:[%s3099_s3 + $0xc0] sm:$0xf] %vm1511_vm0, %v1656_v53  ;;  %v1561_v55 = vadd.f32 %v1342_v54, %v860_v52  ;;  %v692_v56 = vpop.f32.mrf.mxu0 }
 0x251   :  { %v867_v57 = vpop.f32.mrf.mxu1 }
 0x252   :  { %v1593_v58 = vadd.f32 %v2850_v33, %v1561_v55  ;;  %v868_v42 = vadd.f32 %v867_v57, %v692_v56 }
 0x254   :  { %v1625_v59 = vmax.f32 %v1593_v58, 0.0  ;;  %v1169_v60 = vpop.f32.mrf.mxu2 }
 0x255   :  { %v1344_v61 = vpop.f32.mrf.mxu3 }
 0x256   :  { %v1657_v63 = vpack.c.bf16 %v1625_v59, %v1625_v59  ;;  %v1345_v0 = vadd.f32 %v1344_v61, %v1169_v60 }
 0x258   :  { %1689 = vst.msk [vmem:[%s3099_s3 + $0xc4] sm:$0xf] %vm1511_vm0, %v1657_v63  ;;  %v1562_v1 = vadd.f32 %v1345_v0, %v863_v62  ;;  %v694_v2 = vpop.f32.mrf.mxu0 }
 0x259   :  { %v869_v3 = vpop.f32.mrf.mxu1 }
 0x25a   :  { %v1594_v4 = vadd.f32 %v2850_v33, %v1562_v1  ;;  %v870_v27 = vadd.f32 %v869_v3, %v694_v2 }
 0x25c   :  { %v1626_v5 = vmax.f32 %v1594_v4, 0.0  ;;  %v1171_v6 = vpop.f32.mrf.mxu2 }
 0x25d   :  { %v1346_v7 = vpop.f32.mrf.mxu3 }
 0x25e   :  { %v1658_v9 = vpack.c.bf16 %v1626_v5, %v1626_v5  ;;  %v1347_v10 = vadd.f32 %v1346_v7, %v1171_v6 }
 0x260   :  { %1690 = vst.msk [vmem:[%s3099_s3 + $0xc8] sm:$0xf] %vm1511_vm0, %v1658_v9  ;;  %v1563_v11 = vadd.f32 %v1347_v10, %v865_v8  ;;  %v697_v12 = vpop.f32.mrf.mxu0 }
 0x261   :  { %v872_v13 = vpop.f32.mrf.mxu1 }
 0x262   :  { %v1595_v14 = vadd.f32 %v2850_v33, %v1563_v11  ;;  %v873_v38 = vadd.f32 %v872_v13, %v697_v12 }
 0x264   :  { %v1627_v15 = vmax.f32 %v1595_v14, 0.0  ;;  %v1174_v16 = vpop.f32.mrf.mxu2 }
 0x265   :  { %v1349_v17 = vpop.f32.mrf.mxu3 }
 0x266   :  { %v1659_v18 = vpack.c.bf16 %v1627_v15, %v1627_v15  ;;  %v1350_v19 = vadd.f32 %v1349_v17, %v1174_v16 }
 0x268   :  { %1691 = vst.msk [vmem:[%s3099_s3 + $0xcc] sm:$0xf] %vm1511_vm0, %v1659_v18  ;;  %v1564_v20 = vadd.f32 %v1350_v19, %v868_v42  ;;  %v699_v21 = vpop.f32.mrf.mxu0 }
 0x269   :  { %v874_v22 = vpop.f32.mrf.mxu1 }
 0x26a   :  { %v1596_v23 = vadd.f32 %v2850_v33, %v1564_v20  ;;  %v875_v49 = vadd.f32 %v874_v22, %v699_v21 }
 0x26c   :  { %v1628_v24 = vmax.f32 %v1596_v23, 0.0  ;;  %v1176_v25 = vpop.f32.mrf.mxu2 }
 0x26d   :  { %v1351_v26 = vpop.f32.mrf.mxu3 }
 0x26e   :  { %v1660_v28 = vpack.c.bf16 %v1628_v24, %v1628_v24  ;;  %v1352_v29 = vadd.f32 %v1351_v26, %v1176_v25 }
 0x270   :  { %1692 = vst.msk [vmem:[%s3099_s3 + $0xd0] sm:$0xf] %vm1511_vm0, %v1660_v28  ;;  %v1565_v30 = vadd.f32 %v1352_v29, %v870_v27  ;;  %v702_v31 = vpop.f32.mrf.mxu0 }
 0x271   :  { %v877_v32 = vpop.f32.mrf.mxu1 }
 0x272   :  { %v1597_v34 = vadd.f32 %v2850_v33, %v1565_v30  ;;  %v878_v59 = vadd.f32 %v877_v32, %v702_v31 }
 0x274   :  { %v1629_v35 = vmax.f32 %v1597_v34, 0.0  ;;  %v1179_v36 = vpop.f32.mrf.mxu2 }
 0x275   :  { %v1354_v37 = vpop.f32.mrf.mxu3 }
 0x276   :  { %v1661_v39 = vpack.c.bf16 %v1629_v35, %v1629_v35  ;;  %v1355_v40 = vadd.f32 %v1354_v37, %v1179_v36 }
 0x278   :  { %1693 = vst.msk [vmem:[%s3099_s3 + $0xd4] sm:$0xf] %vm1511_vm0, %v1661_v39  ;;  %v1566_v41 = vadd.f32 %v1355_v40, %v873_v38  ;;  %v704_v43 = vpop.f32.mrf.mxu0 }
 0x279   :  { %v879_v44 = vpop.f32.mrf.mxu1 }
 0x27a   :  { %v1598_v45 = vadd.f32 %v2850_v33, %v1566_v41  ;;  %v880_v5 = vadd.f32 %v879_v44, %v704_v43 }
 0x27c   :  { %v1630_v46 = vmax.f32 %v1598_v45, 0.0  ;;  %v1181_v47 = vpop.f32.mrf.mxu2 }
 0x27d   :  { %v1356_v48 = vpop.f32.mrf.mxu3 }
 0x27e   :  { %v1662_v50 = vpack.c.bf16 %v1630_v46, %v1630_v46  ;;  %v1357_v51 = vadd.f32 %v1356_v48, %v1181_v47 }
 0x280   :  { %1694 = vst.msk [vmem:[%s3099_s3 + $0xd8] sm:$0xf] %vm1511_vm0, %v1662_v50  ;;  %v1567_v52 = vadd.f32 %v1357_v51, %v875_v49  ;;  %v707_v53 = vpop.f32.mrf.mxu0 }
 0x281   :  { %v882_v54 = vpop.f32.mrf.mxu1 }
 0x282   :  { %v1599_v55 = vadd.f32 %v2850_v33, %v1567_v52  ;;  %v883_v15 = vadd.f32 %v882_v54, %v707_v53 }
 0x284   :  { %v1631_v56 = vmax.f32 %v1599_v55, 0.0  ;;  %v1184_v57 = vpop.f32.mrf.mxu2 }
 0x285   :  { %v1359_v58 = vpop.f32.mrf.mxu3 }
 0x286   :  { %v1663_v60 = vpack.c.bf16 %v1631_v56, %v1631_v56  ;;  %v1360_v61 = vadd.f32 %v1359_v58, %v1184_v57 }
 0x288   :  { %1695 = vst.msk [vmem:[%s3099_s3 + $0xdc] sm:$0xf] %vm1511_vm0, %v1663_v60  ;;  %v1568_v62 = vadd.f32 %v1360_v61, %v878_v59  ;;  %v709_v63 = vpop.f32.mrf.mxu0 }
 0x289   :  { %v884_v0 = vpop.f32.mrf.mxu1 }
 0x28a   :  { %v1600_v1 = vadd.f32 %v2850_v33, %v1568_v62  ;;  %v885_v24 = vadd.f32 %v884_v0, %v709_v63 }
 0x28c   :  { %v1632_v2 = vmax.f32 %v1600_v1, 0.0  ;;  %v1186_v3 = vpop.f32.mrf.mxu2 }
 0x28d   :  { %v1361_v4 = vpop.f32.mrf.mxu3 }
 0x28e   :  { %v1664_v6 = vpack.c.bf16 %v1632_v2, %v1632_v2  ;;  %v1362_v7 = vadd.f32 %v1361_v4, %v1186_v3 }
 0x290   :  { %1696 = vst.msk [vmem:[%s3099_s3 + $0xe0] sm:$0xf] %vm1511_vm0, %v1664_v6  ;;  %v1569_v8 = vadd.f32 %v1362_v7, %v880_v5  ;;  %v712_v9 = vpop.f32.mrf.mxu0 }
 0x291   :  { %v887_v10 = vpop.f32.mrf.mxu1 }
 0x292   :  { %v1601_v11 = vadd.f32 %v2850_v33, %v1569_v8  ;;  %v888_v35 = vadd.f32 %v887_v10, %v712_v9 }
 0x294   :  { %v1633_v12 = vmax.f32 %v1601_v11, 0.0  ;;  %v1189_v13 = vpop.f32.mrf.mxu2 }
 0x295   :  { %v1364_v14 = vpop.f32.mrf.mxu3 }
 0x296   :  { %v1665_v16 = vpack.c.bf16 %v1633_v12, %v1633_v12  ;;  %v1365_v17 = vadd.f32 %v1364_v14, %v1189_v13 }
 0x298   :  { %1697 = vst.msk [vmem:[%s3099_s3 + $0xe4] sm:$0xf] %vm1511_vm0, %v1665_v16  ;;  %v1570_v42 = vadd.f32 %v1365_v17, %v883_v15  ;;  %v714_v18 = vpop.f32.mrf.mxu0 }
 0x299   :  { %v889_v19 = vpop.f32.mrf.mxu1 }
 0x29a   :  { %v1602_v20 = vadd.f32 %v2850_v33, %v1570_v42  ;;  %v890_v46 = vadd.f32 %v889_v19, %v714_v18 }
 0x29c   :  { %v1634_v21 = vmax.f32 %v1602_v20, 0.0  ;;  %v1191_v22 = vpop.f32.mrf.mxu2 }
 0x29d   :  { %v1366_v23 = vpop.f32.mrf.mxu3 }
 0x29e   :  { %v1666_v25 = vpack.c.bf16 %v1634_v21, %v1634_v21  ;;  %v1367_v26 = vadd.f32 %v1366_v23, %v1191_v22 }
 0x2a0   :  { %1698 = vst.msk [vmem:[%s3099_s3 + $0xe8] sm:$0xf] %vm1511_vm0, %v1666_v25  ;;  %v1571_v27 = vadd.f32 %v1367_v26, %v885_v24  ;;  %v717_v28 = vpop.f32.mrf.mxu0 }
 0x2a1   :  { %v892_v29 = vpop.f32.mrf.mxu1 }
 0x2a2   :  { %v1603_v30 = vadd.f32 %v2850_v33, %v1571_v27  ;;  %v893_v56 = vadd.f32 %v892_v29, %v717_v28 }
 0x2a4   :  { %v1635_v31 = vmax.f32 %v1603_v30, 0.0  ;;  %v1194_v32 = vpop.f32.mrf.mxu2 }
 0x2a5   :  { %v1369_v34 = vpop.f32.mrf.mxu3 }
 0x2a6   :  { %v1667_v36 = vpack.c.bf16 %v1635_v31, %v1635_v31  ;;  %v1370_v37 = vadd.f32 %v1369_v34, %v1194_v32 }
 0x2a8   :  { %1699 = vst.msk [vmem:[%s3099_s3 + $0xec] sm:$0xf] %vm1511_vm0, %v1667_v36  ;;  %v1572_v38 = vadd.f32 %v1370_v37, %v888_v35  ;;  %v719_v39 = vpop.f32.mrf.mxu0 }
 0x2a9   :  { %v894_v40 = vpop.f32.mrf.mxu1 }
 0x2aa   :  { %v1604_v41 = vadd.f32 %v2850_v33, %v1572_v38  ;;  %v895_v2 = vadd.f32 %v894_v40, %v719_v39 }
 0x2ac   :  { %v1636_v43 = vmax.f32 %v1604_v41, 0.0  ;;  %v1196_v44 = vpop.f32.mrf.mxu2 }
 0x2ad   :  { %v1371_v45 = vpop.f32.mrf.mxu3 }
 0x2ae   :  { %v1668_v47 = vpack.c.bf16 %v1636_v43, %v1636_v43  ;;  %v1372_v48 = vadd.f32 %v1371_v45, %v1196_v44 }
 0x2b0   :  { %1700 = vst.msk [vmem:[%s3099_s3 + $0xf0] sm:$0xf] %vm1511_vm0, %v1668_v47  ;;  %v1573_v49 = vadd.f32 %v1372_v48, %v890_v46  ;;  %v722_v50 = vpop.f32.mrf.mxu0 }
 0x2b1   :  { %v897_v51 = vpop.f32.mrf.mxu1 }
 0x2b2   :  { %v1605_v52 = vadd.f32 %v2850_v33, %v1573_v49 }
 0x2b4   :  { %v1637_v53 = vmax.f32 %v1605_v52, 0.0  ;;  %v1199_v54 = vpop.f32.mrf.mxu2 }
 0x2b5   :  { %v1374_v55 = vpop.f32.mrf.mxu3 }
 0x2b6   :  { %v1669_v57 = vpack.c.bf16 %v1637_v53, %v1637_v53  ;;  %v1375_v58 = vadd.f32 %v1374_v55, %v1199_v54 }
 0x2b8   :  { %1701 = vst.msk [vmem:[%s3099_s3 + $0xf4] sm:$0xf] %vm1511_vm0, %v1669_v57  ;;  %v1574_v59 = vadd.f32 %v1375_v58, %v893_v56  ;;  %v723_v60 = vpop.f32.mrf.mxu0 }
 0x2b9   :  { %v898_v61 = vpop.f32.mrf.mxu1 }
 0x2ba   :  { %v1606_v62 = vadd.f32 %v2850_v33, %v1574_v59 }
 0x2bc   :  { %v1638_v63 = vmax.f32 %v1606_v62, 0.0  ;;  %v1201_v0 = vpop.f32.mrf.mxu2 }
 0x2bd   :  { %v1376_v1 = vpop.f32.mrf.mxu3 }
 0x2be   :  { %v1670_v3 = vpack.c.bf16 %v1638_v63, %v1638_v63  ;;  %v1377_v4 = vadd.f32 %v1376_v1, %v1201_v0 }
 0x2c0   :  { %1702 = vst.msk [vmem:[%s3099_s3 + $0xf8] sm:$0xf] %vm1511_vm0, %v1670_v3  ;;  %v1575_v5 = vadd.f32 %v1377_v4, %v895_v2 }
 0x2c2   :  { %v1607_v6 = vadd.f32 %v2850_v33, %v1575_v5 }
 0x2c4   :  { %v1639_v7 = vmax.f32 %v1607_v6, 0.0 }
 0x2c6   :  { %v1671_v8 = vpack.c.bf16 %v1639_v7, %v1639_v7 }
 0x2c8   :  { %1703 = vst.msk [vmem:[%s3099_s3 + $0xfc] sm:$0xf] %vm1511_vm0, %v1671_v8 }

// kernel: enc_forward.6
= control target key start
LH: loop header
LB: loop body
LE: loop exit
PB: predicated region body
PF: predicated region fallthrough
CT: control target
= control target key end

     0   :  { %vm623_vm0 = vcmask 519168   ;;  %s1268_s1 = inlined_call_operand.vmem [shape: bf16[2,256,64], index: 1, kind: input, shape index: {}]   ;;  %s1269_s0 = inlined_call_operand.vmem [shape: bf16[144,256], index: 0, kind: input, shape index: {}]   ;;  %s1270_s2 = inlined_call_operand.vmem [shape: f32[1,64], index: 2, kind: input, shape index: {}]   ;;  %s1271_s3 = inlined_call_operand.vmem [shape: bf16[128,64], index: 3, kind: output, shape index: {}]  }
   0x1   :  { %v949_v0 = vld [vmem:[%s1268_s1 + $0xb8] sm:$0xff]  ;;  %v948_v4 = vld [vmem:[%s1268_s1 + $0xb0] sm:$0xff]  ;;  %v947_v8 = vld [vmem:[%s1268_s1 + $0xa8] sm:$0xff] }
   0x2   :  { %v957_v1 = vld [vmem:[%s1268_s1 + $0xf8] sm:$0xff]  ;;  %483 = vmatpush.bf16.msra.mxu2 %v949_v0  ;;  %v956_v5 = vld [vmem:[%s1268_s1 + $0xf0] sm:$0xff]  ;;  %v955_v9 = vld [vmem:[%s1268_s1 + $0xe8] sm:$0xff] }
   0x3   :  { %v933_v2 = vld [vmem:[%s1268_s1 + $0x38] sm:$0xff]  ;;  %535 = vmatpush.bf16.msra.mxu3 %v957_v1  ;;  %v932_v6 = vld [vmem:[%s1268_s1 + $0x30] sm:$0xff]  ;;  %v931_v10 = vld [vmem:[%s1268_s1 + $0x28] sm:$0xff] }
   0x4   :  { %v941_v3 = vld [vmem:[%s1268_s1 + $0x78] sm:$0xff]  ;;  %250 = vmatpush.bf16.msra.mxu0 %v933_v2  ;;  %v940_v7 = vld [vmem:[%s1268_s1 + $0x70] sm:$0xff]  ;;  %v939_v11 = vld [vmem:[%s1268_s1 + $0x68] sm:$0xff] }
   0x5   :  { %302 = vmatpush.bf16.msra.mxu1 %v941_v3  ;;  %v946_v12 = vld [vmem:[%s1268_s1 + $0xa0] sm:$0xff]  ;;  %v945_v16 = vld [vmem:[%s1268_s1 + $0x98] sm:$0xff]  ;;  %v944_v20 = vld [vmem:[%s1268_s1 + $0x90] sm:$0xff] }
   0x6   :  { %484 = vmatpush.bf16.msra.mxu2 %v948_v4  ;;  %v954_v13 = vld [vmem:[%s1268_s1 + $0xe0] sm:$0xff]  ;;  %v953_v17 = vld [vmem:[%s1268_s1 + $0xd8] sm:$0xff]  ;;  %v952_v21 = vld [vmem:[%s1268_s1 + $0xd0] sm:$0xff] }
   0x7   :  { %536 = vmatpush.bf16.msra.mxu3 %v956_v5  ;;  %v930_v14 = vld [vmem:[%s1268_s1 + $0x20] sm:$0xff]  ;;  %v929_v18 = vld [vmem:[%s1268_s1 + $0x18] sm:$0xff]  ;;  %v928_v22 = vld [vmem:[%s1268_s1 + $0x10] sm:$0xff] }
   0x8   :  { %251 = vmatpush.bf16.msra.mxu0 %v932_v6  ;;  %v938_v15 = vld [vmem:[%s1268_s1 + $0x60] sm:$0xff]  ;;  %v937_v19 = vld [vmem:[%s1268_s1 + $0x58] sm:$0xff]  ;;  %v936_v23 = vld [vmem:[%s1268_s1 + $0x50] sm:$0xff] }
   0x9   :  { %303 = vmatpush.bf16.msra.mxu1 %v940_v7  ;;  %v943_v24 = vld [vmem:[%s1268_s1 + $0x88] sm:$0xff]  ;;  %v942_v28 = vld [vmem:[%s1268_s1 + $0x80] sm:$0xff]  ;;  %v686_v38 = vld [vmem:[%s1269_s0 + $0x10] sm:$0xf] }
   0xa   :  { %485 = vmatpush.bf16.msra.mxu2 %v947_v8  ;;  %v951_v25 = vld [vmem:[%s1268_s1 + $0xc8] sm:$0xff]  ;;  %v950_v29 = vld [vmem:[%s1268_s1 + $0xc0] sm:$0xff]  ;;  %v911_v39 = vld [vmem:[%s1269_s0 + $0x14] sm:$0xf0] }
   0xb   :  { %537 = vmatpush.bf16.msra.mxu3 %v955_v9  ;;  %v927_v26 = vld [vmem:[%s1268_s1 + $0x8] sm:$0xff]  ;;  %v678_v30 = vld [vmem:[%s1269_s0] sm:$0xf]  ;;  %v908_v32 = vld [vmem:[%s1269_s0 + $0x4] sm:$0xf]  ;;  %v687_v42 = vor.u32 %v911_v39, %v686_v38 }
   0xc   :  { %252 = vmatpush.bf16.msra.mxu0 %v931_v10  ;;  %v935_v27 = vld [vmem:[%s1268_s1 + $0x48] sm:$0xff]  ;;  %v926_v34 = vld [vmem:[%s1268_s1] sm:$0xff]  ;;  %v910_v40 = vld [vmem:[%s1269_s0 + $0x14] sm:$0xf] }
   0xd   :  { %304 = vmatpush.bf16.msra.mxu1 %v939_v11  ;;  %v909_v31 = vld [vmem:[%s1269_s0 + $0x4] sm:$0xf0]  ;;  %v680_v33 = vld [vmem:[%s1269_s0 + $0x8] sm:$0xf0]  ;;  %v934_v35 = vld [vmem:[%s1268_s1 + $0x40] sm:$0xff] }
   0xe   :  { %486 = vmatpush.bf16.msra.mxu2 %v946_v12  ;;  %v679_v36 = vor.u32 %v909_v31, %v678_v30  ;;  %v683_v37 = vor.u32 %v908_v32, %v680_v33  ;;  %v688_v41 = vld [vmem:[%s1269_s0 + $0x18] sm:$0xf0]  ;;  %v694_v44 = vld [vmem:[%s1269_s0 + $0x20] sm:$0xf]  ;;  %v913_v45 = vld [vmem:[%s1269_s0 + $0x24] sm:$0xf0] }
   0xf   :  { %538 = vmatpush.bf16.msra.mxu3 %v954_v13  ;;  %v691_v43 = vor.u32 %v910_v40, %v688_v41  ;;  %v912_v46 = vld [vmem:[%s1269_s0 + $0x24] sm:$0xf]  ;;  %v696_v47 = vld [vmem:[%s1269_s0 + $0x28] sm:$0xf0]  ;;  %v695_v48 = vor.u32 %v913_v45, %v694_v44  ;;  %v702_v50 = vld [vmem:[%s1269_s0 + $0x30] sm:$0xf] }
  0x10   :  { %253 = vmatpush.bf16.msra.mxu0 %v930_v14  ;;  %v699_v49 = vor.u32 %v912_v46, %v696_v47  ;;  %v915_v51 = vld [vmem:[%s1269_s0 + $0x34] sm:$0xf0]  ;;  %v914_v52 = vld [vmem:[%s1269_s0 + $0x34] sm:$0xf]  ;;  %v704_v53 = vld [vmem:[%s1269_s0 + $0x38] sm:$0xf0] }
  0x11   :  { %305 = vmatpush.bf16.msra.mxu1 %v938_v15  ;;  %v703_v54 = vor.u32 %v915_v51, %v702_v50  ;;  %v707_v55 = vor.u32 %v914_v52, %v704_v53  ;;  %v710_v56 = vld [vmem:[%s1269_s0 + $0x40] sm:$0xf]  ;;  %v917_v57 = vld [vmem:[%s1269_s0 + $0x44] sm:$0xf0]  ;;  %v916_v58 = vld [vmem:[%s1269_s0 + $0x44] sm:$0xf] }
  0x12   :  { %487 = vmatpush.bf16.msra.mxu2 %v945_v16  ;;  %v712_v59 = vld [vmem:[%s1269_s0 + $0x48] sm:$0xf0]  ;;  %v711_v60 = vor.u32 %v917_v57, %v710_v56  ;;  %v718_v62 = vld [vmem:[%s1269_s0 + $0x50] sm:$0xf]  ;;  %v919_v63 = vld [vmem:[%s1269_s0 + $0x54] sm:$0xf0] }
  0x13   :  { %539 = vmatpush.bf16.msra.mxu3 %v953_v17  ;;  %v715_v61 = vor.u32 %v916_v58, %v712_v59  ;;  %v918_v0 = vld [vmem:[%s1269_s0 + $0x54] sm:$0xf]  ;;  %v720_v1 = vld [vmem:[%s1269_s0 + $0x58] sm:$0xf0]  ;;  %v719_v2 = vor.u32 %v919_v63, %v718_v62  ;;  %v726_v4 = vld [vmem:[%s1269_s0 + $0x60] sm:$0xf] }
  0x14   :  { %254 = vmatpush.bf16.msra.mxu0 %v929_v18  ;;  %v723_v3 = vor.u32 %v918_v0, %v720_v1  ;;  %v921_v5 = vld [vmem:[%s1269_s0 + $0x64] sm:$0xf0]  ;;  %v920_v6 = vld [vmem:[%s1269_s0 + $0x64] sm:$0xf]  ;;  %v728_v7 = vld [vmem:[%s1269_s0 + $0x68] sm:$0xf0] }
  0x15   :  { %306 = vmatpush.bf16.msra.mxu1 %v937_v19  ;;  %v727_v8 = vor.u32 %v921_v5, %v726_v4  ;;  %v731_v9 = vor.u32 %v920_v6, %v728_v7  ;;  %v734_v10 = vld [vmem:[%s1269_s0 + $0x70] sm:$0xf]  ;;  %v923_v11 = vld [vmem:[%s1269_s0 + $0x74] sm:$0xf0]  ;;  %v922_v12 = vld [vmem:[%s1269_s0 + $0x74] sm:$0xf] }
  0x16   :  { %488 = vmatpush.bf16.msra.mxu2 %v944_v20  ;;  %v736_v13 = vld [vmem:[%s1269_s0 + $0x78] sm:$0xf0]  ;;  %v735_v14 = vor.u32 %v923_v11, %v734_v10  ;;  %v742_v16 = vld [vmem:[%s1269_s0 + $0x80] sm:$0xf]  ;;  %v925_v17 = vld [vmem:[%s1269_s0 + $0x84] sm:$0xf0] }
  0x17   :  { %540 = vmatpush.bf16.msra.mxu3 %v952_v21  ;;  %v739_v15 = vor.u32 %v922_v12, %v736_v13  ;;  %v924_v18 = vld [vmem:[%s1269_s0 + $0x84] sm:$0xf]  ;;  %v744_v19 = vld [vmem:[%s1269_s0 + $0x88] sm:$0xf0]  ;;  %v743_v20 = vor.u32 %v925_v17, %v742_v16  ;;  %v1186_v32 = vld [vmem:[%s1270_s2] ss:$0 sm:$0xff] }
  0x18   :  { %255 = vmatpush.bf16.msra.mxu0 %v928_v22  ;;  %v747_v21 = vor.u32 %v924_v18, %v744_v19 }
  0x19   :  { %307 = vmatpush.bf16.msra.mxu1 %v936_v23 }
  0x1a   :  { %489 = vmatpush.bf16.msra.mxu2 %v943_v24 }
  0x1b   :  { %541 = vmatpush.bf16.msra.mxu3 %v951_v25 }
  0x1c   :  { %256 = vmatpush.bf16.msra.mxu0 %v927_v26 }
  0x1d   :  { %308 = vmatpush.bf16.msra.mxu1 %v935_v27 }
  0x1e   :  { %490 = vmatpush.bf16.msra.mxu2 %v942_v28 }
  0x1f   :  { %542 = vmatpush.bf16.msra.mxu3 %v950_v29 }
  0x20   :  { %257 = vmatpush.bf16.msra.mxu0 %v926_v34 }
  0x21   :  { %309 = vmatpush.bf16.msra.mxu1 %v934_v35  ;;  %491 = vmatmul.bf16.vlgmr.msra.gmra.mxu2 %v679_v36 }
  0x22   :  { %543 = vmatmul.bf16.vlgmr.msra.gmra.mxu3 %v683_v37 }
  0x23   :  { %258 = vmatmul.bf16.vlgmr.msra.gmra.mxu0 %v679_v36 }
  0x24   :  { %310 = vmatmul.bf16.vlgmr.msra.gmra.mxu1 %v683_v37 }
  0x31   :  { %495 = vmatmul.bf16.gmra.mxu2 %v687_v42 }
  0x32   :  { %547 = vmatmul.bf16.gmra.mxu3 %v691_v43 }
  0x33   :  { %263 = vmatmul.bf16.gmra.mxu0 %v687_v42 }
  0x34   :  { %315 = vmatmul.bf16.gmra.mxu1 %v691_v43 }
  0x41   :  { %500 = vmatmul.bf16.gmra.mxu2 %v695_v48 }
  0x42   :  { %552 = vmatmul.bf16.gmra.mxu3 %v699_v49 }
  0x43   :  { %268 = vmatmul.bf16.gmra.mxu0 %v695_v48 }
  0x44   :  { %320 = vmatmul.bf16.gmra.mxu1 %v699_v49 }
  0x51   :  { %505 = vmatmul.bf16.gmra.mxu2 %v703_v54 }
  0x52   :  { %557 = vmatmul.bf16.gmra.mxu3 %v707_v55 }
  0x53   :  { %273 = vmatmul.bf16.gmra.mxu0 %v703_v54 }
  0x54   :  { %325 = vmatmul.bf16.gmra.mxu1 %v707_v55 }
  0x61   :  { %510 = vmatmul.bf16.gmra.mxu2 %v711_v60 }
  0x62   :  { %562 = vmatmul.bf16.gmra.mxu3 %v715_v61 }
  0x63   :  { %278 = vmatmul.bf16.gmra.mxu0 %v711_v60 }
  0x64   :  { %330 = vmatmul.bf16.gmra.mxu1 %v715_v61 }
  0x71   :  { %514 = vmatmul.bf16.gmra.mxu2 %v719_v2 }
  0x72   :  { %566 = vmatmul.bf16.gmra.mxu3 %v723_v3 }
  0x73   :  { %282 = vmatmul.bf16.gmra.mxu0 %v719_v2 }
  0x74   :  { %334 = vmatmul.bf16.gmra.mxu1 %v723_v3 }
  0x81   :  { %519 = vmatmul.bf16.gmra.mxu2 %v727_v8 }
  0x82   :  { %571 = vmatmul.bf16.gmra.mxu3 %v731_v9 }
  0x83   :  { %287 = vmatmul.bf16.gmra.mxu0 %v727_v8 }
  0x84   :  { %339 = vmatmul.bf16.gmra.mxu1 %v731_v9 }
  0x91   :  { %524 = vmatmul.bf16.gmra.mxu2 %v735_v14 }
  0x92   :  { %576 = vmatmul.bf16.gmra.mxu3 %v739_v15 }
  0x93   :  { %292 = vmatmul.bf16.gmra.mxu0 %v735_v14 }
  0x94   :  { %344 = vmatmul.bf16.gmra.mxu1 %v739_v15 }
  0xa0   :  { %v259_v22 = vpop.f32.mrf.mxu0 }
  0xa1   :  { %v311_v23 = vpop.f32.mrf.mxu1  ;;  %529 = vmatmul.bf16.gmra.mxu2 %v743_v20 }
  0xa2   :  { %581 = vmatmul.bf16.gmra.mxu3 %v747_v21  ;;  %v312_v28 = vadd.f32 %v311_v23, %v259_v22 }
  0xa3   :  { %297 = vmatmul.bf16.gmra.mxu0 %v743_v20 }
  0xa4   :  { %349 = vmatmul.bf16.gmra.mxu1 %v747_v21  ;;  %v492_v24 = vpop.f32.mrf.mxu2 }
  0xa5   :  { %v544_v25 = vpop.f32.mrf.mxu3 }
  0xa8   :  { %v261_v26 = vpop.f32.mrf.mxu0 }
  0xa9   :  { %v313_v27 = vpop.f32.mrf.mxu1 }
  0xaa   :  { %v314_v40 = vadd.f32 %v313_v27, %v261_v26 }
  0xac   :  { %v493_v29 = vpop.f32.mrf.mxu2 }
  0xad   :  { %v545_v30 = vpop.f32.mrf.mxu3 }
  0xae   :  { %v546_v31 = vadd.f32 %v545_v30, %v493_v29 }
  0xb0   :  { %v588_v33 = vadd.f32 %v546_v31, %v312_v28  ;;  %v264_v34 = vpop.f32.mrf.mxu0 }
  0xb1   :  { %v316_v35 = vpop.f32.mrf.mxu1 }
  0xb2   :  { %v599_v36 = vadd.f32 %v1186_v32, %v588_v33  ;;  %v317_v47 = vadd.f32 %v316_v35, %v264_v34 }
  0xb4   :  { %v607_v37 = vmax.f32 %v599_v36, 0.0  ;;  %v496_v38 = vpop.f32.mrf.mxu2 }
  0xb5   :  { %v548_v39 = vpop.f32.mrf.mxu3 }
  0xb6   :  { %v615_v41 = vpack.c.bf16 %v607_v37, %v607_v37  ;;  %v549_v42 = vadd.f32 %v548_v39, %v496_v38 }
  0xb8   :  { %624 = vst.msk [vmem:[%s1271_s3] sm:$0xf] %vm623_vm0, %v615_v41  ;;  %v589_v43 = vadd.f32 %v549_v42, %v314_v40  ;;  %v266_v44 = vpop.f32.mrf.mxu0 }
  0xb9   :  { %v318_v45 = vpop.f32.mrf.mxu1 }
  0xba   :  { %v600_v46 = vadd.f32 %v1186_v32, %v589_v43  ;;  %v319_v60 = vadd.f32 %v318_v45, %v266_v44 }
  0xbc   :  { %v608_v48 = vmax.f32 %v600_v46, 0.0  ;;  %v498_v49 = vpop.f32.mrf.mxu2 }
  0xbd   :  { %v550_v50 = vpop.f32.mrf.mxu3 }
  0xbe   :  { %v616_v51 = vpack.c.bf16 %v608_v48, %v608_v48  ;;  %v551_v52 = vadd.f32 %v550_v50, %v498_v49 }
  0xc0   :  { %625 = vst.msk [vmem:[%s1271_s3 + $0x4] sm:$0xf] %vm623_vm0, %v616_v51  ;;  %v590_v53 = vadd.f32 %v551_v52, %v317_v47  ;;  %v269_v54 = vpop.f32.mrf.mxu0 }
  0xc1   :  { %v321_v55 = vpop.f32.mrf.mxu1 }
  0xc2   :  { %v601_v56 = vadd.f32 %v1186_v32, %v590_v53  ;;  %v322_v3 = vadd.f32 %v321_v55, %v269_v54 }
  0xc4   :  { %v609_v57 = vmax.f32 %v601_v56, 0.0  ;;  %v501_v58 = vpop.f32.mrf.mxu2 }
  0xc5   :  { %v553_v59 = vpop.f32.mrf.mxu3 }
  0xc6   :  { %v617_v61 = vpack.c.bf16 %v609_v57, %v609_v57  ;;  %v554_v62 = vadd.f32 %v553_v59, %v501_v58 }
  0xc8   :  { %626 = vst.msk [vmem:[%s1271_s3 + $0x8] sm:$0xf] %vm623_vm0, %v617_v61  ;;  %v591_v63 = vadd.f32 %v554_v62, %v319_v60  ;;  %v271_v0 = vpop.f32.mrf.mxu0 }
  0xc9   :  { %v323_v1 = vpop.f32.mrf.mxu1 }
  0xca   :  { %v602_v2 = vadd.f32 %v1186_v32, %v591_v63  ;;  %v324_v16 = vadd.f32 %v323_v1, %v271_v0 }
  0xcc   :  { %v610_v4 = vmax.f32 %v602_v2, 0.0  ;;  %v503_v5 = vpop.f32.mrf.mxu2 }
  0xcd   :  { %v555_v6 = vpop.f32.mrf.mxu3 }
  0xce   :  { %v618_v7 = vpack.c.bf16 %v610_v4, %v610_v4  ;;  %v556_v8 = vadd.f32 %v555_v6, %v503_v5 }
  0xd0   :  { %627 = vst.msk [vmem:[%s1271_s3 + $0xc] sm:$0xf] %vm623_vm0, %v618_v7  ;;  %v592_v9 = vadd.f32 %v556_v8, %v322_v3  ;;  %v274_v10 = vpop.f32.mrf.mxu0 }
  0xd1   :  { %v326_v11 = vpop.f32.mrf.mxu1 }
  0xd2   :  { %v603_v12 = vadd.f32 %v1186_v32, %v592_v9  ;;  %v327_v23 = vadd.f32 %v326_v11, %v274_v10 }
  0xd4   :  { %v611_v13 = vmax.f32 %v603_v12, 0.0  ;;  %v506_v14 = vpop.f32.mrf.mxu2 }
  0xd5   :  { %v558_v15 = vpop.f32.mrf.mxu3 }
  0xd6   :  { %v619_v17 = vpack.c.bf16 %v611_v13, %v611_v13  ;;  %v559_v18 = vadd.f32 %v558_v15, %v506_v14 }
  0xd8   :  { %628 = vst.msk [vmem:[%s1271_s3 + $0x10] sm:$0xf] %vm623_vm0, %v619_v17  ;;  %v593_v19 = vadd.f32 %v559_v18, %v324_v16  ;;  %v276_v20 = vpop.f32.mrf.mxu0 }
  0xd9   :  { %v328_v21 = vpop.f32.mrf.mxu1 }
  0xda   :  { %v604_v22 = vadd.f32 %v1186_v32, %v593_v19  ;;  %v329_v37 = vadd.f32 %v328_v21, %v276_v20 }
  0xdc   :  { %v612_v24 = vmax.f32 %v604_v22, 0.0  ;;  %v508_v25 = vpop.f32.mrf.mxu2 }
  0xdd   :  { %v560_v26 = vpop.f32.mrf.mxu3 }
  0xde   :  { %v620_v27 = vpack.c.bf16 %v612_v24, %v612_v24  ;;  %v561_v28 = vadd.f32 %v560_v26, %v508_v25 }
  0xe0   :  { %629 = vst.msk [vmem:[%s1271_s3 + $0x14] sm:$0xf] %vm623_vm0, %v620_v27  ;;  %v594_v29 = vadd.f32 %v561_v28, %v327_v23  ;;  %v279_v30 = vpop.f32.mrf.mxu0 }
  0xe1   :  { %v331_v31 = vpop.f32.mrf.mxu1 }
  0xe2   :  { %v605_v33 = vadd.f32 %v1186_v32, %v594_v29 }
  0xe4   :  { %v613_v34 = vmax.f32 %v605_v33, 0.0  ;;  %v511_v35 = vpop.f32.mrf.mxu2 }
  0xe5   :  { %v563_v36 = vpop.f32.mrf.mxu3 }
  0xe6   :  { %v621_v38 = vpack.c.bf16 %v613_v34, %v613_v34  ;;  %v564_v39 = vadd.f32 %v563_v36, %v511_v35 }
  0xe8   :  { %630 = vst.msk [vmem:[%s1271_s3 + $0x18] sm:$0xf] %vm623_vm0, %v621_v38  ;;  %v595_v40 = vadd.f32 %v564_v39, %v329_v37  ;;  %v280_v41 = vpop.f32.mrf.mxu0 }
  0xe9   :  { %v332_v42 = vpop.f32.mrf.mxu1 }
  0xea   :  { %v606_v43 = vadd.f32 %v1186_v32, %v595_v40  ;;  %v333_v52 = vadd.f32 %v332_v42, %v280_v41 }
  0xec   :  { %v614_v44 = vmax.f32 %v606_v43, 0.0  ;;  %v513_v45 = vpop.f32.mrf.mxu2 }
  0xed   :  { %v565_v46 = vpop.f32.mrf.mxu3 }
  0xee   :  { %v622_v47 = vpack.c.bf16 %v614_v44, %v614_v44 }
  0xf0   :  { %631 = vst.msk [vmem:[%s1271_s3 + $0x1c] sm:$0xf] %vm623_vm0, %v622_v47  ;;  %v283_v48 = vpop.f32.mrf.mxu0 }
  0xf1   :  { %v335_v49 = vpop.f32.mrf.mxu1 }
  0xf2   :  { %v336_v58 = vadd.f32 %v335_v49, %v283_v48 }
  0xf4   :  { %v515_v50 = vpop.f32.mrf.mxu2 }
  0xf5   :  { %v567_v51 = vpop.f32.mrf.mxu3 }
  0xf6   :  { %v568_v53 = vadd.f32 %v567_v51, %v515_v50 }
  0xf8   :  { %v632_v54 = vadd.f32 %v568_v53, %v333_v52  ;;  %v285_v55 = vpop.f32.mrf.mxu0 }
  0xf9   :  { %v337_v56 = vpop.f32.mrf.mxu1 }
  0xfa   :  { %v640_v57 = vadd.f32 %v1186_v32, %v632_v54  ;;  %v338_v7 = vadd.f32 %v337_v56, %v285_v55 }
  0xfc   :  { %v648_v59 = vmax.f32 %v640_v57, 0.0  ;;  %v517_v60 = vpop.f32.mrf.mxu2 }
  0xfd   :  { %v569_v61 = vpop.f32.mrf.mxu3 }
  0xfe   :  { %v656_v62 = vpack.c.bf16 %v648_v59, %v648_v59  ;;  %v570_v63 = vadd.f32 %v569_v61, %v517_v60 }
 0x100   :  { %664 = vst.msk [vmem:[%s1271_s3 + $0x20] sm:$0xf] %vm623_vm0, %v656_v62  ;;  %v633_v0 = vadd.f32 %v570_v63, %v336_v58  ;;  %v288_v1 = vpop.f32.mrf.mxu0 }
 0x101   :  { %v340_v2 = vpop.f32.mrf.mxu1 }
 0x102   :  { %v641_v3 = vadd.f32 %v1186_v32, %v633_v0  ;;  %v341_v14 = vadd.f32 %v340_v2, %v288_v1 }
 0x104   :  { %v649_v4 = vmax.f32 %v641_v3, 0.0  ;;  %v520_v5 = vpop.f32.mrf.mxu2 }
 0x105   :  { %v572_v6 = vpop.f32.mrf.mxu3 }
 0x106   :  { %v657_v8 = vpack.c.bf16 %v649_v4, %v649_v4  ;;  %v573_v9 = vadd.f32 %v572_v6, %v520_v5 }
 0x108   :  { %665 = vst.msk [vmem:[%s1271_s3 + $0x24] sm:$0xf] %vm623_vm0, %v657_v8  ;;  %v634_v10 = vadd.f32 %v573_v9, %v338_v7  ;;  %v290_v11 = vpop.f32.mrf.mxu0 }
 0x109   :  { %v342_v12 = vpop.f32.mrf.mxu1 }
 0x10a   :  { %v642_v13 = vadd.f32 %v1186_v32, %v634_v10  ;;  %v343_v27 = vadd.f32 %v342_v12, %v290_v11 }
 0x10c   :  { %v650_v15 = vmax.f32 %v642_v13, 0.0  ;;  %v522_v16 = vpop.f32.mrf.mxu2 }
 0x10d   :  { %v574_v17 = vpop.f32.mrf.mxu3 }
 0x10e   :  { %v658_v18 = vpack.c.bf16 %v650_v15, %v650_v15  ;;  %v575_v19 = vadd.f32 %v574_v17, %v522_v16 }
 0x110   :  { %666 = vst.msk [vmem:[%s1271_s3 + $0x28] sm:$0xf] %vm623_vm0, %v658_v18  ;;  %v635_v20 = vadd.f32 %v575_v19, %v341_v14  ;;  %v293_v21 = vpop.f32.mrf.mxu0 }
 0x111   :  { %v345_v22 = vpop.f32.mrf.mxu1 }
 0x112   :  { %v643_v23 = vadd.f32 %v1186_v32, %v635_v20  ;;  %v346_v35 = vadd.f32 %v345_v22, %v293_v21 }
 0x114   :  { %v651_v24 = vmax.f32 %v643_v23, 0.0  ;;  %v525_v25 = vpop.f32.mrf.mxu2 }
 0x115   :  { %v577_v26 = vpop.f32.mrf.mxu3 }
 0x116   :  { %v659_v28 = vpack.c.bf16 %v651_v24, %v651_v24  ;;  %v578_v29 = vadd.f32 %v577_v26, %v525_v25 }
 0x118   :  { %667 = vst.msk [vmem:[%s1271_s3 + $0x2c] sm:$0xf] %vm623_vm0, %v659_v28  ;;  %v636_v30 = vadd.f32 %v578_v29, %v343_v27  ;;  %v295_v31 = vpop.f32.mrf.mxu0 }
 0x119   :  { %v347_v33 = vpop.f32.mrf.mxu1 }
 0x11a   :  { %v644_v34 = vadd.f32 %v1186_v32, %v636_v30  ;;  %v348_v48 = vadd.f32 %v347_v33, %v295_v31 }
 0x11c   :  { %v652_v36 = vmax.f32 %v644_v34, 0.0  ;;  %v527_v37 = vpop.f32.mrf.mxu2 }
 0x11d   :  { %v579_v38 = vpop.f32.mrf.mxu3 }
 0x11e   :  { %v660_v39 = vpack.c.bf16 %v652_v36, %v652_v36  ;;  %v580_v40 = vadd.f32 %v579_v38, %v527_v37 }
 0x120   :  { %668 = vst.msk [vmem:[%s1271_s3 + $0x30] sm:$0xf] %vm623_vm0, %v660_v39  ;;  %v637_v41 = vadd.f32 %v580_v40, %v346_v35  ;;  %v298_v42 = vpop.f32.mrf.mxu0 }
 0x121   :  { %v350_v43 = vpop.f32.mrf.mxu1 }
 0x122   :  { %v645_v44 = vadd.f32 %v1186_v32, %v637_v41  ;;  %v351_v55 = vadd.f32 %v350_v43, %v298_v42 }
 0x124   :  { %v653_v45 = vmax.f32 %v645_v44, 0.0  ;;  %v530_v46 = vpop.f32.mrf.mxu2 }
 0x125   :  { %v582_v47 = vpop.f32.mrf.mxu3 }
 0x126   :  { %v661_v49 = vpack.c.bf16 %v653_v45, %v653_v45  ;;  %v583_v50 = vadd.f32 %v582_v47, %v530_v46 }
 0x128   :  { %669 = vst.msk [vmem:[%s1271_s3 + $0x34] sm:$0xf] %vm623_vm0, %v661_v49  ;;  %v638_v51 = vadd.f32 %v583_v50, %v348_v48  ;;  %v300_v52 = vpop.f32.mrf.mxu0 }
 0x129   :  { %v352_v53 = vpop.f32.mrf.mxu1 }
 0x12a   :  { %v646_v54 = vadd.f32 %v1186_v32, %v638_v51 }
 0x12c   :  { %v654_v56 = vmax.f32 %v646_v54, 0.0  ;;  %v532_v57 = vpop.f32.mrf.mxu2 }
 0x12d   :  { %v584_v58 = vpop.f32.mrf.mxu3 }
 0x12e   :  { %v662_v59 = vpack.c.bf16 %v654_v56, %v654_v56  ;;  %v585_v60 = vadd.f32 %v584_v58, %v532_v57 }
 0x130   :  { %670 = vst.msk [vmem:[%s1271_s3 + $0x38] sm:$0xf] %vm623_vm0, %v662_v59  ;;  %v639_v61 = vadd.f32 %v585_v60, %v351_v55 }
 0x132   :  { %v647_v62 = vadd.f32 %v1186_v32, %v639_v61 }
 0x134   :  { %v655_v63 = vmax.f32 %v647_v62, 0.0 }
 0x136   :  { %v663_v0 = vpack.c.bf16 %v655_v63, %v655_v63 }
 0x138   :  { %671 = vst.msk [vmem:[%s1271_s3 + $0x3c] sm:$0xf] %vm623_vm0, %v663_v0 }

// kernel: enc_forward.7
= control target key start
LH: loop header
LB: loop body
LE: loop exit
PB: predicated region body
PF: predicated region fallthrough
CT: control target
= control target key end

     0   :  { %17 = vsyncpa [#allocation4], 0  ;;  %s3339_s0 = inlined_call_operand.vmem [shape: bf16[1,32,512], index: 0, kind: input, shape index: {}]   ;;  %s3340_s1 = inlined_call_operand.vmem [shape: bf16[1,32,512], index: 1, kind: input, shape index: {}]   ;;  %s3341_s2 = inlined_call_operand.vmem [shape: bf16[2,512,64], index: 2, kind: input, shape index: {}]   ;;  %s3342_s3 = inlined_call_operand.vmem [shape: f32[1,64], index: 3, kind: input, shape index: {}]   ;;  %s3343_s4 = inlined_call_operand.vmem [shape: bf16[1024,128], index: 4, kind: input, shape index: {}]   ;;  %s3344_s5 = inlined_call_operand.vmem [shape: f32[1,128], index: 5, kind: input, shape index: {}]   ;;  %s3345_s6 = inlined_call_operand.vmem [shape: f32[128,10], index: 6, kind: input, shape index: {}]   ;;  %s3346_s7 = inlined_call_operand.vmem [shape: f32[1,10], index: 7, kind: input, shape index: {}]   ;;  %s3347_s8 = inlined_call_operand.vmem [shape: f32[128,10], index: 8, kind: input, shape index: {}]   ;;  %s3348_s9 = inlined_call_operand.vmem [shape: f32[1,10], index: 9, kind: input, shape index: {}]   ;;  %s3349_s10 = inlined_call_operand.hbm [shape: f32[2,10], index: 10, kind: output, shape index: {0}]   ;;  %s3350_s11 = inlined_call_operand.hbm [shape: f32[2,10], index: 11, kind: output, shape index: {1}]  }
   0x1   :  { %v2467_v0 = vld [vmem:[%s3341_s2 + $0x138] sm:$0xff]  ;;  %v2466_v4 = vld [vmem:[%s3341_s2 + $0x130] sm:$0xff]  ;;  %v2465_v8 = vld [vmem:[%s3341_s2 + $0x128] sm:$0xff] }
   0x2   :  { %v2475_v1 = vld [vmem:[%s3341_s2 + $0x178] sm:$0xff]  ;;  %417 = vmatpush.bf16.msra.mxu0 %v2467_v0  ;;  %v2474_v5 = vld [vmem:[%s3341_s2 + $0x170] sm:$0xff]  ;;  %v2473_v9 = vld [vmem:[%s3341_s2 + $0x168] sm:$0xff] }
   0x3   :  { %v2483_v2 = vld [vmem:[%s3341_s2 + $0x1b8] sm:$0xff]  ;;  %436 = vmatpush.bf16.msra.mxu1 %v2475_v1  ;;  %v2482_v6 = vld [vmem:[%s3341_s2 + $0x1b0] sm:$0xff]  ;;  %v2481_v10 = vld [vmem:[%s3341_s2 + $0x1a8] sm:$0xff] }
   0x4   :  { %v2491_v3 = vld [vmem:[%s3341_s2 + $0x1f8] sm:$0xff]  ;;  %455 = vmatpush.bf16.msra.mxu2 %v2483_v2  ;;  %v2490_v7 = vld [vmem:[%s3341_s2 + $0x1f0] sm:$0xff]  ;;  %v2489_v11 = vld [vmem:[%s3341_s2 + $0x1e8] sm:$0xff] }
   0x5   :  { %474 = vmatpush.bf16.msra.mxu3 %v2491_v3  ;;  %v2464_v12 = vld [vmem:[%s3341_s2 + $0x120] sm:$0xff]  ;;  %v2463_v16 = vld [vmem:[%s3341_s2 + $0x118] sm:$0xff]  ;;  %v2462_v20 = vld [vmem:[%s3341_s2 + $0x110] sm:$0xff] }
   0x6   :  { %418 = vmatpush.bf16.msra.mxu0 %v2466_v4  ;;  %v2472_v13 = vld [vmem:[%s3341_s2 + $0x160] sm:$0xff]  ;;  %v2471_v17 = vld [vmem:[%s3341_s2 + $0x158] sm:$0xff]  ;;  %v2470_v21 = vld [vmem:[%s3341_s2 + $0x150] sm:$0xff] }
   0x7   :  { %437 = vmatpush.bf16.msra.mxu1 %v2474_v5  ;;  %v2480_v14 = vld [vmem:[%s3341_s2 + $0x1a0] sm:$0xff]  ;;  %v2479_v18 = vld [vmem:[%s3341_s2 + $0x198] sm:$0xff]  ;;  %v2478_v22 = vld [vmem:[%s3341_s2 + $0x190] sm:$0xff] }
   0x8   :  { %456 = vmatpush.bf16.msra.mxu2 %v2482_v6  ;;  %v2488_v15 = vld [vmem:[%s3341_s2 + $0x1e0] sm:$0xff]  ;;  %v2487_v19 = vld [vmem:[%s3341_s2 + $0x1d8] sm:$0xff]  ;;  %v2486_v23 = vld [vmem:[%s3341_s2 + $0x1d0] sm:$0xff] }
   0x9   :  { %475 = vmatpush.bf16.msra.mxu3 %v2490_v7  ;;  %v2461_v24 = vld [vmem:[%s3341_s2 + $0x108] sm:$0xff]  ;;  %v2460_v28 = vld [vmem:[%s3341_s2 + $0x100] sm:$0xff]  ;;  %v2454_v31 = vld [vmem:[%s3340_s1 + $0xc] sm:$0xf0] }
   0xa   :  { %419 = vmatpush.bf16.msra.mxu0 %v2465_v8  ;;  %v2469_v25 = vld [vmem:[%s3341_s2 + $0x148] sm:$0xff]  ;;  %v2468_v29 = vld [vmem:[%s3341_s2 + $0x140] sm:$0xff]  ;;  %v1824_v33 = vld [vmem:[%s3340_s1 + $0x10] sm:$0xf0] }
   0xb   :  { %438 = vmatpush.bf16.msra.mxu1 %v2473_v9  ;;  %v2477_v26 = vld [vmem:[%s3341_s2 + $0x188] sm:$0xff]  ;;  %v1822_v30 = vld [vmem:[%s3340_s1] sm:$0xf]  ;;  %v2452_v32 = vld [vmem:[%s3340_s1 + $0x4] sm:$0xf] }
   0xc   :  { %457 = vmatpush.bf16.msra.mxu2 %v2481_v10  ;;  %v2485_v27 = vld [vmem:[%s3341_s2 + $0x1c8] sm:$0xff]  ;;  %v2476_v34 = vld [vmem:[%s3341_s2 + $0x180] sm:$0xff] }
   0xd   :  { %476 = vmatpush.bf16.msra.mxu3 %v2489_v11  ;;  %v2484_v35 = vld [vmem:[%s3341_s2 + $0x1c0] sm:$0xff]  ;;  %v1830_v36 = vld [vmem:[%s3340_s1 + $0x8] sm:$0xf] }
   0xe   :  { %420 = vmatpush.bf16.msra.mxu0 %v2464_v12 }
   0xf   :  { %439 = vmatpush.bf16.msra.mxu1 %v2472_v13 }
  0x10   :  { %458 = vmatpush.bf16.msra.mxu2 %v2480_v14 }
  0x11   :  { %477 = vmatpush.bf16.msra.mxu3 %v2488_v15 }
  0x12   :  { %421 = vmatpush.bf16.msra.mxu0 %v2463_v16 }
  0x13   :  { %440 = vmatpush.bf16.msra.mxu1 %v2471_v17 }
  0x14   :  { %459 = vmatpush.bf16.msra.mxu2 %v2479_v18 }
  0x15   :  { %478 = vmatpush.bf16.msra.mxu3 %v2487_v19 }
  0x16   :  { %422 = vmatpush.bf16.msra.mxu0 %v2462_v20 }
  0x17   :  { %441 = vmatpush.bf16.msra.mxu1 %v2470_v21 }
  0x18   :  { %460 = vmatpush.bf16.msra.mxu2 %v2478_v22 }
  0x19   :  { %479 = vmatpush.bf16.msra.mxu3 %v2486_v23 }
  0x1a   :  { %423 = vmatpush.bf16.msra.mxu0 %v2461_v24 }
  0x1b   :  { %442 = vmatpush.bf16.msra.mxu1 %v2469_v25 }
  0x1c   :  { %18 = vsyncpa [#allocation6], 0  ;;  %461 = vmatpush.bf16.msra.mxu2 %v2477_v26  ;;  %v2455_v37 = vld [vmem:[%s3340_s1 + $0x14] sm:$0xf0]  ;;  %v2453_v38 = vld [vmem:[%s3340_s1 + $0xc] sm:$0xf]  ;;  %v1823_v42 = vor.u32 %v2454_v31, %v1822_v30  ;;  %v1827_v43 = vor.u32 %v2452_v32, %v1824_v33 }
  0x1d   :  { %480 = vmatpush.bf16.msra.mxu3 %v2485_v27  ;;  %v1832_v39 = vld [vmem:[%s3340_s1 + $0x18] sm:$0xf0]  ;;  %v1831_v44 = vor.u32 %v2455_v37, %v1830_v36  ;;  %v2442_v48 = vld [vmem:[%s3341_s2 + $0xb0] sm:$0xff]  ;;  %v2441_v52 = vld [vmem:[%s3341_s2 + $0xa8] sm:$0xff]  ;;  %vm813_vm0 = vcmask 523264   ;;  %s2616_s25 = smov [#allocation3]  }
  0x1e   :  { %v2443_v40 = vld [vmem:[%s3341_s2 + $0xb8] sm:$0xff]  ;;  %424 = vmatpush.bf16.msra.mxu0 %v2460_v28  ;;  %v1835_v45 = vor.u32 %v2453_v38, %v1832_v39  ;;  %v2426_v49 = vld [vmem:[%s3341_s2 + $0x30] sm:$0xff]  ;;  %v2425_v53 = vld [vmem:[%s3341_s2 + $0x28] sm:$0xff]  ;;  %s1729_s26 = sshll.u32 %s2616_s25, 4  ;;  %vm1717_vm1 = vcmask 74752   ;;  %s1730_s26 = int_to_ptr.vmem [resolvable:$true] %s1729_s26 }
  0x1f   :  { %v2427_v41 = vld [vmem:[%s3341_s2 + $0x38] sm:$0xff]  ;;  %443 = vmatpush.bf16.msra.mxu1 %v2468_v29  ;;  %v2434_v50 = vld [vmem:[%s3341_s2 + $0x70] sm:$0xff]  ;;  %v2433_v54 = vld [vmem:[%s3341_s2 + $0x68] sm:$0xff] }
  0x20   :  { %462 = vmatpush.bf16.msra.mxu2 %v2476_v34  ;;  %v2435_v46 = vld [vmem:[%s3341_s2 + $0x78] sm:$0xff]  ;;  %v2450_v51 = vld [vmem:[%s3341_s2 + $0xf0] sm:$0xff]  ;;  %v2449_v55 = vld [vmem:[%s3341_s2 + $0xe8] sm:$0xff] }
  0x21   :  { %481 = vmatpush.bf16.msra.mxu3 %v2484_v35  ;;  %v2451_v47 = vld [vmem:[%s3341_s2 + $0xf8] sm:$0xff]  ;;  %425 = vmatmul.bf16.vlgmr.msra.gmra.mxu0 %v1823_v42  ;;  %v2440_v56 = vld [vmem:[%s3341_s2 + $0xa0] sm:$0xff]  ;;  %v2458_v61 = vld [vmem:[%s3340_s1 + $0x2c] sm:$0xf0] }
  0x22   :  { %725 = vmatpush.bf16.msrb.mxu0 %v2427_v41  ;;  %444 = vmatmul.bf16.vlgmr.msra.gmra.mxu1 %v1827_v43  ;;  %v2424_v57 = vld [vmem:[%s3341_s2 + $0x20] sm:$0xff]  ;;  %v1840_v63 = vld [vmem:[%s3340_s1 + $0x30] sm:$0xf0]  ;;  %v1846_v0 = vld [vmem:[%s3340_s1 + $0x28] sm:$0xf] }
  0x23   :  { %463 = vmatmul.bf16.vlgmr.msra.gmra.mxu2 %v1831_v44  ;;  %744 = vmatpush.bf16.msrb.mxu1 %v2435_v46  ;;  %v2432_v58 = vld [vmem:[%s3341_s2 + $0x60] sm:$0xff]  ;;  %v2459_v1 = vld [vmem:[%s3340_s1 + $0x34] sm:$0xf0]  ;;  %v2457_v2 = vld [vmem:[%s3340_s1 + $0x2c] sm:$0xf] }
  0x24   :  { %763 = vmatpush.bf16.msrb.mxu2 %v2443_v40  ;;  %482 = vmatmul.bf16.vlgmr.msra.gmra.mxu3 %v1835_v45  ;;  %v2448_v59 = vld [vmem:[%s3341_s2 + $0xe0] sm:$0xff]  ;;  %v1848_v3 = vld [vmem:[%s3340_s1 + $0x38] sm:$0xf0]  ;;  %v1847_v8 = vor.u32 %v2459_v1, %v1846_v0  ;;  %v2438_v12 = vld [vmem:[%s3341_s2 + $0x90] sm:$0xff] }
  0x25   :  { %782 = vmatpush.bf16.msrb.mxu3 %v2451_v47  ;;  %v1838_v60 = vld [vmem:[%s3340_s1 + $0x20] sm:$0xf]  ;;  %v2456_v62 = vld [vmem:[%s3340_s1 + $0x24] sm:$0xf]  ;;  %v2439_v4 = vld [vmem:[%s3341_s2 + $0x98] sm:$0xff]  ;;  %v1851_v9 = vor.u32 %v2457_v2, %v1848_v3 }
  0x26   :  { %726 = vmatpush.bf16.msrb.mxu0 %v2426_v49  ;;  %v2423_v5 = vld [vmem:[%s3341_s2 + $0x18] sm:$0xff]  ;;  %v1839_v6 = vor.u32 %v2458_v61, %v1838_v60  ;;  %v1843_v7 = vor.u32 %v2456_v62, %v1840_v63  ;;  %v2422_v13 = vld [vmem:[%s3341_s2 + $0x10] sm:$0xff]  ;;  %v2437_v16 = vld [vmem:[%s3341_s2 + $0x88] sm:$0xff] }
  0x27   :  { %745 = vmatpush.bf16.msrb.mxu1 %v2434_v50  ;;  %v2431_v10 = vld [vmem:[%s3341_s2 + $0x58] sm:$0xff]  ;;  %v2430_v14 = vld [vmem:[%s3341_s2 + $0x50] sm:$0xff]  ;;  %v2421_v17 = vld [vmem:[%s3341_s2 + $0x8] sm:$0xff] }
  0x28   :  { %764 = vmatpush.bf16.msrb.mxu2 %v2442_v48  ;;  %v2447_v11 = vld [vmem:[%s3341_s2 + $0xd8] sm:$0xff]  ;;  %v2446_v15 = vld [vmem:[%s3341_s2 + $0xd0] sm:$0xff]  ;;  %v2429_v18 = vld [vmem:[%s3341_s2 + $0x48] sm:$0xff] }
  0x29   :  { %783 = vmatpush.bf16.msrb.mxu3 %v2450_v51  ;;  %v2445_v19 = vld [vmem:[%s3341_s2 + $0xc8] sm:$0xff]  ;;  %v2436_v20 = vld [vmem:[%s3341_s2 + $0x80] sm:$0xff]  ;;  %v2414_v25 = vld [vmem:[%s3339_s0 + $0xc] sm:$0xf0] }
  0x2a   :  { %727 = vmatpush.bf16.msrb.mxu0 %v2425_v53  ;;  %v2420_v21 = vld [vmem:[%s3341_s2] sm:$0xff]  ;;  %v1984_v27 = vld [vmem:[%s3339_s0 + $0x10] sm:$0xf0]  ;;  %v1990_v28 = vld [vmem:[%s3339_s0 + $0x8] sm:$0xf] }
  0x2b   :  { %746 = vmatpush.bf16.msrb.mxu1 %v2433_v54  ;;  %v2428_v22 = vld [vmem:[%s3341_s2 + $0x40] sm:$0xff]  ;;  %v2415_v29 = vld [vmem:[%s3339_s0 + $0x14] sm:$0xf0]  ;;  %v2413_v30 = vld [vmem:[%s3339_s0 + $0xc] sm:$0xf] }
  0x2c   :  { %765 = vmatpush.bf16.msrb.mxu2 %v2441_v52  ;;  %v2444_v23 = vld [vmem:[%s3341_s2 + $0xc0] sm:$0xff]  ;;  %v1992_v31 = vld [vmem:[%s3339_s0 + $0x18] sm:$0xf0]  ;;  %v1991_v34 = vor.u32 %v2415_v29, %v1990_v28  ;;  %v2418_v37 = vld [vmem:[%s3339_s0 + $0x2c] sm:$0xf0] }
  0x2d   :  { %784 = vmatpush.bf16.msrb.mxu3 %v2449_v55  ;;  %v1982_v24 = vld [vmem:[%s3339_s0] sm:$0xf]  ;;  %v2412_v26 = vld [vmem:[%s3339_s0 + $0x4] sm:$0xf]  ;;  %v1995_v35 = vor.u32 %v2413_v30, %v1992_v31  ;;  %v2006_v38 = vld [vmem:[%s3339_s0 + $0x28] sm:$0xf] }
  0x2e   :  { %728 = vmatpush.bf16.msrb.mxu0 %v2424_v57  ;;  %v1983_v32 = vor.u32 %v2414_v25, %v1982_v24  ;;  %v1987_v33 = vor.u32 %v2412_v26, %v1984_v27  ;;  %v1998_v36 = vld [vmem:[%s3339_s0 + $0x20] sm:$0xf]  ;;  %v2419_v39 = vld [vmem:[%s3339_s0 + $0x34] sm:$0xf0]  ;;  %v2416_v40 = vld [vmem:[%s3339_s0 + $0x24] sm:$0xf] }
  0x2f   :  { %747 = vmatpush.bf16.msrb.mxu1 %v2432_v58  ;;  %v2000_v41 = vld [vmem:[%s3339_s0 + $0x30] sm:$0xf0]  ;;  %v2417_v42 = vld [vmem:[%s3339_s0 + $0x2c] sm:$0xf]  ;;  %v2008_v43 = vld [vmem:[%s3339_s0 + $0x38] sm:$0xf0]  ;;  %v1999_v44 = vor.u32 %v2418_v37, %v1998_v36  ;;  %v2007_v45 = vor.u32 %v2419_v39, %v2006_v38 }
  0x30   :  { %766 = vmatpush.bf16.msrb.mxu2 %v2440_v56  ;;  %v2003_v46 = vor.u32 %v2416_v40, %v2000_v41  ;;  %v2011_v47 = vor.u32 %v2417_v42, %v2008_v43  ;;  %v2499_v48 = vld [vmem:[%s3343_s4 + $0x38] sm:$0xff]  ;;  %v2498_v52 = vld [vmem:[%s3343_s4 + $0x30] sm:$0xff]  ;;  %v2497_v62 = vld [vmem:[%s3343_s4 + $0x28] sm:$0xff] }
  0x31   :  { %785 = vmatpush.bf16.msrb.mxu3 %v2448_v59  ;;  %430 = vmatmul.bf16.gmra.mxu0 %v1839_v6  ;;  %v2495_v49 = vld [vmem:[%s3343_s4 + $0x18] sm:$0xff]  ;;  %v2494_v53 = vld [vmem:[%s3343_s4 + $0x10] sm:$0xff]  ;;  %v2493_v63 = vld [vmem:[%s3343_s4 + $0x8] sm:$0xff] }
  0x32   :  { %729 = vmatpush.bf16.msrb.mxu0 %v2423_v5  ;;  %449 = vmatmul.bf16.gmra.mxu1 %v1843_v7  ;;  %v2511_v0 = vld [vmem:[%s3343_s4 + $0x98] sm:$0xff]  ;;  %v2496_v2 = vld [vmem:[%s3343_s4 + $0x20] sm:$0xff]  ;;  %v2514_v7 = vld [vmem:[%s3343_s4 + $0xb0] sm:$0xff] }
  0x33   :  { %468 = vmatmul.bf16.gmra.mxu2 %v1847_v8  ;;  %748 = vmatpush.bf16.msrb.mxu1 %v2431_v10  ;;  %v2515_v1 = vld [vmem:[%s3343_s4 + $0xb8] sm:$0xff]  ;;  %v2492_v3 = vld [vmem:[%s3343_s4] sm:$0xff]  ;;  %v2501_v27 = vld [vmem:[%s3343_s4 + $0x48] sm:$0xff] }
  0x34   :  { %767 = vmatpush.bf16.msrb.mxu2 %v2439_v4  ;;  %487 = vmatmul.bf16.gmra.mxu3 %v1851_v9  ;;  %v2510_v4 = vld [vmem:[%s3343_s4 + $0x90] sm:$0xff]  ;;  %v2505_v28 = vld [vmem:[%s3343_s4 + $0x68] sm:$0xff]  ;;  %v2527_v29 = vld [vmem:[%s3343_s4 + $0x118] sm:$0xff] }
  0x35   :  { %786 = vmatpush.bf16.msrb.mxu3 %v2447_v11  ;;  %v2503_v11 = vld [vmem:[%s3343_s4 + $0x58] sm:$0xff]  ;;  %v2530_v37 = vld [vmem:[%s3343_s4 + $0x130] sm:$0xff]  ;;  %v3072_v41 = vld [vmem:[%s3342_s3] ss:$0 sm:$0xff]  ;;  %s1742_s3 = sshll.u32 %s3350_s11, 4  ;;  %s1743_s3 = int_to_ptr.hbm [resolvable:$true] %s1742_s3 }
  0x36   :  { %730 = vmatpush.bf16.msrb.mxu0 %v2422_v13  ;;  %v2509_v13 = vld [vmem:[%s3343_s4 + $0x88] sm:$0xff]  ;;  %v2531_v30 = vld [vmem:[%s3343_s4 + $0x138] sm:$0xff] }
  0x37   :  { %749 = vmatpush.bf16.msrb.mxu1 %v2430_v14  ;;  %v2513_v14 = vld [vmem:[%s3343_s4 + $0xa8] sm:$0xff] }
  0x38   :  { %768 = vmatpush.bf16.msrb.mxu2 %v2438_v12  ;;  %v2507_v12 = vld [vmem:[%s3343_s4 + $0x78] sm:$0xff] }
  0x39   :  { %787 = vmatpush.bf16.msrb.mxu3 %v2446_v15 }
  0x3a   :  { %731 = vmatpush.bf16.msrb.mxu0 %v2421_v17  ;;  %v2506_v17 = vld [vmem:[%s3343_s4 + $0x70] sm:$0xff] }
  0x3b   :  { %750 = vmatpush.bf16.msrb.mxu1 %v2429_v18  ;;  %v2508_v18 = vld [vmem:[%s3343_s4 + $0x80] sm:$0xff] }
  0x3c   :  { %769 = vmatpush.bf16.msrb.mxu2 %v2437_v16  ;;  %v2502_v16 = vld [vmem:[%s3343_s4 + $0x50] sm:$0xff] }
  0x3d   :  { %788 = vmatpush.bf16.msrb.mxu3 %v2445_v19 }
  0x3e   :  { %732 = vmatpush.bf16.msrb.mxu0 %v2420_v21  ;;  %v2512_v21 = vld [vmem:[%s3343_s4 + $0xa0] sm:$0xff] }
  0x3f   :  { %751 = vmatpush.bf16.msrb.mxu1 %v2428_v22 }
  0x40   :  { %770 = vmatpush.bf16.msrb.mxu2 %v2436_v20 }
  0x41   :  { %789 = vmatpush.bf16.msrb.mxu3 %v2444_v23  ;;  %733 = vmatmul.bf16.vlgmr.msrb.gmra.mxu0 %v1983_v32 }
  0x42   :  { %752 = vmatmul.bf16.vlgmr.msrb.gmra.mxu1 %v1987_v33  ;;  %1061 = vmatpush.bf16.msra.mxu0 %v2511_v0  ;;  %v2500_v33 = vld [vmem:[%s3343_s4 + $0x40] sm:$0xff] }
  0x43   :  { %771 = vmatmul.bf16.vlgmr.msrb.gmra.mxu2 %v1991_v34  ;;  %1112 = vmatpush.bf16.msra.mxu1 %v2515_v1  ;;  %v2504_v34 = vld [vmem:[%s3343_s4 + $0x60] sm:$0xff] }
  0x44   :  { %790 = vmatmul.bf16.vlgmr.msrb.gmra.mxu3 %v1995_v35  ;;  %869 = vmatpush.bf16.msra.mxu2 %v2499_v48  ;;  %v2526_v35 = vld [vmem:[%s3343_s4 + $0x110] sm:$0xff]  ;;  %v2529_v48 = vld [vmem:[%s3343_s4 + $0x128] sm:$0xff] }
  0x45   :  { %909 = vmatpush.bf16.msra.mxu3 %v2495_v49 }
  0x46   :  { %1062 = vmatpush.bf16.msra.mxu0 %v2510_v4  ;;  %v2519_v4 = vld [vmem:[%s3343_s4 + $0xd8] sm:$0xff] }
  0x47   :  { %1113 = vmatpush.bf16.msra.mxu1 %v2514_v7 }
  0x48   :  { %870 = vmatpush.bf16.msra.mxu2 %v2498_v52  ;;  %v2528_v52 = vld [vmem:[%s3343_s4 + $0x120] sm:$0xff] }
  0x49   :  { %910 = vmatpush.bf16.msra.mxu3 %v2494_v53 }
  0x4a   :  { %1063 = vmatpush.bf16.msra.mxu0 %v2509_v13 }
  0x4b   :  { %1114 = vmatpush.bf16.msra.mxu1 %v2513_v14 }
  0x4c   :  { %871 = vmatpush.bf16.msra.mxu2 %v2497_v62 }
  0x4d   :  { %911 = vmatpush.bf16.msra.mxu3 %v2493_v63 }
  0x4e   :  { %1064 = vmatpush.bf16.msra.mxu0 %v2508_v18  ;;  %v2518_v18 = vld [vmem:[%s3343_s4 + $0xd0] sm:$0xff] }
  0x4f   :  { %1115 = vmatpush.bf16.msra.mxu1 %v2512_v21 }
  0x50   :  { %872 = vmatpush.bf16.msra.mxu2 %v2496_v2 }
  0x51   :  { %738 = vmatmul.bf16.gmra.mxu0 %v1999_v44  ;;  %912 = vmatpush.bf16.msra.mxu3 %v2492_v3 }
  0x52   :  { %757 = vmatmul.bf16.gmra.mxu1 %v2003_v46  ;;  %1265 = vmatpush.bf16.msrb.mxu0 %v2527_v29 }
  0x53   :  { %776 = vmatmul.bf16.gmra.mxu2 %v2007_v45  ;;  %1316 = vmatpush.bf16.msrb.mxu1 %v2531_v30 }
  0x54   :  { %795 = vmatmul.bf16.gmra.mxu3 %v2011_v47  ;;  %959 = vmatpush.bf16.msrb.mxu2 %v2503_v11  ;;  %v2525_v47 = vld [vmem:[%s3343_s4 + $0x108] sm:$0xff] }
  0x55   :  { %1010 = vmatpush.bf16.msrb.mxu3 %v2507_v12 }
  0x56   :  { %1266 = vmatpush.bf16.msrb.mxu0 %v2526_v35  ;;  %v2516_v35 = vld [vmem:[%s3343_s4 + $0xc0] sm:$0xff] }
  0x57   :  { %1317 = vmatpush.bf16.msrb.mxu1 %v2530_v37 }
  0x58   :  { %960 = vmatpush.bf16.msrb.mxu2 %v2502_v16 }
  0x59   :  { %1011 = vmatpush.bf16.msrb.mxu3 %v2506_v17 }
  0x5a   :  { %1267 = vmatpush.bf16.msrb.mxu0 %v2525_v47  ;;  %v2541_v47 = vld [vmem:[%s3343_s4 + $0x188] sm:$0xff] }
  0x5b   :  { %1318 = vmatpush.bf16.msrb.mxu1 %v2529_v48  ;;  %v2545_v48 = vld [vmem:[%s3343_s4 + $0x1a8] sm:$0xff] }
  0x5c   :  { %961 = vmatpush.bf16.msrb.mxu2 %v2501_v27  ;;  %v2521_v27 = vld [vmem:[%s3343_s4 + $0xe8] sm:$0xff] }
  0x5d   :  { %1012 = vmatpush.bf16.msrb.mxu3 %v2505_v28 }
  0x5f   :  { %1319 = vmatpush.bf16.msrb.mxu1 %v2528_v52  ;;  %v2544_v52 = vld [vmem:[%s3343_s4 + $0x1a0] sm:$0xff] }
  0x60   :  { %962 = vmatpush.bf16.msrb.mxu2 %v2500_v33  ;;  %v2547_v33 = vld [vmem:[%s3343_s4 + $0x1b8] sm:$0xff] }
  0x61   :  { %1013 = vmatpush.bf16.msrb.mxu3 %v2504_v34 }
  0x9e   :  { %v426_v50 = vpop.f32.mrf.mxu0 }
  0x9f   :  { %v445_v51 = vpop.f32.mrf.mxu1 }
  0xa0   :  { %v446_v10 = vadd.f32 %v445_v51, %v426_v50  ;;  %v2524_v51 = vld [vmem:[%s3343_s4 + $0x100] sm:$0xff] }
  0xa1   :  { %1268 = vmatpush.bf16.msrb.mxu0 %v2524_v51  ;;  %v2540_v51 = vld [vmem:[%s3343_s4 + $0x180] sm:$0xff] }
  0xa6   :  { %v464_v54 = vpop.f32.mrf.mxu2  ;;  %v428_v56 = vpop.f32.mrf.mxu0 }
  0xa7   :  { %v483_v55 = vpop.f32.mrf.mxu3  ;;  %v447_v57 = vpop.f32.mrf.mxu1  ;;  %v465_v15 = vadd.f32 %v464_v54, %v446_v10  ;;  %v2523_v10 = vld [vmem:[%s3343_s4 + $0xf8] sm:$0xff] }
  0xa8   :  { %v448_v25 = vadd.f32 %v447_v57, %v428_v56 }
  0xa9   :  { %v484_v22 = vadd.f32 %v483_v55, %v465_v15 }
  0xae   :  { %v466_v58 = vpop.f32.mrf.mxu2  ;;  %v2980_v60 = vpop.f32.mrf.mxu0 }
  0xaf   :  { %v2978_v59 = vpop.f32.mrf.mxu3  ;;  %v2982_v61 = vpop.f32.mrf.mxu1  ;;  %v467_v31 = vadd.f32 %v466_v58, %v448_v25 }
  0xb0   :  { %v451_v44 = vadd.f32 %v2982_v61, %v2980_v60 }
  0xb1   :  { %v486_v38 = vadd.f32 %v2978_v59, %v467_v31 }
  0xb6   :  { %v3005_v5 = vpop.f32.mrf.mxu2  ;;  %v3012_v8 = vpop.f32.mrf.mxu0 }
  0xb7   :  { %v3007_v6 = vpop.f32.mrf.mxu3  ;;  %v3014_v9 = vpop.f32.mrf.mxu1  ;;  %v470_v49 = vadd.f32 %v3005_v5, %v451_v44  ;;  %v2535_v44 = vld [vmem:[%s3343_s4 + $0x158] sm:$0xff] }
  0xb8   :  { %v453_v61 = vadd.f32 %v3014_v9, %v3012_v8 }
  0xb9   :  { %v489_v56 = vadd.f32 %v3007_v6, %v470_v49  ;;  %v2534_v49 = vld [vmem:[%s3343_s4 + $0x150] sm:$0xff] }
  0xbe   :  { %v3037_v19 = vpop.f32.mrf.mxu2  ;;  %v734_v23 = vpop.f32.mrf.mxu0 }
  0xbf   :  { %v3039_v20 = vpop.f32.mrf.mxu3  ;;  %v753_v24 = vpop.f32.mrf.mxu1  ;;  %v735_v26 = vadd.f32 %v734_v23, %v484_v22  ;;  %v472_v0 = vadd.f32 %v3037_v19, %v453_v61  ;;  %v2522_v19 = vld [vmem:[%s3343_s4 + $0xf0] sm:$0xff]  ;;  %v2517_v23 = vld [vmem:[%s3343_s4 + $0xc8] sm:$0xff] }
  0xc1   :  { %v754_v32 = vadd.f32 %v753_v24, %v735_v26  ;;  %v491_v8 = vadd.f32 %v3039_v20, %v472_v0  ;;  %v2555_v0 = vld [vmem:[%s3343_s4 + $0x1f8] sm:$0xff] }
  0xc6   :  { %v772_v36 = vpop.f32.mrf.mxu2  ;;  %v736_v42 = vpop.f32.mrf.mxu0 }
  0xc7   :  { %v773_v39 = vadd.f32 %v772_v36, %v754_v32  ;;  %v791_v40 = vpop.f32.mrf.mxu3  ;;  %v755_v43 = vpop.f32.mrf.mxu1  ;;  %v737_v46 = vadd.f32 %v736_v42, %v486_v38  ;;  %v2543_v32 = vld [vmem:[%s3343_s4 + $0x198] sm:$0xff]  ;;  %v2520_v36 = vld [vmem:[%s3343_s4 + $0xe0] sm:$0xff]  ;;  %v2542_v38 = vld [vmem:[%s3343_s4 + $0x190] sm:$0xff] }
  0xc9   :  { %v792_v45 = vadd.f32 %v791_v40, %v773_v39  ;;  %v756_v54 = vadd.f32 %v755_v43, %v737_v46  ;;  %v2546_v39 = vld [vmem:[%s3343_s4 + $0x1b0] sm:$0xff] }
  0xcb   :  { %v805_v50 = vadd.f32 %v3072_v41, %v792_v45 }
  0xcd   :  { %v809_v53 = vmax.f32 %v805_v50, 0.0  ;;  %v2538_v50 = vld [vmem:[%s3343_s4 + $0x170] sm:$0xff] }
  0xce   :  { %v774_v55 = vpop.f32.mrf.mxu2  ;;  %v739_v59 = vpop.f32.mrf.mxu0 }
  0xcf   :  { %814 = vst.msk [vmem:[#allocation2] sm:$0xff] %vm813_vm0, %v809_v53  ;;  %v775_v57 = vadd.f32 %v774_v55, %v756_v54  ;;  %v793_v58 = vpop.f32.mrf.mxu3  ;;  %v758_v60 = vpop.f32.mrf.mxu1  ;;  %v740_v63 = vadd.f32 %v739_v59, %v489_v56  ;;  %v2533_v55 = vld [vmem:[%s3343_s4 + $0x148] sm:$0xff]  ;;  %v2532_v59 = vld [vmem:[%s3343_s4 + $0x140] sm:$0xff] }
  0xd0   :  { %v2537_v56 = vld [vmem:[%s3343_s4 + $0x168] sm:$0xff] }
  0xd1   :  { %v794_v62 = vadd.f32 %v793_v58, %v775_v57  ;;  %v759_v3 = vadd.f32 %v758_v60, %v740_v63  ;;  %v2536_v60 = vld [vmem:[%s3343_s4 + $0x160] sm:$0xff]  ;;  %v2551_v63 = vld [vmem:[%s3343_s4 + $0x1d8] sm:$0xff] }
  0xd3   :  { %v806_v1 = vadd.f32 %v3072_v41, %v794_v62 }
  0xd5   :  { %v810_v2 = vmax.f32 %v806_v1, 0.0 }
  0xd6   :  { %v777_v5 = vpop.f32.mrf.mxu2  ;;  %v828_v6 = vld [vmem:[#allocation2 + $0x2] sm:$0x3]  ;;  %v818_v7 = vld [vmem:[#allocation2] sm:$0x3]  ;;  %v741_v11 = vpop.f32.mrf.mxu0  ;;  %v918_v40 = vld [vmem:[#allocation2 + $0x4] sm:$0x3] }
  0xd7   :  { %815 = vst.msk [vmem:[#allocation2 + $0x8] sm:$0xff] %vm813_vm0, %v810_v2  ;;  %v778_v9 = vadd.f32 %v777_v5, %v759_v3  ;;  %v796_v12 = vpop.f32.mrf.mxu3  ;;  %v829_v13 = vpack.c.bf16 %v828_v6, %v828_v6  ;;  %v819_v14 = vpack.c.bf16 %v818_v7, %v818_v7  ;;  %v742_v15 = vadd.f32 %v741_v11, %v491_v8  ;;  %v760_v17 = vpop.f32.mrf.mxu1  ;;  %v969_v42 = vld [vmem:[#allocation2 + $0x6] sm:$0x3]  ;;  %v2550_v3 = vld [vmem:[%s3343_s4 + $0x1d0] sm:$0xff]  ;;  %v2549_v7 = vld [vmem:[%s3343_s4 + $0x1c8] sm:$0xff] }
  0xd8   :  { %v919_v45 = vpack.c.bf16 %v918_v40, %v918_v40  ;;  %v970_v46 = vpack.c.bf16 %v969_v42, %v969_v42  ;;  %v2548_v11 = vld [vmem:[%s3343_s4 + $0x1c0] sm:$0xff]  ;;  %v1688_v40 = vld [vmem:[%s3347_s8 + $0x58] sm:$0xff] }
  0xd9   :  { %v797_v16 = vadd.f32 %v796_v12, %v778_v9  ;;  %2156 = vmatmul.msk.bf16.vlgmr.msra.gmra.mxu2 %vm813_vm0, %v829_v13  ;;  %2173 = vmatmul.msk.bf16.vlgmr.msra.gmra.mxu3 %vm813_vm0, %v819_v14  ;;  %v761_v22 = vadd.f32 %v760_v17, %v742_v15  ;;  %v2552_v12 = vld [vmem:[%s3343_s4 + $0x1e0] sm:$0xff] }
  0xda   :  { %1163 = vmatpush.bf16.msra.mxu2 %v2519_v4  ;;  %1214 = vmatpush.bf16.msra.mxu3 %v2523_v10  ;;  %v2554_v4 = vld [vmem:[%s3343_s4 + $0x1f0] sm:$0xff]  ;;  %v2553_v10 = vld [vmem:[%s3343_s4 + $0x1e8] sm:$0xff] }
  0xdb   :  { %v807_v20 = vadd.f32 %v3072_v41, %v797_v16 }
  0xdd   :  { %v811_v21 = vmax.f32 %v807_v20, 0.0 }
  0xde   :  { %v779_v24 = vpop.f32.mrf.mxu2  ;;  %v1020_v25 = vld [vmem:[#allocation2 + $0x8] sm:$0x3]  ;;  %v1071_v26 = vld [vmem:[#allocation2 + $0xa] sm:$0x3]  ;;  %1164 = vmatpush.bf16.msra.mxu2 %v2518_v18  ;;  %1215 = vmatpush.bf16.msra.mxu3 %v2522_v19  ;;  %v1122_v61 = vld [vmem:[#allocation2 + $0xc] sm:$0x3] }
  0xdf   :  { %816 = vst.msk [vmem:[#allocation2 + $0x10] sm:$0xff] %vm813_vm0, %v811_v21  ;;  %v780_v28 = vadd.f32 %v779_v24, %v761_v22  ;;  %v798_v29 = vpop.f32.mrf.mxu3  ;;  %v1021_v30 = vpack.c.bf16 %v1020_v25, %v1020_v25  ;;  %v1072_v31 = vpack.c.bf16 %v1071_v26, %v1071_v26  ;;  %v1173_v62 = vld [vmem:[#allocation2 + $0xe] sm:$0x3]  ;;  %v1123_v1 = vpack.c.bf16 %v1122_v61, %v1122_v61 }
  0xe0   :  { %v1174_v2 = vpack.c.bf16 %v1173_v62, %v1173_v62  ;;  %v1641_v62 = vld [vmem:[%s3345_s6 + $0x20] sm:$0xff] }
  0xe1   :  { %v799_v34 = vadd.f32 %v798_v29, %v780_v28  ;;  %2224 = vmatmul.msk.bf16.vlgmr.msra.gmra.mxu0 %vm813_vm0, %v1021_v30  ;;  %2241 = vmatmul.msk.bf16.vlgmr.msra.gmra.mxu1 %vm813_vm0, %v1072_v31  ;;  %v1692_v28 = vld [vmem:[%s3347_s8 + $0x78] sm:$0xff]  ;;  %v1651_v31 = vld [vmem:[%s3345_s6 + $0x70] sm:$0xff] }
  0xe2   :  { %1165 = vmatpush.bf16.msra.mxu2 %v2517_v23  ;;  %1216 = vmatpush.bf16.msra.mxu3 %v2521_v27  ;;  %v1652_v27 = vld [vmem:[%s3345_s6 + $0x78] sm:$0xff] }
  0xe3   :  { %v808_v37 = vadd.f32 %v3072_v41, %v799_v34  ;;  %1469 = vmatpush.bf16.msra.mxu0 %v2543_v32  ;;  %1520 = vmatpush.bf16.msra.mxu1 %v2547_v33  ;;  %v2539_v41 = vld [vmem:[%s3343_s4 + $0x178] sm:$0xff]  ;;  %v1691_v32 = vld [vmem:[%s3347_s8 + $0x70] sm:$0xff]  ;;  %v1650_v33 = vld [vmem:[%s3345_s6 + $0x68] sm:$0xff] }
  0xe4   :  { %v1690_v34 = vld [vmem:[%s3347_s8 + $0x68] sm:$0xff] }
  0xe5   :  { %v812_v43 = vmax.f32 %v808_v37, 0.0 }
  0xe6   :  { %1166 = vmatpush.bf16.msra.mxu2 %v2516_v35  ;;  %1217 = vmatpush.bf16.msra.mxu3 %v2520_v36  ;;  %v1224_v53 = vld [vmem:[#allocation2 + $0x10] sm:$0x3]  ;;  %v1275_v54 = vld [vmem:[#allocation2 + $0x12] sm:$0x3]  ;;  %v1326_v13 = vld [vmem:[#allocation2 + $0x14] sm:$0x3] }
  0xe7   :  { %817 = vst.msk [vmem:[#allocation2 + $0x18] sm:$0xff] %vm813_vm0, %v812_v43  ;;  %1470 = vmatpush.bf16.msra.mxu0 %v2542_v38  ;;  %1521 = vmatpush.bf16.msra.mxu1 %v2546_v39  ;;  %v1225_v57 = vpack.c.bf16 %v1224_v53, %v1224_v53  ;;  %v1276_v58 = vpack.c.bf16 %v1275_v54, %v1275_v54  ;;  %v1377_v14 = vld [vmem:[#allocation2 + $0x16] sm:$0x3]  ;;  %v1649_v35 = vld [vmem:[%s3345_s6 + $0x60] sm:$0xff]  ;;  %v1648_v39 = vld [vmem:[%s3345_s6 + $0x58] sm:$0xff] }
  0xe8   :  { %v1327_v15 = vpack.c.bf16 %v1326_v13, %v1326_v13  ;;  %v1378_v16 = vpack.c.bf16 %v1377_v14, %v1377_v14  ;;  %v1689_v36 = vld [vmem:[%s3347_s8 + $0x60] sm:$0xff]  ;;  %v1644_v53 = vld [vmem:[%s3345_s6 + $0x38] sm:$0xff] }
  0xe9   :  { %2190 = vmatmul.msk.bf16.vlgmr.msrb.gmra.mxu2 %vm813_vm0, %v919_v45  ;;  %2207 = vmatmul.msk.bf16.vlgmr.msrb.gmra.mxu3 %vm813_vm0, %v970_v46  ;;  %v1646_v45 = vld [vmem:[%s3345_s6 + $0x48] sm:$0xff]  ;;  %v1684_v54 = vld [vmem:[%s3347_s8 + $0x38] sm:$0xff]  ;;  %v1637_v13 = vld [vmem:[%s3345_s6] sm:$0xff] }
  0xea   :  { %1367 = vmatpush.bf16.msrb.mxu2 %v2535_v44  ;;  %1418 = vmatpush.bf16.msrb.mxu3 %v2539_v41  ;;  %v1647_v44 = vld [vmem:[%s3345_s6 + $0x50] sm:$0xff]  ;;  %v1686_v46 = vld [vmem:[%s3347_s8 + $0x48] sm:$0xff]  ;;  %v1677_v14 = vld [vmem:[%s3347_s8] sm:$0xff] }
  0xeb   :  { %1471 = vmatpush.bf16.msra.mxu0 %v2541_v47  ;;  %1522 = vmatpush.bf16.msra.mxu1 %v2545_v48  ;;  %v1687_v41 = vld [vmem:[%s3347_s8 + $0x50] sm:$0xff]  ;;  %v1645_v48 = vld [vmem:[%s3345_s6 + $0x40] sm:$0xff] }
  0xee   :  { %1368 = vmatpush.bf16.msrb.mxu2 %v2534_v49  ;;  %1419 = vmatpush.bf16.msrb.mxu3 %v2538_v50  ;;  %v1428_v5 = vld [vmem:[#allocation2 + $0x18] sm:$0x3]  ;;  %v1479_v6 = vld [vmem:[#allocation2 + $0x1a] sm:$0x3]  ;;  %v1530_v17 = vld [vmem:[#allocation2 + $0x1c] sm:$0x3] }
  0xef   :  { %1472 = vmatpush.bf16.msra.mxu0 %v2540_v51  ;;  %1523 = vmatpush.bf16.msra.mxu1 %v2544_v52  ;;  %v1429_v8 = vpack.c.bf16 %v1428_v5, %v1428_v5  ;;  %v1480_v9 = vpack.c.bf16 %v1479_v6, %v1479_v6  ;;  %v1581_v18 = vld [vmem:[#allocation2 + $0x1e] sm:$0x3]  ;;  %v1531_v19 = vpack.c.bf16 %v1530_v17, %v1530_v17  ;;  %v1685_v49 = vld [vmem:[%s3347_s8 + $0x40] sm:$0xff] }
  0xf0   :  { %v1582_v20 = vpack.c.bf16 %v1581_v18, %v1581_v18 }
  0xf1   :  { %2292 = vmatmul.msk.bf16.vlgmr.msrb.gmra.mxu0 %vm813_vm0, %v1225_v57  ;;  %2309 = vmatmul.msk.bf16.vlgmr.msrb.gmra.mxu1 %vm813_vm0, %v1276_v58 }
  0xf2   :  { %1369 = vmatpush.bf16.msrb.mxu2 %v2533_v55  ;;  %1420 = vmatpush.bf16.msrb.mxu3 %v2537_v56  ;;  %v1643_v55 = vld [vmem:[%s3345_s6 + $0x30] sm:$0xff] }
  0xf3   :  { %1657 = vmatpush.msrb.mxu0 %v1652_v27  ;;  %1697 = vmatpush.msrb.mxu1 %v1692_v28  ;;  %v1683_v56 = vld [vmem:[%s3347_s8 + $0x30] sm:$0xff] }
  0xf5   :  { %1658 = vmatpush.msrb.mxu0 %v1651_v31  ;;  %1698 = vmatpush.msrb.mxu1 %v1691_v32 }
  0xf6   :  { %1370 = vmatpush.bf16.msrb.mxu2 %v2532_v59  ;;  %1421 = vmatpush.bf16.msrb.mxu3 %v2536_v60  ;;  %v1642_v59 = vld [vmem:[%s3345_s6 + $0x28] sm:$0xff] }
  0xf7   :  { %1659 = vmatpush.msrb.mxu0 %v1650_v33  ;;  %1699 = vmatpush.msrb.mxu1 %v1690_v34  ;;  %v1682_v60 = vld [vmem:[%s3347_s8 + $0x28] sm:$0xff]  ;;  %v2559_v33 = vld [vmem:[%s3344_s5] ss:$0 sm:$0xff]  ;;  %s1731_s5 = sshll.u32 %s3349_s10, 4  ;;  %s1732_s5 = int_to_ptr.hbm [resolvable:$true] %s1731_s5 }
  0xf9   :  { %2258 = vmatmul.msk.bf16.vlgmr.msra.gmra.mxu2 %vm813_vm0, %v1123_v1  ;;  %2275 = vmatmul.msk.bf16.vlgmr.msra.gmra.mxu3 %vm813_vm0, %v1174_v2 }
  0xfa   :  { %1571 = vmatpush.bf16.msra.mxu2 %v2551_v63  ;;  %1622 = vmatpush.bf16.msra.mxu3 %v2555_v0  ;;  %v1681_v63 = vld [vmem:[%s3347_s8 + $0x20] sm:$0xff] }
  0xfb   :  { %1660 = vmatpush.msrb.mxu0 %v1649_v35  ;;  %1700 = vmatpush.msrb.mxu1 %v1689_v36 }
  0xfd   :  { %1661 = vmatpush.msrb.mxu0 %v1648_v39  ;;  %1701 = vmatpush.msrb.mxu1 %v1688_v40  ;;  %v2561_v39 = vld [vmem:[%s3348_s9] ss:$0 sm:$0xff] }
  0xfe   :  { %1572 = vmatpush.bf16.msra.mxu2 %v2550_v3  ;;  %1623 = vmatpush.bf16.msra.mxu3 %v2554_v4  ;;  %v1640_v3 = vld [vmem:[%s3345_s6 + $0x18] sm:$0xff] }
  0xff   :  { %1662 = vmatpush.msrb.mxu0 %v1647_v44  ;;  %1702 = vmatpush.msrb.mxu1 %v1687_v41  ;;  %v1680_v4 = vld [vmem:[%s3347_s8 + $0x18] sm:$0xff] }
 0x101   :  { %2360 = vmatmul.msk.bf16.vlgmr.msra.gmra.mxu0 %vm813_vm0, %v1429_v8  ;;  %2377 = vmatmul.msk.bf16.vlgmr.msra.gmra.mxu1 %vm813_vm0, %v1480_v9  ;;  %v1638_v9 = vld [vmem:[%s3345_s6 + $0x8] sm:$0xff] }
 0x102   :  { %1573 = vmatpush.bf16.msra.mxu2 %v2549_v7  ;;  %1624 = vmatpush.bf16.msra.mxu3 %v2553_v10  ;;  %v1639_v7 = vld [vmem:[%s3345_s6 + $0x10] sm:$0xff] }
 0x103   :  { %1663 = vmatpush.msrb.mxu0 %v1646_v45  ;;  %1703 = vmatpush.msrb.mxu1 %v1686_v46  ;;  %v1679_v10 = vld [vmem:[%s3347_s8 + $0x10] sm:$0xff] }
 0x105   :  { %1664 = vmatpush.msrb.mxu0 %v1645_v48  ;;  %1704 = vmatpush.msrb.mxu1 %v1685_v49 }
 0x106   :  { %1574 = vmatpush.bf16.msra.mxu2 %v2548_v11  ;;  %1625 = vmatpush.bf16.msra.mxu3 %v2552_v12  ;;  %v1678_v11 = vld [vmem:[%s3347_s8 + $0x8] sm:$0xff] }
 0x107   :  { %1665 = vmatpush.msrb.mxu0 %v1644_v53  ;;  %1705 = vmatpush.msrb.mxu1 %v1684_v54 }
 0x109   :  { %2326 = vmatmul.msk.bf16.vlgmr.msrb.gmra.mxu2 %vm813_vm0, %v1327_v15  ;;  %2343 = vmatmul.msk.bf16.vlgmr.msrb.gmra.mxu3 %vm813_vm0, %v1378_v16 }
 0x10a   :  { %1666 = vmatpush.msrb.mxu0 %v1643_v55  ;;  %1706 = vmatpush.msrb.mxu1 %v1683_v56 }
 0x10c   :  { %1667 = vmatpush.msrb.mxu0 %v1642_v59  ;;  %1707 = vmatpush.msrb.mxu1 %v1682_v60 }
 0x10e   :  { %1668 = vmatpush.msrb.mxu0 %v1641_v62  ;;  %1708 = vmatpush.msrb.mxu1 %v1681_v63 }
 0x110   :  { %1669 = vmatpush.msrb.mxu0 %v1640_v3  ;;  %1709 = vmatpush.msrb.mxu1 %v1680_v4 }
 0x112   :  { %1670 = vmatpush.msrb.mxu0 %v1639_v7  ;;  %1710 = vmatpush.msrb.mxu1 %v1679_v10 }
 0x114   :  { %1671 = vmatpush.msrb.mxu0 %v1638_v9  ;;  %1711 = vmatpush.msrb.mxu1 %v1678_v11 }
 0x116   :  { %1672 = vmatpush.msrb.mxu0 %v1637_v13  ;;  %1712 = vmatpush.msrb.mxu1 %v1677_v14 }
 0x119   :  { %2394 = vmatmul.msk.bf16.vlgmr.msra.gmra.mxu2 %vm813_vm0, %v1531_v19  ;;  %2411 = vmatmul.msk.bf16.vlgmr.msra.gmra.mxu3 %vm813_vm0, %v1582_v20 }
 0x15c   :  { %v874_v21 = vpop.f32.mrf.mxu2  ;;  %v914_v22 = vpop.f32.mrf.mxu3 }
 0x15d   :  { %v915_v47 = vadd.f32 %v914_v22, %v874_v21 }
 0x15e   :  { %v3214_v23 = vpop.f32.mrf.mxu0  ;;  %v3216_v24 = vpop.f32.mrf.mxu1 }
 0x164   :  { %v876_v25 = vpop.f32.mrf.mxu2  ;;  %v916_v26 = vpop.f32.mrf.mxu3 }
 0x166   :  { %v1068_v29 = vpop.f32.mrf.mxu0  ;;  %v1119_v30 = vpop.f32.mrf.mxu1 }
 0x16c   :  { %v964_v37 = vpop.f32.mrf.mxu2  ;;  %v1015_v38 = vpop.f32.mrf.mxu3 }
 0x16d   :  { %v968_v50 = vadd.f32 %v964_v37, %v915_v47 }
 0x16e   :  { %v3248_v42 = vpop.f32.mrf.mxu0  ;;  %v3250_v43 = vpop.f32.mrf.mxu1 }
 0x16f   :  { %v1019_v61 = vadd.f32 %v1015_v38, %v968_v50  ;;  %v2560_v38 = vld [vmem:[%s3346_s7] ss:$0 sm:$0xff]  ;;  %s2617_s7 = smov [#allocation5]  }
 0x170   :  { %s1740_s9 = sshll.u32 %s2617_s7, 4  ;;  %s1741_s9 = int_to_ptr.vmem [resolvable:$true] %s1740_s9 }
 0x171   :  { %v1070_v0 = vadd.f32 %v3214_v23, %v1019_v61 }
 0x173   :  { %v1121_v8 = vadd.f32 %v3216_v24, %v1070_v0 }
 0x174   :  { %v966_v51 = vpop.f32.mrf.mxu2  ;;  %v1017_v52 = vpop.f32.mrf.mxu3 }
 0x176   :  { %v1272_v57 = vpop.f32.mrf.mxu0  ;;  %v1323_v58 = vpop.f32.mrf.mxu1 }
 0x17c   :  { %v1168_v1 = vpop.f32.mrf.mxu2  ;;  %v1219_v2 = vpop.f32.mrf.mxu3 }
 0x17d   :  { %v1172_v12 = vadd.f32 %v1168_v1, %v1121_v8 }
 0x17e   :  { %v1474_v5 = vpop.f32.mrf.mxu0  ;;  %v1525_v6 = vpop.f32.mrf.mxu1 }
 0x17f   :  { %v1223_v17 = vadd.f32 %v1219_v2, %v1172_v12 }
 0x181   :  { %v1274_v20 = vadd.f32 %v3248_v42, %v1223_v17 }
 0x183   :  { %v1325_v23 = vadd.f32 %v3250_v43, %v1274_v20 }
 0x184   :  { %v1170_v15 = vpop.f32.mrf.mxu2  ;;  %v1221_v16 = vpop.f32.mrf.mxu3 }
 0x186   :  { %v1476_v18 = vpop.f32.mrf.mxu0  ;;  %v1527_v19 = vpop.f32.mrf.mxu1 }
 0x18c   :  { %v1372_v21 = vpop.f32.mrf.mxu2  ;;  %v1423_v22 = vpop.f32.mrf.mxu3 }
 0x18d   :  { %v1376_v24 = vadd.f32 %v1372_v21, %v1325_v23 }
 0x18f   :  { %v1427_v25 = vadd.f32 %v1423_v22, %v1376_v24 }
 0x191   :  { %v1478_v28 = vadd.f32 %v1474_v5, %v1427_v25 }
 0x193   :  { %v1529_v29 = vadd.f32 %v1525_v6, %v1478_v28 }
 0x194   :  { %v1374_v26 = vpop.f32.mrf.mxu2  ;;  %v1425_v27 = vpop.f32.mrf.mxu3 }
 0x19c   :  { %v1576_v30 = vpop.f32.mrf.mxu2  ;;  %v1627_v31 = vpop.f32.mrf.mxu3 }
 0x19d   :  { %v1580_v32 = vadd.f32 %v1576_v30, %v1529_v29 }
 0x19f   :  { %v1631_v34 = vadd.f32 %v1627_v31, %v1580_v32 }
 0x1a1   :  { %v1636_v35 = vadd.f32 %v2559_v33, %v1631_v34 }
 0x1a3   :  { %1673 = vmatmul.f32.vlgmr.msrb.gmra.mxu0 %v1636_v35  ;;  %1713 = vmatmul.f32.vlgmr.msrb.gmra.mxu1 %v1636_v35 }
 0x1a4   :  { %v1578_v36 = vpop.f32.mrf.mxu2  ;;  %v1629_v37 = vpop.f32.mrf.mxu3 }
 0x220   :  { %v1674_v40 = vpop.f32.mrf.mxu0  ;;  %v1714_v42 = vpop.f32.mrf.mxu1 }
 0x221   :  { %v1675_v43 = vadd.f32 %v2560_v38, %v1674_v40  ;;  %v1715_v44 = vadd.f32 %v2561_v39, %v1714_v42 }
 0x223   :  { %v1719_v41 = vmul.f32 0.5, %v1715_v44  ;;  %1718 = vst.msk [vmem:[#allocation3] sm:$0x3] %vm1717_vm1, %v1675_v43 }
 0x224   :  { %1734 = dma.vmem_to_hbm [thread:$0]  %s1730_s26, 32, %s1732_s5, [#allocation4]  }
 0x225   :  { %v1720_v45 = vmul.f32 1.442695, %v1719_v41 }
 0x227   :  { %2562 = vpow2.f32 %v1720_v45 }
 0x22d   :  { %v2563_v46 = vpop.eup %2562 }
 0x22e   :  { %v1722_v47 = vadd.f32 1e-06, %v2563_v46 }
 0x230   :  { %1723 = vst.msk [vmem:[#allocation5] sm:$0x3] %vm1717_vm1, %v1722_v47 }
 0x231   :  { %1745 = dma.vmem_to_hbm [thread:$0]  %s1741_s9, 32, %s1743_s3, [#allocation6]  }
 0x232   :  { %2612 = dma.done.wait [#allocation4], 32  }
 0x233   :  { %2613 = vsyncadd [#allocation4], 4294967264 }
 0x234   :  { %2614 = dma.done.wait [#allocation6], 32  }
 0x235   :  { %2615 = vsyncadd [#allocation6], 4294967264 }
 0x236   :  { %1754 = vsyncpa [#allocation4], 1 }
 0x237   :  { %1755 = vsyncpa [#allocation6], 1 }

</bundles_post_ra>
